<compile_context>
chip_gen: v5e
topology: v5e:2x2
jax: 0.10.0
libtpu: 0.0.40
codegen_flags: <defaults>
</compile_context>

<pallas_src>
import functools

import jax
import jax.numpy as jnp
from jax.experimental import pallas as pl
from jax.experimental.pallas import tpu as pltpu

EPS = 1e-5


def _fused_kernel(w_ref, x_ref, gb_ref, o_ref, *, inv_m):
    """One-shot ReLU -> 1x1 conv (matmul) -> BatchNorm(batch stats) -> ReLU.

    Orientation: y[cout, m] = sum_k W[cout, k] * relu(x)[k, m], with
    m = N*H*W.  The whole (Cout_blk, M) result stays VMEM-resident, so the
    BN statistics + affine + final ReLU run directly on it.
    """
    # Leading ReLU fused on the activation tile; cast x to the weight dtype
    # (bf16 on the perf path) so the MXU sees matched operands; f32 accumulate.
    x = jnp.maximum(x_ref[...], 0.0).astype(w_ref.dtype)
    y = jnp.dot(w_ref[...], x, preferred_element_type=jnp.float32)  # (Cb, M)

    # Per-channel batch statistics over M on the resident result.
    mean = jnp.sum(y, axis=1, keepdims=True) * inv_m
    var = jnp.sum(y * y, axis=1, keepdims=True) * inv_m - mean * mean
    var = jnp.maximum(var, 0.0)          # guard E[y^2]-mean^2 cancellation -> NaN
    inv_std = jax.lax.rsqrt(var + EPS)

    gamma = gb_ref[:, 0:1]
    beta = gb_ref[:, 1:2]
    scale = gamma * inv_std
    shift = beta - mean * scale
    o_ref[...] = jnp.maximum(y * scale + shift, 0.0)


def _default_cout_blocks():
    """Split Cout across TensorCores only on chips that have two of them."""
    try:
        kind = jax.devices()[0].device_kind.lower()
        if "v7" in kind:
            return 2
    except Exception:
        pass
    return 1


def fused_relu_conv_bn_relu(x_nchw, conv_w, gamma, beta, *,
                            compute_dtype=jnp.bfloat16, cout_blocks=None):
    N, Cin, H, W = x_nchw.shape
    Cout = conv_w.shape[0]
    M = N * H * W

    if cout_blocks is None:
        cout_blocks = _default_cout_blocks()
    if Cout % cout_blocks != 0 or (Cout // cout_blocks) % 8 != 0:
        cout_blocks = 1
    cb = Cout // cout_blocks

    # NCHW -> (Cin, M).  Free reshape for the module's N == 1 input.
    if N == 1:
        x_mat = x_nchw.reshape(Cin, M)
    else:
        x_mat = jnp.transpose(x_nchw, (1, 0, 2, 3)).reshape(Cin, M)

    # Pre-cast W at parameter level -> half-width HBM read on the bf16 path.
    w_mat = conv_w.reshape(Cout, Cin).astype(compute_dtype)
    # gamma|beta merged into one (Cout, 2) f32 block.
    gb = jnp.stack([gamma, beta], axis=1).astype(jnp.float32)

    # VMEM budget: x block may still be double-buffered by the pipeline even
    # though its block index is constant; the resident output is single-buffered
    # per Cout block (x2 here to stay conservative on the split path).
    w_bytes = 2 * cb * Cin * jnp.dtype(compute_dtype).itemsize
    vmem_est = (2 * 4 * Cin * M) + w_bytes + (2 * 4 * cb * M) + (2 * 4 * Cout * 2)
    if vmem_est > 48 * 1024 * 1024:
        # TODO(synk): two-pass variant (pass 1 emits per-channel sum/sum-sq,
        # pass 2 applies scale/shift) for feature maps whose result does not
        # fit in VMEM.
        raise NotImplementedError("feature map too large for fused BN path")

    kernel = functools.partial(_fused_kernel, inv_m=1.0 / M)

    y = pl.pallas_call(
        kernel,
        out_shape=jax.ShapeDtypeStruct((Cout, M), jnp.float32),
        grid_spec=pltpu.PrefetchScalarGridSpec(
            num_scalar_prefetch=0,
            grid=(cout_blocks,),
            in_specs=[
                pl.BlockSpec((cb, Cin), lambda i: (i, 0)),   # weight block
                pl.BlockSpec((Cin, M), lambda i: (0, 0)),    # full activation
                pl.BlockSpec((cb, 2), lambda i: (i, 0)),     # gamma|beta block
            ],
            out_specs=pl.BlockSpec((cb, M), lambda i: (i, 0)),
        ),
        compiler_params=pltpu.CompilerParams(
            dimension_semantics=("parallel",),
            vmem_limit_bytes=int(vmem_est) + (4 << 20),
        ),
    )(w_mat, x_mat, gb)

    # (Cout, M) -> NCHW (free reshape for N == 1).
    if N == 1:
        return y.reshape(1, Cout, H, W)
    return jnp.transpose(y.reshape(Cout, N, H, W), (1, 0, 2, 3))


# TODO(synk): BatchNorm's running_mean/running_var (track_running_stats,
# momentum=0.1) side-effect buffers are not materialized; the forward output
# does not depend on them.


def reference_forward(x_nchw, conv_w, gamma, beta):
    """Pure-JAX f32 reference with identical forward semantics."""
    x = jnp.maximum(x_nchw, 0.0)
    N, Cin, H, W = x.shape
    Cout = conv_w.shape[0]
    xf = jnp.transpose(x, (0, 2, 3, 1)).reshape(-1, Cin)
    y = xf @ jnp.transpose(conv_w.reshape(Cout, Cin), (1, 0))
    mean = jnp.mean(y, axis=0, keepdims=True)
    var = jnp.mean((y - mean) ** 2, axis=0, keepdims=True)
    z = (y - mean) / jnp.sqrt(var + EPS) * gamma[None, :] + beta[None, :]
    z = jnp.maximum(z, 0.0)
    return jnp.transpose(z.reshape(N, H, W, Cout), (0, 3, 1, 2))


if __name__ == "__main__":
    key = jax.random.PRNGKey(0)
    k_x, k_w, k_g, k_b = jax.random.split(key, 4)

    # Exact module shapes: x [1, 1024, 14, 14], 1x1 conv 1024 -> 256.
    N, Cin, H, W = 1, 1024, 14, 14
    Cout = 256

    x = jax.random.normal(k_x, (N, Cin, H, W), dtype=jnp.float32)
    conv_w = jax.random.normal(k_w, (Cout, Cin, 1, 1), dtype=jnp.float32) * 0.02
    gamma = 1.0 + 0.1 * jax.random.normal(k_g, (Cout,), dtype=jnp.float32)
    beta = 0.1 * jax.random.normal(k_b, (Cout,), dtype=jnp.float32)

    ref = jax.block_until_ready(reference_forward(x, conv_w, gamma, beta))

    # Exact-math specialization (f32 operands, single Cout block): tight check.
    out_f32 = jax.block_until_ready(
        fused_relu_conv_bn_relu(x, conv_w, gamma, beta,
                                compute_dtype=jnp.float32, cout_blocks=1))
    assert out_f32.shape == (N, Cout, H, W), out_f32.shape
    err_f32 = float(jnp.max(jnp.abs(out_f32 - ref)))
    assert jnp.allclose(out_f32, ref, atol=1e-3, rtol=1e-3), err_f32

    # Split-Cout path (used on v7x) must be numerically identical: check it
    # explicitly with f32 operands regardless of the chip we run on.
    out_split = jax.block_until_ready(
        fused_relu_conv_bn_relu(x, conv_w, gamma, beta,
                                compute_dtype=jnp.float32, cout_blocks=2))
    err_split = float(jnp.max(jnp.abs(out_split - ref)))
    assert jnp.allclose(out_split, ref, atol=1e-3, rtol=1e-3), err_split

    # Performance specialization (bf16 MXU operands pre-cast at param level,
    # f32 accumulation, auto Cout split): tolerance covers bf16 rounding.
    out_bf16 = jax.block_until_ready(
        fused_relu_conv_bn_relu(x, conv_w, gamma, beta,
                                compute_dtype=jnp.bfloat16))
    assert out_bf16.shape == (N, Cout, H, W), out_bf16.shape
    err_bf16 = float(jnp.max(jnp.abs(out_bf16 - ref)))
    assert jnp.allclose(out_bf16, ref, atol=2e-2, rtol=2e-2), err_bf16

    print("KERNEL_OK")
</pallas_src>

<mosaic_0001>
module attributes {stable_mosaic.version = 11 : i64} {
  func.func @_fused_kernel(%arg0: i32, %arg1: memref<256x1024xf32, #tpu.memory_space<vmem>>, %arg2: memref<1024x196xf32, #tpu.memory_space<vmem>>, %arg3: memref<256x2xf32, #tpu.memory_space<vmem>>, %arg4: memref<256x196xf32, #tpu.memory_space<vmem>>) attributes {dimension_semantics = [#tpu.dimension_semantics<parallel>], iteration_bounds = array<i64: 1>, scalar_prefetch = 0 : i64, scratch_operands = 0 : i64, tpu.core_type = #tpu.core_type<tc>, window_params = [{transform_indices = @transform_0, window_bounds = array<i64: 256, 1024>}, {pipeline_mode = #tpu.pipeline_mode<synchronous>, transform_indices = @transform_1, window_bounds = array<i64: 1024, 196>}, {transform_indices = @transform_2, window_bounds = array<i64: 256, 2>}, {transform_indices = @transform_3, window_bounds = array<i64: 256, 196>}]} {
    %c0 = arith.constant 0 : index
    %c0_0 = arith.constant 0 : index
    %0 = vector.load %arg2[%c0, %c0_0] : memref<1024x196xf32, #tpu.memory_space<vmem>>, vector<1024x196xf32>
    %cst = arith.constant 0.000000e+00 : f32
    %1 = vector.broadcast %cst : f32 to vector<1024x196xf32>
    %2 = arith.maximumf %0, %1 : vector<1024x196xf32>
    %c0_1 = arith.constant 0 : index
    %c0_2 = arith.constant 0 : index
    %3 = vector.load %arg1[%c0_1, %c0_2] : memref<256x1024xf32, #tpu.memory_space<vmem>>, vector<256x1024xf32>
    %cst_3 = arith.constant dense<0.000000e+00> : vector<256x196xf32>
    %4 = tpu.matmul %3, %2, %cst_3 {dimension_numbers = #tpu.dot_dimension_numbers<[1], [0], [0], [1], [0, 0, 1, 1], [], []>} : vector<256x1024xf32>, vector<1024x196xf32>, vector<256x196xf32> -> vector<256x196xf32>
    %cst_4 = arith.constant dense<0.000000e+00> : vector<256xf32>
    %5 = vector.multi_reduction <add>, %4, %cst_4 [1] : vector<256x196xf32> to vector<256xf32>
    %6 = vector.shape_cast %5 : vector<256xf32> to vector<256x1xf32>
    %cst_5 = arith.constant 0.00510204071 : f32
    %7 = vector.broadcast %cst_5 : f32 to vector<256x1xf32>
    %8 = arith.mulf %6, %7 : vector<256x1xf32>
    %9 = arith.mulf %4, %4 : vector<256x196xf32>
    %cst_6 = arith.constant dense<0.000000e+00> : vector<256xf32>
    %10 = vector.multi_reduction <add>, %9, %cst_6 [1] : vector<256x196xf32> to vector<256xf32>
    %11 = vector.shape_cast %10 : vector<256xf32> to vector<256x1xf32>
    %cst_7 = arith.constant 0.00510204071 : f32
    %12 = vector.broadcast %cst_7 : f32 to vector<256x1xf32>
    %13 = arith.mulf %11, %12 : vector<256x1xf32>
    %14 = arith.mulf %8, %8 : vector<256x1xf32>
    %15 = arith.subf %13, %14 : vector<256x1xf32>
    %cst_8 = arith.constant 0.000000e+00 : f32
    %16 = vector.broadcast %cst_8 : f32 to vector<256x1xf32>
    %17 = arith.maximumf %15, %16 : vector<256x1xf32>
    %cst_9 = arith.constant 9.99999974E-6 : f32
    %18 = vector.broadcast %cst_9 : f32 to vector<256x1xf32>
    %19 = arith.addf %17, %18 : vector<256x1xf32>
    %20 = math.rsqrt %19 : vector<256x1xf32>
    %c0_10 = arith.constant 0 : index
    %c0_11 = arith.constant 0 : index
    %21 = vector.load %arg3[%c0_10, %c0_11] : memref<256x2xf32, #tpu.memory_space<vmem>>, vector<256x1xf32>
    %c0_12 = arith.constant 0 : index
    %c1 = arith.constant 1 : index
    %22 = vector.load %arg3[%c0_12, %c1] : memref<256x2xf32, #tpu.memory_space<vmem>>, vector<256x1xf32>
    %23 = arith.mulf %21, %20 : vector<256x1xf32>
    %24 = arith.mulf %8, %23 : vector<256x1xf32>
    %25 = arith.subf %22, %24 : vector<256x1xf32>
    %26 = vector.broadcast %23 : vector<256x1xf32> to vector<256x196xf32>
    %27 = arith.mulf %4, %26 : vector<256x196xf32>
    %28 = vector.broadcast %25 : vector<256x1xf32> to vector<256x196xf32>
    %29 = arith.addf %27, %28 : vector<256x196xf32>
    %cst_13 = arith.constant 0.000000e+00 : f32
    %30 = vector.broadcast %cst_13 : f32 to vector<256x196xf32>
    %31 = arith.maximumf %29, %30 : vector<256x196xf32>
    %c0_14 = arith.constant 0 : index
    %c0_15 = arith.constant 0 : index
    %32 = vector.load %arg4[%c0_14, %c0_15] : memref<256x196xf32, #tpu.memory_space<vmem>>, vector<256x196xf32>
    tpu.vector_store %arg4[%c0_14, %c0_15], %31 {strides = array<i32>} : memref<256x196xf32, #tpu.memory_space<vmem>>, vector<256x196xf32>,
    return
  }
  func.func @transform_0(%arg0: i32) -> (i32, i32) {
    %c0_i32 = arith.constant 0 : i32
    %c0_i32_0 = arith.constant 0 : i32
    return %arg0, %c0_i32 : i32, i32
  }
  func.func @transform_1(%arg0: i32) -> (i32, i32) {
    %c0_i32 = arith.constant 0 : i32
    %c0_i32_0 = arith.constant 0 : i32
    %c0_i32_1 = arith.constant 0 : i32
    return %c0_i32, %c0_i32_0 : i32, i32
  }
  func.func @transform_2(%arg0: i32) -> (i32, i32) {
    %c0_i32 = arith.constant 0 : i32
    %c0_i32_0 = arith.constant 0 : i32
    return %arg0, %c0_i32 : i32, i32
  }
  func.func @transform_3(%arg0: i32) -> (i32, i32) {
    %c0_i32 = arith.constant 0 : i32
    %c0_i32_0 = arith.constant 0 : i32
    return %arg0, %c0_i32 : i32, i32
  }
}

</mosaic_0001>

<bundles_post_ra>
// kernel: tpu_custom_call.1
= control target key start
LH: loop header
LB: loop body
LE: loop exit
PB: predicated region body
PF: predicated region fallthrough
CT: control target
= control target key end

     0   :  { %vm2590_vm0 = vcmask 556032   ;;  %s4620_s26 = smov 1   ;;  %s8720_s1 = inlined_call_operand.vmem [shape: f32[1024,196], index: 1, kind: input, shape index: {}]   ;;  %s8721_s0 = inlined_call_operand.vmem [shape: f32[256,1024], index: 0, kind: input, shape index: {}]   ;;  %s8722_s2 = inlined_call_operand.vmem [shape: f32[256,2], index: 2, kind: input, shape index: {}]   ;;  %s8723_s3 = inlined_call_operand.vmem [shape: f32[256,196], index: 3, kind: output, shape index: {}]  }
   0x1   :  { %v44_v0 = vld [vmem:[%s8720_s1 + $0xf0] sm:$0xff]  ;;  %v42_v2 = vld [vmem:[%s8720_s1 + $0xe0] sm:$0xff] }
   0x2   :  { %v108_v1 = vld [vmem:[%s8720_s1 + $0x2f0] sm:$0xff]  ;;  %v300_v3 = vmax.f32 %v44_v0, 0.0  ;;  %v298_v5 = vmax.f32 %v42_v2, 0.0  ;;  %v106_v7 = vld [vmem:[%s8720_s1 + $0x2e0] sm:$0xff] }
   0x3   :  { %v364_v4 = vmax.f32 %v108_v1, 0.0  ;;  %v76_v6 = vld [vmem:[%s8720_s1 + $0x1f0] sm:$0xff]  ;;  %v362_v10 = vmax.f32 %v106_v7, 0.0  ;;  %v74_v13 = vld [vmem:[%s8720_s1 + $0x1e0] sm:$0xff] }
   0x4   :  { %v140_v8 = vld [vmem:[%s8720_s1 + $0x3f0] sm:$0xff]  ;;  %v332_v9 = vmax.f32 %v76_v6, 0.0  ;;  %782 = vmatpush.msra.mxu0 %v300_v3  ;;  %v330_v16 = vmax.f32 %v74_v13, 0.0  ;;  %v138_v18 = vld [vmem:[%s8720_s1 + $0x3e0] sm:$0xff] }
   0x5   :  { %v396_v11 = vmax.f32 %v140_v8, 0.0  ;;  %v40_v12 = vld [vmem:[%s8720_s1 + $0xd0] sm:$0xff]  ;;  %1008 = vmatpush.msra.mxu2 %v364_v4  ;;  %v38_v19 = vld [vmem:[%s8720_s1 + $0xc0] sm:$0xff]  ;;  %v394_v21 = vmax.f32 %v138_v18, 0.0 }
   0x6   :  { %v104_v14 = vld [vmem:[%s8720_s1 + $0x2d0] sm:$0xff]  ;;  %v296_v15 = vmax.f32 %v40_v12, 0.0  ;;  %895 = vmatpush.msra.mxu1 %v332_v9  ;;  %v102_v23 = vld [vmem:[%s8720_s1 + $0x2c0] sm:$0xff]  ;;  %783 = vmatpush.msra.mxu0 %v298_v5  ;;  %v294_v26 = vmax.f32 %v38_v19, 0.0 }
   0x7   :  { %v360_v17 = vmax.f32 %v104_v14, 0.0  ;;  %v72_v20 = vld [vmem:[%s8720_s1 + $0x1d0] sm:$0xff]  ;;  %1121 = vmatpush.msra.mxu3 %v396_v11  ;;  %1009 = vmatpush.msra.mxu2 %v362_v10  ;;  %v358_v27 = vmax.f32 %v102_v23, 0.0  ;;  %v70_v29 = vld [vmem:[%s8720_s1 + $0x1c0] sm:$0xff] }
   0x8   :  { %v328_v22 = vmax.f32 %v72_v20, 0.0  ;;  %v136_v24 = vld [vmem:[%s8720_s1 + $0x3d0] sm:$0xff]  ;;  %v134_v31 = vld [vmem:[%s8720_s1 + $0x3c0] sm:$0xff]  ;;  %896 = vmatpush.msra.mxu1 %v330_v16  ;;  %v326_v32 = vmax.f32 %v70_v29, 0.0  ;;  %784 = vmatpush.msra.mxu0 %v296_v15 }
   0x9   :  { %v36_v25 = vld [vmem:[%s8720_s1 + $0xb0] sm:$0xff]  ;;  %v392_v28 = vmax.f32 %v136_v24, 0.0  ;;  %1122 = vmatpush.msra.mxu3 %v394_v21  ;;  %v390_v33 = vmax.f32 %v134_v31, 0.0  ;;  %v34_v34 = vld [vmem:[%s8720_s1 + $0xa0] sm:$0xff]  ;;  %1010 = vmatpush.msra.mxu2 %v360_v17 }
   0xa   :  { %v100_v30 = vld [vmem:[%s8720_s1 + $0x2b0] sm:$0xff]  ;;  %v98_v36 = vld [vmem:[%s8720_s1 + $0x2a0] sm:$0xff]  ;;  %v292_v37 = vmax.f32 %v36_v25, 0.0  ;;  %897 = vmatpush.msra.mxu1 %v328_v22  ;;  %785 = vmatpush.msra.mxu0 %v294_v26  ;;  %v290_v46 = vmax.f32 %v34_v34, 0.0 }
   0xb   :  { %v68_v35 = vld [vmem:[%s8720_s1 + $0x1b0] sm:$0xff]  ;;  %v356_v38 = vmax.f32 %v100_v30, 0.0  ;;  %v66_v40 = vld [vmem:[%s8720_s1 + $0x1a0] sm:$0xff]  ;;  %1123 = vmatpush.msra.mxu3 %v392_v28  ;;  %1011 = vmatpush.msra.mxu2 %v358_v27  ;;  %v354_v47 = vmax.f32 %v98_v36, 0.0 }
   0xc   :  { %v132_v39 = vld [vmem:[%s8720_s1 + $0x3b0] sm:$0xff]  ;;  %v324_v41 = vmax.f32 %v68_v35, 0.0  ;;  %v130_v45 = vld [vmem:[%s8720_s1 + $0x3a0] sm:$0xff]  ;;  %898 = vmatpush.msra.mxu1 %v326_v32  ;;  %v322_v50 = vmax.f32 %v66_v40, 0.0  ;;  %786 = vmatpush.msra.mxu0 %v292_v37 }
   0xd   :  { %v388_v42 = vmax.f32 %v132_v39, 0.0  ;;  %v32_v43 = vld [vmem:[%s8720_s1 + $0x90] sm:$0xff]  ;;  %1124 = vmatpush.msra.mxu3 %v390_v33  ;;  %v386_v51 = vmax.f32 %v130_v45, 0.0  ;;  %v30_v52 = vld [vmem:[%s8720_s1 + $0x80] sm:$0xff]  ;;  %1012 = vmatpush.msra.mxu2 %v356_v38 }
   0xe   :  { %v96_v44 = vld [vmem:[%s8720_s1 + $0x290] sm:$0xff]  ;;  %v94_v53 = vld [vmem:[%s8720_s1 + $0x280] sm:$0xff]  ;;  %v288_v54 = vmax.f32 %v32_v43, 0.0  ;;  %899 = vmatpush.msra.mxu1 %v324_v41  ;;  %787 = vmatpush.msra.mxu0 %v290_v46  ;;  %v286_v62 = vmax.f32 %v30_v52, 0.0 }
   0xf   :  { %v64_v48 = vld [vmem:[%s8720_s1 + $0x190] sm:$0xff]  ;;  %v352_v55 = vmax.f32 %v96_v44, 0.0  ;;  %v62_v56 = vld [vmem:[%s8720_s1 + $0x180] sm:$0xff]  ;;  %1125 = vmatpush.msra.mxu3 %v388_v42  ;;  %1013 = vmatpush.msra.mxu2 %v354_v47  ;;  %v350_v63 = vmax.f32 %v94_v53, 0.0 }
  0x10   :  { %v128_v49 = vld [vmem:[%s8720_s1 + $0x390] sm:$0xff]  ;;  %v126_v57 = vld [vmem:[%s8720_s1 + $0x380] sm:$0xff]  ;;  %v320_v58 = vmax.f32 %v64_v48, 0.0  ;;  %900 = vmatpush.msra.mxu1 %v322_v50  ;;  %v318_v2 = vmax.f32 %v62_v56, 0.0  ;;  %788 = vmatpush.msra.mxu0 %v288_v54 }
  0x11   :  { %v384_v59 = vmax.f32 %v128_v49, 0.0  ;;  %v28_v60 = vld [vmem:[%s8720_s1 + $0x70] sm:$0xff]  ;;  %1126 = vmatpush.msra.mxu3 %v386_v51  ;;  %v382_v3 = vmax.f32 %v126_v57, 0.0  ;;  %v26_v4 = vld [vmem:[%s8720_s1 + $0x60] sm:$0xff]  ;;  %1014 = vmatpush.msra.mxu2 %v352_v55 }
  0x12   :  { %v92_v61 = vld [vmem:[%s8720_s1 + $0x270] sm:$0xff]  ;;  %v90_v5 = vld [vmem:[%s8720_s1 + $0x260] sm:$0xff]  ;;  %v284_v6 = vmax.f32 %v28_v60, 0.0  ;;  %901 = vmatpush.msra.mxu1 %v320_v58  ;;  %789 = vmatpush.msra.mxu0 %v286_v62  ;;  %v282_v14 = vmax.f32 %v26_v4, 0.0 }
  0x13   :  { %v60_v0 = vld [vmem:[%s8720_s1 + $0x170] sm:$0xff]  ;;  %v348_v7 = vmax.f32 %v92_v61, 0.0  ;;  %v58_v8 = vld [vmem:[%s8720_s1 + $0x160] sm:$0xff]  ;;  %1127 = vmatpush.msra.mxu3 %v384_v59  ;;  %1015 = vmatpush.msra.mxu2 %v350_v63  ;;  %v346_v15 = vmax.f32 %v90_v5, 0.0 }
  0x14   :  { %v124_v1 = vld [vmem:[%s8720_s1 + $0x370] sm:$0xff]  ;;  %v122_v9 = vld [vmem:[%s8720_s1 + $0x360] sm:$0xff]  ;;  %v316_v10 = vmax.f32 %v60_v0, 0.0  ;;  %902 = vmatpush.msra.mxu1 %v318_v2  ;;  %v314_v18 = vmax.f32 %v58_v8, 0.0  ;;  %790 = vmatpush.msra.mxu0 %v284_v6 }
  0x15   :  { %v380_v11 = vmax.f32 %v124_v1, 0.0  ;;  %v24_v12 = vld [vmem:[%s8720_s1 + $0x50] sm:$0xff]  ;;  %1128 = vmatpush.msra.mxu3 %v382_v3  ;;  %v378_v19 = vmax.f32 %v122_v9, 0.0  ;;  %v22_v20 = vld [vmem:[%s8720_s1 + $0x40] sm:$0xff]  ;;  %1016 = vmatpush.msra.mxu2 %v348_v7  ;;  %v527_v9 = vld [vmem:[%s8721_s0 + $0x8] sm:$0xff] }
  0x16   :  { %v88_v13 = vld [vmem:[%s8720_s1 + $0x250] sm:$0xff]  ;;  %v86_v21 = vld [vmem:[%s8720_s1 + $0x240] sm:$0xff]  ;;  %v280_v22 = vmax.f32 %v24_v12, 0.0  ;;  %903 = vmatpush.msra.mxu1 %v316_v10  ;;  %791 = vmatpush.msra.mxu0 %v282_v14  ;;  %v278_v30 = vmax.f32 %v22_v20, 0.0 }
  0x17   :  { %v56_v16 = vld [vmem:[%s8720_s1 + $0x150] sm:$0xff]  ;;  %v344_v23 = vmax.f32 %v88_v13, 0.0  ;;  %v54_v24 = vld [vmem:[%s8720_s1 + $0x140] sm:$0xff]  ;;  %1129 = vmatpush.msra.mxu3 %v380_v11  ;;  %1017 = vmatpush.msra.mxu2 %v346_v15  ;;  %v342_v31 = vmax.f32 %v86_v21, 0.0  ;;  %v529_v13 = vld [vmem:[%s8721_s0 + $0x18] sm:$0xff] }
  0x18   :  { %v120_v17 = vld [vmem:[%s8720_s1 + $0x350] sm:$0xff]  ;;  %v118_v25 = vld [vmem:[%s8720_s1 + $0x340] sm:$0xff]  ;;  %v312_v26 = vmax.f32 %v56_v16, 0.0  ;;  %904 = vmatpush.msra.mxu1 %v314_v18  ;;  %v310_v34 = vmax.f32 %v54_v24, 0.0  ;;  %792 = vmatpush.msra.mxu0 %v280_v22 }
  0x19   :  { %v376_v27 = vmax.f32 %v120_v17, 0.0  ;;  %v20_v28 = vld [vmem:[%s8720_s1 + $0x30] sm:$0xff]  ;;  %1130 = vmatpush.msra.mxu3 %v378_v19  ;;  %v374_v35 = vmax.f32 %v118_v25, 0.0  ;;  %v18_v36 = vld [vmem:[%s8720_s1 + $0x20] sm:$0xff]  ;;  %1018 = vmatpush.msra.mxu2 %v344_v23 }
  0x1a   :  { %v84_v29 = vld [vmem:[%s8720_s1 + $0x230] sm:$0xff]  ;;  %v82_v37 = vld [vmem:[%s8720_s1 + $0x220] sm:$0xff]  ;;  %v276_v38 = vmax.f32 %v20_v28, 0.0  ;;  %905 = vmatpush.msra.mxu1 %v312_v26  ;;  %793 = vmatpush.msra.mxu0 %v278_v30  ;;  %v274_v46 = vmax.f32 %v18_v36, 0.0  ;;  %v535_v30 = vld [vmem:[%s8721_s0 + $0x48] sm:$0xff] }
  0x1b   :  { %v52_v32 = vld [vmem:[%s8720_s1 + $0x130] sm:$0xff]  ;;  %v340_v39 = vmax.f32 %v84_v29, 0.0  ;;  %v50_v40 = vld [vmem:[%s8720_s1 + $0x120] sm:$0xff]  ;;  %1131 = vmatpush.msra.mxu3 %v376_v27  ;;  %1019 = vmatpush.msra.mxu2 %v342_v31  ;;  %v338_v47 = vmax.f32 %v82_v37, 0.0  ;;  %v537_v31 = vld [vmem:[%s8721_s0 + $0x58] sm:$0xff] }
  0x1c   :  { %v116_v33 = vld [vmem:[%s8720_s1 + $0x330] sm:$0xff]  ;;  %v114_v41 = vld [vmem:[%s8720_s1 + $0x320] sm:$0xff]  ;;  %v308_v42 = vmax.f32 %v52_v32, 0.0  ;;  %906 = vmatpush.msra.mxu1 %v310_v34  ;;  %v306_v50 = vmax.f32 %v50_v40, 0.0  ;;  %794 = vmatpush.msra.mxu0 %v276_v38  ;;  %v543_v34 = vld [vmem:[%s8721_s0 + $0x88] sm:$0xff] }
  0x1d   :  { %v372_v43 = vmax.f32 %v116_v33, 0.0  ;;  %v16_v44 = vld [vmem:[%s8720_s1 + $0x10] sm:$0xff]  ;;  %1132 = vmatpush.msra.mxu3 %v374_v35  ;;  %v370_v51 = vmax.f32 %v114_v41, 0.0  ;;  %v14_v52 = vld [vmem:[%s8720_s1] sm:$0xff]  ;;  %1020 = vmatpush.msra.mxu2 %v340_v39  ;;  %v545_v35 = vld [vmem:[%s8721_s0 + $0x98] sm:$0xff] }
  0x1e   :  { %v80_v45 = vld [vmem:[%s8720_s1 + $0x210] sm:$0xff]  ;;  %v78_v53 = vld [vmem:[%s8720_s1 + $0x200] sm:$0xff]  ;;  %v272_v54 = vmax.f32 %v16_v44, 0.0  ;;  %907 = vmatpush.msra.mxu1 %v308_v42  ;;  %795 = vmatpush.msra.mxu0 %v274_v46  ;;  %v270_v60 = vmax.f32 %v14_v52, 0.0  ;;  %v551_v46 = vld [vmem:[%s8721_s0 + $0xc8] sm:$0xff] }
  0x1f   :  { %v48_v48 = vld [vmem:[%s8720_s1 + $0x110] sm:$0xff]  ;;  %v336_v55 = vmax.f32 %v80_v45, 0.0  ;;  %1133 = vmatpush.msra.mxu3 %v372_v43  ;;  %v46_v59 = vld [vmem:[%s8720_s1 + $0x100] sm:$0xff]  ;;  %1021 = vmatpush.msra.mxu2 %v338_v47  ;;  %v334_v61 = vmax.f32 %v78_v53, 0.0  ;;  %v553_v47 = vld [vmem:[%s8721_s0 + $0xd8] sm:$0xff] }
  0x20   :  { %v112_v49 = vld [vmem:[%s8720_s1 + $0x310] sm:$0xff]  ;;  %v304_v56 = vmax.f32 %v48_v48, 0.0  ;;  %v110_v62 = vld [vmem:[%s8720_s1 + $0x300] sm:$0xff]  ;;  %908 = vmatpush.msra.mxu1 %v306_v50  ;;  %796 = vmatpush.msra.mxu0 %v272_v54  ;;  %v302_v3 = vmax.f32 %v46_v59, 0.0  ;;  %v559_v50 = vld [vmem:[%s8721_s0 + $0x108] sm:$0xff] }
  0x21   :  { %v368_v57 = vmax.f32 %v112_v49, 0.0  ;;  %v236_v58 = vld [vmem:[%s8720_s1 + $0x6f0] sm:$0xff]  ;;  %1134 = vmatpush.msra.mxu3 %v370_v51  ;;  %v526_v63 = vld [vmem:[%s8721_s0] sm:$0xff]  ;;  %1022 = vmatpush.msra.mxu2 %v336_v55  ;;  %v366_v6 = vmax.f32 %v110_v62, 0.0  ;;  %v561_v51 = vld [vmem:[%s8721_s0 + $0x118] sm:$0xff] }
  0x22   :  { %v172_v0 = vld [vmem:[%s8720_s1 + $0x4f0] sm:$0xff]  ;;  %v492_v2 = vmax.f32 %v236_v58, 0.0  ;;  %909 = vmatpush.msra.mxu1 %v304_v56  ;;  %v234_v7 = vld [vmem:[%s8720_s1 + $0x6e0] sm:$0xff]  ;;  %797 = vmatpush.msra.mxu0 %v270_v60  ;;  %v567_v62 = vld [vmem:[%s8721_s0 + $0x148] sm:$0xff] }
  0x23   :  { %v528_v1 = vld [vmem:[%s8721_s0 + $0x10] sm:$0xff]  ;;  %1135 = vmatpush.msra.mxu3 %v368_v57  ;;  %v170_v8 = vld [vmem:[%s8720_s1 + $0x4e0] sm:$0xff]  ;;  %1023 = vmatpush.msra.mxu2 %v334_v61  ;;  %v428_v10 = vmax.f32 %v172_v0, 0.0  ;;  %v490_v17 = vmax.f32 %v234_v7, 0.0 }
  0x24   :  { %v268_v4 = vld [vmem:[%s8720_s1 + $0x7f0] sm:$0xff]  ;;  %v266_v11 = vld [vmem:[%s8720_s1 + $0x7e0] sm:$0xff]  ;;  %798 = vmatmul.f32.vlgmr.msra.gmra.mxu0 %v526_v63  ;;  %1024 = vmatmul.f32.vlgmr.msra.gmra.mxu2 %v528_v1  ;;  %v426_v18 = vmax.f32 %v170_v8, 0.0  ;;  %v569_v63 = vld [vmem:[%s8721_s0 + $0x158] sm:$0xff] }
  0x25   :  { %v204_v5 = vld [vmem:[%s8720_s1 + $0x5f0] sm:$0xff]  ;;  %v202_v12 = vld [vmem:[%s8720_s1 + $0x5e0] sm:$0xff]  ;;  %v524_v14 = vmax.f32 %v268_v4, 0.0  ;;  %1460 = vmatpush.msrb.mxu2 %v492_v2  ;;  %910 = vmatpush.msra.mxu1 %v302_v3  ;;  %v522_v19 = vmax.f32 %v266_v11, 0.0  ;;  %v575_v2 = vld [vmem:[%s8721_s0 + $0x188] sm:$0xff] }
  0x26   :  { %v460_v15 = vmax.f32 %v204_v5, 0.0  ;;  %v232_v16 = vld [vmem:[%s8720_s1 + $0x6d0] sm:$0xff]  ;;  %1136 = vmatpush.msra.mxu3 %v366_v6  ;;  %911 = vmatmul.f32.vlgmr.msra.gmra.mxu1 %v527_v9  ;;  %v458_v20 = vmax.f32 %v202_v12, 0.0  ;;  %v534_v26 = vld [vmem:[%s8721_s0 + $0x40] sm:$0xff]  ;;  %v577_v3 = vld [vmem:[%s8721_s0 + $0x198] sm:$0xff] }
  0x27   :  { %1137 = vmatmul.f32.vlgmr.msra.gmra.mxu3 %v529_v13  ;;  %1234 = vmatpush.msrb.mxu0 %v428_v10  ;;  %v488_v21 = vmax.f32 %v232_v16, 0.0  ;;  %v168_v22 = vld [vmem:[%s8720_s1 + $0x4d0] sm:$0xff]  ;;  %v542_v32 = vld [vmem:[%s8721_s0 + $0x80] sm:$0xff] }
  0x28   :  { %v264_v23 = vld [vmem:[%s8720_s1 + $0x7d0] sm:$0xff]  ;;  %1573 = vmatpush.msrb.mxu3 %v524_v14  ;;  %1347 = vmatpush.msrb.mxu1 %v460_v15  ;;  %v424_v25 = vmax.f32 %v168_v22, 0.0  ;;  %v230_v36 = vld [vmem:[%s8720_s1 + $0x6c0] sm:$0xff]  ;;  %v583_v14 = vld [vmem:[%s8721_s0 + $0x1c8] sm:$0xff] }
  0x29   :  { %v200_v24 = vld [vmem:[%s8720_s1 + $0x5d0] sm:$0xff]  ;;  %1461 = vmatpush.msrb.mxu2 %v490_v17  ;;  %1235 = vmatpush.msrb.mxu0 %v426_v18  ;;  %v520_v28 = vmax.f32 %v264_v23, 0.0  ;;  %v486_v37 = vmax.f32 %v230_v36, 0.0  ;;  %v166_v38 = vld [vmem:[%s8720_s1 + $0x4c0] sm:$0xff]  ;;  %v585_v15 = vld [vmem:[%s8721_s0 + $0x1d8] sm:$0xff] }
  0x2a   :  { %v536_v27 = vld [vmem:[%s8721_s0 + $0x50] sm:$0xff]  ;;  %v456_v29 = vmax.f32 %v200_v24, 0.0  ;;  %1574 = vmatpush.msrb.mxu3 %v522_v19  ;;  %1348 = vmatpush.msrb.mxu1 %v458_v20  ;;  %v262_v39 = vld [vmem:[%s8720_s1 + $0x7c0] sm:$0xff]  ;;  %v422_v41 = vmax.f32 %v166_v38, 0.0  ;;  %v591_v18 = vld [vmem:[%s8721_s0 + $0x208] sm:$0xff] }
  0x2b   :  { %1462 = vmatpush.msrb.mxu2 %v488_v21  ;;  %1236 = vmatpush.msrb.mxu0 %v424_v25  ;;  %v544_v33 = vld [vmem:[%s8721_s0 + $0x90] sm:$0xff]  ;;  %v198_v40 = vld [vmem:[%s8720_s1 + $0x5c0] sm:$0xff]  ;;  %v518_v42 = vmax.f32 %v262_v39, 0.0  ;;  %v593_v19 = vld [vmem:[%s8721_s0 + $0x218] sm:$0xff] }
  0x2c   :  { %801 = vmatmul.f32.gmra.mxu0 %v534_v26  ;;  %1027 = vmatmul.f32.gmra.mxu2 %v536_v27  ;;  %v454_v43 = vmax.f32 %v198_v40, 0.0  ;;  %v550_v44 = vld [vmem:[%s8721_s0 + $0xc0] sm:$0xff]  ;;  %v552_v45 = vld [vmem:[%s8721_s0 + $0xd0] sm:$0xff] }
  0x2d   :  { %1575 = vmatpush.msrb.mxu3 %v520_v28  ;;  %1349 = vmatpush.msrb.mxu1 %v456_v29  ;;  %v558_v48 = vld [vmem:[%s8721_s0 + $0x100] sm:$0xff]  ;;  %v560_v49 = vld [vmem:[%s8721_s0 + $0x110] sm:$0xff] }
  0x2e   :  { %914 = vmatmul.f32.gmra.mxu1 %v535_v30  ;;  %1463 = vmatpush.msrb.mxu2 %v486_v37  ;;  %v228_v52 = vld [vmem:[%s8720_s1 + $0x6b0] sm:$0xff]  ;;  %v566_v60 = vld [vmem:[%s8721_s0 + $0x140] sm:$0xff]  ;;  %v599_v30 = vld [vmem:[%s8721_s0 + $0x248] sm:$0xff] }
  0x2f   :  { %1140 = vmatmul.f32.gmra.mxu3 %v537_v31  ;;  %1237 = vmatpush.msrb.mxu0 %v422_v41  ;;  %v484_v53 = vmax.f32 %v228_v52, 0.0  ;;  %v164_v54 = vld [vmem:[%s8720_s1 + $0x4b0] sm:$0xff]  ;;  %v574_v0 = vld [vmem:[%s8721_s0 + $0x180] sm:$0xff]  ;;  %v601_v31 = vld [vmem:[%s8721_s0 + $0x258] sm:$0xff] }
  0x30   :  { %1576 = vmatpush.msrb.mxu3 %v518_v42  ;;  %1350 = vmatpush.msrb.mxu1 %v454_v43  ;;  %v260_v55 = vld [vmem:[%s8720_s1 + $0x7b0] sm:$0xff]  ;;  %v420_v57 = vmax.f32 %v164_v54, 0.0  ;;  %v226_v4 = vld [vmem:[%s8720_s1 + $0x6a0] sm:$0xff] }
  0x31   :  { %1464 = vmatpush.msrb.mxu2 %v484_v53  ;;  %v196_v56 = vld [vmem:[%s8720_s1 + $0x5b0] sm:$0xff]  ;;  %v516_v58 = vmax.f32 %v260_v55, 0.0  ;;  %v482_v5 = vmax.f32 %v226_v4, 0.0  ;;  %v162_v6 = vld [vmem:[%s8720_s1 + $0x4a0] sm:$0xff] }
  0x32   :  { %v452_v59 = vmax.f32 %v196_v56, 0.0  ;;  %v568_v61 = vld [vmem:[%s8721_s0 + $0x150] sm:$0xff]  ;;  %1238 = vmatpush.msrb.mxu0 %v420_v57  ;;  %v258_v7 = vld [vmem:[%s8720_s1 + $0x7a0] sm:$0xff]  ;;  %v418_v9 = vmax.f32 %v162_v6, 0.0 }
  0x33   :  { %1577 = vmatpush.msrb.mxu3 %v516_v58  ;;  %v576_v1 = vld [vmem:[%s8721_s0 + $0x190] sm:$0xff]  ;;  %1465 = vmatpush.msrb.mxu2 %v482_v5  ;;  %v194_v8 = vld [vmem:[%s8720_s1 + $0x5a0] sm:$0xff]  ;;  %v514_v10 = vmax.f32 %v258_v7, 0.0 }
  0x34   :  { %804 = vmatmul.f32.gmra.mxu0 %v542_v32  ;;  %1030 = vmatmul.f32.gmra.mxu2 %v544_v33  ;;  %v450_v11 = vmax.f32 %v194_v8, 0.0  ;;  %v582_v12 = vld [vmem:[%s8721_s0 + $0x1c0] sm:$0xff]  ;;  %v584_v13 = vld [vmem:[%s8721_s0 + $0x1d0] sm:$0xff] }
  0x35   :  { %1351 = vmatpush.msrb.mxu1 %v452_v59  ;;  %1239 = vmatpush.msrb.mxu0 %v418_v9  ;;  %v590_v16 = vld [vmem:[%s8721_s0 + $0x200] sm:$0xff]  ;;  %v592_v17 = vld [vmem:[%s8721_s0 + $0x210] sm:$0xff] }
  0x36   :  { %917 = vmatmul.f32.gmra.mxu1 %v543_v34  ;;  %1578 = vmatpush.msrb.mxu3 %v514_v10  ;;  %v224_v20 = vld [vmem:[%s8720_s1 + $0x690] sm:$0xff]  ;;  %v598_v28 = vld [vmem:[%s8721_s0 + $0x240] sm:$0xff]  ;;  %v607_v34 = vld [vmem:[%s8721_s0 + $0x288] sm:$0xff] }
  0x37   :  { %1143 = vmatmul.f32.gmra.mxu3 %v545_v35  ;;  %1352 = vmatpush.msrb.mxu1 %v450_v11  ;;  %v480_v21 = vmax.f32 %v224_v20, 0.0  ;;  %v160_v22 = vld [vmem:[%s8720_s1 + $0x490] sm:$0xff]  ;;  %v606_v32 = vld [vmem:[%s8721_s0 + $0x280] sm:$0xff]  ;;  %v609_v35 = vld [vmem:[%s8721_s0 + $0x298] sm:$0xff] }
  0x38   :  { %v256_v23 = vld [vmem:[%s8720_s1 + $0x790] sm:$0xff]  ;;  %v416_v25 = vmax.f32 %v160_v22, 0.0  ;;  %v222_v36 = vld [vmem:[%s8720_s1 + $0x680] sm:$0xff]  ;;  %v655_v20 = vld [vmem:[%s8721_s0 + $0x408] sm:$0xff] }
  0x39   :  { %1466 = vmatpush.msrb.mxu2 %v480_v21  ;;  %v192_v24 = vld [vmem:[%s8720_s1 + $0x590] sm:$0xff]  ;;  %v512_v26 = vmax.f32 %v256_v23, 0.0  ;;  %v478_v37 = vmax.f32 %v222_v36, 0.0  ;;  %v158_v38 = vld [vmem:[%s8720_s1 + $0x480] sm:$0xff]  ;;  %v657_v21 = vld [vmem:[%s8721_s0 + $0x418] sm:$0xff] }
  0x3a   :  { %v448_v27 = vmax.f32 %v192_v24, 0.0  ;;  %v600_v29 = vld [vmem:[%s8721_s0 + $0x250] sm:$0xff]  ;;  %1240 = vmatpush.msrb.mxu0 %v416_v25  ;;  %v254_v39 = vld [vmem:[%s8720_s1 + $0x780] sm:$0xff]  ;;  %v414_v41 = vmax.f32 %v158_v38, 0.0 }
  0x3b   :  { %1579 = vmatpush.msrb.mxu3 %v512_v26  ;;  %v608_v33 = vld [vmem:[%s8721_s0 + $0x290] sm:$0xff]  ;;  %1467 = vmatpush.msrb.mxu2 %v478_v37  ;;  %v190_v40 = vld [vmem:[%s8720_s1 + $0x580] sm:$0xff]  ;;  %v510_v42 = vmax.f32 %v254_v39, 0.0  ;;  %v663_v39 = vld [vmem:[%s8721_s0 + $0x448] sm:$0xff] }
  0x3c   :  { %807 = vmatmul.f32.gmra.mxu0 %v550_v44  ;;  %1033 = vmatmul.f32.gmra.mxu2 %v552_v45  ;;  %v446_v43 = vmax.f32 %v190_v40, 0.0  ;;  %v614_v44 = vld [vmem:[%s8721_s0 + $0x2c0] sm:$0xff]  ;;  %v616_v45 = vld [vmem:[%s8721_s0 + $0x2d0] sm:$0xff]  ;;  %v665_v40 = vld [vmem:[%s8721_s0 + $0x458] sm:$0xff] }
  0x3d   :  { %1353 = vmatpush.msrb.mxu1 %v448_v27  ;;  %1241 = vmatpush.msrb.mxu0 %v414_v41  ;;  %v220_v52 = vld [vmem:[%s8720_s1 + $0x670] sm:$0xff]  ;;  %v630_v59 = vld [vmem:[%s8721_s0 + $0x340] sm:$0xff] }
  0x3e   :  { %920 = vmatmul.f32.gmra.mxu1 %v551_v46  ;;  %1580 = vmatpush.msrb.mxu3 %v510_v42  ;;  %v615_v46 = vld [vmem:[%s8721_s0 + $0x2c8] sm:$0xff]  ;;  %v476_v53 = vmax.f32 %v220_v52, 0.0  ;;  %v156_v54 = vld [vmem:[%s8720_s1 + $0x470] sm:$0xff]  ;;  %v218_v4 = vld [vmem:[%s8720_s1 + $0x660] sm:$0xff] }
  0x3f   :  { %1146 = vmatmul.f32.gmra.mxu3 %v553_v47  ;;  %1354 = vmatpush.msrb.mxu1 %v446_v43  ;;  %v617_v47 = vld [vmem:[%s8721_s0 + $0x2d8] sm:$0xff]  ;;  %v252_v55 = vld [vmem:[%s8720_s1 + $0x770] sm:$0xff]  ;;  %v412_v56 = vmax.f32 %v156_v54, 0.0  ;;  %v474_v5 = vmax.f32 %v218_v4, 0.0  ;;  %v154_v6 = vld [vmem:[%s8720_s1 + $0x460] sm:$0xff] }
  0x40   :  { %1468 = vmatpush.msrb.mxu2 %v476_v53  ;;  %v508_v57 = vmax.f32 %v252_v55, 0.0  ;;  %v188_v58 = vld [vmem:[%s8720_s1 + $0x570] sm:$0xff]  ;;  %v250_v7 = vld [vmem:[%s8720_s1 + $0x760] sm:$0xff]  ;;  %v410_v8 = vmax.f32 %v154_v6, 0.0  ;;  %v681_v6 = vld [vmem:[%s8721_s0 + $0x4d8] sm:$0xff] }
  0x41   :  { %1242 = vmatpush.msrb.mxu0 %v412_v56  ;;  %v506_v9 = vmax.f32 %v250_v7, 0.0  ;;  %v186_v10 = vld [vmem:[%s8720_s1 + $0x560] sm:$0xff]  ;;  %v216_v22 = vld [vmem:[%s8720_s1 + $0x650] sm:$0xff] }
  0x42   :  { %1581 = vmatpush.msrb.mxu3 %v508_v57  ;;  %1469 = vmatpush.msrb.mxu2 %v474_v5  ;;  %v646_v11 = vld [vmem:[%s8721_s0 + $0x3c0] sm:$0xff]  ;;  %v472_v23 = vmax.f32 %v216_v22, 0.0  ;;  %v152_v26 = vld [vmem:[%s8720_s1 + $0x450] sm:$0xff]  ;;  %v679_v5 = vld [vmem:[%s8721_s0 + $0x4c8] sm:$0xff] }
  0x43   :  { %1243 = vmatpush.msrb.mxu0 %v410_v8  ;;  %v248_v27 = vld [vmem:[%s8720_s1 + $0x750] sm:$0xff]  ;;  %v214_v52 = vld [vmem:[%s8720_s1 + $0x640] sm:$0xff] }
  0x44   :  { %810 = vmatmul.f32.gmra.mxu0 %v558_v48  ;;  %1036 = vmatmul.f32.gmra.mxu2 %v560_v49  ;;  %v622_v48 = vld [vmem:[%s8721_s0 + $0x300] sm:$0xff]  ;;  %v624_v49 = vld [vmem:[%s8721_s0 + $0x310] sm:$0xff]  ;;  %v470_v53 = vmax.f32 %v214_v52, 0.0 }
  0x45   :  { %1582 = vmatpush.msrb.mxu3 %v506_v9  ;;  %1470 = vmatpush.msrb.mxu2 %v472_v23  ;;  %v150_v56 = vld [vmem:[%s8720_s1 + $0x440] sm:$0xff]  ;;  %v148_v22 = vld [vmem:[%s8720_s1 + $0x430] sm:$0xff] }
  0x46   :  { %923 = vmatmul.f32.gmra.mxu1 %v559_v50  ;;  %v623_v50 = vld [vmem:[%s8721_s0 + $0x308] sm:$0xff]  ;;  %v246_v57 = vld [vmem:[%s8720_s1 + $0x740] sm:$0xff]  ;;  %v244_v23 = vld [vmem:[%s8720_s1 + $0x730] sm:$0xff] }
  0x47   :  { %1149 = vmatmul.f32.gmra.mxu3 %v561_v51  ;;  %v625_v51 = vld [vmem:[%s8721_s0 + $0x318] sm:$0xff]  ;;  %1471 = vmatpush.msrb.mxu2 %v470_v53 }
  0x4c   :  { %813 = vmatmul.f32.gmra.mxu0 %v566_v60  ;;  %1039 = vmatmul.f32.gmra.mxu2 %v568_v61  ;;  %v632_v60 = vld [vmem:[%s8721_s0 + $0x350] sm:$0xff]  ;;  %v444_v61 = vmax.f32 %v188_v58, 0.0 }
  0x4e   :  { %926 = vmatmul.f32.gmra.mxu1 %v567_v62  ;;  %v631_v62 = vld [vmem:[%s8721_s0 + $0x348] sm:$0xff] }
  0x4f   :  { %1152 = vmatmul.f32.gmra.mxu3 %v569_v63  ;;  %1355 = vmatpush.msrb.mxu1 %v444_v61  ;;  %v633_v63 = vld [vmem:[%s8721_s0 + $0x358] sm:$0xff]  ;;  %v182_v61 = vld [vmem:[%s8720_s1 + $0x540] sm:$0xff] }
  0x54   :  { %816 = vmatmul.f32.gmra.mxu0 %v574_v0  ;;  %1042 = vmatmul.f32.gmra.mxu2 %v576_v1  ;;  %v638_v0 = vld [vmem:[%s8721_s0 + $0x380] sm:$0xff]  ;;  %v640_v1 = vld [vmem:[%s8721_s0 + $0x390] sm:$0xff] }
  0x56   :  { %929 = vmatmul.f32.gmra.mxu1 %v575_v2  ;;  %v639_v2 = vld [vmem:[%s8721_s0 + $0x388] sm:$0xff] }
  0x57   :  { %1155 = vmatmul.f32.gmra.mxu3 %v577_v3  ;;  %v641_v3 = vld [vmem:[%s8721_s0 + $0x398] sm:$0xff] }
  0x5c   :  { %819 = vmatmul.f32.gmra.mxu0 %v582_v12  ;;  %1045 = vmatmul.f32.gmra.mxu2 %v584_v13  ;;  %v648_v12 = vld [vmem:[%s8721_s0 + $0x3d0] sm:$0xff]  ;;  %v442_v13 = vmax.f32 %v186_v10, 0.0 }
  0x5e   :  { %932 = vmatmul.f32.gmra.mxu1 %v583_v14  ;;  %v647_v14 = vld [vmem:[%s8721_s0 + $0x3c8] sm:$0xff] }
  0x5f   :  { %1158 = vmatmul.f32.gmra.mxu3 %v585_v15  ;;  %1356 = vmatpush.msrb.mxu1 %v442_v13  ;;  %v649_v15 = vld [vmem:[%s8721_s0 + $0x3d8] sm:$0xff] }
  0x64   :  { %822 = vmatmul.f32.gmra.mxu0 %v590_v16  ;;  %1048 = vmatmul.f32.gmra.mxu2 %v592_v17  ;;  %v654_v17 = vld [vmem:[%s8721_s0 + $0x400] sm:$0xff] }
  0x66   :  { %935 = vmatmul.f32.gmra.mxu1 %v591_v18  ;;  %v656_v18 = vld [vmem:[%s8721_s0 + $0x410] sm:$0xff] }
  0x67   :  { %1161 = vmatmul.f32.gmra.mxu3 %v593_v19 }
  0x6c   :  { %825 = vmatmul.f32.gmra.mxu0 %v598_v28  ;;  %1051 = vmatmul.f32.gmra.mxu2 %v600_v29  ;;  %v408_v29 = vmax.f32 %v152_v26, 0.0  ;;  %v500_v26 = vmax.f32 %v244_v23, 0.0  ;;  %v240_v23 = vld [vmem:[%s8720_s1 + $0x710] sm:$0xff] }
  0x6e   :  { %938 = vmatmul.f32.gmra.mxu1 %v599_v30  ;;  %v504_v30 = vmax.f32 %v248_v27, 0.0  ;;  %1244 = vmatpush.msrb.mxu0 %v408_v29  ;;  %v180_v27 = vld [vmem:[%s8720_s1 + $0x530] sm:$0xff]  ;;  %v694_v29 = vld [vmem:[%s8721_s0 + $0x540] sm:$0xff] }
  0x6f   :  { %1164 = vmatmul.f32.gmra.mxu3 %v601_v31  ;;  %v184_v31 = vld [vmem:[%s8720_s1 + $0x550] sm:$0xff] }
  0x70   :  { %1583 = vmatpush.msrb.mxu3 %v504_v30  ;;  %v696_v30 = vld [vmem:[%s8721_s0 + $0x550] sm:$0xff] }
  0x74   :  { %828 = vmatmul.f32.gmra.mxu0 %v606_v32  ;;  %1054 = vmatmul.f32.gmra.mxu2 %v608_v33  ;;  %v662_v33 = vld [vmem:[%s8721_s0 + $0x440] sm:$0xff] }
  0x76   :  { %941 = vmatmul.f32.gmra.mxu1 %v607_v34  ;;  %v664_v34 = vld [vmem:[%s8721_s0 + $0x450] sm:$0xff] }
  0x77   :  { %1167 = vmatmul.f32.gmra.mxu3 %v609_v35  ;;  %v440_v35 = vmax.f32 %v184_v31, 0.0  ;;  %v436_v31 = vmax.f32 %v180_v27, 0.0  ;;  %v176_v27 = vld [vmem:[%s8720_s1 + $0x510] sm:$0xff] }
  0x79   :  { %1357 = vmatpush.msrb.mxu1 %v440_v35  ;;  %v695_v35 = vld [vmem:[%s8721_s0 + $0x548] sm:$0xff] }
  0x7c   :  { %831 = vmatmul.f32.gmra.mxu0 %v614_v44  ;;  %1057 = vmatmul.f32.gmra.mxu2 %v616_v45  ;;  %v670_v45 = vld [vmem:[%s8721_s0 + $0x480] sm:$0xff] }
  0x7e   :  { %944 = vmatmul.f32.gmra.mxu1 %v615_v46  ;;  %v672_v46 = vld [vmem:[%s8721_s0 + $0x490] sm:$0xff] }
  0x7f   :  { %1170 = vmatmul.f32.gmra.mxu3 %v617_v47 }
  0x84   :  { %834 = vmatmul.f32.gmra.mxu0 %v622_v48  ;;  %1060 = vmatmul.f32.gmra.mxu2 %v624_v49 }
  0x86   :  { %947 = vmatmul.f32.gmra.mxu1 %v623_v50  ;;  %v671_v50 = vld [vmem:[%s8721_s0 + $0x488] sm:$0xff] }
  0x87   :  { %1173 = vmatmul.f32.gmra.mxu3 %v625_v51  ;;  %v673_v51 = vld [vmem:[%s8721_s0 + $0x498] sm:$0xff] }
  0x8c   :  { %837 = vmatmul.f32.gmra.mxu0 %v630_v59  ;;  %1063 = vmatmul.f32.gmra.mxu2 %v632_v60  ;;  %v406_v59 = vmax.f32 %v150_v56, 0.0  ;;  %v502_v60 = vmax.f32 %v246_v57, 0.0 }
  0x8e   :  { %950 = vmatmul.f32.gmra.mxu1 %v631_v62  ;;  %1245 = vmatpush.msrb.mxu0 %v406_v59  ;;  %v178_v59 = vld [vmem:[%s8720_s1 + $0x520] sm:$0xff] }
  0x8f   :  { %1176 = vmatmul.f32.gmra.mxu3 %v633_v63  ;;  %v678_v63 = vld [vmem:[%s8721_s0 + $0x4c0] sm:$0xff] }
  0x90   :  { %1584 = vmatpush.msrb.mxu3 %v502_v60 }
  0x92   :  { %1585 = vmatpush.msrb.mxu3 %v500_v26  ;;  %v496_v26 = vmax.f32 %v240_v23, 0.0 }
  0x94   :  { %840 = vmatmul.f32.gmra.mxu0 %v638_v0  ;;  %1066 = vmatmul.f32.gmra.mxu2 %v640_v1  ;;  %v680_v0 = vld [vmem:[%s8721_s0 + $0x4d0] sm:$0xff]  ;;  %v438_v1 = vmax.f32 %v182_v61, 0.0  ;;  %v710_v61 = vld [vmem:[%s8721_s0 + $0x5c0] sm:$0xff] }
  0x96   :  { %953 = vmatmul.f32.gmra.mxu1 %v639_v2 }
  0x97   :  { %1179 = vmatmul.f32.gmra.mxu3 %v641_v3  ;;  %1358 = vmatpush.msrb.mxu1 %v438_v1 }
  0x99   :  { %1359 = vmatpush.msrb.mxu1 %v436_v31  ;;  %v432_v31 = vmax.f32 %v176_v27, 0.0  ;;  %v141_v27 = vld [vmem:[%s8720_s1 + $0x3f8] sm:$0xff] }
  0x9c   :  { %843 = vmatmul.f32.gmra.mxu0 %v646_v11  ;;  %1069 = vmatmul.f32.gmra.mxu2 %v648_v12  ;;  %v686_v11 = vld [vmem:[%s8721_s0 + $0x500] sm:$0xff]  ;;  %v688_v12 = vld [vmem:[%s8721_s0 + $0x510] sm:$0xff] }
  0x9e   :  { %956 = vmatmul.f32.gmra.mxu1 %v647_v14 }
  0x9f   :  { %1182 = vmatmul.f32.gmra.mxu3 %v649_v15 }
  0xa1   :  { %v799_v16 = vpop.f32.mrf.mxu0 }
  0xa3   :  { %v912_v19 = vpop.f32.mrf.mxu1 }
  0xa4   :  { %846 = vmatmul.f32.gmra.mxu0 %v654_v17  ;;  %1072 = vmatmul.f32.gmra.mxu2 %v656_v18  ;;  %v913_v24 = vadd.f32 %v912_v19, %v799_v16  ;;  %v687_v16 = vld [vmem:[%s8721_s0 + $0x508] sm:$0xff]  ;;  %v689_v17 = vld [vmem:[%s8721_s0 + $0x518] sm:$0xff]  ;;  %v212_v18 = vld [vmem:[%s8720_s1 + $0x630] sm:$0xff] }
  0xa5   :  { %v468_v19 = vmax.f32 %v212_v18, 0.0  ;;  %v208_v18 = vld [vmem:[%s8720_s1 + $0x610] sm:$0xff] }
  0xa6   :  { %959 = vmatmul.f32.gmra.mxu1 %v655_v20 }
  0xa7   :  { %1185 = vmatmul.f32.gmra.mxu3 %v657_v21  ;;  %v1025_v25 = vpop.f32.mrf.mxu2  ;;  %1472 = vmatpush.msrb.mxu2 %v468_v19  ;;  %v464_v19 = vmax.f32 %v208_v18, 0.0 }
  0xa8   :  { %v1026_v28 = vadd.f32 %v1025_v25, %v913_v24  ;;  %v404_v25 = vmax.f32 %v148_v22, 0.0  ;;  %v144_v22 = vld [vmem:[%s8720_s1 + $0x410] sm:$0xff] }
  0xa9   :  { %v802_v32 = vpop.f32.mrf.mxu0 }
  0xaa   :  { %v1138_v36 = vpop.f32.mrf.mxu3  ;;  %1246 = vmatpush.msrb.mxu0 %v404_v25  ;;  %v400_v25 = vmax.f32 %v144_v22, 0.0  ;;  %v109_v22 = vld [vmem:[%s8720_s1 + $0x2f8] sm:$0xff] }
  0xab   :  { %v5176_v37 = vadd.f32 %v1138_v36, %v1026_v28  ;;  %v915_v38 = vpop.f32.mrf.mxu1  ;;  %v697_v36 = vld [vmem:[%s8721_s0 + $0x558] sm:$0xff]  ;;  %v365_v23 = vmax.f32 %v109_v22, 0.0 }
  0xac   :  { %849 = vmatmul.f32.gmra.mxu0 %v662_v33  ;;  %1075 = vmatmul.f32.gmra.mxu2 %v664_v34  ;;  %v916_v41 = vadd.f32 %v915_v38, %v802_v32 }
  0xae   :  { %962 = vmatmul.f32.gmra.mxu1 %v663_v39 }
  0xaf   :  { %1188 = vmatmul.f32.gmra.mxu3 %v665_v40  ;;  %v1028_v42 = vpop.f32.mrf.mxu2 }
  0xb0   :  { %v1029_v43 = vadd.f32 %v1028_v42, %v916_v41  ;;  %v702_v42 = vld [vmem:[%s8721_s0 + $0x580] sm:$0xff] }
  0xb1   :  { %v805_v44 = vpop.f32.mrf.mxu0 }
  0xb2   :  { %v1141_v47 = vpop.f32.mrf.mxu3 }
  0xb3   :  { %v5190_v48 = vadd.f32 %v1141_v47, %v1029_v43  ;;  %v918_v49 = vpop.f32.mrf.mxu1  ;;  %v704_v43 = vld [vmem:[%s8721_s0 + $0x590] sm:$0xff]  ;;  %v703_v47 = vld [vmem:[%s8721_s0 + $0x588] sm:$0xff] }
  0xb4   :  { %852 = vmatmul.f32.gmra.mxu0 %v670_v45  ;;  %1078 = vmatmul.f32.gmra.mxu2 %v672_v46  ;;  %v919_v54 = vadd.f32 %v918_v49, %v805_v44  ;;  %v705_v49 = vld [vmem:[%s8721_s0 + $0x598] sm:$0xff] }
  0xb6   :  { %965 = vmatmul.f32.gmra.mxu1 %v671_v50  ;;  %v210_v50 = vld [vmem:[%s8720_s1 + $0x620] sm:$0xff] }
  0xb7   :  { %1191 = vmatmul.f32.gmra.mxu3 %v673_v51  ;;  %v1031_v55 = vpop.f32.mrf.mxu2  ;;  %v466_v51 = vmax.f32 %v210_v50, 0.0  ;;  %v735_v50 = vld [vmem:[%s8721_s0 + $0x688] sm:$0xff] }
  0xb8   :  { %v1032_v58 = vadd.f32 %v1031_v55, %v919_v54  ;;  %v146_v54 = vld [vmem:[%s8720_s1 + $0x420] sm:$0xff] }
  0xb9   :  { %v808_v62 = vpop.f32.mrf.mxu0  ;;  %1473 = vmatpush.msrb.mxu2 %v466_v51  ;;  %v242_v55 = vld [vmem:[%s8720_s1 + $0x720] sm:$0xff]  ;;  %v402_v57 = vmax.f32 %v146_v54, 0.0  ;;  %v737_v51 = vld [vmem:[%s8721_s0 + $0x698] sm:$0xff] }
  0xba   :  { %v1144_v2 = vpop.f32.mrf.mxu3 }
  0xbb   :  { %v5216_v3 = vadd.f32 %v1144_v2, %v1032_v58  ;;  %v921_v4 = vpop.f32.mrf.mxu1  ;;  %v498_v58 = vmax.f32 %v242_v55, 0.0  ;;  %1247 = vmatpush.msrb.mxu0 %v402_v57  ;;  %1474 = vmatpush.msrb.mxu2 %v464_v19  ;;  %v238_v57 = vld [vmem:[%s8720_s1 + $0x700] sm:$0xff] }
  0xbc   :  { %855 = vmatmul.f32.gmra.mxu0 %v678_v63  ;;  %1081 = vmatmul.f32.gmra.mxu2 %v680_v0  ;;  %v922_v7 = vadd.f32 %v921_v4, %v808_v62  ;;  %v712_v62 = vld [vmem:[%s8721_s0 + $0x5d0] sm:$0xff]  ;;  %v434_v63 = vmax.f32 %v178_v59, 0.0  ;;  %v711_v4 = vld [vmem:[%s8721_s0 + $0x5c8] sm:$0xff] }
  0xbd   :  { %1586 = vmatpush.msrb.mxu3 %v498_v58  ;;  %1248 = vmatpush.msrb.mxu0 %v400_v25 }
  0xbe   :  { %968 = vmatmul.f32.gmra.mxu1 %v679_v5  ;;  %v713_v5 = vld [vmem:[%s8721_s0 + $0x5d8] sm:$0xff] }
  0xbf   :  { %1194 = vmatmul.f32.gmra.mxu3 %v681_v6  ;;  %v1034_v8 = vpop.f32.mrf.mxu2  ;;  %1360 = vmatpush.msrb.mxu1 %v434_v63  ;;  %v742_v63 = vld [vmem:[%s8721_s0 + $0x6c0] sm:$0xff] }
  0xc0   :  { %v1035_v9 = vadd.f32 %v1034_v8, %v922_v7  ;;  %1587 = vmatpush.msrb.mxu3 %v496_v26  ;;  %v45_v26 = vld [vmem:[%s8720_s1 + $0xf8] sm:$0xff] }
  0xc1   :  { %v811_v10 = vpop.f32.mrf.mxu0  ;;  %1361 = vmatpush.msrb.mxu1 %v432_v31  ;;  %v77_v31 = vld [vmem:[%s8720_s1 + $0x1f8] sm:$0xff] }
  0xc2   :  { %v1147_v13 = vpop.f32.mrf.mxu3 }
  0xc3   :  { %v5230_v14 = vadd.f32 %v1147_v13, %v1035_v9  ;;  %v924_v15 = vpop.f32.mrf.mxu1 }
  0xc4   :  { %858 = vmatmul.f32.gmra.mxu0 %v686_v11  ;;  %1084 = vmatmul.f32.gmra.mxu2 %v688_v12  ;;  %v925_v20 = vadd.f32 %v924_v15, %v811_v10  ;;  %v718_v10 = vld [vmem:[%s8721_s0 + $0x600] sm:$0xff]  ;;  %v720_v11 = vld [vmem:[%s8721_s0 + $0x610] sm:$0xff] }
  0xc6   :  { %971 = vmatmul.f32.gmra.mxu1 %v687_v16  ;;  %v719_v16 = vld [vmem:[%s8721_s0 + $0x608] sm:$0xff] }
  0xc7   :  { %1197 = vmatmul.f32.gmra.mxu3 %v689_v17  ;;  %v1037_v21 = vpop.f32.mrf.mxu2  ;;  %v721_v17 = vld [vmem:[%s8721_s0 + $0x618] sm:$0xff] }
  0xc8   :  { %v1038_v24 = vadd.f32 %v1037_v21, %v925_v20 }
  0xc9   :  { %v814_v28 = vpop.f32.mrf.mxu0 }
  0xca   :  { %v1150_v32 = vpop.f32.mrf.mxu3 }
  0xcb   :  { %v5256_v33 = vadd.f32 %v1150_v32, %v1038_v24  ;;  %v927_v34 = vpop.f32.mrf.mxu1 }
  0xcc   :  { %861 = vmatmul.f32.gmra.mxu0 %v694_v29  ;;  %1087 = vmatmul.f32.gmra.mxu2 %v696_v30  ;;  %v928_v38 = vadd.f32 %v927_v34, %v814_v28  ;;  %v726_v29 = vld [vmem:[%s8721_s0 + $0x640] sm:$0xff]  ;;  %v728_v30 = vld [vmem:[%s8721_s0 + $0x650] sm:$0xff] }
  0xce   :  { %974 = vmatmul.f32.gmra.mxu1 %v695_v35 }
  0xcf   :  { %1200 = vmatmul.f32.gmra.mxu3 %v697_v36  ;;  %v1040_v39 = vpop.f32.mrf.mxu2  ;;  %v727_v36 = vld [vmem:[%s8721_s0 + $0x648] sm:$0xff] }
  0xd0   :  { %v1041_v40 = vadd.f32 %v1040_v39, %v928_v38  ;;  %v729_v38 = vld [vmem:[%s8721_s0 + $0x658] sm:$0xff] }
  0xd1   :  { %v817_v41 = vpop.f32.mrf.mxu0 }
  0xd2   :  { %v1153_v44 = vpop.f32.mrf.mxu3 }
  0xd3   :  { %v5270_v45 = vadd.f32 %v1153_v44, %v1041_v40  ;;  %v930_v46 = vpop.f32.mrf.mxu1  ;;  %v736_v44 = vld [vmem:[%s8721_s0 + $0x690] sm:$0xff] }
  0xd4   :  { %864 = vmatmul.f32.gmra.mxu0 %v702_v42  ;;  %1090 = vmatmul.f32.gmra.mxu2 %v704_v43  ;;  %v931_v52 = vadd.f32 %v930_v46, %v817_v41  ;;  %v734_v43 = vld [vmem:[%s8721_s0 + $0x680] sm:$0xff] }
  0xd6   :  { %977 = vmatmul.f32.gmra.mxu1 %v703_v47 }
  0xd7   :  { %1203 = vmatmul.f32.gmra.mxu3 %v705_v49  ;;  %v1043_v53 = vpop.f32.mrf.mxu2 }
  0xd8   :  { %v1044_v56 = vadd.f32 %v1043_v53, %v931_v52  ;;  %v206_v52 = vld [vmem:[%s8720_s1 + $0x600] sm:$0xff] }
  0xd9   :  { %v820_v60 = vpop.f32.mrf.mxu0  ;;  %v462_v53 = vmax.f32 %v206_v52, 0.0  ;;  %v768_v52 = vld [vmem:[%s8721_s0 + $0x790] sm:$0xff] }
  0xda   :  { %v1156_v0 = vpop.f32.mrf.mxu3 }
  0xdb   :  { %v5296_v1 = vadd.f32 %v1156_v0, %v1044_v56  ;;  %v933_v2 = vpop.f32.mrf.mxu1  ;;  %1475 = vmatpush.msrb.mxu2 %v462_v53  ;;  %v142_v56 = vld [vmem:[%s8720_s1 + $0x400] sm:$0xff]  ;;  %v744_v0 = vld [vmem:[%s8721_s0 + $0x6d0] sm:$0xff] }
  0xdc   :  { %867 = vmatmul.f32.gmra.mxu0 %v710_v61  ;;  %1093 = vmatmul.f32.gmra.mxu2 %v712_v62  ;;  %v934_v6 = vadd.f32 %v933_v2, %v820_v60  ;;  %v398_v59 = vmax.f32 %v142_v56, 0.0  ;;  %v494_v60 = vmax.f32 %v238_v57, 0.0  ;;  %v174_v61 = vld [vmem:[%s8720_s1 + $0x500] sm:$0xff]  ;;  %v767_v56 = vld [vmem:[%s8721_s0 + $0x788] sm:$0xff]  ;;  %v769_v57 = vld [vmem:[%s8721_s0 + $0x798] sm:$0xff] }
  0xdd   :  { %v430_v2 = vmax.f32 %v174_v61, 0.0  ;;  %1912 = vmatpush.msra.mxu2 %v365_v23  ;;  %v530_v23 = vld [vmem:[%s8721_s0 + $0x20] sm:$0xff] }
  0xde   :  { %980 = vmatmul.f32.gmra.mxu1 %v711_v4  ;;  %1249 = vmatpush.msrb.mxu0 %v398_v59 }
  0xdf   :  { %1206 = vmatmul.f32.gmra.mxu3 %v713_v5  ;;  %v1046_v7 = vpop.f32.mrf.mxu2  ;;  %1362 = vmatpush.msrb.mxu1 %v430_v2 }
  0xe0   :  { %v1047_v8 = vadd.f32 %v1046_v7, %v934_v6  ;;  %1588 = vmatpush.msrb.mxu3 %v494_v60  ;;  %v743_v7 = vld [vmem:[%s8721_s0 + $0x6c8] sm:$0xff] }
  0xe1   :  { %v823_v9 = vpop.f32.mrf.mxu0 }
  0xe2   :  { %v1159_v12 = vpop.f32.mrf.mxu3 }
  0xe3   :  { %v5310_v13 = vadd.f32 %v1159_v12, %v1047_v8  ;;  %v936_v15 = vpop.f32.mrf.mxu1  ;;  %v745_v8 = vld [vmem:[%s8721_s0 + $0x6d8] sm:$0xff] }
  0xe4   :  { %870 = vmatmul.f32.gmra.mxu0 %v718_v10  ;;  %1096 = vmatmul.f32.gmra.mxu2 %v720_v11  ;;  %v937_v20 = vadd.f32 %v936_v15, %v823_v9  ;;  %v750_v15 = vld [vmem:[%s8721_s0 + $0x700] sm:$0xff] }
  0xe6   :  { %983 = vmatmul.f32.gmra.mxu1 %v719_v16  ;;  %v752_v16 = vld [vmem:[%s8721_s0 + $0x710] sm:$0xff] }
  0xe7   :  { %1209 = vmatmul.f32.gmra.mxu3 %v721_v17  ;;  %v1049_v21 = vpop.f32.mrf.mxu2 }
  0xe8   :  { %v1050_v24 = vadd.f32 %v1049_v21, %v937_v20  ;;  %v751_v20 = vld [vmem:[%s8721_s0 + $0x708] sm:$0xff]  ;;  %v753_v21 = vld [vmem:[%s8721_s0 + $0x718] sm:$0xff] }
  0xe9   :  { %v826_v28 = vpop.f32.mrf.mxu0 }
  0xea   :  { %v1162_v32 = vpop.f32.mrf.mxu3 }
  0xeb   :  { %v5336_v34 = vadd.f32 %v1162_v32, %v1050_v24  ;;  %v939_v35 = vpop.f32.mrf.mxu1 }
  0xec   :  { %873 = vmatmul.f32.gmra.mxu0 %v726_v29  ;;  %1099 = vmatmul.f32.gmra.mxu2 %v728_v30  ;;  %v940_v39 = vadd.f32 %v939_v35, %v826_v28  ;;  %v301_v29 = vmax.f32 %v45_v26, 0.0  ;;  %v397_v30 = vmax.f32 %v141_v27, 0.0  ;;  %v758_v35 = vld [vmem:[%s8721_s0 + $0x740] sm:$0xff] }
  0xee   :  { %986 = vmatmul.f32.gmra.mxu1 %v727_v36  ;;  %v760_v36 = vld [vmem:[%s8721_s0 + $0x750] sm:$0xff]  ;;  %1686 = vmatpush.msra.mxu0 %v301_v29  ;;  %v533_v29 = vld [vmem:[%s8721_s0 + $0x38] sm:$0xff] }
  0xef   :  { %1212 = vmatmul.f32.gmra.mxu3 %v729_v38  ;;  %v1052_v40 = vpop.f32.mrf.mxu2  ;;  %v333_v38 = vmax.f32 %v77_v31, 0.0 }
  0xf0   :  { %v1053_v41 = vadd.f32 %v1052_v40, %v940_v39  ;;  %2025 = vmatpush.msra.mxu3 %v397_v30  ;;  %v105_v30 = vld [vmem:[%s8720_s1 + $0x2d8] sm:$0xff] }
  0xf1   :  { %v829_v42 = vpop.f32.mrf.mxu0  ;;  %1799 = vmatpush.msra.mxu1 %v333_v38  ;;  %v361_v31 = vmax.f32 %v105_v30, 0.0  ;;  %v137_v38 = vld [vmem:[%s8720_s1 + $0x3d8] sm:$0xff] }
  0xf2   :  { %v1165_v46 = vpop.f32.mrf.mxu3  ;;  %v557_v30 = vld [vmem:[%s8721_s0 + $0xf8] sm:$0xff] }
  0xf3   :  { %v5350_v47 = vadd.f32 %v1165_v46, %v1053_v41  ;;  %v942_v49 = vpop.f32.mrf.mxu1 }
  0xf4   :  { %876 = vmatmul.f32.gmra.mxu0 %v734_v43  ;;  %1102 = vmatmul.f32.gmra.mxu2 %v736_v44  ;;  %v943_v54 = vadd.f32 %v942_v49, %v829_v42  ;;  %v759_v42 = vld [vmem:[%s8721_s0 + $0x748] sm:$0xff]  ;;  %v761_v43 = vld [vmem:[%s8721_s0 + $0x758] sm:$0xff] }
  0xf6   :  { %989 = vmatmul.f32.gmra.mxu1 %v735_v50 }
  0xf7   :  { %1215 = vmatmul.f32.gmra.mxu3 %v737_v51  ;;  %v1055_v55 = vpop.f32.mrf.mxu2  ;;  %v766_v51 = vld [vmem:[%s8721_s0 + $0x780] sm:$0xff] }
  0xf8   :  { %v1056_v58 = vadd.f32 %v1055_v55, %v943_v54 }
  0xf9   :  { %v832_v62 = vpop.f32.mrf.mxu0 }
  0xfa   :  { %v1168_v4 = vpop.f32.mrf.mxu3 }
  0xfb   :  { %v5376_v5 = vadd.f32 %v1168_v4, %v1056_v58  ;;  %v945_v6 = vpop.f32.mrf.mxu1  ;;  %v107_v58 = vld [vmem:[%s8720_s1 + $0x2e8] sm:$0xff] }
  0xfc   :  { %879 = vmatmul.f32.gmra.mxu0 %v742_v63  ;;  %1105 = vmatmul.f32.gmra.mxu2 %v744_v0  ;;  %v946_v9 = vadd.f32 %v945_v6, %v832_v62  ;;  %v363_v59 = vmax.f32 %v107_v58, 0.0  ;;  %v43_v62 = vld [vmem:[%s8720_s1 + $0xe8] sm:$0xff] }
  0xfd   :  { %v139_v63 = vld [vmem:[%s8720_s1 + $0x3e8] sm:$0xff]  ;;  %v299_v2 = vmax.f32 %v43_v62, 0.0  ;;  %v548_v62 = vld [vmem:[%s8721_s0 + $0xb0] sm:$0xff] }
  0xfe   :  { %992 = vmatmul.f32.gmra.mxu1 %v743_v7  ;;  %1913 = vmatpush.msra.mxu2 %v363_v59  ;;  %v395_v4 = vmax.f32 %v139_v63, 0.0  ;;  %v75_v6 = vld [vmem:[%s8720_s1 + $0x1e8] sm:$0xff] }
  0xff   :  { %1218 = vmatmul.f32.gmra.mxu3 %v745_v8  ;;  %v1058_v10 = vpop.f32.mrf.mxu2  ;;  %v774_v8 = vld [vmem:[%s8721_s0 + $0x7c0] sm:$0xff]  ;;  %1687 = vmatpush.msra.mxu0 %v299_v2 }
 0x100   :  { %v1059_v11 = vadd.f32 %v1058_v10, %v946_v9  ;;  %v776_v9 = vld [vmem:[%s8721_s0 + $0x7d0] sm:$0xff]  ;;  %v331_v10 = vmax.f32 %v75_v6, 0.0  ;;  %2026 = vmatpush.msra.mxu3 %v395_v4  ;;  %1914 = vmatpush.msra.mxu2 %v361_v31  ;;  %v547_v4 = vld [vmem:[%s8721_s0 + $0xa8] sm:$0xff]  ;;  %v549_v6 = vld [vmem:[%s8721_s0 + $0xb8] sm:$0xff] }
 0x101   :  { %v835_v12 = vpop.f32.mrf.mxu0 }
 0x102   :  { %v1171_v17 = vpop.f32.mrf.mxu3  ;;  %1800 = vmatpush.msra.mxu1 %v331_v10 }
 0x103   :  { %v5390_v18 = vadd.f32 %v1171_v17, %v1059_v11  ;;  %v948_v19 = vpop.f32.mrf.mxu1  ;;  %v777_v17 = vld [vmem:[%s8721_s0 + $0x7d8] sm:$0xff] }
 0x104   :  { %882 = vmatmul.f32.gmra.mxu0 %v750_v15  ;;  %1108 = vmatmul.f32.gmra.mxu2 %v752_v16  ;;  %v949_v24 = vadd.f32 %v948_v19, %v835_v12  ;;  %v775_v16 = vld [vmem:[%s8721_s0 + $0x7c8] sm:$0xff] }
 0x106   :  { %995 = vmatmul.f32.gmra.mxu1 %v751_v20 }
 0x107   :  { %1221 = vmatmul.f32.gmra.mxu3 %v753_v21  ;;  %v1061_v25 = vpop.f32.mrf.mxu2 }
 0x108   :  { %v1062_v28 = vadd.f32 %v1061_v25, %v949_v24  ;;  %v532_v24 = vld [vmem:[%s8721_s0 + $0x30] sm:$0xff] }
 0x109   :  { %v838_v32 = vpop.f32.mrf.mxu0 }
 0x10a   :  { %v1174_v39 = vpop.f32.mrf.mxu3 }
 0x10b   :  { %v5416_v40 = vadd.f32 %v1174_v39, %v1062_v28  ;;  %v951_v41 = vpop.f32.mrf.mxu1  ;;  %v531_v28 = vld [vmem:[%s8721_s0 + $0x28] sm:$0xff] }
 0x10c   :  { %885 = vmatmul.f32.gmra.mxu0 %v758_v35  ;;  %1111 = vmatmul.f32.gmra.mxu2 %v760_v36  ;;  %v952_v44 = vadd.f32 %v951_v41, %v838_v32  ;;  %v41_v36 = vld [vmem:[%s8720_s1 + $0xd8] sm:$0xff] }
 0x10d   :  { %v297_v41 = vmax.f32 %v41_v36, 0.0 }
 0x10e   :  { %998 = vmatmul.f32.gmra.mxu1 %v759_v42  ;;  %v393_v42 = vmax.f32 %v137_v38, 0.0  ;;  %v562_v38 = vld [vmem:[%s8721_s0 + $0x120] sm:$0xff] }
 0x10f   :  { %1224 = vmatmul.f32.gmra.mxu3 %v761_v43  ;;  %v1064_v46 = vpop.f32.mrf.mxu2  ;;  %v73_v43 = vld [vmem:[%s8720_s1 + $0x1d8] sm:$0xff]  ;;  %1688 = vmatpush.msra.mxu0 %v297_v41 }
 0x110   :  { %v1065_v49 = vadd.f32 %v1064_v46, %v952_v44  ;;  %v538_v46 = vld [vmem:[%s8721_s0 + $0x60] sm:$0xff]  ;;  %2027 = vmatpush.msra.mxu3 %v393_v42 }
 0x111   :  { %v841_v50 = vpop.f32.mrf.mxu0 }
 0x112   :  { %v1177_v53 = vpop.f32.mrf.mxu3 }
 0x113   :  { %v5430_v54 = vadd.f32 %v1177_v53, %v1065_v49  ;;  %v954_v55 = vpop.f32.mrf.mxu1  ;;  %v540_v49 = vld [vmem:[%s8721_s0 + $0x70] sm:$0xff] }
 0x114   :  { %888 = vmatmul.f32.gmra.mxu0 %v766_v51  ;;  %1114 = vmatmul.f32.gmra.mxu2 %v768_v52  ;;  %v955_v60 = vadd.f32 %v954_v55, %v841_v50  ;;  %v329_v50 = vmax.f32 %v73_v43, 0.0  ;;  %v539_v55 = vld [vmem:[%s8721_s0 + $0x68] sm:$0xff] }
 0x116   :  { %1001 = vmatmul.f32.gmra.mxu1 %v767_v56  ;;  %v541_v56 = vld [vmem:[%s8721_s0 + $0x78] sm:$0xff] }
 0x117   :  { %1227 = vmatmul.f32.gmra.mxu3 %v769_v57  ;;  %v1067_v61 = vpop.f32.mrf.mxu2  ;;  %1801 = vmatpush.msra.mxu1 %v329_v50 }
 0x118   :  { %v1068_v0 = vadd.f32 %v1067_v61, %v955_v60  ;;  %v546_v61 = vld [vmem:[%s8721_s0 + $0xa0] sm:$0xff] }
 0x119   :  { %v844_v7 = vpop.f32.mrf.mxu0 }
 0x11a   :  { %v1180_v11 = vpop.f32.mrf.mxu3 }
 0x11b   :  { %v5456_v12 = vadd.f32 %v1180_v11, %v1068_v0  ;;  %v957_v15 = vpop.f32.mrf.mxu1  ;;  %v39_v11 = vld [vmem:[%s8720_s1 + $0xc8] sm:$0xff] }
 0x11c   :  { %891 = vmatmul.f32.gmra.mxu0 %v774_v8  ;;  %1117 = vmatmul.f32.gmra.mxu2 %v776_v9  ;;  %v958_v19 = vadd.f32 %v957_v15, %v844_v7  ;;  %v103_v7 = vld [vmem:[%s8720_s1 + $0x2c8] sm:$0xff] }
 0x11d   :  { %v359_v8 = vmax.f32 %v103_v7, 0.0  ;;  %v135_v15 = vld [vmem:[%s8720_s1 + $0x3c8] sm:$0xff] }
 0x11e   :  { %1004 = vmatmul.f32.gmra.mxu1 %v775_v16 }
 0x11f   :  { %1230 = vmatmul.f32.gmra.mxu3 %v777_v17  ;;  %v1070_v20 = vpop.f32.mrf.mxu2  ;;  %1915 = vmatpush.msra.mxu2 %v359_v8  ;;  %v295_v17 = vmax.f32 %v39_v11, 0.0  ;;  %v571_v8 = vld [vmem:[%s8721_s0 + $0x168] sm:$0xff] }
 0x120   :  { %v1071_v21 = vadd.f32 %v1070_v20, %v958_v19  ;;  %v391_v19 = vmax.f32 %v135_v15, 0.0  ;;  %v71_v20 = vld [vmem:[%s8720_s1 + $0x1c8] sm:$0xff] }
 0x121   :  { %v847_v22 = vpop.f32.mrf.mxu0  ;;  %1689 = vmatpush.msra.mxu0 %v295_v17  ;;  %v578_v17 = vld [vmem:[%s8721_s0 + $0x1a0] sm:$0xff] }
 0x122   :  { %v1183_v25 = vpop.f32.mrf.mxu3  ;;  %2028 = vmatpush.msra.mxu3 %v391_v19  ;;  %v580_v19 = vld [vmem:[%s8721_s0 + $0x1b0] sm:$0xff] }
 0x123   :  { %v5470_v26 = vadd.f32 %v1183_v25, %v1071_v21  ;;  %v960_v27 = vpop.f32.mrf.mxu1 }
 0x124   :  { %1250 = vmatmul.f32.vlgmr.msrb.gmra.mxu0 %v530_v23  ;;  %1476 = vmatmul.f32.vlgmr.msrb.gmra.mxu2 %v532_v24  ;;  %v961_v32 = vadd.f32 %v960_v27, %v847_v22  ;;  %v554_v22 = vld [vmem:[%s8721_s0 + $0xe0] sm:$0xff]  ;;  %v556_v23 = vld [vmem:[%s8721_s0 + $0xf0] sm:$0xff]  ;;  %v327_v24 = vmax.f32 %v71_v20, 0.0 }
 0x126   :  { %1363 = vmatmul.f32.vlgmr.msrb.gmra.mxu1 %v531_v28 }
 0x127   :  { %1589 = vmatmul.f32.vlgmr.msrb.gmra.mxu3 %v533_v29  ;;  %v1073_v35 = vpop.f32.mrf.mxu2  ;;  %v555_v29 = vld [vmem:[%s8721_s0 + $0xe8] sm:$0xff]  ;;  %1802 = vmatpush.msra.mxu1 %v327_v24  ;;  %v581_v24 = vld [vmem:[%s8721_s0 + $0x1b8] sm:$0xff] }
 0x128   :  { %v1074_v39 = vadd.f32 %v1073_v35, %v961_v32 }
 0x129   :  { %v850_v44 = vpop.f32.mrf.mxu0 }
 0x12a   :  { %v1186_v51 = vpop.f32.mrf.mxu3 }
 0x12b   :  { %v5496_v52 = vadd.f32 %v1186_v51, %v1074_v39  ;;  %v963_v53 = vpop.f32.mrf.mxu1  ;;  %v564_v39 = vld [vmem:[%s8721_s0 + $0x130] sm:$0xff] }
 0x12c   :  { %1253 = vmatmul.f32.gmra.mxu0 %v538_v46  ;;  %1479 = vmatmul.f32.gmra.mxu2 %v540_v49  ;;  %v964_v57 = vadd.f32 %v963_v53, %v850_v44  ;;  %v563_v44 = vld [vmem:[%s8721_s0 + $0x128] sm:$0xff]  ;;  %v565_v46 = vld [vmem:[%s8721_s0 + $0x138] sm:$0xff] }
 0x12d   :  { %v101_v49 = vld [vmem:[%s8720_s1 + $0x2b8] sm:$0xff] }
 0x12e   :  { %1366 = vmatmul.f32.gmra.mxu1 %v539_v55  ;;  %v357_v50 = vmax.f32 %v101_v49, 0.0  ;;  %v37_v55 = vld [vmem:[%s8720_s1 + $0xb8] sm:$0xff] }
 0x12f   :  { %1592 = vmatmul.f32.gmra.mxu3 %v541_v56  ;;  %v1076_v58 = vpop.f32.mrf.mxu2  ;;  %v133_v56 = vld [vmem:[%s8720_s1 + $0x3b8] sm:$0xff] }
 0x130   :  { %v1077_v59 = vadd.f32 %v1076_v58, %v964_v57  ;;  %1916 = vmatpush.msra.mxu2 %v357_v50  ;;  %v293_v58 = vmax.f32 %v37_v55, 0.0  ;;  %v589_v55 = vld [vmem:[%s8721_s0 + $0x1f8] sm:$0xff] }
 0x131   :  { %v853_v60 = vpop.f32.mrf.mxu0 }
 0x132   :  { %v1189_v63 = vpop.f32.mrf.mxu3  ;;  %1690 = vmatpush.msra.mxu0 %v293_v58 }
 0x133   :  { %v5510_v0 = vadd.f32 %v1189_v63, %v1077_v59  ;;  %v966_v2 = vpop.f32.mrf.mxu1  ;;  %v389_v59 = vmax.f32 %v133_v56, 0.0  ;;  %v572_v63 = vld [vmem:[%s8721_s0 + $0x170] sm:$0xff] }
 0x134   :  { %1256 = vmatmul.f32.gmra.mxu0 %v546_v61  ;;  %1482 = vmatmul.f32.gmra.mxu2 %v548_v62  ;;  %v967_v9 = vadd.f32 %v966_v2, %v853_v60  ;;  %v69_v60 = vld [vmem:[%s8720_s1 + $0x1b8] sm:$0xff]  ;;  %v570_v62 = vld [vmem:[%s8721_s0 + $0x160] sm:$0xff] }
 0x135   :  { %v325_v2 = vmax.f32 %v69_v60, 0.0  ;;  %2029 = vmatpush.msra.mxu3 %v389_v59  ;;  %v594_v60 = vld [vmem:[%s8721_s0 + $0x220] sm:$0xff] }
 0x136   :  { %1369 = vmatmul.f32.gmra.mxu1 %v547_v4 }
 0x137   :  { %1595 = vmatmul.f32.gmra.mxu3 %v549_v6  ;;  %v1079_v10 = vpop.f32.mrf.mxu2  ;;  %1803 = vmatpush.msra.mxu1 %v325_v2 }
 0x138   :  { %v1080_v16 = vadd.f32 %v1079_v10, %v967_v9  ;;  %v573_v9 = vld [vmem:[%s8721_s0 + $0x178] sm:$0xff] }
 0x139   :  { %v856_v21 = vpop.f32.mrf.mxu0 }
 0x13a   :  { %v1192_v25 = vpop.f32.mrf.mxu3 }
 0x13b   :  { %v5536_v27 = vadd.f32 %v1192_v25, %v1080_v16  ;;  %v969_v28 = vpop.f32.mrf.mxu1  ;;  %v99_v25 = vld [vmem:[%s8720_s1 + $0x2a8] sm:$0xff] }
 0x13c   :  { %1259 = vmatmul.f32.gmra.mxu0 %v554_v22  ;;  %1485 = vmatmul.f32.gmra.mxu2 %v556_v23  ;;  %v970_v31 = vadd.f32 %v969_v28, %v856_v21  ;;  %v579_v23 = vld [vmem:[%s8721_s0 + $0x1a8] sm:$0xff]  ;;  %v355_v28 = vmax.f32 %v99_v25, 0.0  ;;  %v604_v25 = vld [vmem:[%s8721_s0 + $0x270] sm:$0xff] }
 0x13e   :  { %1372 = vmatmul.f32.gmra.mxu1 %v555_v29  ;;  %1917 = vmatpush.msra.mxu2 %v355_v28 }
 0x13f   :  { %1598 = vmatmul.f32.gmra.mxu3 %v557_v30  ;;  %v1082_v32 = vpop.f32.mrf.mxu2 }
 0x140   :  { %v1083_v35 = vadd.f32 %v1082_v32, %v970_v31  ;;  %v35_v31 = vld [vmem:[%s8720_s1 + $0xa8] sm:$0xff] }
 0x141   :  { %v859_v36 = vpop.f32.mrf.mxu0  ;;  %v131_v32 = vld [vmem:[%s8720_s1 + $0x3a8] sm:$0xff] }
 0x142   :  { %v1195_v41 = vpop.f32.mrf.mxu3 }
 0x143   :  { %v5550_v42 = vadd.f32 %v1195_v41, %v1083_v35  ;;  %v972_v43 = vpop.f32.mrf.mxu1 }
 0x144   :  { %1262 = vmatmul.f32.gmra.mxu0 %v562_v38  ;;  %1488 = vmatmul.f32.gmra.mxu2 %v564_v39  ;;  %v973_v51 = vadd.f32 %v972_v43, %v859_v36  ;;  %v291_v36 = vmax.f32 %v35_v31, 0.0  ;;  %v387_v38 = vmax.f32 %v131_v32, 0.0  ;;  %v67_v39 = vld [vmem:[%s8720_s1 + $0x1a8] sm:$0xff]  ;;  %v586_v43 = vld [vmem:[%s8721_s0 + $0x1e0] sm:$0xff] }
 0x145   :  { %v603_v32 = vld [vmem:[%s8721_s0 + $0x268] sm:$0xff] }
 0x146   :  { %1375 = vmatmul.f32.gmra.mxu1 %v563_v44  ;;  %v588_v44 = vld [vmem:[%s8721_s0 + $0x1f0] sm:$0xff]  ;;  %1691 = vmatpush.msra.mxu0 %v291_v36 }
 0x147   :  { %1601 = vmatmul.f32.gmra.mxu3 %v565_v46  ;;  %v1085_v53 = vpop.f32.mrf.mxu2  ;;  %v323_v46 = vmax.f32 %v67_v39, 0.0 }
 0x148   :  { %v1086_v57 = vadd.f32 %v1085_v53, %v973_v51  ;;  %2030 = vmatpush.msra.mxu3 %v387_v38  ;;  %v587_v53 = vld [vmem:[%s8721_s0 + $0x1e8] sm:$0xff] }
 0x149   :  { %v862_v61 = vpop.f32.mrf.mxu0  ;;  %1804 = vmatpush.msra.mxu1 %v323_v46 }
 0x14a   :  { %v1198_v4 = vpop.f32.mrf.mxu3 }
 0x14b   :  { %v5576_v6 = vadd.f32 %v1198_v4, %v1086_v57  ;;  %v975_v7 = vpop.f32.mrf.mxu1  ;;  %v595_v4 = vld [vmem:[%s8721_s0 + $0x228] sm:$0xff] }
 0x14c   :  { %1265 = vmatmul.f32.gmra.mxu0 %v570_v62  ;;  %1491 = vmatmul.f32.gmra.mxu2 %v572_v63  ;;  %v976_v10 = vadd.f32 %v975_v7, %v862_v61  ;;  %v596_v61 = vld [vmem:[%s8721_s0 + $0x230] sm:$0xff]  ;;  %v597_v7 = vld [vmem:[%s8721_s0 + $0x238] sm:$0xff] }
 0x14e   :  { %1378 = vmatmul.f32.gmra.mxu1 %v571_v8  ;;  %v97_v8 = vld [vmem:[%s8720_s1 + $0x298] sm:$0xff] }
 0x14f   :  { %1604 = vmatmul.f32.gmra.mxu3 %v573_v9  ;;  %v1088_v11 = vpop.f32.mrf.mxu2  ;;  %v353_v9 = vmax.f32 %v97_v8, 0.0 }
 0x150   :  { %v1089_v15 = vadd.f32 %v1088_v11, %v976_v10 }
 0x151   :  { %v865_v16 = vpop.f32.mrf.mxu0  ;;  %1918 = vmatpush.msra.mxu2 %v353_v9  ;;  %v618_v9 = vld [vmem:[%s8721_s0 + $0x2e0] sm:$0xff] }
 0x152   :  { %v1201_v20 = vpop.f32.mrf.mxu3 }
 0x153   :  { %v5590_v21 = vadd.f32 %v1201_v20, %v1089_v15  ;;  %v978_v22 = vpop.f32.mrf.mxu1  ;;  %v33_v15 = vld [vmem:[%s8720_s1 + $0x98] sm:$0xff] }
 0x154   :  { %1268 = vmatmul.f32.gmra.mxu0 %v578_v17  ;;  %1494 = vmatmul.f32.gmra.mxu2 %v580_v19  ;;  %v979_v29 = vadd.f32 %v978_v22, %v865_v16  ;;  %v129_v16 = vld [vmem:[%s8720_s1 + $0x398] sm:$0xff]  ;;  %v289_v19 = vmax.f32 %v33_v15, 0.0 }
 0x155   :  { %v385_v20 = vmax.f32 %v129_v16, 0.0  ;;  %v65_v22 = vld [vmem:[%s8720_s1 + $0x198] sm:$0xff] }
 0x156   :  { %1381 = vmatmul.f32.gmra.mxu1 %v579_v23  ;;  %v321_v28 = vmax.f32 %v65_v22, 0.0  ;;  %1692 = vmatpush.msra.mxu0 %v289_v19  ;;  %v619_v19 = vld [vmem:[%s8721_s0 + $0x2e8] sm:$0xff] }
 0x157   :  { %1607 = vmatmul.f32.gmra.mxu3 %v581_v24  ;;  %v1091_v30 = vpop.f32.mrf.mxu2  ;;  %v602_v24 = vld [vmem:[%s8721_s0 + $0x260] sm:$0xff] }
 0x158   :  { %v1092_v35 = vadd.f32 %v1091_v30, %v979_v29  ;;  %2031 = vmatpush.msra.mxu3 %v385_v20  ;;  %1805 = vmatpush.msra.mxu1 %v321_v28  ;;  %v621_v20 = vld [vmem:[%s8721_s0 + $0x2f8] sm:$0xff]  ;;  %v626_v28 = vld [vmem:[%s8721_s0 + $0x320] sm:$0xff] }
 0x159   :  { %v868_v41 = vpop.f32.mrf.mxu0 }
 0x15a   :  { %v1204_v49 = vpop.f32.mrf.mxu3 }
 0x15b   :  { %v5616_v50 = vadd.f32 %v1204_v49, %v1092_v35  ;;  %v981_v51 = vpop.f32.mrf.mxu1  ;;  %v605_v35 = vld [vmem:[%s8721_s0 + $0x278] sm:$0xff] }
 0x15c   :  { %1271 = vmatmul.f32.gmra.mxu0 %v586_v43  ;;  %1497 = vmatmul.f32.gmra.mxu2 %v588_v44  ;;  %v982_v56 = vadd.f32 %v981_v51, %v868_v41  ;;  %v610_v43 = vld [vmem:[%s8721_s0 + $0x2a0] sm:$0xff]  ;;  %v612_v44 = vld [vmem:[%s8721_s0 + $0x2b0] sm:$0xff] }
 0x15e   :  { %1384 = vmatmul.f32.gmra.mxu1 %v587_v53  ;;  %v611_v53 = vld [vmem:[%s8721_s0 + $0x2a8] sm:$0xff] }
 0x15f   :  { %1610 = vmatmul.f32.gmra.mxu3 %v589_v55  ;;  %v1094_v57 = vpop.f32.mrf.mxu2  ;;  %v613_v55 = vld [vmem:[%s8721_s0 + $0x2b8] sm:$0xff] }
 0x160   :  { %v1095_v58 = vadd.f32 %v1094_v57, %v982_v56  ;;  %v95_v56 = vld [vmem:[%s8720_s1 + $0x288] sm:$0xff] }
 0x161   :  { %v871_v59 = vpop.f32.mrf.mxu0  ;;  %v351_v57 = vmax.f32 %v95_v56, 0.0 }
 0x162   :  { %v1207_v62 = vpop.f32.mrf.mxu3 }
 0x163   :  { %v5630_v63 = vadd.f32 %v1207_v62, %v1095_v58  ;;  %v984_v2 = vpop.f32.mrf.mxu1  ;;  %1919 = vmatpush.msra.mxu2 %v351_v57  ;;  %v61_v57 = vld [vmem:[%s8720_s1 + $0x178] sm:$0xff] }
 0x164   :  { %1274 = vmatmul.f32.gmra.mxu0 %v594_v60  ;;  %1500 = vmatmul.f32.gmra.mxu2 %v596_v61  ;;  %v985_v10 = vadd.f32 %v984_v2, %v871_v59  ;;  %v31_v60 = vld [vmem:[%s8720_s1 + $0x88] sm:$0xff] }
 0x165   :  { %v127_v61 = vld [vmem:[%s8720_s1 + $0x388] sm:$0xff]  ;;  %v287_v2 = vmax.f32 %v31_v60, 0.0  ;;  %v636_v60 = vld [vmem:[%s8721_s0 + $0x370] sm:$0xff] }
 0x166   :  { %1387 = vmatmul.f32.gmra.mxu1 %v595_v4  ;;  %v383_v4 = vmax.f32 %v127_v61, 0.0  ;;  %v317_v61 = vmax.f32 %v61_v57, 0.0 }
 0x167   :  { %1613 = vmatmul.f32.gmra.mxu3 %v597_v7  ;;  %v1097_v11 = vpop.f32.mrf.mxu2  ;;  %v63_v7 = vld [vmem:[%s8720_s1 + $0x188] sm:$0xff]  ;;  %1693 = vmatpush.msra.mxu0 %v287_v2 }
 0x168   :  { %v1098_v17 = vadd.f32 %v1097_v11, %v985_v10  ;;  %v620_v10 = vld [vmem:[%s8721_s0 + $0x2f0] sm:$0xff]  ;;  %v319_v11 = vmax.f32 %v63_v7, 0.0  ;;  %2032 = vmatpush.msra.mxu3 %v383_v4  ;;  %v635_v7 = vld [vmem:[%s8721_s0 + $0x368] sm:$0xff] }
 0x169   :  { %v874_v23 = vpop.f32.mrf.mxu0 }
 0x16a   :  { %v1210_v29 = vpop.f32.mrf.mxu3  ;;  %1806 = vmatpush.msra.mxu1 %v319_v11 }
 0x16b   :  { %v5656_v30 = vadd.f32 %v1210_v29, %v1098_v17  ;;  %v987_v31 = vpop.f32.mrf.mxu1  ;;  %v628_v29 = vld [vmem:[%s8721_s0 + $0x330] sm:$0xff] }
 0x16c   :  { %1277 = vmatmul.f32.gmra.mxu0 %v602_v24  ;;  %1503 = vmatmul.f32.gmra.mxu2 %v604_v25  ;;  %v988_v36 = vadd.f32 %v987_v31, %v874_v23 }
 0x16d   :  { %1807 = vmatpush.msra.mxu1 %v317_v61 }
 0x16e   :  { %1390 = vmatmul.f32.gmra.mxu1 %v603_v32 }
 0x16f   :  { %1616 = vmatmul.f32.gmra.mxu3 %v605_v35  ;;  %v1100_v38 = vpop.f32.mrf.mxu2 }
 0x170   :  { %v1101_v39 = vadd.f32 %v1100_v38, %v988_v36  ;;  %v627_v36 = vld [vmem:[%s8721_s0 + $0x328] sm:$0xff]  ;;  %v629_v38 = vld [vmem:[%s8721_s0 + $0x338] sm:$0xff] }
 0x171   :  { %v877_v41 = vpop.f32.mrf.mxu0 }
 0x172   :  { %v1213_v46 = vpop.f32.mrf.mxu3 }
 0x173   :  { %v5670_v49 = vadd.f32 %v1213_v46, %v1101_v39  ;;  %v990_v51 = vpop.f32.mrf.mxu1  ;;  %v93_v39 = vld [vmem:[%s8720_s1 + $0x278] sm:$0xff] }
 0x174   :  { %1280 = vmatmul.f32.gmra.mxu0 %v610_v43  ;;  %1506 = vmatmul.f32.gmra.mxu2 %v612_v44  ;;  %v991_v58 = vadd.f32 %v990_v51, %v877_v41  ;;  %v349_v41 = vmax.f32 %v93_v39, 0.0  ;;  %v29_v46 = vld [vmem:[%s8720_s1 + $0x78] sm:$0xff] }
 0x175   :  { %v125_v51 = vld [vmem:[%s8720_s1 + $0x378] sm:$0xff] }
 0x176   :  { %1393 = vmatmul.f32.gmra.mxu1 %v611_v53  ;;  %1920 = vmatpush.msra.mxu2 %v349_v41  ;;  %v381_v56 = vmax.f32 %v125_v51, 0.0  ;;  %v650_v51 = vld [vmem:[%s8721_s0 + $0x3e0] sm:$0xff] }
 0x177   :  { %1619 = vmatmul.f32.gmra.mxu3 %v613_v55  ;;  %v1103_v59 = vpop.f32.mrf.mxu2  ;;  %v285_v55 = vmax.f32 %v29_v46, 0.0 }
 0x178   :  { %v1104_v62 = vadd.f32 %v1103_v59, %v991_v58  ;;  %v634_v59 = vld [vmem:[%s8721_s0 + $0x360] sm:$0xff]  ;;  %2033 = vmatpush.msra.mxu3 %v381_v56 }
 0x179   :  { %v880_v8 = vpop.f32.mrf.mxu0  ;;  %1694 = vmatpush.msra.mxu0 %v285_v55 }
 0x17a   :  { %v1216_v15 = vpop.f32.mrf.mxu3 }
 0x17b   :  { %v5696_v16 = vadd.f32 %v1216_v15, %v1104_v62  ;;  %v993_v17 = vpop.f32.mrf.mxu1 }
 0x17c   :  { %1283 = vmatmul.f32.gmra.mxu0 %v618_v9  ;;  %1509 = vmatmul.f32.gmra.mxu2 %v620_v10  ;;  %v994_v22 = vadd.f32 %v993_v17, %v880_v8  ;;  %v637_v8 = vld [vmem:[%s8721_s0 + $0x378] sm:$0xff]  ;;  %v642_v17 = vld [vmem:[%s8721_s0 + $0x3a0] sm:$0xff] }
 0x17e   :  { %1396 = vmatmul.f32.gmra.mxu1 %v619_v19  ;;  %v644_v19 = vld [vmem:[%s8721_s0 + $0x3b0] sm:$0xff] }
 0x17f   :  { %1622 = vmatmul.f32.gmra.mxu3 %v621_v20  ;;  %v1106_v23 = vpop.f32.mrf.mxu2 }
 0x180   :  { %v1107_v24 = vadd.f32 %v1106_v23, %v994_v22 }
 0x181   :  { %v883_v25 = vpop.f32.mrf.mxu0 }
 0x182   :  { %v1219_v31 = vpop.f32.mrf.mxu3 }
 0x183   :  { %v5710_v32 = vadd.f32 %v1219_v31, %v1107_v24  ;;  %v996_v35 = vpop.f32.mrf.mxu1  ;;  %v643_v24 = vld [vmem:[%s8721_s0 + $0x3a8] sm:$0xff] }
 0x184   :  { %1286 = vmatmul.f32.gmra.mxu0 %v626_v28  ;;  %1512 = vmatmul.f32.gmra.mxu2 %v628_v29  ;;  %v997_v43 = vadd.f32 %v996_v35, %v883_v25  ;;  %v645_v25 = vld [vmem:[%s8721_s0 + $0x3b8] sm:$0xff]  ;;  %v91_v28 = vld [vmem:[%s8720_s1 + $0x268] sm:$0xff] }
 0x185   :  { %v347_v29 = vmax.f32 %v91_v28, 0.0  ;;  %v25_v28 = vld [vmem:[%s8720_s1 + $0x58] sm:$0xff] }
 0x186   :  { %1399 = vmatmul.f32.gmra.mxu1 %v627_v36  ;;  %v27_v36 = vld [vmem:[%s8720_s1 + $0x68] sm:$0xff] }
 0x187   :  { %1625 = vmatmul.f32.gmra.mxu3 %v629_v38  ;;  %v1109_v44 = vpop.f32.mrf.mxu2  ;;  %1921 = vmatpush.msra.mxu2 %v347_v29  ;;  %v123_v38 = vld [vmem:[%s8720_s1 + $0x368] sm:$0xff]  ;;  %v283_v41 = vmax.f32 %v27_v36, 0.0  ;;  %v121_v29 = vld [vmem:[%s8720_s1 + $0x358] sm:$0xff] }
 0x188   :  { %v1110_v53 = vadd.f32 %v1109_v44, %v997_v43  ;;  %v379_v43 = vmax.f32 %v123_v38, 0.0  ;;  %v59_v44 = vld [vmem:[%s8720_s1 + $0x168] sm:$0xff]  ;;  %v377_v36 = vmax.f32 %v121_v29, 0.0  ;;  %v57_v38 = vld [vmem:[%s8720_s1 + $0x158] sm:$0xff] }
 0x189   :  { %v886_v58 = vpop.f32.mrf.mxu0  ;;  %v315_v55 = vmax.f32 %v59_v44, 0.0  ;;  %1695 = vmatpush.msra.mxu0 %v283_v41  ;;  %v666_v41 = vld [vmem:[%s8721_s0 + $0x460] sm:$0xff]  ;;  %v313_v44 = vmax.f32 %v57_v38, 0.0  ;;  %v684_v38 = vld [vmem:[%s8721_s0 + $0x4f0] sm:$0xff] }
 0x18a   :  { %v1222_v62 = vpop.f32.mrf.mxu3  ;;  %2034 = vmatpush.msra.mxu3 %v379_v43  ;;  %v668_v43 = vld [vmem:[%s8721_s0 + $0x470] sm:$0xff] }
 0x18b   :  { %v5736_v2 = vadd.f32 %v1222_v62, %v1110_v53  ;;  %v999_v4 = vpop.f32.mrf.mxu1  ;;  %v652_v53 = vld [vmem:[%s8721_s0 + $0x3f0] sm:$0xff]  ;;  %1808 = vmatpush.msra.mxu1 %v315_v55 }
 0x18c   :  { %1289 = vmatmul.f32.gmra.mxu0 %v634_v59  ;;  %1515 = vmatmul.f32.gmra.mxu2 %v636_v60  ;;  %v1000_v9 = vadd.f32 %v999_v4, %v886_v58  ;;  %v651_v59 = vld [vmem:[%s8721_s0 + $0x3e8] sm:$0xff]  ;;  %v653_v60 = vld [vmem:[%s8721_s0 + $0x3f8] sm:$0xff] }
 0x18d   :  { %2035 = vmatpush.msra.mxu3 %v377_v36  ;;  %1809 = vmatpush.msra.mxu1 %v313_v44  ;;  %v682_v36 = vld [vmem:[%s8721_s0 + $0x4e0] sm:$0xff] }
 0x18e   :  { %1402 = vmatmul.f32.gmra.mxu1 %v635_v7 }
 0x18f   :  { %1628 = vmatmul.f32.gmra.mxu3 %v637_v8  ;;  %v1112_v10 = vpop.f32.mrf.mxu2  ;;  %v658_v8 = vld [vmem:[%s8721_s0 + $0x420] sm:$0xff] }
 0x190   :  { %v1113_v11 = vadd.f32 %v1112_v10, %v1000_v9  ;;  %v660_v9 = vld [vmem:[%s8721_s0 + $0x430] sm:$0xff] }
 0x191   :  { %v889_v15 = vpop.f32.mrf.mxu0 }
 0x192   :  { %v1225_v20 = vpop.f32.mrf.mxu3 }
 0x193   :  { %v5750_v22 = vadd.f32 %v1225_v20, %v1113_v11  ;;  %v1002_v23 = vpop.f32.mrf.mxu1  ;;  %v661_v20 = vld [vmem:[%s8721_s0 + $0x438] sm:$0xff] }
 0x194   :  { %1292 = vmatmul.f32.gmra.mxu0 %v642_v17  ;;  %1518 = vmatmul.f32.gmra.mxu2 %v644_v19  ;;  %v1003_v31 = vadd.f32 %v1002_v23, %v889_v15  ;;  %v659_v19 = vld [vmem:[%s8721_s0 + $0x428] sm:$0xff]  ;;  %v89_v23 = vld [vmem:[%s8720_s1 + $0x258] sm:$0xff] }
 0x196   :  { %1405 = vmatmul.f32.gmra.mxu1 %v643_v24  ;;  %v345_v24 = vmax.f32 %v89_v23, 0.0 }
 0x197   :  { %1631 = vmatmul.f32.gmra.mxu3 %v645_v25  ;;  %v1115_v35 = vpop.f32.mrf.mxu2 }
 0x198   :  { %v1116_v39 = vadd.f32 %v1115_v35, %v1003_v31  ;;  %1922 = vmatpush.msra.mxu2 %v345_v24  ;;  %v281_v35 = vmax.f32 %v25_v28, 0.0  ;;  %v23_v24 = vld [vmem:[%s8720_s1 + $0x48] sm:$0xff] }
 0x199   :  { %v892_v46 = vpop.f32.mrf.mxu0  ;;  %v279_v28 = vmax.f32 %v23_v24, 0.0 }
 0x19a   :  { %v1228_v56 = vpop.f32.mrf.mxu3  ;;  %1696 = vmatpush.msra.mxu0 %v281_v35 }
 0x19b   :  { %v5776_v57 = vadd.f32 %v1228_v56, %v1116_v39  ;;  %v1005_v58 = vpop.f32.mrf.mxu1  ;;  %v667_v56 = vld [vmem:[%s8721_s0 + $0x468] sm:$0xff] }
 0x19c   :  { %1295 = vmatmul.f32.gmra.mxu0 %v650_v51  ;;  %1521 = vmatmul.f32.gmra.mxu2 %v652_v53  ;;  %v1006_v61 = vadd.f32 %v1005_v58, %v892_v46  ;;  %v669_v58 = vld [vmem:[%s8721_s0 + $0x478] sm:$0xff] }
 0x19d   :  { %1697 = vmatpush.msra.mxu0 %v279_v28 }
 0x19e   :  { %1408 = vmatmul.f32.gmra.mxu1 %v651_v59 }
 0x19f   :  { %1634 = vmatmul.f32.gmra.mxu3 %v653_v60  ;;  %v1118_v62 = vpop.f32.mrf.mxu2 }
 0x1a0   :  { %v1119_v4 = vadd.f32 %v1118_v62, %v1006_v61  ;;  %v674_v62 = vld [vmem:[%s8721_s0 + $0x4a0] sm:$0xff] }
 0x1a1   :  { %v1251_v7 = vpop.f32.mrf.mxu0 }
 0x1a2   :  { %v1231_v10 = vpop.f32.mrf.mxu3  ;;  %v1252_v11 = vadd.f32 %v1251_v7, %v5176_v37 }
 0x1a3   :  { %v5791_v15 = vadd.f32 %v1231_v10, %v1119_v4  ;;  %v1364_v17 = vpop.f32.mrf.mxu1  ;;  %v676_v4 = vld [vmem:[%s8721_s0 + $0x4b0] sm:$0xff] }
 0x1a4   :  { %1298 = vmatmul.f32.gmra.mxu0 %v658_v8  ;;  %1524 = vmatmul.f32.gmra.mxu2 %v660_v9  ;;  %v1365_v25 = vadd.f32 %v1364_v17, %v1252_v11  ;;  %v675_v11 = vld [vmem:[%s8721_s0 + $0x4a8] sm:$0xff]  ;;  %v677_v17 = vld [vmem:[%s8721_s0 + $0x4b8] sm:$0xff] }
 0x1a6   :  { %1411 = vmatmul.f32.gmra.mxu1 %v659_v19  ;;  %v87_v19 = vld [vmem:[%s8720_s1 + $0x248] sm:$0xff] }
 0x1a7   :  { %1637 = vmatmul.f32.gmra.mxu3 %v661_v20  ;;  %v1477_v37 = vpop.f32.mrf.mxu2  ;;  %v343_v20 = vmax.f32 %v87_v19, 0.0 }
 0x1a8   :  { %v1478_v31 = vadd.f32 %v1477_v37, %v1365_v25  ;;  %v119_v25 = vld [vmem:[%s8720_s1 + $0x348] sm:$0xff] }
 0x1a9   :  { %v1254_v39 = vpop.f32.mrf.mxu0  ;;  %1923 = vmatpush.msra.mxu2 %v343_v20  ;;  %v375_v29 = vmax.f32 %v119_v25, 0.0  ;;  %v21_v20 = vld [vmem:[%s8720_s1 + $0x38] sm:$0xff] }
 0x1aa   :  { %v1255_v46 = vadd.f32 %v1254_v39, %v5190_v48  ;;  %v1590_v51 = vpop.f32.mrf.mxu3  ;;  %v277_v24 = vmax.f32 %v21_v20, 0.0 }
 0x1ab   :  { %v5818_v53 = vadd.f32 %v1590_v51, %v1478_v31  ;;  %v1367_v55 = vpop.f32.mrf.mxu1  ;;  %v55_v31 = vld [vmem:[%s8720_s1 + $0x148] sm:$0xff]  ;;  %2036 = vmatpush.msra.mxu3 %v375_v29  ;;  %v698_v29 = vld [vmem:[%s8721_s0 + $0x560] sm:$0xff] }
 0x1ac   :  { %1301 = vmatmul.f32.gmra.mxu0 %v666_v41  ;;  %1527 = vmatmul.f32.gmra.mxu2 %v668_v43  ;;  %v1368_v59 = vadd.f32 %v1367_v55, %v1255_v46  ;;  %v311_v39 = vmax.f32 %v55_v31, 0.0  ;;  %v683_v51 = vld [vmem:[%s8721_s0 + $0x4e8] sm:$0xff]  ;;  %v685_v55 = vld [vmem:[%s8721_s0 + $0x4f8] sm:$0xff]  ;;  %v700_v31 = vld [vmem:[%s8721_s0 + $0x570] sm:$0xff] }
 0x1ad   :  { %8797 = vst [vmem:[#allocation2_spill] sm:$0xff] %v5818_v53  ;;  %1698 = vmatpush.msra.mxu0 %v277_v24 }
 0x1ae   :  { %1414 = vmatmul.f32.gmra.mxu1 %v667_v56 }
 0x1af   :  { %1640 = vmatmul.f32.gmra.mxu3 %v669_v58  ;;  %v1480_v48 = vpop.f32.mrf.mxu2  ;;  %1810 = vmatpush.msra.mxu1 %v311_v39 }
 0x1b0   :  { %v1481_v60 = vadd.f32 %v1480_v48, %v1368_v59  ;;  %v690_v48 = vld [vmem:[%s8721_s0 + $0x520] sm:$0xff] }
 0x1b1   :  { %v1257_v61 = vpop.f32.mrf.mxu0 }
 0x1b2   :  { %v1258_v7 = vadd.f32 %v1257_v61, %v5216_v3  ;;  %v1593_v8 = vpop.f32.mrf.mxu3 }
 0x1b3   :  { %v5833_v9 = vadd.f32 %v1593_v8, %v1481_v60  ;;  %v1370_v10 = vpop.f32.mrf.mxu1  ;;  %v692_v60 = vld [vmem:[%s8721_s0 + $0x530] sm:$0xff]  ;;  %v691_v8 = vld [vmem:[%s8721_s0 + $0x528] sm:$0xff] }
 0x1b4   :  { %1304 = vmatmul.f32.gmra.mxu0 %v674_v62  ;;  %1530 = vmatmul.f32.gmra.mxu2 %v676_v4  ;;  %v1371_v3 = vadd.f32 %v1370_v10, %v1258_v7  ;;  %v693_v10 = vld [vmem:[%s8721_s0 + $0x538] sm:$0xff] }
 0x1b6   :  { %1417 = vmatmul.f32.gmra.mxu1 %v675_v11  ;;  %v85_v11 = vld [vmem:[%s8720_s1 + $0x238] sm:$0xff] }
 0x1b7   :  { %1643 = vmatmul.f32.gmra.mxu3 %v677_v17  ;;  %v1483_v23 = vpop.f32.mrf.mxu2  ;;  %v341_v17 = vmax.f32 %v85_v11, 0.0 }
 0x1b8   :  { %v1484_v37 = vadd.f32 %v1483_v23, %v1371_v3  ;;  %v117_v3 = vld [vmem:[%s8720_s1 + $0x338] sm:$0xff] }
 0x1b9   :  { %v1260_v35 = vpop.f32.mrf.mxu0  ;;  %1924 = vmatpush.msra.mxu2 %v341_v17  ;;  %v373_v25 = vmax.f32 %v117_v3, 0.0  ;;  %v19_v17 = vld [vmem:[%s8720_s1 + $0x28] sm:$0xff] }
 0x1ba   :  { %v1261_v41 = vadd.f32 %v1260_v35, %v5230_v14  ;;  %v1596_v43 = vpop.f32.mrf.mxu3  ;;  %v275_v20 = vmax.f32 %v19_v17, 0.0 }
 0x1bb   :  { %v5860_v44 = vadd.f32 %v1596_v43, %v1484_v37  ;;  %v1373_v46 = vpop.f32.mrf.mxu1  ;;  %v53_v37 = vld [vmem:[%s8720_s1 + $0x138] sm:$0xff]  ;;  %2037 = vmatpush.msra.mxu3 %v373_v25  ;;  %v699_v43 = vld [vmem:[%s8721_s0 + $0x568] sm:$0xff]  ;;  %v714_v25 = vld [vmem:[%s8721_s0 + $0x5e0] sm:$0xff] }
 0x1bc   :  { %1307 = vmatmul.f32.gmra.mxu0 %v682_v36  ;;  %1533 = vmatmul.f32.gmra.mxu2 %v684_v38  ;;  %v1374_v56 = vadd.f32 %v1373_v46, %v1261_v41  ;;  %v309_v35 = vmax.f32 %v53_v37, 0.0  ;;  %v701_v46 = vld [vmem:[%s8721_s0 + $0x578] sm:$0xff]  ;;  %v716_v37 = vld [vmem:[%s8721_s0 + $0x5f0] sm:$0xff] }
 0x1bd   :  { %8798 = vst [vmem:[#allocation3_spill] sm:$0xff] %v5860_v44  ;;  %1699 = vmatpush.msra.mxu0 %v275_v20 }
 0x1be   :  { %1420 = vmatmul.f32.gmra.mxu1 %v683_v51 }
 0x1bf   :  { %1646 = vmatmul.f32.gmra.mxu3 %v685_v55  ;;  %v1486_v14 = vpop.f32.mrf.mxu2  ;;  %1811 = vmatpush.msra.mxu1 %v309_v35 }
 0x1c0   :  { %v1487_v58 = vadd.f32 %v1486_v14, %v1374_v56  ;;  %v706_v14 = vld [vmem:[%s8721_s0 + $0x5a0] sm:$0xff] }
 0x1c1   :  { %v1263_v59 = vpop.f32.mrf.mxu0 }
 0x1c2   :  { %v1264_v61 = vadd.f32 %v1263_v59, %v5256_v33  ;;  %v1599_v62 = vpop.f32.mrf.mxu3 }
 0x1c3   :  { %v5875_v4 = vadd.f32 %v1599_v62, %v1487_v58  ;;  %v1376_v7 = vpop.f32.mrf.mxu1  ;;  %v708_v58 = vld [vmem:[%s8721_s0 + $0x5b0] sm:$0xff]  ;;  %v707_v62 = vld [vmem:[%s8721_s0 + $0x5a8] sm:$0xff] }
 0x1c4   :  { %1310 = vmatmul.f32.gmra.mxu0 %v690_v48  ;;  %1536 = vmatmul.f32.gmra.mxu2 %v692_v60  ;;  %v1377_v33 = vadd.f32 %v1376_v7, %v1264_v61  ;;  %v709_v7 = vld [vmem:[%s8721_s0 + $0x5b8] sm:$0xff] }
 0x1c6   :  { %1423 = vmatmul.f32.gmra.mxu1 %v691_v8  ;;  %v83_v8 = vld [vmem:[%s8720_s1 + $0x228] sm:$0xff] }
 0x1c7   :  { %1649 = vmatmul.f32.gmra.mxu3 %v693_v10  ;;  %v1489_v19 = vpop.f32.mrf.mxu2  ;;  %v339_v10 = vmax.f32 %v83_v8, 0.0 }
 0x1c8   :  { %v1490_v23 = vadd.f32 %v1489_v19, %v1377_v33  ;;  %v115_v33 = vld [vmem:[%s8720_s1 + $0x328] sm:$0xff] }
 0x1c9   :  { %v1266_v28 = vpop.f32.mrf.mxu0  ;;  %1925 = vmatpush.msra.mxu2 %v339_v10  ;;  %v371_v3 = vmax.f32 %v115_v33, 0.0  ;;  %v17_v10 = vld [vmem:[%s8720_s1 + $0x18] sm:$0xff] }
 0x1ca   :  { %v1267_v36 = vadd.f32 %v1266_v28, %v5270_v45  ;;  %v1602_v38 = vpop.f32.mrf.mxu3  ;;  %v273_v17 = vmax.f32 %v17_v10, 0.0 }
 0x1cb   :  { %v5902_v39 = vadd.f32 %v1602_v38, %v1490_v23  ;;  %v1379_v41 = vpop.f32.mrf.mxu1  ;;  %v51_v23 = vld [vmem:[%s8720_s1 + $0x128] sm:$0xff]  ;;  %2038 = vmatpush.msra.mxu3 %v371_v3  ;;  %v730_v3 = vld [vmem:[%s8721_s0 + $0x660] sm:$0xff] }
 0x1cc   :  { %1313 = vmatmul.f32.gmra.mxu0 %v698_v29  ;;  %1539 = vmatmul.f32.gmra.mxu2 %v700_v31  ;;  %v1380_v51 = vadd.f32 %v1379_v41, %v1267_v36  ;;  %v307_v28 = vmax.f32 %v51_v23, 0.0  ;;  %v715_v38 = vld [vmem:[%s8721_s0 + $0x5e8] sm:$0xff]  ;;  %v717_v41 = vld [vmem:[%s8721_s0 + $0x5f8] sm:$0xff]  ;;  %v732_v23 = vld [vmem:[%s8721_s0 + $0x670] sm:$0xff] }
 0x1cd   :  { %8799 = vst [vmem:[#allocation4_spill] sm:$0xff] %v5902_v39  ;;  %1700 = vmatpush.msra.mxu0 %v273_v17 }
 0x1ce   :  { %1426 = vmatmul.f32.gmra.mxu1 %v699_v43 }
 0x1cf   :  { %1652 = vmatmul.f32.gmra.mxu3 %v701_v46  ;;  %v1492_v45 = vpop.f32.mrf.mxu2  ;;  %1812 = vmatpush.msra.mxu1 %v307_v28 }
 0x1d0   :  { %v1493_v55 = vadd.f32 %v1492_v45, %v1380_v51  ;;  %v722_v45 = vld [vmem:[%s8721_s0 + $0x620] sm:$0xff] }
 0x1d1   :  { %v1269_v56 = vpop.f32.mrf.mxu0 }
 0x1d2   :  { %v1270_v59 = vadd.f32 %v1269_v56, %v5296_v1  ;;  %v1605_v48 = vpop.f32.mrf.mxu3 }
 0x1d3   :  { %v5917_v60 = vadd.f32 %v1605_v48, %v1493_v55  ;;  %v1382_v61 = vpop.f32.mrf.mxu1  ;;  %v724_v55 = vld [vmem:[%s8721_s0 + $0x630] sm:$0xff]  ;;  %v723_v48 = vld [vmem:[%s8721_s0 + $0x628] sm:$0xff] }
 0x1d4   :  { %1316 = vmatmul.f32.gmra.mxu0 %v706_v14  ;;  %1542 = vmatmul.f32.gmra.mxu2 %v708_v58  ;;  %v1383_v1 = vadd.f32 %v1382_v61, %v1270_v59  ;;  %v725_v61 = vld [vmem:[%s8721_s0 + $0x638] sm:$0xff] }
 0x1d5   :  { %8800 = vst [vmem:[#allocation5_spill] sm:$0xff] %v5917_v60 }
 0x1d6   :  { %1429 = vmatmul.f32.gmra.mxu1 %v707_v62  ;;  %v81_v62 = vld [vmem:[%s8720_s1 + $0x218] sm:$0xff] }
 0x1d7   :  { %1655 = vmatmul.f32.gmra.mxu3 %v709_v7  ;;  %v1495_v11 = vpop.f32.mrf.mxu2  ;;  %v337_v7 = vmax.f32 %v81_v62, 0.0 }
 0x1d8   :  { %v1496_v19 = vadd.f32 %v1495_v11, %v1383_v1  ;;  %v113_v1 = vld [vmem:[%s8720_s1 + $0x318] sm:$0xff] }
 0x1d9   :  { %v1272_v24 = vpop.f32.mrf.mxu0  ;;  %1926 = vmatpush.msra.mxu2 %v337_v7  ;;  %v369_v33 = vmax.f32 %v113_v1, 0.0  ;;  %v15_v7 = vld [vmem:[%s8720_s1 + $0x8] sm:$0xff] }
 0x1da   :  { %v1273_v29 = vadd.f32 %v1272_v24, %v5310_v13  ;;  %v1608_v31 = vpop.f32.mrf.mxu3  ;;  %v271_v10 = vmax.f32 %v15_v7, 0.0 }
 0x1db   :  { %v5944_v35 = vadd.f32 %v1608_v31, %v1496_v19  ;;  %v1385_v36 = vpop.f32.mrf.mxu1  ;;  %v49_v19 = vld [vmem:[%s8720_s1 + $0x118] sm:$0xff]  ;;  %2039 = vmatpush.msra.mxu3 %v369_v33  ;;  %v731_v31 = vld [vmem:[%s8721_s0 + $0x668] sm:$0xff]  ;;  %v746_v33 = vld [vmem:[%s8721_s0 + $0x6e0] sm:$0xff] }
 0x1dc   :  { %1319 = vmatmul.f32.gmra.mxu0 %v714_v25  ;;  %1545 = vmatmul.f32.gmra.mxu2 %v716_v37  ;;  %v1386_v43 = vadd.f32 %v1385_v36, %v1273_v29  ;;  %v305_v24 = vmax.f32 %v49_v19, 0.0  ;;  %v733_v36 = vld [vmem:[%s8721_s0 + $0x678] sm:$0xff]  ;;  %v748_v19 = vld [vmem:[%s8721_s0 + $0x6f0] sm:$0xff] }
 0x1dd   :  { %1701 = vmatpush.msra.mxu0 %v271_v10 }
 0x1de   :  { %1432 = vmatmul.f32.gmra.mxu1 %v715_v38 }
 0x1df   :  { %1658 = vmatmul.f32.gmra.mxu3 %v717_v41  ;;  %v1498_v13 = vpop.f32.mrf.mxu2  ;;  %1813 = vmatpush.msra.mxu1 %v305_v24 }
 0x1e0   :  { %v1499_v46 = vadd.f32 %v1498_v13, %v1386_v43  ;;  %v738_v13 = vld [vmem:[%s8721_s0 + $0x6a0] sm:$0xff] }
 0x1e1   :  { %v1275_v51 = vpop.f32.mrf.mxu0 }
 0x1e2   :  { %v1276_v56 = vadd.f32 %v1275_v51, %v5336_v34  ;;  %v1611_v14 = vpop.f32.mrf.mxu3 }
 0x1e3   :  { %v5959_v58 = vadd.f32 %v1611_v14, %v1499_v46  ;;  %v1388_v59 = vpop.f32.mrf.mxu1  ;;  %v740_v46 = vld [vmem:[%s8721_s0 + $0x6b0] sm:$0xff]  ;;  %v739_v14 = vld [vmem:[%s8721_s0 + $0x6a8] sm:$0xff] }
 0x1e4   :  { %1322 = vmatmul.f32.gmra.mxu0 %v722_v45  ;;  %1548 = vmatmul.f32.gmra.mxu2 %v724_v55  ;;  %v1389_v34 = vadd.f32 %v1388_v59, %v1276_v56  ;;  %v741_v59 = vld [vmem:[%s8721_s0 + $0x6b8] sm:$0xff] }
 0x1e5   :  { %8801 = vst [vmem:[#allocation6_spill] sm:$0xff] %v5959_v58 }
 0x1e6   :  { %1435 = vmatmul.f32.gmra.mxu1 %v723_v48  ;;  %v79_v48 = vld [vmem:[%s8720_s1 + $0x208] sm:$0xff] }
 0x1e7   :  { %1661 = vmatmul.f32.gmra.mxu3 %v725_v61  ;;  %v1501_v8 = vpop.f32.mrf.mxu2  ;;  %v335_v61 = vmax.f32 %v79_v48, 0.0 }
 0x1e8   :  { %v1502_v11 = vadd.f32 %v1501_v8, %v1389_v34  ;;  %v111_v34 = vld [vmem:[%s8720_s1 + $0x308] sm:$0xff] }
 0x1e9   :  { %v1278_v20 = vpop.f32.mrf.mxu0  ;;  %1927 = vmatpush.msra.mxu2 %v335_v61  ;;  %v367_v1 = vmax.f32 %v111_v34, 0.0  ;;  %v173_v61 = vld [vmem:[%s8720_s1 + $0x4f8] sm:$0xff] }
 0x1ea   :  { %v1279_v25 = vadd.f32 %v1278_v20, %v5350_v47  ;;  %v1614_v37 = vpop.f32.mrf.mxu3  ;;  %v429_v7 = vmax.f32 %v173_v61, 0.0 }
 0x1eb   :  { %v5986_v28 = vadd.f32 %v1614_v37, %v1502_v11  ;;  %v1391_v29 = vpop.f32.mrf.mxu1  ;;  %v47_v11 = vld [vmem:[%s8720_s1 + $0x108] sm:$0xff]  ;;  %2040 = vmatpush.msra.mxu3 %v367_v1  ;;  %v762_v1 = vld [vmem:[%s8721_s0 + $0x760] sm:$0xff] }
 0x1ec   :  { %1325 = vmatmul.f32.gmra.mxu0 %v730_v3  ;;  %1551 = vmatmul.f32.gmra.mxu2 %v732_v23  ;;  %v1392_v38 = vadd.f32 %v1391_v29, %v1279_v25  ;;  %v303_v20 = vmax.f32 %v47_v11, 0.0  ;;  %v747_v37 = vld [vmem:[%s8721_s0 + $0x6e8] sm:$0xff]  ;;  %v749_v29 = vld [vmem:[%s8721_s0 + $0x6f8] sm:$0xff]  ;;  %v764_v11 = vld [vmem:[%s8721_s0 + $0x770] sm:$0xff] }
 0x1ed   :  { %8802 = vst [vmem:[#allocation7_spill] sm:$0xff] %v5986_v28  ;;  %2138 = vmatpush.msrb.mxu0 %v429_v7 }
 0x1ee   :  { %1438 = vmatmul.f32.gmra.mxu1 %v731_v31 }
 0x1ef   :  { %1664 = vmatmul.f32.gmra.mxu3 %v733_v36  ;;  %v1504_v47 = vpop.f32.mrf.mxu2  ;;  %1814 = vmatpush.msra.mxu1 %v303_v20 }
 0x1f0   :  { %v1505_v41 = vadd.f32 %v1504_v47, %v1392_v38  ;;  %v754_v47 = vld [vmem:[%s8721_s0 + $0x720] sm:$0xff] }
 0x1f1   :  { %v1281_v43 = vpop.f32.mrf.mxu0 }
 0x1f2   :  { %v1282_v51 = vadd.f32 %v1281_v43, %v5376_v5  ;;  %v1617_v45 = vpop.f32.mrf.mxu3 }
 0x1f3   :  { %v6001_v55 = vadd.f32 %v1617_v45, %v1505_v41  ;;  %v1394_v56 = vpop.f32.mrf.mxu1  ;;  %v756_v41 = vld [vmem:[%s8721_s0 + $0x730] sm:$0xff]  ;;  %v755_v45 = vld [vmem:[%s8721_s0 + $0x728] sm:$0xff] }
 0x1f4   :  { %1328 = vmatmul.f32.gmra.mxu0 %v738_v13  ;;  %1554 = vmatmul.f32.gmra.mxu2 %v740_v46  ;;  %v1395_v5 = vadd.f32 %v1394_v56, %v1282_v51  ;;  %v757_v56 = vld [vmem:[%s8721_s0 + $0x738] sm:$0xff] }
 0x1f6   :  { %1441 = vmatmul.f32.gmra.mxu1 %v739_v14  ;;  %v237_v14 = vld [vmem:[%s8720_s1 + $0x6f8] sm:$0xff] }
 0x1f7   :  { %1667 = vmatmul.f32.gmra.mxu3 %v741_v59  ;;  %v1507_v62 = vpop.f32.mrf.mxu2  ;;  %v493_v59 = vmax.f32 %v237_v14, 0.0 }
 0x1f8   :  { %v1508_v8 = vadd.f32 %v1507_v62, %v1395_v5  ;;  %v269_v5 = vld [vmem:[%s8720_s1 + $0x7f8] sm:$0xff] }
 0x1f9   :  { %v1284_v17 = vpop.f32.mrf.mxu0  ;;  %2364 = vmatpush.msrb.mxu2 %v493_v59  ;;  %v525_v34 = vmax.f32 %v269_v5, 0.0  ;;  %v171_v59 = vld [vmem:[%s8720_s1 + $0x4e8] sm:$0xff] }
 0x1fa   :  { %v1285_v3 = vadd.f32 %v1284_v17, %v5390_v18  ;;  %v1620_v23 = vpop.f32.mrf.mxu3  ;;  %v427_v61 = vmax.f32 %v171_v59, 0.0 }
 0x1fb   :  { %v6028_v24 = vadd.f32 %v1620_v23, %v1508_v8  ;;  %v1397_v25 = vpop.f32.mrf.mxu1  ;;  %v205_v8 = vld [vmem:[%s8720_s1 + $0x5f8] sm:$0xff]  ;;  %2477 = vmatpush.msrb.mxu3 %v525_v34  ;;  %v763_v23 = vld [vmem:[%s8721_s0 + $0x768] sm:$0xff]  ;;  %v778_v34 = vld [vmem:[%s8721_s0 + $0x7e0] sm:$0xff] }
 0x1fc   :  { %1331 = vmatmul.f32.gmra.mxu0 %v746_v33  ;;  %1557 = vmatmul.f32.gmra.mxu2 %v748_v19  ;;  %v1398_v31 = vadd.f32 %v1397_v25, %v1285_v3  ;;  %v461_v17 = vmax.f32 %v205_v8, 0.0  ;;  %v765_v25 = vld [vmem:[%s8721_s0 + $0x778] sm:$0xff]  ;;  %v780_v8 = vld [vmem:[%s8721_s0 + $0x7f0] sm:$0xff] }
 0x1fd   :  { %8803 = vst [vmem:[#allocation8_spill] sm:$0xff] %v6028_v24  ;;  %2139 = vmatpush.msrb.mxu0 %v427_v61 }
 0x1fe   :  { %1444 = vmatmul.f32.gmra.mxu1 %v747_v37 }
 0x1ff   :  { %1670 = vmatmul.f32.gmra.mxu3 %v749_v29  ;;  %v1510_v18 = vpop.f32.mrf.mxu2  ;;  %2251 = vmatpush.msrb.mxu1 %v461_v17 }
 0x200   :  { %v1511_v36 = vadd.f32 %v1510_v18, %v1398_v31  ;;  %v770_v18 = vld [vmem:[%s8721_s0 + $0x7a0] sm:$0xff] }
 0x201   :  { %v1287_v38 = vpop.f32.mrf.mxu0 }
 0x202   :  { %v1288_v43 = vadd.f32 %v1287_v38, %v5416_v40  ;;  %v1623_v13 = vpop.f32.mrf.mxu3 }
 0x203   :  { %v6043_v46 = vadd.f32 %v1623_v13, %v1511_v36  ;;  %v1400_v51 = vpop.f32.mrf.mxu1  ;;  %v772_v36 = vld [vmem:[%s8721_s0 + $0x7b0] sm:$0xff]  ;;  %v771_v13 = vld [vmem:[%s8721_s0 + $0x7a8] sm:$0xff] }
 0x204   :  { %1334 = vmatmul.f32.gmra.mxu0 %v754_v47  ;;  %1560 = vmatmul.f32.gmra.mxu2 %v756_v41  ;;  %v1401_v40 = vadd.f32 %v1400_v51, %v1288_v43  ;;  %v773_v51 = vld [vmem:[%s8721_s0 + $0x7b8] sm:$0xff] }
 0x205   :  { %8804 = vst [vmem:[#allocation9_spill] sm:$0xff] %v6043_v46 }
 0x206   :  { %1447 = vmatmul.f32.gmra.mxu1 %v755_v45  ;;  %v235_v45 = vld [vmem:[%s8720_s1 + $0x6e8] sm:$0xff] }
 0x207   :  { %1673 = vmatmul.f32.gmra.mxu3 %v757_v56  ;;  %v1513_v48 = vpop.f32.mrf.mxu2  ;;  %v491_v56 = vmax.f32 %v235_v45, 0.0 }
 0x208   :  { %v1514_v62 = vadd.f32 %v1513_v48, %v1401_v40  ;;  %v267_v40 = vld [vmem:[%s8720_s1 + $0x7e8] sm:$0xff] }
 0x209   :  { %v1290_v10 = vpop.f32.mrf.mxu0  ;;  %2365 = vmatpush.msrb.mxu2 %v491_v56  ;;  %v523_v5 = vmax.f32 %v267_v40, 0.0  ;;  %v169_v56 = vld [vmem:[%s8720_s1 + $0x4d8] sm:$0xff] }
 0x20a   :  { %v1291_v33 = vadd.f32 %v1290_v10, %v5430_v54  ;;  %v1626_v19 = vpop.f32.mrf.mxu3  ;;  %v425_v59 = vmax.f32 %v169_v56, 0.0 }
 0x20b   :  { %v6070_v20 = vadd.f32 %v1626_v19, %v1514_v62  ;;  %v1403_v3 = vpop.f32.mrf.mxu1  ;;  %v203_v62 = vld [vmem:[%s8720_s1 + $0x5e8] sm:$0xff]  ;;  %2478 = vmatpush.msrb.mxu3 %v523_v5 }
 0x20c   :  { %1337 = vmatmul.f32.gmra.mxu0 %v762_v1  ;;  %1563 = vmatmul.f32.gmra.mxu2 %v764_v11  ;;  %v1404_v37 = vadd.f32 %v1403_v3, %v1291_v33  ;;  %v459_v10 = vmax.f32 %v203_v62, 0.0  ;;  %v779_v19 = vld [vmem:[%s8721_s0 + $0x7e8] sm:$0xff]  ;;  %v781_v3 = vld [vmem:[%s8721_s0 + $0x7f8] sm:$0xff] }
 0x20d   :  { %8805 = vst [vmem:[#allocation10_spill] sm:$0xff] %v6070_v20  ;;  %2140 = vmatpush.msrb.mxu0 %v425_v59 }
 0x20e   :  { %1450 = vmatmul.f32.gmra.mxu1 %v763_v23 }
 0x20f   :  { %1676 = vmatmul.f32.gmra.mxu3 %v765_v25  ;;  %v1516_v54 = vpop.f32.mrf.mxu2  ;;  %2252 = vmatpush.msrb.mxu1 %v459_v10  ;;  %v4360_v10 = vld [vmem:[%s8721_s0 + $0x40] sm:$0xff] }
 0x210   :  { %v1517_v29 = vadd.f32 %v1516_v54, %v1404_v37 }
 0x211   :  { %v1293_v31 = vpop.f32.mrf.mxu0 }
 0x212   :  { %v1294_v38 = vadd.f32 %v1293_v31, %v5456_v12  ;;  %v1629_v47 = vpop.f32.mrf.mxu3 }
 0x213   :  { %v6085_v41 = vadd.f32 %v1629_v47, %v1517_v29  ;;  %v1406_v43 = vpop.f32.mrf.mxu1  ;;  %v233_v47 = vld [vmem:[%s8720_s1 + $0x6d8] sm:$0xff] }
 0x214   :  { %1340 = vmatmul.f32.gmra.mxu0 %v770_v18  ;;  %1566 = vmatmul.f32.gmra.mxu2 %v772_v36  ;;  %v1407_v12 = vadd.f32 %v1406_v43, %v1294_v38  ;;  %v4356_v36 = vld [vmem:[%s8721_s0] sm:$0xff]  ;;  %v4357_v38 = vld [vmem:[%s8721_s0 + $0x10] sm:$0xff]  ;;  %v489_v43 = vmax.f32 %v233_v47, 0.0  ;;  %v4366_v47 = vld [vmem:[%s8721_s0 + $0x88] sm:$0xff] }
 0x215   :  { %8806 = vst [vmem:[#allocation11_spill] sm:$0xff] %v6085_v41 }
 0x216   :  { %1453 = vmatmul.f32.gmra.mxu1 %v771_v13  ;;  %v4358_v13 = vld [vmem:[%s8721_s0 + $0x8] sm:$0xff]  ;;  %2366 = vmatpush.msrb.mxu2 %v489_v43  ;;  %v4367_v43 = vld [vmem:[%s8721_s0 + $0x98] sm:$0xff] }
 0x217   :  { %1679 = vmatmul.f32.gmra.mxu3 %v773_v51  ;;  %v1519_v14 = vpop.f32.mrf.mxu2  ;;  %v4359_v51 = vld [vmem:[%s8721_s0 + $0x18] sm:$0xff] }
 0x218   :  { %v1520_v48 = vadd.f32 %v1519_v14, %v1407_v12  ;;  %v265_v12 = vld [vmem:[%s8720_s1 + $0x7d8] sm:$0xff] }
 0x219   :  { %v1296_v7 = vpop.f32.mrf.mxu0  ;;  %v521_v40 = vmax.f32 %v265_v12, 0.0 }
 0x21a   :  { %v1297_v1 = vadd.f32 %v1296_v7, %v5470_v26  ;;  %v1632_v11 = vpop.f32.mrf.mxu3 }
 0x21b   :  { %v6112_v17 = vadd.f32 %v1632_v11, %v1520_v48  ;;  %v1409_v33 = vpop.f32.mrf.mxu1  ;;  %v201_v48 = vld [vmem:[%s8720_s1 + $0x5d8] sm:$0xff]  ;;  %2479 = vmatpush.msrb.mxu3 %v521_v40 }
 0x21c   :  { %1343 = vmatmul.f32.gmra.mxu0 %v778_v34  ;;  %1569 = vmatmul.f32.gmra.mxu2 %v780_v8  ;;  %v1410_v23 = vadd.f32 %v1409_v33, %v1297_v1  ;;  %v457_v5 = vmax.f32 %v201_v48, 0.0  ;;  %v4361_v1 = vld [vmem:[%s8721_s0 + $0x50] sm:$0xff]  ;;  %v4363_v33 = vld [vmem:[%s8721_s0 + $0x58] sm:$0xff] }
 0x21d   :  { %8807 = vst [vmem:[#allocation12_spill] sm:$0xff] %v6112_v17 }
 0x21e   :  { %1456 = vmatmul.f32.gmra.mxu1 %v779_v19 }
 0x21f   :  { %1682 = vmatmul.f32.gmra.mxu3 %v781_v3  ;;  %v1522_v26 = vpop.f32.mrf.mxu2  ;;  %2253 = vmatpush.msrb.mxu1 %v457_v5 }
 0x220   :  { %v1523_v25 = vadd.f32 %v1522_v26, %v1410_v23 }
 0x221   :  { %v1299_v37 = vpop.f32.mrf.mxu0 }
 0x222   :  { %v1300_v54 = vadd.f32 %v1299_v37, %v5496_v52  ;;  %v1635_v29 = vpop.f32.mrf.mxu3 }
 0x223   :  { %v6121_v31 = vadd.f32 %v1635_v29, %v1523_v25  ;;  %v1412_v18 = vpop.f32.mrf.mxu1  ;;  %v4364_v29 = vld [vmem:[%s8721_s0 + $0x80] sm:$0xff] }
 0x224   :  { %1702 = vmatmul.f32.vlgmr.msra.gmra.mxu0 %v4356_v36  ;;  %1928 = vmatmul.f32.vlgmr.msra.gmra.mxu2 %v4357_v38  ;;  %v1413_v52 = vadd.f32 %v1412_v18, %v1300_v54  ;;  %v4365_v18 = vld [vmem:[%s8721_s0 + $0x90] sm:$0xff]  ;;  %v231_v36 = vld [vmem:[%s8720_s1 + $0x6c8] sm:$0xff] }
 0x225   :  { %8808 = vst [vmem:[#allocation13_spill] sm:$0xff] %v6121_v31  ;;  %v487_v38 = vmax.f32 %v231_v36, 0.0  ;;  %v4374_v36 = vld [vmem:[%s8721_s0 + $0x108] sm:$0xff] }
 0x226   :  { %1815 = vmatmul.f32.vlgmr.msra.gmra.mxu1 %v4358_v13  ;;  %v167_v13 = vld [vmem:[%s8720_s1 + $0x4c8] sm:$0xff] }
 0x227   :  { %2041 = vmatmul.f32.vlgmr.msra.gmra.mxu3 %v4359_v51  ;;  %v1525_v45 = vpop.f32.mrf.mxu2  ;;  %2367 = vmatpush.msrb.mxu2 %v487_v38  ;;  %v263_v51 = vld [vmem:[%s8720_s1 + $0x7c8] sm:$0xff]  ;;  %v423_v56 = vmax.f32 %v167_v13, 0.0  ;;  %v4375_v38 = vld [vmem:[%s8721_s0 + $0x118] sm:$0xff] }
 0x228   :  { %v1526_v14 = vadd.f32 %v1525_v45, %v1413_v52  ;;  %v519_v12 = vmax.f32 %v263_v51, 0.0 }
 0x229   :  { %v1302_v61 = vpop.f32.mrf.mxu0  ;;  %2141 = vmatpush.msrb.mxu0 %v423_v56 }
 0x22a   :  { %v1303_v62 = vadd.f32 %v1302_v61, %v5510_v0  ;;  %v1638_v7 = vpop.f32.mrf.mxu3  ;;  %v4362_v0 = vld [vmem:[%s8721_s0 + $0x48] sm:$0xff]  ;;  %2480 = vmatpush.msrb.mxu3 %v519_v12 }
 0x22b   :  { %v6148_v34 = vadd.f32 %v1638_v7, %v1526_v14  ;;  %v1415_v8 = vpop.f32.mrf.mxu1  ;;  %v199_v14 = vld [vmem:[%s8720_s1 + $0x5c8] sm:$0xff]  ;;  %v4368_v7 = vld [vmem:[%s8721_s0 + $0xc0] sm:$0xff] }
 0x22c   :  { %1705 = vmatmul.f32.gmra.mxu0 %v4360_v10  ;;  %1931 = vmatmul.f32.gmra.mxu2 %v4361_v1  ;;  %v1416_v11 = vadd.f32 %v1415_v8, %v1303_v62  ;;  %v455_v40 = vmax.f32 %v199_v14, 0.0  ;;  %v4369_v8 = vld [vmem:[%s8721_s0 + $0xd0] sm:$0xff]  ;;  %v4371_v1 = vld [vmem:[%s8721_s0 + $0xd8] sm:$0xff] }
 0x22d   :  { %8809 = vst [vmem:[#allocation14_spill] sm:$0xff] %v6148_v34 }
 0x22e   :  { %1818 = vmatmul.f32.gmra.mxu1 %v4362_v0 }
 0x22f   :  { %2044 = vmatmul.f32.gmra.mxu3 %v4363_v33  ;;  %v1528_v19 = vpop.f32.mrf.mxu2  ;;  %2254 = vmatpush.msrb.mxu1 %v455_v40 }
 0x230   :  { %v1529_v3 = vadd.f32 %v1528_v19, %v1416_v11 }
 0x231   :  { %v1305_v23 = vpop.f32.mrf.mxu0 }
 0x232   :  { %v1306_v26 = vadd.f32 %v1305_v23, %v5536_v27  ;;  %v1641_v25 = vpop.f32.mrf.mxu3 }
 0x233   :  { %v6163_v37 = vadd.f32 %v1641_v25, %v1529_v3  ;;  %v1418_v54 = vpop.f32.mrf.mxu1  ;;  %v4372_v25 = vld [vmem:[%s8721_s0 + $0x100] sm:$0xff] }
 0x234   :  { %1708 = vmatmul.f32.gmra.mxu0 %v4364_v29  ;;  %1934 = vmatmul.f32.gmra.mxu2 %v4365_v18  ;;  %v1419_v27 = vadd.f32 %v1418_v54, %v1306_v26  ;;  %v4373_v54 = vld [vmem:[%s8721_s0 + $0x110] sm:$0xff]  ;;  %v229_v29 = vld [vmem:[%s8720_s1 + $0x6b8] sm:$0xff] }
 0x235   :  { %8810 = vst [vmem:[#allocation15_spill] sm:$0xff] %v6163_v37  ;;  %v485_v18 = vmax.f32 %v229_v29, 0.0  ;;  %v4382_v29 = vld [vmem:[%s8721_s0 + $0x188] sm:$0xff] }
 0x236   :  { %1821 = vmatmul.f32.gmra.mxu1 %v4366_v47  ;;  %v165_v47 = vld [vmem:[%s8720_s1 + $0x4b8] sm:$0xff] }
 0x237   :  { %2047 = vmatmul.f32.gmra.mxu3 %v4367_v43  ;;  %v1531_v52 = vpop.f32.mrf.mxu2  ;;  %2368 = vmatpush.msrb.mxu2 %v485_v18  ;;  %v261_v43 = vld [vmem:[%s8720_s1 + $0x7b8] sm:$0xff]  ;;  %v421_v13 = vmax.f32 %v165_v47, 0.0 }
 0x238   :  { %v1532_v45 = vadd.f32 %v1531_v52, %v1419_v27  ;;  %v517_v51 = vmax.f32 %v261_v43, 0.0  ;;  %v4383_v18 = vld [vmem:[%s8721_s0 + $0x198] sm:$0xff] }
 0x239   :  { %v1308_v59 = vpop.f32.mrf.mxu0  ;;  %2142 = vmatpush.msrb.mxu0 %v421_v13 }
 0x23a   :  { %v1309_v48 = vadd.f32 %v1308_v59, %v5550_v42  ;;  %v1644_v61 = vpop.f32.mrf.mxu3  ;;  %v4370_v42 = vld [vmem:[%s8721_s0 + $0xc8] sm:$0xff]  ;;  %2481 = vmatpush.msrb.mxu3 %v517_v51 }
 0x23b   :  { %v6190_v5 = vadd.f32 %v1644_v61, %v1532_v45  ;;  %v1421_v62 = vpop.f32.mrf.mxu1  ;;  %v197_v45 = vld [vmem:[%s8720_s1 + $0x5b8] sm:$0xff]  ;;  %v4376_v61 = vld [vmem:[%s8721_s0 + $0x140] sm:$0xff] }
 0x23c   :  { %1711 = vmatmul.f32.gmra.mxu0 %v4368_v7  ;;  %1937 = vmatmul.f32.gmra.mxu2 %v4369_v8  ;;  %v1422_v10 = vadd.f32 %v1421_v62, %v1309_v48  ;;  %v453_v12 = vmax.f32 %v197_v45, 0.0  ;;  %v4377_v62 = vld [vmem:[%s8721_s0 + $0x150] sm:$0xff]  ;;  %v4379_v8 = vld [vmem:[%s8721_s0 + $0x158] sm:$0xff] }
 0x23d   :  { %8811 = vst [vmem:[#allocation16_spill] sm:$0xff] %v6190_v5 }
 0x23e   :  { %1824 = vmatmul.f32.gmra.mxu1 %v4370_v42 }
 0x23f   :  { %2050 = vmatmul.f32.gmra.mxu3 %v4371_v1  ;;  %v1534_v11 = vpop.f32.mrf.mxu2  ;;  %2255 = vmatpush.msrb.mxu1 %v453_v12 }
 0x240   :  { %v1535_v0 = vadd.f32 %v1534_v11, %v1422_v10 }
 0x241   :  { %v1311_v33 = vpop.f32.mrf.mxu0 }
 0x242   :  { %v1312_v19 = vadd.f32 %v1311_v33, %v5576_v6  ;;  %v1647_v3 = vpop.f32.mrf.mxu3 }
 0x243   :  { %v6205_v23 = vadd.f32 %v1647_v3, %v1535_v0  ;;  %v1424_v26 = vpop.f32.mrf.mxu1  ;;  %v4380_v3 = vld [vmem:[%s8721_s0 + $0x180] sm:$0xff] }
 0x244   :  { %1714 = vmatmul.f32.gmra.mxu0 %v4372_v25  ;;  %1940 = vmatmul.f32.gmra.mxu2 %v4373_v54  ;;  %v1425_v6 = vadd.f32 %v1424_v26, %v1312_v19  ;;  %v4381_v26 = vld [vmem:[%s8721_s0 + $0x190] sm:$0xff]  ;;  %v227_v25 = vld [vmem:[%s8720_s1 + $0x6a8] sm:$0xff] }
 0x245   :  { %8812 = vst [vmem:[#allocation17_spill] sm:$0xff] %v6205_v23  ;;  %v483_v54 = vmax.f32 %v227_v25, 0.0  ;;  %v4390_v25 = vld [vmem:[%s8721_s0 + $0x208] sm:$0xff] }
 0x246   :  { %1827 = vmatmul.f32.gmra.mxu1 %v4374_v36  ;;  %v163_v36 = vld [vmem:[%s8720_s1 + $0x4a8] sm:$0xff] }
 0x247   :  { %2053 = vmatmul.f32.gmra.mxu3 %v4375_v38  ;;  %v1537_v27 = vpop.f32.mrf.mxu2  ;;  %2369 = vmatpush.msrb.mxu2 %v483_v54  ;;  %v259_v38 = vld [vmem:[%s8720_s1 + $0x7a8] sm:$0xff]  ;;  %v419_v47 = vmax.f32 %v163_v36, 0.0  ;;  %v4391_v54 = vld [vmem:[%s8721_s0 + $0x218] sm:$0xff] }
 0x248   :  { %v1538_v52 = vadd.f32 %v1537_v27, %v1425_v6  ;;  %v515_v43 = vmax.f32 %v259_v38, 0.0 }
 0x249   :  { %v1314_v56 = vpop.f32.mrf.mxu0  ;;  %2143 = vmatpush.msrb.mxu0 %v419_v47 }
 0x24a   :  { %v1315_v14 = vadd.f32 %v1314_v56, %v5590_v21  ;;  %v1650_v59 = vpop.f32.mrf.mxu3  ;;  %v4378_v21 = vld [vmem:[%s8721_s0 + $0x148] sm:$0xff]  ;;  %2482 = vmatpush.msrb.mxu3 %v515_v43 }
 0x24b   :  { %v6232_v40 = vadd.f32 %v1650_v59, %v1538_v52  ;;  %v1427_v48 = vpop.f32.mrf.mxu1  ;;  %v195_v52 = vld [vmem:[%s8720_s1 + $0x5a8] sm:$0xff]  ;;  %v4384_v59 = vld [vmem:[%s8721_s0 + $0x1c0] sm:$0xff] }
 0x24c   :  { %1717 = vmatmul.f32.gmra.mxu0 %v4376_v61  ;;  %1943 = vmatmul.f32.gmra.mxu2 %v4377_v62  ;;  %v1428_v7 = vadd.f32 %v1427_v48, %v1315_v14  ;;  %v451_v51 = vmax.f32 %v195_v52, 0.0  ;;  %v4385_v48 = vld [vmem:[%s8721_s0 + $0x1d0] sm:$0xff]  ;;  %v4387_v62 = vld [vmem:[%s8721_s0 + $0x1d8] sm:$0xff] }
 0x24d   :  { %8813 = vst [vmem:[#allocation18_spill] sm:$0xff] %v6232_v40 }
 0x24e   :  { %1830 = vmatmul.f32.gmra.mxu1 %v4378_v21 }
 0x24f   :  { %2056 = vmatmul.f32.gmra.mxu3 %v4379_v8  ;;  %v1540_v10 = vpop.f32.mrf.mxu2  ;;  %2256 = vmatpush.msrb.mxu1 %v451_v51 }
 0x250   :  { %v1541_v42 = vadd.f32 %v1540_v10, %v1428_v7 }
 0x251   :  { %v1317_v1 = vpop.f32.mrf.mxu0 }
 0x252   :  { %v1318_v11 = vadd.f32 %v1317_v1, %v5616_v50  ;;  %v1653_v0 = vpop.f32.mrf.mxu3 }
 0x253   :  { %v6247_v33 = vadd.f32 %v1653_v0, %v1541_v42  ;;  %v1430_v19 = vpop.f32.mrf.mxu1  ;;  %v4388_v0 = vld [vmem:[%s8721_s0 + $0x200] sm:$0xff] }
 0x254   :  { %1720 = vmatmul.f32.gmra.mxu0 %v4380_v3  ;;  %1946 = vmatmul.f32.gmra.mxu2 %v4381_v26  ;;  %v1431_v50 = vadd.f32 %v1430_v19, %v1318_v11  ;;  %v4389_v19 = vld [vmem:[%s8721_s0 + $0x210] sm:$0xff]  ;;  %v225_v3 = vld [vmem:[%s8720_s1 + $0x698] sm:$0xff] }
 0x255   :  { %8814 = vst [vmem:[#allocation19_spill] sm:$0xff] %v6247_v33  ;;  %v481_v26 = vmax.f32 %v225_v3, 0.0  ;;  %v4398_v3 = vld [vmem:[%s8721_s0 + $0x288] sm:$0xff] }
 0x256   :  { %1833 = vmatmul.f32.gmra.mxu1 %v4382_v29  ;;  %v161_v29 = vld [vmem:[%s8720_s1 + $0x498] sm:$0xff] }
 0x257   :  { %2059 = vmatmul.f32.gmra.mxu3 %v4383_v18  ;;  %v1543_v6 = vpop.f32.mrf.mxu2  ;;  %2370 = vmatpush.msrb.mxu2 %v481_v26  ;;  %v257_v18 = vld [vmem:[%s8720_s1 + $0x798] sm:$0xff]  ;;  %v417_v36 = vmax.f32 %v161_v29, 0.0 }
 0x258   :  { %v1544_v27 = vadd.f32 %v1543_v6, %v1431_v50  ;;  %v513_v38 = vmax.f32 %v257_v18, 0.0  ;;  %v4399_v26 = vld [vmem:[%s8721_s0 + $0x298] sm:$0xff] }
 0x259   :  { %v1320_v13 = vpop.f32.mrf.mxu0  ;;  %2144 = vmatpush.msrb.mxu0 %v417_v36 }
 0x25a   :  { %v1321_v45 = vadd.f32 %v1320_v13, %v5630_v63  ;;  %v1656_v56 = vpop.f32.mrf.mxu3  ;;  %v4386_v63 = vld [vmem:[%s8721_s0 + $0x1c8] sm:$0xff]  ;;  %2483 = vmatpush.msrb.mxu3 %v513_v38 }
 0x25b   :  { %v6274_v12 = vadd.f32 %v1656_v56, %v1544_v27  ;;  %v1433_v14 = vpop.f32.mrf.mxu1  ;;  %v193_v27 = vld [vmem:[%s8720_s1 + $0x598] sm:$0xff]  ;;  %v4392_v56 = vld [vmem:[%s8721_s0 + $0x240] sm:$0xff] }
 0x25c   :  { %1723 = vmatmul.f32.gmra.mxu0 %v4384_v59  ;;  %1949 = vmatmul.f32.gmra.mxu2 %v4385_v48  ;;  %v1434_v61 = vadd.f32 %v1433_v14, %v1321_v45  ;;  %v449_v43 = vmax.f32 %v193_v27, 0.0  ;;  %v4393_v14 = vld [vmem:[%s8721_s0 + $0x250] sm:$0xff]  ;;  %v4395_v48 = vld [vmem:[%s8721_s0 + $0x258] sm:$0xff] }
 0x25d   :  { %8815 = vst [vmem:[#allocation20_spill] sm:$0xff] %v6274_v12 }
 0x25e   :  { %1836 = vmatmul.f32.gmra.mxu1 %v4386_v63 }
 0x25f   :  { %2062 = vmatmul.f32.gmra.mxu3 %v4387_v62  ;;  %v1546_v7 = vpop.f32.mrf.mxu2  ;;  %2257 = vmatpush.msrb.mxu1 %v449_v43 }
 0x260   :  { %v1547_v21 = vadd.f32 %v1546_v7, %v1434_v61 }
 0x261   :  { %v1323_v8 = vpop.f32.mrf.mxu0 }
 0x262   :  { %v1324_v10 = vadd.f32 %v1323_v8, %v5656_v30  ;;  %v1659_v42 = vpop.f32.mrf.mxu3 }
 0x263   :  { %v6289_v1 = vadd.f32 %v1659_v42, %v1547_v21  ;;  %v1436_v11 = vpop.f32.mrf.mxu1  ;;  %v4396_v42 = vld [vmem:[%s8721_s0 + $0x280] sm:$0xff] }
 0x264   :  { %1726 = vmatmul.f32.gmra.mxu0 %v4388_v0  ;;  %1952 = vmatmul.f32.gmra.mxu2 %v4389_v19  ;;  %v1437_v30 = vadd.f32 %v1436_v11, %v1324_v10  ;;  %v4397_v11 = vld [vmem:[%s8721_s0 + $0x290] sm:$0xff]  ;;  %v223_v0 = vld [vmem:[%s8720_s1 + $0x688] sm:$0xff] }
 0x265   :  { %8816 = vst [vmem:[#allocation21_spill] sm:$0xff] %v6289_v1  ;;  %v479_v19 = vmax.f32 %v223_v0, 0.0  ;;  %v4406_v0 = vld [vmem:[%s8721_s0 + $0x308] sm:$0xff] }
 0x266   :  { %1839 = vmatmul.f32.gmra.mxu1 %v4390_v25  ;;  %v159_v25 = vld [vmem:[%s8720_s1 + $0x488] sm:$0xff] }
 0x267   :  { %2065 = vmatmul.f32.gmra.mxu3 %v4391_v54  ;;  %v1549_v50 = vpop.f32.mrf.mxu2  ;;  %2371 = vmatpush.msrb.mxu2 %v479_v19  ;;  %v255_v54 = vld [vmem:[%s8720_s1 + $0x788] sm:$0xff]  ;;  %v415_v29 = vmax.f32 %v159_v25, 0.0  ;;  %v4407_v19 = vld [vmem:[%s8721_s0 + $0x318] sm:$0xff] }
 0x268   :  { %v1550_v6 = vadd.f32 %v1549_v50, %v1437_v30  ;;  %v511_v18 = vmax.f32 %v255_v54, 0.0 }
 0x269   :  { %v1326_v47 = vpop.f32.mrf.mxu0  ;;  %2145 = vmatpush.msrb.mxu0 %v415_v29 }
 0x26a   :  { %v1327_v52 = vadd.f32 %v1326_v47, %v5670_v49  ;;  %v1662_v13 = vpop.f32.mrf.mxu3  ;;  %v4394_v49 = vld [vmem:[%s8721_s0 + $0x248] sm:$0xff]  ;;  %2484 = vmatpush.msrb.mxu3 %v511_v18 }
 0x26b   :  { %v6316_v51 = vadd.f32 %v1662_v13, %v1550_v6  ;;  %v1439_v45 = vpop.f32.mrf.mxu1  ;;  %v191_v6 = vld [vmem:[%s8720_s1 + $0x588] sm:$0xff]  ;;  %v4400_v13 = vld [vmem:[%s8721_s0 + $0x2c0] sm:$0xff] }
 0x26c   :  { %1729 = vmatmul.f32.gmra.mxu0 %v4392_v56  ;;  %1955 = vmatmul.f32.gmra.mxu2 %v4393_v14  ;;  %v1440_v59 = vadd.f32 %v1439_v45, %v1327_v52  ;;  %v447_v38 = vmax.f32 %v191_v6, 0.0  ;;  %v4401_v45 = vld [vmem:[%s8721_s0 + $0x2d0] sm:$0xff]  ;;  %v4403_v14 = vld [vmem:[%s8721_s0 + $0x2d8] sm:$0xff] }
 0x26d   :  { %8817 = vst [vmem:[#allocation22_spill] sm:$0xff] %v6316_v51 }
 0x26e   :  { %1842 = vmatmul.f32.gmra.mxu1 %v4394_v49 }
 0x26f   :  { %2068 = vmatmul.f32.gmra.mxu3 %v4395_v48  ;;  %v1552_v61 = vpop.f32.mrf.mxu2  ;;  %2258 = vmatpush.msrb.mxu1 %v447_v38 }
 0x270   :  { %v1553_v63 = vadd.f32 %v1552_v61, %v1440_v59 }
 0x271   :  { %v1329_v62 = vpop.f32.mrf.mxu0 }
 0x272   :  { %v1330_v7 = vadd.f32 %v1329_v62, %v5696_v16  ;;  %v1665_v21 = vpop.f32.mrf.mxu3 }
 0x273   :  { %v6331_v8 = vadd.f32 %v1665_v21, %v1553_v63  ;;  %v1442_v10 = vpop.f32.mrf.mxu1  ;;  %v4404_v21 = vld [vmem:[%s8721_s0 + $0x300] sm:$0xff] }
 0x274   :  { %1732 = vmatmul.f32.gmra.mxu0 %v4396_v42  ;;  %1958 = vmatmul.f32.gmra.mxu2 %v4397_v11  ;;  %v1443_v16 = vadd.f32 %v1442_v10, %v1330_v7  ;;  %v4405_v10 = vld [vmem:[%s8721_s0 + $0x310] sm:$0xff]  ;;  %v221_v42 = vld [vmem:[%s8720_s1 + $0x678] sm:$0xff] }
 0x275   :  { %8818 = vst [vmem:[#allocation23_spill] sm:$0xff] %v6331_v8  ;;  %v477_v11 = vmax.f32 %v221_v42, 0.0  ;;  %v4414_v42 = vld [vmem:[%s8721_s0 + $0x388] sm:$0xff] }
 0x276   :  { %1845 = vmatmul.f32.gmra.mxu1 %v4398_v3  ;;  %v157_v3 = vld [vmem:[%s8720_s1 + $0x478] sm:$0xff] }
 0x277   :  { %2071 = vmatmul.f32.gmra.mxu3 %v4399_v26  ;;  %v1555_v30 = vpop.f32.mrf.mxu2  ;;  %2372 = vmatpush.msrb.mxu2 %v477_v11  ;;  %v253_v26 = vld [vmem:[%s8720_s1 + $0x778] sm:$0xff]  ;;  %v413_v25 = vmax.f32 %v157_v3, 0.0 }
 0x278   :  { %v1556_v50 = vadd.f32 %v1555_v30, %v1443_v16  ;;  %v509_v54 = vmax.f32 %v253_v26, 0.0  ;;  %v4415_v11 = vld [vmem:[%s8721_s0 + $0x398] sm:$0xff] }
 0x279   :  { %v1332_v36 = vpop.f32.mrf.mxu0  ;;  %2146 = vmatpush.msrb.mxu0 %v413_v25 }
 0x27a   :  { %v1333_v27 = vadd.f32 %v1332_v36, %v5710_v32  ;;  %v1668_v47 = vpop.f32.mrf.mxu3  ;;  %v4402_v32 = vld [vmem:[%s8721_s0 + $0x2c8] sm:$0xff]  ;;  %2485 = vmatpush.msrb.mxu3 %v509_v54 }
 0x27b   :  { %v6358_v43 = vadd.f32 %v1668_v47, %v1556_v50  ;;  %v1445_v52 = vpop.f32.mrf.mxu1  ;;  %v189_v50 = vld [vmem:[%s8720_s1 + $0x578] sm:$0xff]  ;;  %v4408_v47 = vld [vmem:[%s8721_s0 + $0x340] sm:$0xff] }
 0x27c   :  { %1735 = vmatmul.f32.gmra.mxu0 %v4400_v13  ;;  %1961 = vmatmul.f32.gmra.mxu2 %v4401_v45  ;;  %v1446_v56 = vadd.f32 %v1445_v52, %v1333_v27  ;;  %v445_v18 = vmax.f32 %v189_v50, 0.0  ;;  %v4409_v52 = vld [vmem:[%s8721_s0 + $0x350] sm:$0xff]  ;;  %v4411_v45 = vld [vmem:[%s8721_s0 + $0x358] sm:$0xff] }
 0x27d   :  { %8819 = vst [vmem:[#allocation24_spill] sm:$0xff] %v6358_v43 }
 0x27e   :  { %1848 = vmatmul.f32.gmra.mxu1 %v4402_v32 }
 0x27f   :  { %2074 = vmatmul.f32.gmra.mxu3 %v4403_v14  ;;  %v1558_v59 = vpop.f32.mrf.mxu2  ;;  %2259 = vmatpush.msrb.mxu1 %v445_v18 }
 0x280   :  { %v1559_v49 = vadd.f32 %v1558_v59, %v1446_v56 }
 0x281   :  { %v1335_v48 = vpop.f32.mrf.mxu0 }
 0x282   :  { %v1336_v61 = vadd.f32 %v1335_v48, %v5736_v2  ;;  %v1671_v63 = vpop.f32.mrf.mxu3 }
 0x283   :  { %v6373_v62 = vadd.f32 %v1671_v63, %v1559_v49  ;;  %v1448_v7 = vpop.f32.mrf.mxu1  ;;  %v4412_v63 = vld [vmem:[%s8721_s0 + $0x380] sm:$0xff] }
 0x284   :  { %1738 = vmatmul.f32.gmra.mxu0 %v4404_v21  ;;  %1964 = vmatmul.f32.gmra.mxu2 %v4405_v10  ;;  %v1449_v2 = vadd.f32 %v1448_v7, %v1336_v61  ;;  %v4413_v7 = vld [vmem:[%s8721_s0 + $0x390] sm:$0xff]  ;;  %v219_v21 = vld [vmem:[%s8720_s1 + $0x668] sm:$0xff] }
 0x285   :  { %8820 = vst [vmem:[#allocation25_spill] sm:$0xff] %v6373_v62  ;;  %v475_v10 = vmax.f32 %v219_v21, 0.0  ;;  %v4422_v21 = vld [vmem:[%s8721_s0 + $0x408] sm:$0xff] }
 0x286   :  { %1851 = vmatmul.f32.gmra.mxu1 %v4406_v0  ;;  %v155_v0 = vld [vmem:[%s8720_s1 + $0x468] sm:$0xff] }
 0x287   :  { %2077 = vmatmul.f32.gmra.mxu3 %v4407_v19  ;;  %v1561_v16 = vpop.f32.mrf.mxu2  ;;  %2373 = vmatpush.msrb.mxu2 %v475_v10  ;;  %v251_v19 = vld [vmem:[%s8720_s1 + $0x768] sm:$0xff]  ;;  %v411_v3 = vmax.f32 %v155_v0, 0.0  ;;  %v4423_v10 = vld [vmem:[%s8721_s0 + $0x418] sm:$0xff] }
 0x288   :  { %v1562_v30 = vadd.f32 %v1561_v16, %v1449_v2  ;;  %v507_v26 = vmax.f32 %v251_v19, 0.0 }
 0x289   :  { %v1338_v29 = vpop.f32.mrf.mxu0  ;;  %2147 = vmatpush.msrb.mxu0 %v411_v3 }
 0x28a   :  { %v1339_v6 = vadd.f32 %v1338_v29, %v5750_v22  ;;  %v1674_v36 = vpop.f32.mrf.mxu3  ;;  %v4410_v22 = vld [vmem:[%s8721_s0 + $0x348] sm:$0xff]  ;;  %2486 = vmatpush.msrb.mxu3 %v507_v26 }
 0x28b   :  { %v6400_v38 = vadd.f32 %v1674_v36, %v1562_v30  ;;  %v1451_v27 = vpop.f32.mrf.mxu1  ;;  %v187_v30 = vld [vmem:[%s8720_s1 + $0x568] sm:$0xff]  ;;  %v4416_v36 = vld [vmem:[%s8721_s0 + $0x3c0] sm:$0xff] }
 0x28c   :  { %1741 = vmatmul.f32.gmra.mxu0 %v4408_v47  ;;  %1967 = vmatmul.f32.gmra.mxu2 %v4409_v52  ;;  %v1452_v13 = vadd.f32 %v1451_v27, %v1339_v6  ;;  %v443_v54 = vmax.f32 %v187_v30, 0.0  ;;  %v4417_v27 = vld [vmem:[%s8721_s0 + $0x3d0] sm:$0xff]  ;;  %v4419_v52 = vld [vmem:[%s8721_s0 + $0x3d8] sm:$0xff] }
 0x28d   :  { %8821 = vst [vmem:[#allocation26_spill] sm:$0xff] %v6400_v38 }
 0x28e   :  { %1854 = vmatmul.f32.gmra.mxu1 %v4410_v22 }
 0x28f   :  { %2080 = vmatmul.f32.gmra.mxu3 %v4411_v45  ;;  %v1564_v56 = vpop.f32.mrf.mxu2  ;;  %2260 = vmatpush.msrb.mxu1 %v443_v54 }
 0x290   :  { %v1565_v32 = vadd.f32 %v1564_v56, %v1452_v13 }
 0x291   :  { %v1341_v14 = vpop.f32.mrf.mxu0 }
 0x292   :  { %v1342_v59 = vadd.f32 %v1341_v14, %v5776_v57  ;;  %v1677_v49 = vpop.f32.mrf.mxu3 }
 0x293   :  { %v6415_v48 = vadd.f32 %v1677_v49, %v1565_v32  ;;  %v1454_v61 = vpop.f32.mrf.mxu1  ;;  %v4421_v49 = vld [vmem:[%s8721_s0 + $0x410] sm:$0xff] }
 0x294   :  { %1744 = vmatmul.f32.gmra.mxu0 %v4412_v63  ;;  %1970 = vmatmul.f32.gmra.mxu2 %v4413_v7  ;;  %v1455_v57 = vadd.f32 %v1454_v61, %v1342_v59  ;;  %v4420_v59 = vld [vmem:[%s8721_s0 + $0x400] sm:$0xff]  ;;  %v217_v61 = vld [vmem:[%s8720_s1 + $0x658] sm:$0xff] }
 0x295   :  { %8822 = vst [vmem:[#allocation27_spill] sm:$0xff] %v6415_v48  ;;  %v473_v63 = vmax.f32 %v217_v61, 0.0 }
 0x296   :  { %1857 = vmatmul.f32.gmra.mxu1 %v4414_v42  ;;  %v153_v42 = vld [vmem:[%s8720_s1 + $0x458] sm:$0xff] }
 0x297   :  { %2083 = vmatmul.f32.gmra.mxu3 %v4415_v11  ;;  %v1567_v2 = vpop.f32.mrf.mxu2  ;;  %2374 = vmatpush.msrb.mxu2 %v473_v63  ;;  %v249_v11 = vld [vmem:[%s8720_s1 + $0x758] sm:$0xff]  ;;  %v409_v0 = vmax.f32 %v153_v42, 0.0  ;;  %v4430_v63 = vld [vmem:[%s8721_s0 + $0x488] sm:$0xff] }
 0x298   :  { %v1568_v16 = vadd.f32 %v1567_v2, %v1455_v57  ;;  %v505_v19 = vmax.f32 %v249_v11, 0.0 }
 0x299   :  { %v1344_v25 = vpop.f32.mrf.mxu0  ;;  %2148 = vmatpush.msrb.mxu0 %v409_v0  ;;  %v183_v0 = vld [vmem:[%s8720_s1 + $0x548] sm:$0xff] }
 0x29a   :  { %v1345_v50 = vadd.f32 %v1344_v25, %v5791_v15  ;;  %v1680_v29 = vpop.f32.mrf.mxu3  ;;  %v4418_v15 = vld [vmem:[%s8721_s0 + $0x3c8] sm:$0xff]  ;;  %2487 = vmatpush.msrb.mxu3 %v505_v19 }
 0x29b   :  { %v6442_v18 = vadd.f32 %v1680_v29, %v1568_v16  ;;  %v1457_v6 = vpop.f32.mrf.mxu1  ;;  %v185_v16 = vld [vmem:[%s8720_s1 + $0x558] sm:$0xff]  ;;  %v4425_v29 = vld [vmem:[%s8721_s0 + $0x450] sm:$0xff] }
 0x29c   :  { %1747 = vmatmul.f32.gmra.mxu0 %v4416_v36  ;;  %1973 = vmatmul.f32.gmra.mxu2 %v4417_v27  ;;  %v1458_v47 = vadd.f32 %v1457_v6, %v1345_v50  ;;  %v441_v26 = vmax.f32 %v185_v16, 0.0  ;;  %v4424_v50 = vld [vmem:[%s8721_s0 + $0x440] sm:$0xff]  ;;  %v4426_v36 = vld [vmem:[%s8721_s0 + $0x448] sm:$0xff]  ;;  %v4427_v27 = vld [vmem:[%s8721_s0 + $0x458] sm:$0xff]  ;;  %v439_v16 = vmax.f32 %v183_v0, 0.0 }
 0x29d   :  { %8823 = vst [vmem:[#allocation28_spill] sm:$0xff] %v6442_v18  ;;  %v181_v0 = vld [vmem:[%s8720_s1 + $0x538] sm:$0xff] }
 0x29e   :  { %1860 = vmatmul.f32.gmra.mxu1 %v4418_v15 }
 0x29f   :  { %2086 = vmatmul.f32.gmra.mxu3 %v4419_v52  ;;  %v1570_v13 = vpop.f32.mrf.mxu2  ;;  %2261 = vmatpush.msrb.mxu1 %v441_v26 }
 0x2a0   :  { %v1571_v22 = vadd.f32 %v1570_v13, %v1458_v47 }
 0x2a1   :  { %v1703_v45 = vpop.f32.mrf.mxu0  ;;  %2262 = vmatpush.msrb.mxu1 %v439_v16  ;;  %v437_v16 = vmax.f32 %v181_v0, 0.0 }
 0x2a2   :  { %v1683_v56 = vpop.f32.mrf.mxu3 }
 0x2a3   :  { %v6456_v32 = vadd.f32 %v1683_v56, %v1571_v22  ;;  %v1816_v14 = vpop.f32.mrf.mxu1  ;;  %v4428_v56 = vld [vmem:[%s8721_s0 + $0x480] sm:$0xff]  ;;  %2263 = vmatpush.msrb.mxu1 %v437_v16  ;;  %v179_v16 = vld [vmem:[%s8720_s1 + $0x528] sm:$0xff] }
 0x2a4   :  { %1750 = vmatmul.f32.gmra.mxu0 %v4420_v59  ;;  %1976 = vmatmul.f32.gmra.mxu2 %v4421_v49  ;;  %v1817_v7 = vadd.f32 %v1816_v14, %v1703_v45  ;;  %v4429_v14 = vld [vmem:[%s8721_s0 + $0x490] sm:$0xff]  ;;  %v215_v59 = vld [vmem:[%s8720_s1 + $0x648] sm:$0xff] }
 0x2a5   :  { %8824 = vst [vmem:[#allocation29_spill] sm:$0xff] %v6456_v32  ;;  %v471_v49 = vmax.f32 %v215_v59, 0.0  ;;  %v213_v59 = vld [vmem:[%s8720_s1 + $0x638] sm:$0xff] }
 0x2a6   :  { %1863 = vmatmul.f32.gmra.mxu1 %v4422_v21 }
 0x2a7   :  { %2089 = vmatmul.f32.gmra.mxu3 %v4423_v10  ;;  %v1929_v57 = vpop.f32.mrf.mxu2  ;;  %2375 = vmatpush.msrb.mxu2 %v471_v49  ;;  %v151_v10 = vld [vmem:[%s8720_s1 + $0x448] sm:$0xff]  ;;  %v469_v49 = vmax.f32 %v213_v59, 0.0  ;;  %v4444_v59 = vld [vmem:[%s8721_s0 + $0x580] sm:$0xff] }
 0x2a8   :  { %v1930_v2 = vadd.f32 %v1929_v57, %v1817_v7  ;;  %v4431_v7 = vld [vmem:[%s8721_s0 + $0x498] sm:$0xff]  ;;  %v247_v57 = vld [vmem:[%s8720_s1 + $0x748] sm:$0xff]  ;;  %v407_v11 = vmax.f32 %v151_v10, 0.0 }
 0x2a9   :  { %v1706_v3 = vpop.f32.mrf.mxu0  ;;  %2376 = vmatpush.msrb.mxu2 %v469_v49  ;;  %v149_v10 = vld [vmem:[%s8720_s1 + $0x438] sm:$0xff]  ;;  %v4445_v49 = vld [vmem:[%s8721_s0 + $0x590] sm:$0xff] }
 0x2aa   :  { %v2042_v30 = vpop.f32.mrf.mxu3  ;;  %2149 = vmatpush.msrb.mxu0 %v407_v11  ;;  %v405_v11 = vmax.f32 %v149_v10, 0.0  ;;  %v4447_v10 = vld [vmem:[%s8721_s0 + $0x598] sm:$0xff] }
 0x2ab   :  { %v6482_v25 = vadd.f32 %v2042_v30, %v1930_v2  ;;  %v1819_v54 = vpop.f32.mrf.mxu1  ;;  %v503_v2 = vmax.f32 %v247_v57, 0.0  ;;  %v245_v57 = vld [vmem:[%s8720_s1 + $0x738] sm:$0xff] }
 0x2ac   :  { %1753 = vmatmul.f32.gmra.mxu0 %v4424_v50  ;;  %1979 = vmatmul.f32.gmra.mxu2 %v4425_v29  ;;  %v1820_v6 = vadd.f32 %v1819_v54, %v1706_v3  ;;  %v4432_v54 = vld [vmem:[%s8721_s0 + $0x4c0] sm:$0xff]  ;;  %v4433_v50 = vld [vmem:[%s8721_s0 + $0x4d0] sm:$0xff] }
 0x2ad   :  { %2488 = vmatpush.msrb.mxu3 %v503_v2  ;;  %v501_v2 = vmax.f32 %v245_v57, 0.0  ;;  %2150 = vmatpush.msrb.mxu0 %v405_v11  ;;  %v243_v11 = vld [vmem:[%s8720_s1 + $0x728] sm:$0xff] }
 0x2ae   :  { %1866 = vmatmul.f32.gmra.mxu1 %v4426_v36  ;;  %v4435_v36 = vld [vmem:[%s8721_s0 + $0x4d8] sm:$0xff] }
 0x2af   :  { %2092 = vmatmul.f32.gmra.mxu3 %v4427_v27  ;;  %v1932_v47 = vpop.f32.mrf.mxu2 }
 0x2b0   :  { %v1933_v15 = vadd.f32 %v1932_v47, %v1820_v6  ;;  %v4434_v6 = vld [vmem:[%s8721_s0 + $0x4c8] sm:$0xff]  ;;  %2489 = vmatpush.msrb.mxu3 %v501_v2 }
 0x2b1   :  { %v1709_v52 = vpop.f32.mrf.mxu0 }
 0x2b2   :  { %v2045_v13 = vpop.f32.mrf.mxu3 }
 0x2b3   :  { %v6496_v22 = vadd.f32 %v2045_v13, %v1933_v15  ;;  %v1822_v45 = vpop.f32.mrf.mxu1 }
 0x2b4   :  { %1756 = vmatmul.f32.gmra.mxu0 %v4428_v56  ;;  %1982 = vmatmul.f32.gmra.mxu2 %v4429_v14  ;;  %v1823_v61 = vadd.f32 %v1822_v45, %v1709_v52  ;;  %v4436_v56 = vld [vmem:[%s8721_s0 + $0x500] sm:$0xff]  ;;  %v4437_v14 = vld [vmem:[%s8721_s0 + $0x510] sm:$0xff] }
 0x2b6   :  { %1869 = vmatmul.f32.gmra.mxu1 %v4430_v63  ;;  %v4438_v63 = vld [vmem:[%s8721_s0 + $0x508] sm:$0xff] }
 0x2b7   :  { %2095 = vmatmul.f32.gmra.mxu3 %v4431_v7  ;;  %v1935_v21 = vpop.f32.mrf.mxu2  ;;  %v4439_v7 = vld [vmem:[%s8721_s0 + $0x518] sm:$0xff] }
 0x2b8   :  { %v1936_v42 = vadd.f32 %v1935_v21, %v1823_v61 }
 0x2b9   :  { %v1712_v19 = vpop.f32.mrf.mxu0 }
 0x2ba   :  { %v2048_v3 = vpop.f32.mrf.mxu3 }
 0x2bb   :  { %v6522_v26 = vadd.f32 %v2048_v3, %v1936_v42  ;;  %v1825_v30 = vpop.f32.mrf.mxu1 }
 0x2bc   :  { %1759 = vmatmul.f32.gmra.mxu0 %v4432_v54  ;;  %1985 = vmatmul.f32.gmra.mxu2 %v4433_v50  ;;  %v1826_v29 = vadd.f32 %v1825_v30, %v1712_v19  ;;  %v4440_v50 = vld [vmem:[%s8721_s0 + $0x540] sm:$0xff] }
 0x2be   :  { %1872 = vmatmul.f32.gmra.mxu1 %v4434_v6 }
 0x2bf   :  { %2098 = vmatmul.f32.gmra.mxu3 %v4435_v36  ;;  %v1938_v27 = vpop.f32.mrf.mxu2  ;;  %v4442_v36 = vld [vmem:[%s8721_s0 + $0x548] sm:$0xff] }
 0x2c0   :  { %v1939_v47 = vadd.f32 %v1938_v27, %v1826_v29  ;;  %v4441_v29 = vld [vmem:[%s8721_s0 + $0x550] sm:$0xff]  ;;  %v4443_v27 = vld [vmem:[%s8721_s0 + $0x558] sm:$0xff] }
 0x2c1   :  { %v1715_v15 = vpop.f32.mrf.mxu0 }
 0x2c2   :  { %v2051_v52 = vpop.f32.mrf.mxu3 }
 0x2c3   :  { %v6536_v13 = vadd.f32 %v2051_v52, %v1939_v47  ;;  %v1828_v45 = vpop.f32.mrf.mxu1 }
 0x2c4   :  { %1762 = vmatmul.f32.gmra.mxu0 %v4436_v56  ;;  %1988 = vmatmul.f32.gmra.mxu2 %v4437_v14  ;;  %v1829_v61 = vadd.f32 %v1828_v45, %v1715_v15 }
 0x2c6   :  { %1875 = vmatmul.f32.gmra.mxu1 %v4438_v63 }
 0x2c7   :  { %2101 = vmatmul.f32.gmra.mxu3 %v4439_v7  ;;  %v1941_v21 = vpop.f32.mrf.mxu2 }
 0x2c8   :  { %v1942_v42 = vadd.f32 %v1941_v21, %v1829_v61  ;;  %v211_v61 = vld [vmem:[%s8720_s1 + $0x628] sm:$0xff] }
 0x2c9   :  { %v1718_v19 = vpop.f32.mrf.mxu0  ;;  %v467_v63 = vmax.f32 %v211_v61, 0.0  ;;  %v4446_v21 = vld [vmem:[%s8721_s0 + $0x588] sm:$0xff] }
 0x2ca   :  { %v2054_v3 = vpop.f32.mrf.mxu3 }
 0x2cb   :  { %v6562_v30 = vadd.f32 %v2054_v3, %v1942_v42  ;;  %v1831_v54 = vpop.f32.mrf.mxu1  ;;  %2377 = vmatpush.msrb.mxu2 %v467_v63  ;;  %v147_v42 = vld [vmem:[%s8720_s1 + $0x428] sm:$0xff] }
 0x2cc   :  { %1765 = vmatmul.f32.gmra.mxu0 %v4440_v50  ;;  %1991 = vmatmul.f32.gmra.mxu2 %v4441_v29  ;;  %v1832_v6 = vadd.f32 %v1831_v54, %v1718_v19  ;;  %v403_v0 = vmax.f32 %v147_v42, 0.0  ;;  %v499_v19 = vmax.f32 %v243_v11, 0.0  ;;  %v435_v54 = vmax.f32 %v179_v16, 0.0  ;;  %v4454_v11 = vld [vmem:[%s8721_s0 + $0x608] sm:$0xff]  ;;  %v241_v16 = vld [vmem:[%s8720_s1 + $0x718] sm:$0xff] }
 0x2ce   :  { %1878 = vmatmul.f32.gmra.mxu1 %v4442_v36  ;;  %2151 = vmatpush.msrb.mxu0 %v403_v0  ;;  %v4448_v36 = vld [vmem:[%s8721_s0 + $0x5c0] sm:$0xff] }
 0x2cf   :  { %2104 = vmatmul.f32.gmra.mxu3 %v4443_v27  ;;  %v1944_v47 = vpop.f32.mrf.mxu2  ;;  %2264 = vmatpush.msrb.mxu1 %v435_v54  ;;  %v4449_v27 = vld [vmem:[%s8721_s0 + $0x5d0] sm:$0xff] }
 0x2d0   :  { %v1945_v15 = vadd.f32 %v1944_v47, %v1832_v6  ;;  %2490 = vmatpush.msrb.mxu3 %v499_v19  ;;  %v145_v19 = vld [vmem:[%s8720_s1 + $0x418] sm:$0xff] }
 0x2d1   :  { %v1721_v52 = vpop.f32.mrf.mxu0  ;;  %v401_v54 = vmax.f32 %v145_v19, 0.0  ;;  %v207_v19 = vld [vmem:[%s8720_s1 + $0x608] sm:$0xff] }
 0x2d2   :  { %v2057_v45 = vpop.f32.mrf.mxu3 }
 0x2d3   :  { %v6576_v56 = vadd.f32 %v2057_v45, %v1945_v15  ;;  %v1834_v14 = vpop.f32.mrf.mxu1  ;;  %v4450_v15 = vld [vmem:[%s8721_s0 + $0x5c8] sm:$0xff]  ;;  %2152 = vmatpush.msrb.mxu0 %v401_v54 }
 0x2d4   :  { %1768 = vmatmul.f32.gmra.mxu0 %v4444_v59  ;;  %1994 = vmatmul.f32.gmra.mxu2 %v4445_v49  ;;  %v1835_v7 = vadd.f32 %v1834_v14, %v1721_v52  ;;  %v4451_v52 = vld [vmem:[%s8721_s0 + $0x5d8] sm:$0xff]  ;;  %v4462_v54 = vld [vmem:[%s8721_s0 + $0x688] sm:$0xff] }
 0x2d6   :  { %1881 = vmatmul.f32.gmra.mxu1 %v4446_v21  ;;  %v4453_v21 = vld [vmem:[%s8721_s0 + $0x610] sm:$0xff] }
 0x2d7   :  { %2107 = vmatmul.f32.gmra.mxu3 %v4447_v10  ;;  %v1947_v57 = vpop.f32.mrf.mxu2  ;;  %v209_v10 = vld [vmem:[%s8720_s1 + $0x618] sm:$0xff] }
 0x2d8   :  { %v1948_v2 = vadd.f32 %v1947_v57, %v1835_v7  ;;  %v4452_v7 = vld [vmem:[%s8721_s0 + $0x600] sm:$0xff]  ;;  %v465_v57 = vmax.f32 %v209_v10, 0.0 }
 0x2d9   :  { %v1724_v3 = vpop.f32.mrf.mxu0 }
 0x2da   :  { %v2060_v50 = vpop.f32.mrf.mxu3  ;;  %2378 = vmatpush.msrb.mxu2 %v465_v57 }
 0x2db   :  { %v6602_v29 = vadd.f32 %v2060_v50, %v1948_v2  ;;  %v1837_v6 = vpop.f32.mrf.mxu1  ;;  %v4455_v2 = vld [vmem:[%s8721_s0 + $0x618] sm:$0xff]  ;;  %v497_v50 = vmax.f32 %v241_v16, 0.0  ;;  %v463_v16 = vmax.f32 %v207_v19, 0.0 }
 0x2dc   :  { %1771 = vmatmul.f32.gmra.mxu0 %v4448_v36  ;;  %1997 = vmatmul.f32.gmra.mxu2 %v4449_v27  ;;  %v1838_v47 = vadd.f32 %v1837_v6, %v1724_v3  ;;  %v177_v6 = vld [vmem:[%s8720_s1 + $0x518] sm:$0xff] }
 0x2dd   :  { %v433_v27 = vmax.f32 %v177_v6, 0.0  ;;  %2491 = vmatpush.msrb.mxu3 %v497_v50  ;;  %v4463_v50 = vld [vmem:[%s8721_s0 + $0x698] sm:$0xff]  ;;  %2379 = vmatpush.msrb.mxu2 %v463_v16 }
 0x2de   :  { %1884 = vmatmul.f32.gmra.mxu1 %v4450_v15 }
 0x2df   :  { %2110 = vmatmul.f32.gmra.mxu3 %v4451_v52  ;;  %v1950_v45 = vpop.f32.mrf.mxu2  ;;  %2265 = vmatpush.msrb.mxu1 %v433_v27  ;;  %v239_v27 = vld [vmem:[%s8720_s1 + $0x708] sm:$0xff] }
 0x2e0   :  { %v1951_v14 = vadd.f32 %v1950_v45, %v1838_v47  ;;  %v4456_v45 = vld [vmem:[%s8721_s0 + $0x640] sm:$0xff] }
 0x2e1   :  { %v1727_v59 = vpop.f32.mrf.mxu0 }
 0x2e2   :  { %v2063_v49 = vpop.f32.mrf.mxu3 }
 0x2e3   :  { %v6616_v61 = vadd.f32 %v2063_v49, %v1951_v14  ;;  %v1840_v63 = vpop.f32.mrf.mxu1  ;;  %v4457_v14 = vld [vmem:[%s8721_s0 + $0x650] sm:$0xff]  ;;  %v4458_v49 = vld [vmem:[%s8721_s0 + $0x648] sm:$0xff] }
 0x2e4   :  { %1774 = vmatmul.f32.gmra.mxu0 %v4452_v7  ;;  %2000 = vmatmul.f32.gmra.mxu2 %v4453_v21  ;;  %v1841_v42 = vadd.f32 %v1840_v63, %v1727_v59  ;;  %v4459_v63 = vld [vmem:[%s8721_s0 + $0x658] sm:$0xff] }
 0x2e6   :  { %1887 = vmatmul.f32.gmra.mxu1 %v4454_v11 }
 0x2e7   :  { %2113 = vmatmul.f32.gmra.mxu3 %v4455_v2  ;;  %v1953_v0 = vpop.f32.mrf.mxu2  ;;  %v4460_v2 = vld [vmem:[%s8721_s0 + $0x680] sm:$0xff] }
 0x2e8   :  { %v1954_v3 = vadd.f32 %v1953_v0, %v1841_v42  ;;  %v4461_v0 = vld [vmem:[%s8721_s0 + $0x690] sm:$0xff] }
 0x2e9   :  { %v1730_v36 = vpop.f32.mrf.mxu0 }
 0x2ea   :  { %v2066_v47 = vpop.f32.mrf.mxu3 }
 0x2eb   :  { %v6642_v15 = vadd.f32 %v2066_v47, %v1954_v3  ;;  %v1843_v52 = vpop.f32.mrf.mxu1 }
 0x2ec   :  { %1777 = vmatmul.f32.gmra.mxu0 %v4456_v45  ;;  %2003 = vmatmul.f32.gmra.mxu2 %v4457_v14  ;;  %v1844_v59 = vadd.f32 %v1843_v52, %v1730_v36  ;;  %v143_v36 = vld [vmem:[%s8720_s1 + $0x408] sm:$0xff]  ;;  %v495_v45 = vmax.f32 %v239_v27, 0.0  ;;  %v4469_v27 = vld [vmem:[%s8721_s0 + $0x710] sm:$0xff] }
 0x2ed   :  { %v399_v52 = vmax.f32 %v143_v36, 0.0  ;;  %v175_v14 = vld [vmem:[%s8720_s1 + $0x508] sm:$0xff]  ;;  %v4468_v36 = vld [vmem:[%s8721_s0 + $0x700] sm:$0xff] }
 0x2ee   :  { %1890 = vmatmul.f32.gmra.mxu1 %v4458_v49  ;;  %v431_v49 = vmax.f32 %v175_v14, 0.0  ;;  %2492 = vmatpush.msrb.mxu3 %v495_v45  ;;  %v4471_v45 = vld [vmem:[%s8721_s0 + $0x718] sm:$0xff] }
 0x2ef   :  { %2116 = vmatmul.f32.gmra.mxu3 %v4459_v63  ;;  %v1956_v7 = vpop.f32.mrf.mxu2  ;;  %2153 = vmatpush.msrb.mxu0 %v399_v52  ;;  %v4470_v52 = vld [vmem:[%s8721_s0 + $0x708] sm:$0xff] }
 0x2f0   :  { %v1957_v21 = vadd.f32 %v1956_v7, %v1844_v59  ;;  %2266 = vmatpush.msrb.mxu1 %v431_v49 }
 0x2f1   :  { %v1733_v10 = vpop.f32.mrf.mxu0 }
 0x2f2   :  { %v2069_v57 = vpop.f32.mrf.mxu3 }
 0x2f3   :  { %v6656_v42 = vadd.f32 %v2069_v57, %v1957_v21  ;;  %v1846_v11 = vpop.f32.mrf.mxu1  ;;  %v4465_v57 = vld [vmem:[%s8721_s0 + $0x6d0] sm:$0xff] }
 0x2f4   :  { %1780 = vmatmul.f32.gmra.mxu0 %v4460_v2  ;;  %2006 = vmatmul.f32.gmra.mxu2 %v4461_v0  ;;  %v1847_v3 = vadd.f32 %v1846_v11, %v1733_v10  ;;  %v4464_v10 = vld [vmem:[%s8721_s0 + $0x6c0] sm:$0xff]  ;;  %v4466_v2 = vld [vmem:[%s8721_s0 + $0x6c8] sm:$0xff]  ;;  %v4467_v0 = vld [vmem:[%s8721_s0 + $0x6d8] sm:$0xff] }
 0x2f6   :  { %1893 = vmatmul.f32.gmra.mxu1 %v4462_v54 }
 0x2f7   :  { %2119 = vmatmul.f32.gmra.mxu3 %v4463_v50  ;;  %v1959_v6 = vpop.f32.mrf.mxu2 }
 0x2f8   :  { %v1960_v47 = vadd.f32 %v1959_v6, %v1847_v3 }
 0x2f9   :  { %v1736_v59 = vpop.f32.mrf.mxu0 }
 0x2fa   :  { %v2072_v63 = vpop.f32.mrf.mxu3 }
 0x2fb   :  { %v6682_v7 = vadd.f32 %v2072_v63, %v1960_v47  ;;  %v1849_v21 = vpop.f32.mrf.mxu1 }
 0x2fc   :  { %1783 = vmatmul.f32.gmra.mxu0 %v4464_v10  ;;  %2009 = vmatmul.f32.gmra.mxu2 %v4465_v57  ;;  %v1850_v11 = vadd.f32 %v1849_v21, %v1736_v59  ;;  %v4472_v57 = vld [vmem:[%s8721_s0 + $0x740] sm:$0xff] }
 0x2fe   :  { %1896 = vmatmul.f32.gmra.mxu1 %v4466_v2 }
 0x2ff   :  { %2122 = vmatmul.f32.gmra.mxu3 %v4467_v0  ;;  %v1962_v19 = vpop.f32.mrf.mxu2  ;;  %v4474_v0 = vld [vmem:[%s8721_s0 + $0x748] sm:$0xff] }
 0x300   :  { %v1963_v16 = vadd.f32 %v1962_v19, %v1850_v11  ;;  %v4473_v11 = vld [vmem:[%s8721_s0 + $0x750] sm:$0xff]  ;;  %v4475_v19 = vld [vmem:[%s8721_s0 + $0x758] sm:$0xff] }
 0x301   :  { %v1739_v3 = vpop.f32.mrf.mxu0 }
 0x302   :  { %v2075_v54 = vpop.f32.mrf.mxu3 }
 0x303   :  { %v6696_v50 = vadd.f32 %v2075_v54, %v1963_v16  ;;  %v1852_v6 = vpop.f32.mrf.mxu1 }
 0x304   :  { %1786 = vmatmul.f32.gmra.mxu0 %v4468_v36  ;;  %2012 = vmatmul.f32.gmra.mxu2 %v4469_v27  ;;  %v1853_v47 = vadd.f32 %v1852_v6, %v1739_v3 }
 0x306   :  { %1899 = vmatmul.f32.gmra.mxu1 %v4470_v52  ;;  %v4477_v52 = vld [vmem:[%s8721_s0 + $0x790] sm:$0xff] }
 0x307   :  { %2125 = vmatmul.f32.gmra.mxu3 %v4471_v45  ;;  %v1965_v14 = vpop.f32.mrf.mxu2 }
 0x308   :  { %v1966_v59 = vadd.f32 %v1965_v14, %v1853_v47  ;;  %v4476_v47 = vld [vmem:[%s8721_s0 + $0x780] sm:$0xff]  ;;  %v4478_v14 = vld [vmem:[%s8721_s0 + $0x788] sm:$0xff] }
 0x309   :  { %v1742_v49 = vpop.f32.mrf.mxu0 }
 0x30a   :  { %v2078_v63 = vpop.f32.mrf.mxu3 }
 0x30b   :  { %v6710_v21 = vadd.f32 %v2078_v63, %v1966_v59  ;;  %v1855_v10 = vpop.f32.mrf.mxu1  ;;  %v4479_v59 = vld [vmem:[%s8721_s0 + $0x798] sm:$0xff] }
 0x30c   :  { %1789 = vmatmul.f32.gmra.mxu0 %v4472_v57  ;;  %2015 = vmatmul.f32.gmra.mxu2 %v4473_v11  ;;  %v1856_v2 = vadd.f32 %v1855_v10, %v1742_v49 }
 0x30e   :  { %1902 = vmatmul.f32.gmra.mxu1 %v4474_v0  ;;  %v4480_v0 = vld [vmem:[%s8721_s0 + $0x7c0] sm:$0xff] }
 0x30f   :  { %2128 = vmatmul.f32.gmra.mxu3 %v4475_v19  ;;  %v1968_v16 = vpop.f32.mrf.mxu2  ;;  %v4481_v19 = vld [vmem:[%s8721_s0 + $0x7d0] sm:$0xff] }
 0x310   :  { %v1969_v3 = vadd.f32 %v1968_v16, %v1856_v2 }
 0x311   :  { %v1745_v54 = vpop.f32.mrf.mxu0 }
 0x312   :  { %v2081_v6 = vpop.f32.mrf.mxu3 }
 0x313   :  { %v6724_v36 = vadd.f32 %v2081_v6, %v1969_v3  ;;  %v1858_v27 = vpop.f32.mrf.mxu1  ;;  %v4482_v3 = vld [vmem:[%s8721_s0 + $0x7c8] sm:$0xff] }
 0x314   :  { %1792 = vmatmul.f32.gmra.mxu0 %v4476_v47  ;;  %2018 = vmatmul.f32.gmra.mxu2 %v4477_v52  ;;  %v1859_v45 = vadd.f32 %v1858_v27, %v1745_v54  ;;  %v4483_v54 = vld [vmem:[%s8721_s0 + $0x7d8] sm:$0xff] }
 0x316   :  { %1905 = vmatmul.f32.gmra.mxu1 %v4478_v14 }
 0x317   :  { %2131 = vmatmul.f32.gmra.mxu3 %v4479_v59  ;;  %v1971_v49 = vpop.f32.mrf.mxu2  ;;  %v4484_v59 = vld [vmem:[%s8721_s0 + $0x20] sm:$0xff] }
 0x318   :  { %v1972_v63 = vadd.f32 %v1971_v49, %v1859_v45  ;;  %v4485_v49 = vld [vmem:[%s8721_s0 + $0x30] sm:$0xff] }
 0x319   :  { %v1748_v10 = vpop.f32.mrf.mxu0 }
 0x31a   :  { %v2084_v57 = vpop.f32.mrf.mxu3 }
 0x31b   :  { %v6738_v11 = vadd.f32 %v2084_v57, %v1972_v63  ;;  %v1861_v2 = vpop.f32.mrf.mxu1  ;;  %v4487_v57 = vld [vmem:[%s8721_s0 + $0x38] sm:$0xff] }
 0x31c   :  { %1795 = vmatmul.f32.gmra.mxu0 %v4480_v0  ;;  %2021 = vmatmul.f32.gmra.mxu2 %v4481_v19  ;;  %v1862_v16 = vadd.f32 %v1861_v2, %v1748_v10  ;;  %v4486_v10 = vld [vmem:[%s8721_s0 + $0x28] sm:$0xff] }
 0x31e   :  { %1908 = vmatmul.f32.gmra.mxu1 %v4482_v3 }
 0x31f   :  { %2134 = vmatmul.f32.gmra.mxu3 %v4483_v54  ;;  %v1974_v6 = vpop.f32.mrf.mxu2 }
 0x320   :  { %v1975_v27 = vadd.f32 %v1974_v6, %v1862_v16  ;;  %v4488_v6 = vld [vmem:[%s8721_s0 + $0x60] sm:$0xff] }
 0x321   :  { %v1751_v47 = vpop.f32.mrf.mxu0 }
 0x322   :  { %v2087_v52 = vpop.f32.mrf.mxu3 }
 0x323   :  { %v6752_v45 = vadd.f32 %v2087_v52, %v1975_v27  ;;  %v1864_v14 = vpop.f32.mrf.mxu1  ;;  %v4489_v27 = vld [vmem:[%s8721_s0 + $0x70] sm:$0xff]  ;;  %v4490_v52 = vld [vmem:[%s8721_s0 + $0x68] sm:$0xff] }
 0x324   :  { %2154 = vmatmul.f32.vlgmr.msrb.gmra.mxu0 %v4484_v59  ;;  %2380 = vmatmul.f32.vlgmr.msrb.gmra.mxu2 %v4485_v49  ;;  %v1865_v63 = vadd.f32 %v1864_v14, %v1751_v47  ;;  %v4491_v14 = vld [vmem:[%s8721_s0 + $0x78] sm:$0xff] }
 0x326   :  { %2267 = vmatmul.f32.vlgmr.msrb.gmra.mxu1 %v4486_v10 }
 0x327   :  { %2493 = vmatmul.f32.vlgmr.msrb.gmra.mxu3 %v4487_v57  ;;  %v1977_v2 = vpop.f32.mrf.mxu2 }
 0x328   :  { %v1978_v0 = vadd.f32 %v1977_v2, %v1865_v63 }
 0x329   :  { %v1754_v19 = vpop.f32.mrf.mxu0 }
 0x32a   :  { %v2090_v16 = vpop.f32.mrf.mxu3 }
 0x32b   :  { %v6766_v3 = vadd.f32 %v2090_v16, %v1978_v0  ;;  %v1867_v54 = vpop.f32.mrf.mxu1  ;;  %v4492_v0 = vld [vmem:[%s8721_s0 + $0xa0] sm:$0xff] }
 0x32c   :  { %2157 = vmatmul.f32.gmra.mxu0 %v4488_v6  ;;  %2383 = vmatmul.f32.gmra.mxu2 %v4489_v27  ;;  %v1868_v47 = vadd.f32 %v1867_v54, %v1754_v19  ;;  %v4493_v19 = vld [vmem:[%s8721_s0 + $0xb0] sm:$0xff]  ;;  %v4494_v54 = vld [vmem:[%s8721_s0 + $0xa8] sm:$0xff]  ;;  %v4495_v6 = vld [vmem:[%s8721_s0 + $0xb8] sm:$0xff] }
 0x32e   :  { %2270 = vmatmul.f32.gmra.mxu1 %v4490_v52 }
 0x32f   :  { %2496 = vmatmul.f32.gmra.mxu3 %v4491_v14  ;;  %v1980_v59 = vpop.f32.mrf.mxu2 }
 0x330   :  { %v1981_v49 = vadd.f32 %v1980_v59, %v1868_v47 }
 0x331   :  { %v1757_v63 = vpop.f32.mrf.mxu0 }
 0x332   :  { %v2093_v10 = vpop.f32.mrf.mxu3 }
 0x333   :  { %v6780_v57 = vadd.f32 %v2093_v10, %v1981_v49  ;;  %v1870_v2 = vpop.f32.mrf.mxu1  ;;  %v4497_v10 = vld [vmem:[%s8721_s0 + $0xf0] sm:$0xff] }
 0x334   :  { %2160 = vmatmul.f32.gmra.mxu0 %v4492_v0  ;;  %2386 = vmatmul.f32.gmra.mxu2 %v4493_v19  ;;  %v1871_v16 = vadd.f32 %v1870_v2, %v1757_v63  ;;  %v4496_v63 = vld [vmem:[%s8721_s0 + $0xe0] sm:$0xff]  ;;  %v4498_v0 = vld [vmem:[%s8721_s0 + $0xe8] sm:$0xff]  ;;  %v4499_v19 = vld [vmem:[%s8721_s0 + $0xf8] sm:$0xff] }
 0x336   :  { %2273 = vmatmul.f32.gmra.mxu1 %v4494_v54 }
 0x337   :  { %2499 = vmatmul.f32.gmra.mxu3 %v4495_v6  ;;  %v1983_v27 = vpop.f32.mrf.mxu2 }
 0x338   :  { %v1984_v47 = vadd.f32 %v1983_v27, %v1871_v16 }
 0x339   :  { %v1760_v52 = vpop.f32.mrf.mxu0 }
 0x33a   :  { %v2096_v14 = vpop.f32.mrf.mxu3 }
 0x33b   :  { %v6794_v59 = vadd.f32 %v2096_v14, %v1984_v47  ;;  %v1873_v49 = vpop.f32.mrf.mxu1 }
 0x33c   :  { %2163 = vmatmul.f32.gmra.mxu0 %v4496_v63  ;;  %2389 = vmatmul.f32.gmra.mxu2 %v4497_v10  ;;  %v1874_v2 = vadd.f32 %v1873_v49, %v1760_v52  ;;  %v4500_v52 = vld [vmem:[%s8721_s0 + $0x120] sm:$0xff]  ;;  %v4501_v49 = vld [vmem:[%s8721_s0 + $0x130] sm:$0xff]  ;;  %v4502_v10 = vld [vmem:[%s8721_s0 + $0x128] sm:$0xff] }
 0x33e   :  { %2276 = vmatmul.f32.gmra.mxu1 %v4498_v0 }
 0x33f   :  { %2502 = vmatmul.f32.gmra.mxu3 %v4499_v19  ;;  %v1986_v16 = vpop.f32.mrf.mxu2 }
 0x340   :  { %v1987_v54 = vadd.f32 %v1986_v16, %v1874_v2  ;;  %v4503_v2 = vld [vmem:[%s8721_s0 + $0x138] sm:$0xff] }
 0x341   :  { %v1763_v6 = vpop.f32.mrf.mxu0 }
 0x342   :  { %v2099_v27 = vpop.f32.mrf.mxu3 }
 0x343   :  { %v6808_v47 = vadd.f32 %v2099_v27, %v1987_v54  ;;  %v1876_v14 = vpop.f32.mrf.mxu1 }
 0x344   :  { %2166 = vmatmul.f32.gmra.mxu0 %v4500_v52  ;;  %2392 = vmatmul.f32.gmra.mxu2 %v4501_v49  ;;  %v1877_v63 = vadd.f32 %v1876_v14, %v1763_v6  ;;  %v4504_v6 = vld [vmem:[%s8721_s0 + $0x160] sm:$0xff]  ;;  %v4505_v14 = vld [vmem:[%s8721_s0 + $0x170] sm:$0xff] }
 0x346   :  { %2279 = vmatmul.f32.gmra.mxu1 %v4502_v10  ;;  %v4507_v10 = vld [vmem:[%s8721_s0 + $0x178] sm:$0xff] }
 0x347   :  { %2505 = vmatmul.f32.gmra.mxu3 %v4503_v2  ;;  %v1989_v0 = vpop.f32.mrf.mxu2 }
 0x348   :  { %v1990_v19 = vadd.f32 %v1989_v0, %v1877_v63  ;;  %v4506_v63 = vld [vmem:[%s8721_s0 + $0x168] sm:$0xff] }
 0x349   :  { %v1766_v16 = vpop.f32.mrf.mxu0 }
 0x34a   :  { %v2102_v54 = vpop.f32.mrf.mxu3 }
 0x34b   :  { %v6822_v27 = vadd.f32 %v2102_v54, %v1990_v19  ;;  %v1879_v52 = vpop.f32.mrf.mxu1 }
 0x34c   :  { %2169 = vmatmul.f32.gmra.mxu0 %v4504_v6  ;;  %2395 = vmatmul.f32.gmra.mxu2 %v4505_v14  ;;  %v1880_v49 = vadd.f32 %v1879_v52, %v1766_v16  ;;  %v4508_v16 = vld [vmem:[%s8721_s0 + $0x1a0] sm:$0xff]  ;;  %v4509_v52 = vld [vmem:[%s8721_s0 + $0x1b0] sm:$0xff] }
 0x34e   :  { %2282 = vmatmul.f32.gmra.mxu1 %v4506_v63  ;;  %v4511_v63 = vld [vmem:[%s8721_s0 + $0x1b8] sm:$0xff] }
 0x34f   :  { %2508 = vmatmul.f32.gmra.mxu3 %v4507_v10  ;;  %v1992_v2 = vpop.f32.mrf.mxu2 }
 0x350   :  { %v1993_v0 = vadd.f32 %v1992_v2, %v1880_v49  ;;  %v4510_v49 = vld [vmem:[%s8721_s0 + $0x1a8] sm:$0xff] }
 0x351   :  { %v1769_v19 = vpop.f32.mrf.mxu0 }
 0x352   :  { %v2105_v54 = vpop.f32.mrf.mxu3 }
 0x353   :  { %v6836_v6 = vadd.f32 %v2105_v54, %v1993_v0  ;;  %v1882_v32 = vpop.f32.mrf.mxu1 }
 0x354   :  { %2172 = vmatmul.f32.gmra.mxu0 %v4508_v16  ;;  %2398 = vmatmul.f32.gmra.mxu2 %v4509_v52  ;;  %v1883_v14 = vadd.f32 %v1882_v32, %v1769_v19  ;;  %v4512_v32 = vld [vmem:[%s8721_s0 + $0x1e0] sm:$0xff]  ;;  %v4513_v19 = vld [vmem:[%s8721_s0 + $0x1f0] sm:$0xff] }
 0x356   :  { %2285 = vmatmul.f32.gmra.mxu1 %v4510_v49  ;;  %v4515_v49 = vld [vmem:[%s8721_s0 + $0x1f8] sm:$0xff] }
 0x357   :  { %2511 = vmatmul.f32.gmra.mxu3 %v4511_v63  ;;  %v1995_v10 = vpop.f32.mrf.mxu2 }
 0x358   :  { %v1996_v2 = vadd.f32 %v1995_v10, %v1883_v14  ;;  %v4514_v14 = vld [vmem:[%s8721_s0 + $0x1e8] sm:$0xff] }
 0x359   :  { %v1772_v0 = vpop.f32.mrf.mxu0 }
 0x35a   :  { %v2108_v54 = vpop.f32.mrf.mxu3 }
 0x35b   :  { %v6850_v16 = vadd.f32 %v2108_v54, %v1996_v2  ;;  %v1885_v18 = vpop.f32.mrf.mxu1 }
 0x35c   :  { %2175 = vmatmul.f32.gmra.mxu0 %v4512_v32  ;;  %2401 = vmatmul.f32.gmra.mxu2 %v4513_v19  ;;  %v1886_v52 = vadd.f32 %v1885_v18, %v1772_v0  ;;  %v4516_v18 = vld [vmem:[%s8721_s0 + $0x220] sm:$0xff]  ;;  %v4517_v0 = vld [vmem:[%s8721_s0 + $0x230] sm:$0xff] }
 0x35e   :  { %2288 = vmatmul.f32.gmra.mxu1 %v4514_v14  ;;  %v4519_v14 = vld [vmem:[%s8721_s0 + $0x238] sm:$0xff] }
 0x35f   :  { %2514 = vmatmul.f32.gmra.mxu3 %v4515_v49  ;;  %v1998_v63 = vpop.f32.mrf.mxu2 }
 0x360   :  { %v1999_v10 = vadd.f32 %v1998_v63, %v1886_v52  ;;  %v4518_v52 = vld [vmem:[%s8721_s0 + $0x228] sm:$0xff] }
 0x361   :  { %v1775_v2 = vpop.f32.mrf.mxu0 }
 0x362   :  { %v2111_v54 = vpop.f32.mrf.mxu3 }
 0x363   :  { %v6864_v32 = vadd.f32 %v2111_v54, %v1999_v10  ;;  %v1888_v48 = vpop.f32.mrf.mxu1 }
 0x364   :  { %2178 = vmatmul.f32.gmra.mxu0 %v4516_v18  ;;  %2404 = vmatmul.f32.gmra.mxu2 %v4517_v0  ;;  %v1889_v19 = vadd.f32 %v1888_v48, %v1775_v2  ;;  %v4520_v48 = vld [vmem:[%s8721_s0 + $0x260] sm:$0xff]  ;;  %v4521_v2 = vld [vmem:[%s8721_s0 + $0x270] sm:$0xff] }
 0x366   :  { %2291 = vmatmul.f32.gmra.mxu1 %v4518_v52  ;;  %v4523_v52 = vld [vmem:[%s8721_s0 + $0x278] sm:$0xff] }
 0x367   :  { %2517 = vmatmul.f32.gmra.mxu3 %v4519_v14  ;;  %v2001_v49 = vpop.f32.mrf.mxu2 }
 0x368   :  { %v2002_v63 = vadd.f32 %v2001_v49, %v1889_v19  ;;  %v4522_v19 = vld [vmem:[%s8721_s0 + $0x268] sm:$0xff] }
 0x369   :  { %v1778_v10 = vpop.f32.mrf.mxu0 }
 0x36a   :  { %v2114_v54 = vpop.f32.mrf.mxu3 }
 0x36b   :  { %v6878_v18 = vadd.f32 %v2114_v54, %v2002_v63  ;;  %v1891_v38 = vpop.f32.mrf.mxu1 }
 0x36c   :  { %2181 = vmatmul.f32.gmra.mxu0 %v4520_v48  ;;  %2407 = vmatmul.f32.gmra.mxu2 %v4521_v2  ;;  %v1892_v0 = vadd.f32 %v1891_v38, %v1778_v10  ;;  %v4524_v38 = vld [vmem:[%s8721_s0 + $0x2a0] sm:$0xff]  ;;  %v4525_v10 = vld [vmem:[%s8721_s0 + $0x2b0] sm:$0xff] }
 0x36e   :  { %2294 = vmatmul.f32.gmra.mxu1 %v4522_v19  ;;  %v4527_v19 = vld [vmem:[%s8721_s0 + $0x2b8] sm:$0xff] }
 0x36f   :  { %2520 = vmatmul.f32.gmra.mxu3 %v4523_v52  ;;  %v2004_v14 = vpop.f32.mrf.mxu2 }
 0x370   :  { %v2005_v49 = vadd.f32 %v2004_v14, %v1892_v0  ;;  %v4526_v0 = vld [vmem:[%s8721_s0 + $0x2a8] sm:$0xff] }
 0x371   :  { %v1781_v63 = vpop.f32.mrf.mxu0 }
 0x372   :  { %v2117_v54 = vpop.f32.mrf.mxu3 }
 0x373   :  { %v6892_v48 = vadd.f32 %v2117_v54, %v2005_v49  ;;  %v1894_v62 = vpop.f32.mrf.mxu1 }
 0x374   :  { %2184 = vmatmul.f32.gmra.mxu0 %v4524_v38  ;;  %2410 = vmatmul.f32.gmra.mxu2 %v4525_v10  ;;  %v1895_v2 = vadd.f32 %v1894_v62, %v1781_v63  ;;  %v4528_v62 = vld [vmem:[%s8721_s0 + $0x2e0] sm:$0xff]  ;;  %v4529_v63 = vld [vmem:[%s8721_s0 + $0x2f0] sm:$0xff] }
 0x376   :  { %2297 = vmatmul.f32.gmra.mxu1 %v4526_v0  ;;  %v4531_v0 = vld [vmem:[%s8721_s0 + $0x2f8] sm:$0xff] }
 0x377   :  { %2523 = vmatmul.f32.gmra.mxu3 %v4527_v19  ;;  %v2007_v52 = vpop.f32.mrf.mxu2 }
 0x378   :  { %v2008_v14 = vadd.f32 %v2007_v52, %v1895_v2  ;;  %v4530_v2 = vld [vmem:[%s8721_s0 + $0x2e8] sm:$0xff] }
 0x379   :  { %v1784_v49 = vpop.f32.mrf.mxu0 }
 0x37a   :  { %v2120_v54 = vpop.f32.mrf.mxu3 }
 0x37b   :  { %v6906_v38 = vadd.f32 %v2120_v54, %v2008_v14  ;;  %v1897_v43 = vpop.f32.mrf.mxu1 }
 0x37c   :  { %2187 = vmatmul.f32.gmra.mxu0 %v4528_v62  ;;  %2413 = vmatmul.f32.gmra.mxu2 %v4529_v63  ;;  %v1898_v10 = vadd.f32 %v1897_v43, %v1784_v49  ;;  %v4532_v43 = vld [vmem:[%s8721_s0 + $0x320] sm:$0xff]  ;;  %v4533_v49 = vld [vmem:[%s8721_s0 + $0x330] sm:$0xff] }
 0x37d   :  { %8825 = vst [vmem:[#allocation30_spill] sm:$0xff] %v6906_v38 }
 0x37e   :  { %2300 = vmatmul.f32.gmra.mxu1 %v4530_v2  ;;  %v4535_v2 = vld [vmem:[%s8721_s0 + $0x338] sm:$0xff] }
 0x37f   :  { %2526 = vmatmul.f32.gmra.mxu3 %v4531_v0  ;;  %v2010_v19 = vpop.f32.mrf.mxu2 }
 0x380   :  { %v2011_v52 = vadd.f32 %v2010_v19, %v1898_v10  ;;  %v4534_v10 = vld [vmem:[%s8721_s0 + $0x328] sm:$0xff] }
 0x381   :  { %v1787_v14 = vpop.f32.mrf.mxu0 }
 0x382   :  { %v2123_v54 = vpop.f32.mrf.mxu3 }
 0x383   :  { %v6920_v62 = vadd.f32 %v2123_v54, %v2011_v52  ;;  %v1900_v38 = vpop.f32.mrf.mxu1 }
 0x384   :  { %2190 = vmatmul.f32.gmra.mxu0 %v4532_v43  ;;  %2416 = vmatmul.f32.gmra.mxu2 %v4533_v49  ;;  %v1901_v63 = vadd.f32 %v1900_v38, %v1787_v14  ;;  %v4536_v38 = vld [vmem:[%s8721_s0 + $0x360] sm:$0xff]  ;;  %v4537_v14 = vld [vmem:[%s8721_s0 + $0x370] sm:$0xff] }
 0x385   :  { %8826 = vst [vmem:[#allocation31_spill] sm:$0xff] %v6920_v62 }
 0x386   :  { %2303 = vmatmul.f32.gmra.mxu1 %v4534_v10  ;;  %v4539_v10 = vld [vmem:[%s8721_s0 + $0x378] sm:$0xff] }
 0x387   :  { %2529 = vmatmul.f32.gmra.mxu3 %v4535_v2  ;;  %v2013_v0 = vpop.f32.mrf.mxu2 }
 0x388   :  { %v2014_v19 = vadd.f32 %v2013_v0, %v1901_v63  ;;  %v4538_v63 = vld [vmem:[%s8721_s0 + $0x368] sm:$0xff] }
 0x389   :  { %v1790_v52 = vpop.f32.mrf.mxu0 }
 0x38a   :  { %v2126_v54 = vpop.f32.mrf.mxu3 }
 0x38b   :  { %v6934_v43 = vadd.f32 %v2126_v54, %v2014_v19  ;;  %v1903_v62 = vpop.f32.mrf.mxu1 }
 0x38c   :  { %2193 = vmatmul.f32.gmra.mxu0 %v4536_v38  ;;  %2419 = vmatmul.f32.gmra.mxu2 %v4537_v14  ;;  %v1904_v49 = vadd.f32 %v1903_v62, %v1790_v52  ;;  %v4540_v62 = vld [vmem:[%s8721_s0 + $0x3a0] sm:$0xff]  ;;  %v4541_v52 = vld [vmem:[%s8721_s0 + $0x3b0] sm:$0xff] }
 0x38d   :  { %8827 = vst [vmem:[#allocation32_spill] sm:$0xff] %v6934_v43 }
 0x38e   :  { %2306 = vmatmul.f32.gmra.mxu1 %v4538_v63  ;;  %v4543_v63 = vld [vmem:[%s8721_s0 + $0x3b8] sm:$0xff] }
 0x38f   :  { %2532 = vmatmul.f32.gmra.mxu3 %v4539_v10  ;;  %v2016_v2 = vpop.f32.mrf.mxu2 }
 0x390   :  { %v2017_v0 = vadd.f32 %v2016_v2, %v1904_v49  ;;  %v4542_v49 = vld [vmem:[%s8721_s0 + $0x3a8] sm:$0xff] }
 0x391   :  { %v1793_v19 = vpop.f32.mrf.mxu0 }
 0x392   :  { %v2129_v54 = vpop.f32.mrf.mxu3 }
 0x393   :  { %v6948_v38 = vadd.f32 %v2129_v54, %v2017_v0  ;;  %v1906_v43 = vpop.f32.mrf.mxu1 }
 0x394   :  { %2196 = vmatmul.f32.gmra.mxu0 %v4540_v62  ;;  %2422 = vmatmul.f32.gmra.mxu2 %v4541_v52  ;;  %v1907_v14 = vadd.f32 %v1906_v43, %v1793_v19  ;;  %v4544_v43 = vld [vmem:[%s8721_s0 + $0x3e0] sm:$0xff]  ;;  %v4545_v19 = vld [vmem:[%s8721_s0 + $0x3f0] sm:$0xff] }
 0x395   :  { %8828 = vst [vmem:[#allocation33_spill] sm:$0xff] %v6948_v38 }
 0x396   :  { %2309 = vmatmul.f32.gmra.mxu1 %v4542_v49  ;;  %v4547_v49 = vld [vmem:[%s8721_s0 + $0x3f8] sm:$0xff] }
 0x397   :  { %2535 = vmatmul.f32.gmra.mxu3 %v4543_v63  ;;  %v2019_v10 = vpop.f32.mrf.mxu2 }
 0x398   :  { %v2020_v2 = vadd.f32 %v2019_v10, %v1907_v14  ;;  %v4546_v14 = vld [vmem:[%s8721_s0 + $0x3e8] sm:$0xff] }
 0x399   :  { %v1796_v0 = vpop.f32.mrf.mxu0 }
 0x39a   :  { %v2132_v54 = vpop.f32.mrf.mxu3 }
 0x39b   :  { %v6962_v62 = vadd.f32 %v2132_v54, %v2020_v2  ;;  %v1909_v38 = vpop.f32.mrf.mxu1 }
 0x39c   :  { %2199 = vmatmul.f32.gmra.mxu0 %v4544_v43  ;;  %2425 = vmatmul.f32.gmra.mxu2 %v4545_v19  ;;  %v1910_v52 = vadd.f32 %v1909_v38, %v1796_v0  ;;  %v4548_v38 = vld [vmem:[%s8721_s0 + $0x420] sm:$0xff]  ;;  %v4549_v0 = vld [vmem:[%s8721_s0 + $0x430] sm:$0xff] }
 0x39d   :  { %8829 = vst [vmem:[#allocation34_spill] sm:$0xff] %v6962_v62 }
 0x39e   :  { %2312 = vmatmul.f32.gmra.mxu1 %v4546_v14 }
 0x39f   :  { %2538 = vmatmul.f32.gmra.mxu3 %v4547_v49  ;;  %v2022_v63 = vpop.f32.mrf.mxu2 }
 0x3a0   :  { %v2023_v10 = vadd.f32 %v2022_v63, %v1910_v52  ;;  %v4550_v52 = vld [vmem:[%s8721_s0 + $0x428] sm:$0xff] }
 0x3a1   :  { %v2155_v2 = vpop.f32.mrf.mxu0 }
 0x3a2   :  { %v2135_v54 = vpop.f32.mrf.mxu3  ;;  %v2156_v43 = vadd.f32 %v2155_v2, %v6482_v25  ;;  %v4551_v25 = vld [vmem:[%s8721_s0 + $0x438] sm:$0xff] }
 0x3a3   :  { %v6977_v62 = vadd.f32 %v2135_v54, %v2023_v10  ;;  %v2268_v19 = vpop.f32.mrf.mxu1 }
 0x3a4   :  { %2202 = vmatmul.f32.gmra.mxu0 %v4548_v38  ;;  %2428 = vmatmul.f32.gmra.mxu2 %v4549_v0  ;;  %v2269_v14 = vadd.f32 %v2268_v19, %v2156_v43  ;;  %v4552_v19 = vld [vmem:[%s8721_s0 + $0x460] sm:$0xff]  ;;  %v4553_v0 = vld [vmem:[%s8721_s0 + $0x470] sm:$0xff] }
 0x3a5   :  { %8830 = vst [vmem:[#allocation35_spill] sm:$0xff] %v6977_v62 }
 0x3a6   :  { %2315 = vmatmul.f32.gmra.mxu1 %v4550_v52 }
 0x3a7   :  { %2541 = vmatmul.f32.gmra.mxu3 %v4551_v25  ;;  %v2381_v49 = vpop.f32.mrf.mxu2  ;;  %v4554_v25 = vld [vmem:[%s8721_s0 + $0x468] sm:$0xff] }
 0x3a8   :  { %v2382_v63 = vadd.f32 %v2381_v49, %v2269_v14 }
 0x3a9   :  { %v2158_v10 = vpop.f32.mrf.mxu0 }
 0x3aa   :  { %v2159_v2 = vadd.f32 %v2158_v10, %v6496_v22  ;;  %v2494_v54 = vpop.f32.mrf.mxu3  ;;  %v4555_v10 = vld [vmem:[%s8721_s0 + $0x478] sm:$0xff] }
 0x3ab   :  { %v6992_v38 = vadd.f32 %v2494_v54, %v2382_v63  ;;  %v2271_v43 = vpop.f32.mrf.mxu1  ;;  %v2751_v63 = vmul.f32 %v5818_v53, %v5818_v53 }
 0x3ac   :  { %2205 = vmatmul.f32.gmra.mxu0 %v4552_v19  ;;  %2431 = vmatmul.f32.gmra.mxu2 %v4553_v0  ;;  %v2272_v52 = vadd.f32 %v2271_v43, %v2159_v2 }
 0x3ad   :  { %8831 = vst [vmem:[#allocation36_spill] sm:$0xff] %v6992_v38  ;;  %v2591_v14 = vsel %vm2590_vm0, %v6992_v38, 0.0  ;;  %v2752_v22 = vmul.f32 %v6992_v38, %v6992_v38 }
 0x3ae   :  { %2318 = vmatmul.f32.gmra.mxu1 %v4554_v25  ;;  %v2592_v49 = vadd.f32 %v2591_v14, %v5818_v53  ;;  %v4556_v53 = vld [vmem:[%s8721_s0 + $0x4a0] sm:$0xff] }
 0x3af   :  { %2544 = vmatmul.f32.gmra.mxu3 %v4555_v10  ;;  %v2384_v54 = vpop.f32.mrf.mxu2  ;;  %v2815_v19 = vsel %vm2590_vm0, %v2752_v22, 0.0  ;;  %v4557_v22 = vld [vmem:[%s8721_s0 + $0x4b0] sm:$0xff] }
 0x3b0   :  { %v2385_v0 = vadd.f32 %v2384_v54, %v2272_v52  ;;  %2593 = vadd.xlane.f32.xlu0 %v2592_v49  ;;  %v2816_v2 = vadd.f32 %v2815_v19, %v2751_v63 }
 0x3b1   :  { %v2161_v43 = vpop.f32.mrf.mxu0 }
 0x3b2   :  { %v2162_v38 = vadd.f32 %v2161_v43, %v6522_v26  ;;  %v2497_v25 = vpop.f32.mrf.mxu3  ;;  %2817 = vadd.xlane.f32.xlu2 %v2816_v2  ;;  %v4558_v26 = vld [vmem:[%s8721_s0 + $0x4a8] sm:$0xff] }
 0x3b3   :  { %v7015_v14 = vadd.f32 %v2497_v25, %v2385_v0  ;;  %v2274_v62 = vpop.f32.mrf.mxu1 }
 0x3b4   :  { %2208 = vmatmul.f32.gmra.mxu0 %v4556_v53  ;;  %2434 = vmatmul.f32.gmra.mxu2 %v4557_v22  ;;  %v2275_v49 = vadd.f32 %v2274_v62, %v2162_v38  ;;  %v4559_v53 = vld [vmem:[%s8721_s0 + $0x4b8] sm:$0xff]  ;;  %v4560_v22 = vld [vmem:[%s8721_s0 + $0x4e0] sm:$0xff] }
 0x3b5   :  { %v2595_v52 = vsel %vm2590_vm0, %v7015_v14, 0.0  ;;  %v2754_v54 = vmul.f32 %v7015_v14, %v7015_v14 }
 0x3b6   :  { %2321 = vmatmul.f32.gmra.mxu1 %v4558_v26  ;;  %v2596_v63 = vadd.f32 %v2595_v52, %v5833_v9  ;;  %v4561_v52 = vld [vmem:[%s8721_s0 + $0x4f0] sm:$0xff] }
 0x3b7   :  { %2547 = vmatmul.f32.gmra.mxu3 %v4559_v53  ;;  %v2387_v10 = vpop.f32.mrf.mxu2  ;;  %v2819_v25 = vsel %vm2590_vm0, %v2754_v54, 0.0  ;;  %v4563_v54 = vld [vmem:[%s8721_s0 + $0x4f8] sm:$0xff] }
 0x3b8   :  { %v2388_v19 = vadd.f32 %v2387_v10, %v2275_v49  ;;  %2597 = vadd.xlane.f32.xlu0 %v2596_v63  ;;  %v2753_v49 = vmul.f32 %v5833_v9, %v5833_v9  ;;  %v4562_v63 = vld [vmem:[%s8721_s0 + $0x4e8] sm:$0xff] }
 0x3b9   :  { %v2164_v0 = vpop.f32.mrf.mxu0 }
 0x3ba   :  { %v2165_v62 = vadd.f32 %v2164_v0, %v6536_v13  ;;  %v2500_v38 = vpop.f32.mrf.mxu3  ;;  %v2820_v10 = vadd.f32 %v2819_v25, %v2753_v49  ;;  %v4564_v49 = vld [vmem:[%s8721_s0 + $0x520] sm:$0xff] }
 0x3bb   :  { %v7035_v2 = vadd.f32 %v2500_v38, %v2388_v19  ;;  %v2277_v43 = vpop.f32.mrf.mxu1 }
 0x3bc   :  { %2211 = vmatmul.f32.gmra.mxu0 %v4560_v22  ;;  %2437 = vmatmul.f32.gmra.mxu2 %v4561_v52  ;;  %v2278_v26 = vadd.f32 %v2277_v43, %v2165_v62 }
 0x3bd   :  { %8832 = vst [vmem:[#allocation37_spill] sm:$0xff] %v7035_v2  ;;  %v2599_v13 = vsel %vm2590_vm0, %v7035_v2, 0.0  ;;  %v2756_v0 = vmul.f32 %v7035_v2, %v7035_v2 }
 0x3be   :  { %2324 = vmatmul.f32.gmra.mxu1 %v4562_v63  ;;  %v2600_v53 = vadd.f32 %v2599_v13, %v5860_v44  ;;  %v2755_v63 = vmul.f32 %v5860_v44, %v5860_v44 }
 0x3bf   :  { %2550 = vmatmul.f32.gmra.mxu3 %v4563_v54  ;;  %v2390_v19 = vpop.f32.mrf.mxu2  ;;  %v2823_v25 = vsel %vm2590_vm0, %v2756_v0, 0.0  ;;  %v4567_v0 = vld [vmem:[%s8721_s0 + $0x538] sm:$0xff] }
 0x3c0   :  { %v2391_v38 = vadd.f32 %v2390_v19, %v2278_v26  ;;  %2601 = vadd.xlane.f32.xlu1 %v2600_v53  ;;  %2821 = vadd.xlane.f32.xlu0 %v2820_v10  ;;  %v4565_v26 = vld [vmem:[%s8721_s0 + $0x530] sm:$0xff]  ;;  %v4566_v10 = vld [vmem:[%s8721_s0 + $0x528] sm:$0xff]  ;;  %v2824_v54 = vadd.f32 %v2823_v25, %v2755_v63  ;;  %v2757_v19 = vmul.f32 %v5875_v4, %v5875_v4 }
 0x3c1   :  { %v2167_v62 = vpop.f32.mrf.mxu0 }
 0x3c2   :  { %v2168_v43 = vadd.f32 %v2167_v62, %v6562_v30  ;;  %v2503_v22 = vpop.f32.mrf.mxu3 }
 0x3c3   :  { %v7058_v52 = vadd.f32 %v2503_v22, %v2391_v38  ;;  %v2280_v13 = vpop.f32.mrf.mxu1 }
 0x3c4   :  { %2214 = vmatmul.f32.gmra.mxu0 %v4564_v49  ;;  %2440 = vmatmul.f32.gmra.mxu2 %v4565_v26  ;;  %v2281_v53 = vadd.f32 %v2280_v13, %v2168_v43 }
 0x3c5   :  { %v2758_v30 = vmul.f32 %v7058_v52, %v7058_v52 }
 0x3c6   :  { %2327 = vmatmul.f32.gmra.mxu1 %v4566_v10  ;;  %v2603_v10 = vsel %vm2590_vm0, %v7058_v52, 0.0 }
 0x3c7   :  { %2553 = vmatmul.f32.gmra.mxu3 %v4567_v0  ;;  %v2393_v38 = vpop.f32.mrf.mxu2  ;;  %v2827_v62 = vsel %vm2590_vm0, %v2758_v30, 0.0  ;;  %v4568_v0 = vld [vmem:[%s8721_s0 + $0x560] sm:$0xff]  ;;  %v4569_v30 = vld [vmem:[%s8721_s0 + $0x570] sm:$0xff] }
 0x3c8   :  { %v2394_v22 = vadd.f32 %v2393_v38, %v2281_v53  ;;  %2825 = vadd.xlane.f32.xlu1 %v2824_v54  ;;  %v2828_v43 = vadd.f32 %v2827_v62, %v2757_v19  ;;  %v4570_v19 = vld [vmem:[%s8721_s0 + $0x568] sm:$0xff]  ;;  %v2604_v38 = vadd.f32 %v2603_v10, %v5875_v4  ;;  %v2759_v62 = vmul.f32 %v5902_v39, %v5902_v39 }
 0x3c9   :  { %v2170_v13 = vpop.f32.mrf.mxu0 }
 0x3ca   :  { %v2171_v49 = vadd.f32 %v2170_v13, %v6576_v56  ;;  %v2506_v26 = vpop.f32.mrf.mxu3  ;;  %2829 = vadd.xlane.f32.xlu2 %v2828_v43 }
 0x3cb   :  { %v7081_v25 = vadd.f32 %v2506_v26, %v2394_v22  ;;  %v2283_v63 = vpop.f32.mrf.mxu1  ;;  %v4571_v22 = vld [vmem:[%s8721_s0 + $0x578] sm:$0xff] }
 0x3cc   :  { %2217 = vmatmul.f32.gmra.mxu0 %v4568_v0  ;;  %2443 = vmatmul.f32.gmra.mxu2 %v4569_v30  ;;  %v2284_v54 = vadd.f32 %v2283_v63, %v2171_v49 }
 0x3cd   :  { %8833 = vst [vmem:[#allocation38_spill] sm:$0xff] %v7081_v25  ;;  %v2607_v56 = vsel %vm2590_vm0, %v7081_v25, 0.0  ;;  %v2760_v53 = vmul.f32 %v7081_v25, %v7081_v25 }
 0x3ce   :  { %2330 = vmatmul.f32.gmra.mxu1 %v4570_v19  ;;  %v2608_v49 = vadd.f32 %v2607_v56, %v5902_v39 }
 0x3cf   :  { %2556 = vmatmul.f32.gmra.mxu3 %v4571_v22  ;;  %v2396_v43 = vpop.f32.mrf.mxu2  ;;  %v2831_v13 = vsel %vm2590_vm0, %v2760_v53, 0.0  ;;  %v4572_v22 = vld [vmem:[%s8721_s0 + $0x5a0] sm:$0xff]  ;;  %v4573_v53 = vld [vmem:[%s8721_s0 + $0x5b0] sm:$0xff] }
 0x3d0   :  { %v2397_v26 = vadd.f32 %v2396_v43, %v2284_v54  ;;  %2605 = vadd.xlane.f32.xlu1 %v2604_v38  ;;  %v2832_v63 = vadd.f32 %v2831_v13, %v2759_v62  ;;  %v4574_v38 = vld [vmem:[%s8721_s0 + $0x5a8] sm:$0xff]  ;;  %v2761_v62 = vmul.f32 %v5917_v60, %v5917_v60  ;;  %v4575_v43 = vld [vmem:[%s8721_s0 + $0x5b8] sm:$0xff] }
 0x3d1   :  { %v2173_v0 = vpop.f32.mrf.mxu0 }
 0x3d2   :  { %v2174_v30 = vadd.f32 %v2173_v0, %v6602_v29  ;;  %v2509_v10 = vpop.f32.mrf.mxu3  ;;  %2609 = vadd.xlane.f32.xlu2 %v2608_v49  ;;  %2833 = vadd.xlane.f32.xlu0 %v2832_v63 }
 0x3d3   :  { %v7107_v19 = vadd.f32 %v2509_v10, %v2397_v26  ;;  %v2286_v25 = vpop.f32.mrf.mxu1 }
 0x3d4   :  { %2220 = vmatmul.f32.gmra.mxu0 %v4572_v22  ;;  %2446 = vmatmul.f32.gmra.mxu2 %v4573_v53  ;;  %v2287_v54 = vadd.f32 %v2286_v25, %v2174_v30 }
 0x3d5   :  { %8834 = vst [vmem:[#allocation39_spill] sm:$0xff] %v7107_v19  ;;  %v2762_v56 = vmul.f32 %v7107_v19, %v7107_v19  ;;  %v2611_v29 = vsel %vm2590_vm0, %v7107_v19, 0.0 }
 0x3d6   :  { %2333 = vmatmul.f32.gmra.mxu1 %v4574_v38  ;;  %v2612_v25 = vadd.f32 %v2611_v29, %v5917_v60  ;;  %v4576_v38 = vld [vmem:[%s8721_s0 + $0x5e0] sm:$0xff] }
 0x3d7   :  { %2559 = vmatmul.f32.gmra.mxu3 %v4575_v43  ;;  %v2399_v13 = vpop.f32.mrf.mxu2  ;;  %v2835_v26 = vsel %vm2590_vm0, %v2762_v56, 0.0  ;;  %v4577_v56 = vld [vmem:[%s8721_s0 + $0x5f0] sm:$0xff] }
 0x3d8   :  { %v2400_v49 = vadd.f32 %v2399_v13, %v2287_v54  ;;  %v2836_v63 = vadd.f32 %v2835_v26, %v2761_v62  ;;  %v4578_v62 = vld [vmem:[%s8721_s0 + $0x5e8] sm:$0xff]  ;;  %v2763_v13 = vmul.f32 %v5944_v35, %v5944_v35  ;;  %v4579_v26 = vld [vmem:[%s8721_s0 + $0x5f8] sm:$0xff] }
 0x3d9   :  { %v2176_v0 = vpop.f32.mrf.mxu0 }
 0x3da   :  { %v2177_v30 = vadd.f32 %v2176_v0, %v6616_v61  ;;  %v2512_v10 = vpop.f32.mrf.mxu3  ;;  %2837 = vadd.xlane.f32.xlu1 %v2836_v63  ;;  %2613 = vadd.xlane.f32.xlu2 %v2612_v25 }
 0x3db   :  { %v7130_v22 = vadd.f32 %v2512_v10, %v2400_v49  ;;  %v2289_v53 = vpop.f32.mrf.mxu1 }
 0x3dc   :  { %2223 = vmatmul.f32.gmra.mxu0 %v4576_v38  ;;  %2449 = vmatmul.f32.gmra.mxu2 %v4577_v56  ;;  %v2290_v54 = vadd.f32 %v2289_v53, %v2177_v30 }
 0x3dd   :  { %v2615_v29 = vsel %vm2590_vm0, %v7130_v22, 0.0  ;;  %v2764_v61 = vmul.f32 %v7130_v22, %v7130_v22 }
 0x3de   :  { %2336 = vmatmul.f32.gmra.mxu1 %v4578_v62  ;;  %v2616_v43 = vadd.f32 %v2615_v29, %v5944_v35  ;;  %v4580_v29 = vld [vmem:[%s8721_s0 + $0x620] sm:$0xff] }
 0x3df   :  { %2562 = vmatmul.f32.gmra.mxu3 %v4579_v26  ;;  %v2402_v49 = vpop.f32.mrf.mxu2  ;;  %v2839_v63 = vsel %vm2590_vm0, %v2764_v61, 0.0  ;;  %v4581_v61 = vld [vmem:[%s8721_s0 + $0x630] sm:$0xff]  ;;  %v2765_v26 = vmul.f32 %v5959_v58, %v5959_v58 }
 0x3e0   :  { %v2403_v25 = vadd.f32 %v2402_v49, %v2290_v54  ;;  %2617 = vadd.xlane.f32.xlu0 %v2616_v43  ;;  %v2840_v0 = vadd.f32 %v2839_v63, %v2763_v13  ;;  %v4582_v43 = vld [vmem:[%s8721_s0 + $0x628] sm:$0xff]  ;;  %v4583_v49 = vld [vmem:[%s8721_s0 + $0x638] sm:$0xff] }
 0x3e1   :  { %v2179_v30 = vpop.f32.mrf.mxu0 }
 0x3e2   :  { %v2180_v10 = vadd.f32 %v2179_v30, %v6642_v15  ;;  %v2515_v53 = vpop.f32.mrf.mxu3  ;;  %2841 = vadd.xlane.f32.xlu2 %v2840_v0 }
 0x3e3   :  { %v7153_v38 = vadd.f32 %v2515_v53, %v2403_v25  ;;  %v2292_v56 = vpop.f32.mrf.mxu1 }
 0x3e4   :  { %2226 = vmatmul.f32.gmra.mxu0 %v4580_v29  ;;  %2452 = vmatmul.f32.gmra.mxu2 %v4581_v61  ;;  %v2293_v62 = vadd.f32 %v2292_v56, %v2180_v10 }
 0x3e5   :  { %8835 = vst [vmem:[#allocation40_spill] sm:$0xff] %v7153_v38  ;;  %v2619_v54 = vsel %vm2590_vm0, %v7153_v38, 0.0  ;;  %v2766_v15 = vmul.f32 %v7153_v38, %v7153_v38 }
 0x3e6   :  { %2339 = vmatmul.f32.gmra.mxu1 %v4582_v43  ;;  %v2620_v13 = vadd.f32 %v2619_v54, %v5959_v58  ;;  %v4584_v54 = vld [vmem:[%s8721_s0 + $0x660] sm:$0xff] }
 0x3e7   :  { %2565 = vmatmul.f32.gmra.mxu3 %v4583_v49  ;;  %v2405_v63 = vpop.f32.mrf.mxu2  ;;  %v2843_v25 = vsel %vm2590_vm0, %v2766_v15, 0.0  ;;  %v4585_v15 = vld [vmem:[%s8721_s0 + $0x670] sm:$0xff]  ;;  %v2767_v49 = vmul.f32 %v5986_v28, %v5986_v28 }
 0x3e8   :  { %v2406_v0 = vadd.f32 %v2405_v63, %v2293_v62  ;;  %2621 = vadd.xlane.f32.xlu1 %v2620_v13  ;;  %v2844_v30 = vadd.f32 %v2843_v25, %v2765_v26  ;;  %v4586_v13 = vld [vmem:[%s8721_s0 + $0x668] sm:$0xff]  ;;  %v4587_v63 = vld [vmem:[%s8721_s0 + $0x678] sm:$0xff] }
 0x3e9   :  { %v2182_v10 = vpop.f32.mrf.mxu0 }
 0x3ea   :  { %v2183_v53 = vadd.f32 %v2182_v10, %v6656_v42  ;;  %v2518_v56 = vpop.f32.mrf.mxu3  ;;  %2845 = vadd.xlane.f32.xlu0 %v2844_v30 }
 0x3eb   :  { %v7176_v29 = vadd.f32 %v2518_v56, %v2406_v0  ;;  %v2295_v61 = vpop.f32.mrf.mxu1 }
 0x3ec   :  { %2229 = vmatmul.f32.gmra.mxu0 %v4584_v54  ;;  %2455 = vmatmul.f32.gmra.mxu2 %v4585_v15  ;;  %v2296_v43 = vadd.f32 %v2295_v61, %v2183_v53 }
 0x3ed   :  { %8836 = vst [vmem:[#allocation41_spill] sm:$0xff] %v7176_v29  ;;  %v2623_v62 = vsel %vm2590_vm0, %v7176_v29, 0.0  ;;  %v2768_v42 = vmul.f32 %v7176_v29, %v7176_v29 }
 0x3ee   :  { %2342 = vmatmul.f32.gmra.mxu1 %v4586_v13  ;;  %v2624_v26 = vadd.f32 %v2623_v62, %v5986_v28  ;;  %v4588_v62 = vld [vmem:[%s8721_s0 + $0x6a0] sm:$0xff] }
 0x3ef   :  { %2568 = vmatmul.f32.gmra.mxu3 %v4587_v63  ;;  %v2408_v25 = vpop.f32.mrf.mxu2  ;;  %v2847_v0 = vsel %vm2590_vm0, %v2768_v42, 0.0  ;;  %v4589_v42 = vld [vmem:[%s8721_s0 + $0x6b0] sm:$0xff]  ;;  %v2769_v63 = vmul.f32 %v6001_v55, %v6001_v55 }
 0x3f0   :  { %v2409_v30 = vadd.f32 %v2408_v25, %v2296_v43  ;;  %2625 = vadd.xlane.f32.xlu2 %v2624_v26  ;;  %v2848_v10 = vadd.f32 %v2847_v0, %v2767_v49  ;;  %v4590_v26 = vld [vmem:[%s8721_s0 + $0x6a8] sm:$0xff]  ;;  %v4591_v25 = vld [vmem:[%s8721_s0 + $0x6b8] sm:$0xff] }
 0x3f1   :  { %v2185_v53 = vpop.f32.mrf.mxu0 }
 0x3f2   :  { %v2186_v56 = vadd.f32 %v2185_v53, %v6682_v7  ;;  %v2521_v61 = vpop.f32.mrf.mxu3  ;;  %2849 = vadd.xlane.f32.xlu1 %v2848_v10 }
 0x3f3   :  { %v7199_v54 = vadd.f32 %v2521_v61, %v2409_v30  ;;  %v2298_v15 = vpop.f32.mrf.mxu1 }
 0x3f4   :  { %2232 = vmatmul.f32.gmra.mxu0 %v4588_v62  ;;  %2458 = vmatmul.f32.gmra.mxu2 %v4589_v42  ;;  %v2299_v13 = vadd.f32 %v2298_v15, %v2186_v56 }
 0x3f5   :  { %8837 = vst [vmem:[#allocation42_spill] sm:$0xff] %v7199_v54  ;;  %v2627_v43 = vsel %vm2590_vm0, %v7199_v54, 0.0  ;;  %v2770_v7 = vmul.f32 %v7199_v54, %v7199_v54 }
 0x3f6   :  { %2345 = vmatmul.f32.gmra.mxu1 %v4590_v26  ;;  %v2628_v49 = vadd.f32 %v2627_v43, %v6001_v55  ;;  %v4592_v43 = vld [vmem:[%s8721_s0 + $0x6e0] sm:$0xff] }
 0x3f7   :  { %2571 = vmatmul.f32.gmra.mxu3 %v4591_v25  ;;  %v2411_v0 = vpop.f32.mrf.mxu2  ;;  %v2851_v30 = vsel %vm2590_vm0, %v2770_v7, 0.0  ;;  %v4593_v7 = vld [vmem:[%s8721_s0 + $0x6f0] sm:$0xff]  ;;  %v2771_v25 = vmul.f32 %v6028_v24, %v6028_v24 }
 0x3f8   :  { %v2412_v10 = vadd.f32 %v2411_v0, %v2299_v13  ;;  %2629 = vadd.xlane.f32.xlu0 %v2628_v49  ;;  %v2852_v53 = vadd.f32 %v2851_v30, %v2769_v63  ;;  %v4594_v49 = vld [vmem:[%s8721_s0 + $0x6e8] sm:$0xff]  ;;  %v4595_v0 = vld [vmem:[%s8721_s0 + $0x6f8] sm:$0xff] }
 0x3f9   :  { %v2188_v56 = vpop.f32.mrf.mxu0 }
 0x3fa   :  { %v2189_v61 = vadd.f32 %v2188_v56, %v6696_v50  ;;  %v2524_v15 = vpop.f32.mrf.mxu3  ;;  %2853 = vadd.xlane.f32.xlu2 %v2852_v53 }
 0x3fb   :  { %v7222_v62 = vadd.f32 %v2524_v15, %v2412_v10  ;;  %v2301_v42 = vpop.f32.mrf.mxu1 }
 0x3fc   :  { %2235 = vmatmul.f32.gmra.mxu0 %v4592_v43  ;;  %2461 = vmatmul.f32.gmra.mxu2 %v4593_v7  ;;  %v2302_v26 = vadd.f32 %v2301_v42, %v2189_v61 }
 0x3fd   :  { %8838 = vst [vmem:[#allocation43_spill] sm:$0xff] %v7222_v62  ;;  %v2631_v13 = vsel %vm2590_vm0, %v7222_v62, 0.0  ;;  %v2772_v50 = vmul.f32 %v7222_v62, %v7222_v62 }
 0x3fe   :  { %2348 = vmatmul.f32.gmra.mxu1 %v4594_v49  ;;  %v2632_v63 = vadd.f32 %v2631_v13, %v6028_v24  ;;  %v4596_v13 = vld [vmem:[%s8721_s0 + $0x720] sm:$0xff] }
 0x3ff   :  { %2574 = vmatmul.f32.gmra.mxu3 %v4595_v0  ;;  %v2414_v30 = vpop.f32.mrf.mxu2  ;;  %v2855_v10 = vsel %vm2590_vm0, %v2772_v50, 0.0  ;;  %v4597_v50 = vld [vmem:[%s8721_s0 + $0x730] sm:$0xff]  ;;  %v2773_v0 = vmul.f32 %v6043_v46, %v6043_v46 }
 0x400   :  { %v2415_v53 = vadd.f32 %v2414_v30, %v2302_v26  ;;  %2633 = vadd.xlane.f32.xlu1 %v2632_v63  ;;  %v2856_v56 = vadd.f32 %v2855_v10, %v2771_v25  ;;  %v4598_v63 = vld [vmem:[%s8721_s0 + $0x728] sm:$0xff]  ;;  %v4599_v30 = vld [vmem:[%s8721_s0 + $0x738] sm:$0xff] }
 0x401   :  { %v2191_v61 = vpop.f32.mrf.mxu0 }
 0x402   :  { %v2192_v15 = vadd.f32 %v2191_v61, %v6710_v21  ;;  %v2527_v42 = vpop.f32.mrf.mxu3  ;;  %2857 = vadd.xlane.f32.xlu0 %v2856_v56 }
 0x403   :  { %v7245_v43 = vadd.f32 %v2527_v42, %v2415_v53  ;;  %v2304_v7 = vpop.f32.mrf.mxu1 }
 0x404   :  { %2238 = vmatmul.f32.gmra.mxu0 %v4596_v13  ;;  %2464 = vmatmul.f32.gmra.mxu2 %v4597_v50  ;;  %v2305_v49 = vadd.f32 %v2304_v7, %v2192_v15 }
 0x405   :  { %8839 = vst [vmem:[#allocation44_spill] sm:$0xff] %v7245_v43  ;;  %v2635_v26 = vsel %vm2590_vm0, %v7245_v43, 0.0  ;;  %v2774_v21 = vmul.f32 %v7245_v43, %v7245_v43 }
 0x406   :  { %2351 = vmatmul.f32.gmra.mxu1 %v4598_v63  ;;  %v2636_v25 = vadd.f32 %v2635_v26, %v6043_v46  ;;  %v4600_v26 = vld [vmem:[%s8721_s0 + $0x760] sm:$0xff] }
 0x407   :  { %2577 = vmatmul.f32.gmra.mxu3 %v4599_v30  ;;  %v2417_v10 = vpop.f32.mrf.mxu2  ;;  %v2859_v53 = vsel %vm2590_vm0, %v2774_v21, 0.0  ;;  %v4601_v21 = vld [vmem:[%s8721_s0 + $0x770] sm:$0xff]  ;;  %v2775_v30 = vmul.f32 %v6070_v20, %v6070_v20 }
 0x408   :  { %v2418_v56 = vadd.f32 %v2417_v10, %v2305_v49  ;;  %2637 = vadd.xlane.f32.xlu2 %v2636_v25  ;;  %v2860_v61 = vadd.f32 %v2859_v53, %v2773_v0  ;;  %v4602_v25 = vld [vmem:[%s8721_s0 + $0x768] sm:$0xff]  ;;  %v4603_v10 = vld [vmem:[%s8721_s0 + $0x778] sm:$0xff] }
 0x409   :  { %v2194_v15 = vpop.f32.mrf.mxu0 }
 0x40a   :  { %v2195_v42 = vadd.f32 %v2194_v15, %v6724_v36  ;;  %v2530_v7 = vpop.f32.mrf.mxu3  ;;  %2861 = vadd.xlane.f32.xlu1 %v2860_v61 }
 0x40b   :  { %v7268_v13 = vadd.f32 %v2530_v7, %v2418_v56  ;;  %v2307_v50 = vpop.f32.mrf.mxu1 }
 0x40c   :  { %2241 = vmatmul.f32.gmra.mxu0 %v4600_v26  ;;  %2467 = vmatmul.f32.gmra.mxu2 %v4601_v21  ;;  %v2308_v63 = vadd.f32 %v2307_v50, %v2195_v42 }
 0x40d   :  { %8840 = vst [vmem:[#allocation45_spill] sm:$0xff] %v7268_v13  ;;  %v2639_v49 = vsel %vm2590_vm0, %v7268_v13, 0.0  ;;  %v2776_v36 = vmul.f32 %v7268_v13, %v7268_v13 }
 0x40e   :  { %2354 = vmatmul.f32.gmra.mxu1 %v4602_v25  ;;  %v2640_v0 = vadd.f32 %v2639_v49, %v6070_v20  ;;  %v4604_v49 = vld [vmem:[%s8721_s0 + $0x7a0] sm:$0xff] }
 0x40f   :  { %2580 = vmatmul.f32.gmra.mxu3 %v4603_v10  ;;  %v2420_v53 = vpop.f32.mrf.mxu2  ;;  %v2863_v56 = vsel %vm2590_vm0, %v2776_v36, 0.0  ;;  %v4605_v36 = vld [vmem:[%s8721_s0 + $0x7b0] sm:$0xff]  ;;  %v2777_v10 = vmul.f32 %v6085_v41, %v6085_v41 }
 0x410   :  { %v2421_v61 = vadd.f32 %v2420_v53, %v2308_v63  ;;  %2641 = vadd.xlane.f32.xlu0 %v2640_v0  ;;  %v2864_v15 = vadd.f32 %v2863_v56, %v2775_v30  ;;  %v4606_v0 = vld [vmem:[%s8721_s0 + $0x7a8] sm:$0xff]  ;;  %v4607_v53 = vld [vmem:[%s8721_s0 + $0x7b8] sm:$0xff] }
 0x411   :  { %v2197_v42 = vpop.f32.mrf.mxu0 }
 0x412   :  { %v2198_v7 = vadd.f32 %v2197_v42, %v6738_v11  ;;  %v2533_v50 = vpop.f32.mrf.mxu3  ;;  %2865 = vadd.xlane.f32.xlu2 %v2864_v15 }
 0x413   :  { %v7291_v26 = vadd.f32 %v2533_v50, %v2421_v61  ;;  %v2310_v21 = vpop.f32.mrf.mxu1 }
 0x414   :  { %2244 = vmatmul.f32.gmra.mxu0 %v4604_v49  ;;  %2470 = vmatmul.f32.gmra.mxu2 %v4605_v36  ;;  %v2311_v25 = vadd.f32 %v2310_v21, %v2198_v7 }
 0x415   :  { %8841 = vst [vmem:[#allocation46_spill] sm:$0xff] %v7291_v26  ;;  %v2643_v63 = vsel %vm2590_vm0, %v7291_v26, 0.0  ;;  %v2778_v11 = vmul.f32 %v7291_v26, %v7291_v26 }
 0x416   :  { %2357 = vmatmul.f32.gmra.mxu1 %v4606_v0  ;;  %v2644_v30 = vadd.f32 %v2643_v63, %v6085_v41  ;;  %v4608_v63 = vld [vmem:[%s8721_s0 + $0x7e0] sm:$0xff] }
 0x417   :  { %2583 = vmatmul.f32.gmra.mxu3 %v4607_v53  ;;  %v2423_v56 = vpop.f32.mrf.mxu2  ;;  %v2867_v61 = vsel %vm2590_vm0, %v2778_v11, 0.0  ;;  %v4609_v11 = vld [vmem:[%s8721_s0 + $0x7f0] sm:$0xff]  ;;  %v2779_v53 = vmul.f32 %v6112_v17, %v6112_v17 }
 0x418   :  { %v2424_v15 = vadd.f32 %v2423_v56, %v2311_v25  ;;  %2645 = vadd.xlane.f32.xlu1 %v2644_v30  ;;  %v2868_v42 = vadd.f32 %v2867_v61, %v2777_v10  ;;  %v4610_v30 = vld [vmem:[%s8721_s0 + $0x7e8] sm:$0xff]  ;;  %v4611_v56 = vld [vmem:[%s8721_s0 + $0x7f8] sm:$0xff] }
 0x419   :  { %v2200_v7 = vpop.f32.mrf.mxu0 }
 0x41a   :  { %v2201_v50 = vadd.f32 %v2200_v7, %v6752_v45  ;;  %v2536_v21 = vpop.f32.mrf.mxu3  ;;  %2869 = vadd.xlane.f32.xlu0 %v2868_v42 }
 0x41b   :  { %v7314_v49 = vadd.f32 %v2536_v21, %v2424_v15  ;;  %v2313_v36 = vpop.f32.mrf.mxu1 }
 0x41c   :  { %2247 = vmatmul.f32.gmra.mxu0 %v4608_v63  ;;  %2473 = vmatmul.f32.gmra.mxu2 %v4609_v11  ;;  %v2314_v0 = vadd.f32 %v2313_v36, %v2201_v50 }
 0x41d   :  { %8842 = vst [vmem:[#allocation47_spill] sm:$0xff] %v7314_v49  ;;  %v2647_v25 = vsel %vm2590_vm0, %v7314_v49, 0.0  ;;  %v2780_v45 = vmul.f32 %v7314_v49, %v7314_v49 }
 0x41e   :  { %2360 = vmatmul.f32.gmra.mxu1 %v4610_v30  ;;  %v2648_v10 = vadd.f32 %v2647_v25, %v6112_v17 }
 0x41f   :  { %2586 = vmatmul.f32.gmra.mxu3 %v4611_v56  ;;  %v2426_v61 = vpop.f32.mrf.mxu2  ;;  %v2871_v15 = vsel %vm2590_vm0, %v2780_v45, 0.0  ;;  %v2781_v45 = vmul.f32 %v6121_v31, %v6121_v31 }
 0x420   :  { %v2427_v42 = vadd.f32 %v2426_v61, %v2314_v0  ;;  %2649 = vadd.xlane.f32.xlu2 %v2648_v10  ;;  %v2872_v7 = vadd.f32 %v2871_v15, %v2779_v53 }
 0x421   :  { %v2203_v50 = vpop.f32.mrf.mxu0 }
 0x422   :  { %v2204_v21 = vadd.f32 %v2203_v50, %v6766_v3  ;;  %v2539_v36 = vpop.f32.mrf.mxu3  ;;  %2873 = vadd.xlane.f32.xlu1 %v2872_v7 }
 0x423   :  { %v7337_v63 = vadd.f32 %v2539_v36, %v2427_v42  ;;  %v2594_v11 = vpop.xlane.xlu0 %2593  ;;  %v2316_v25 = vpop.f32.mrf.mxu1 }
 0x424   :  { %v7339_v30 = vmul.f32 0.0051020407, %v2594_v11  ;;  %v2317_v10 = vadd.f32 %v2316_v25, %v2204_v21 }
 0x425   :  { %8843 = vst [vmem:[#allocation48_spill] sm:$0xff] %v7337_v63  ;;  %v2818_v49 = vpop.xlane.xlu2 %2817  ;;  %v2651_v56 = vsel %vm2590_vm0, %v7337_v63, 0.0  ;;  %v2782_v0 = vmul.f32 %v7337_v63, %v7337_v63 }
 0x426   :  { %v2975_v3 = vmul.f32 %v7339_v30, %v7339_v30  ;;  %v2943_v53 = vmul.f32 0.0051020407, %v2818_v49  ;;  %v2652_v61 = vadd.f32 %v2651_v56, %v6121_v31 }
 0x427   :  { %v2429_v15 = vpop.f32.mrf.mxu2  ;;  %v2875_v42 = vsel %vm2590_vm0, %v2782_v0, 0.0 }
 0x428   :  { %v3007_v7 = vsub.f32 %v2943_v53, %v2975_v3  ;;  %v2430_v50 = vadd.f32 %v2429_v15, %v2317_v10  ;;  %2653 = vadd.xlane.f32.xlu0 %v2652_v61  ;;  %v2876_v36 = vadd.f32 %v2875_v42, %v2781_v45 }
 0x429   :  { %v2206_v11 = vpop.f32.mrf.mxu0 }
 0x42a   :  { %v3039_v17 = vmax.f32 %v3007_v7, 0.0  ;;  %v2207_v26 = vadd.f32 %v2206_v11, %v6780_v57  ;;  %v2542_v41 = vpop.f32.mrf.mxu3  ;;  %2877 = vadd.xlane.f32.xlu2 %v2876_v36  ;;  %v2783_v57 = vmul.f32 %v6148_v34, %v6148_v34 }
 0x42b   :  { %v7352_v62 = vadd.f32 %v2542_v41, %v2430_v50  ;;  %v2598_v24 = vpop.xlane.xlu0 %2597  ;;  %v2319_v21 = vpop.f32.mrf.mxu1 }
 0x42c   :  { %v7354_v49 = vadd.f32 1e-05, %v3039_v17  ;;  %v2320_v45 = vadd.f32 %v2319_v21, %v2207_v26  ;;  %v7365_v10 = vmul.f32 0.0051020407, %v2598_v24 }
 0x42d   :  { %8844 = vst [vmem:[#allocation49_spill] sm:$0xff] %v7352_v62  ;;  %v2655_v25 = vsel %vm2590_vm0, %v7352_v62, 0.0  ;;  %v2784_v56 = vmul.f32 %v7352_v62, %v7352_v62 }
 0x42e   :  { %4292 = vrsqrt.f32 %v7354_v49  ;;  %v2656_v0 = vadd.f32 %v2655_v25, %v6148_v34  ;;  %v2976_v36 = vmul.f32 %v7365_v10, %v7365_v10  ;;  %v8742_v25 = vmov 0  }
 0x42f   :  { %v2432_v41 = vpop.f32.mrf.mxu2  ;;  %v2879_v3 = vsel %vm2590_vm0, %v2784_v56, 0.0  ;;  %4262 = vset.pattern.permute.xlu0 %v8742_v25  ;;  %4263 = vset.pattern.permute.xlu2 %v8742_v25  ;;  %vm3109_vm2 = vweird.f32 %v7354_v49 }
 0x430   :  { %v2433_v17 = vadd.f32 %v2432_v41, %v2320_v45  ;;  %2657 = vadd.xlane.f32.xlu1 %v2656_v0  ;;  %v2880_v53 = vadd.f32 %v2879_v3, %v2783_v57 }
 0x431   :  { %v2209_v61 = vpop.f32.mrf.mxu0  ;;  %4264 = vset.pattern.permute.xlu1 %v8742_v25 }
 0x432   :  { %v2210_v15 = vadd.f32 %v2209_v61, %v6794_v59  ;;  %v2545_v42 = vpop.f32.mrf.mxu3  ;;  %2881 = vadd.xlane.f32.xlu0 %v2880_v53  ;;  %v2785_v59 = vmul.f32 %v6163_v37, %v6163_v37 }
 0x433   :  { %v7368_v7 = vadd.f32 %v2545_v42, %v2433_v17  ;;  %v2822_v26 = vpop.xlane.xlu0 %2821  ;;  %v2322_v21 = vpop.f32.mrf.mxu1 }
 0x434   :  { %v4293_v50 = vpop.eup %4292  ;;  %v2944_v11 = vmul.f32 0.0051020407, %v2822_v26  ;;  %v2323_v57 = vadd.f32 %v2322_v21, %v2210_v15 }
 0x435   :  { %8845 = vst [vmem:[#allocation50_spill] sm:$0xff] %v7368_v7  ;;  %v2659_v24 = vsel %vm2590_vm0, %v7368_v7, 0.0  ;;  %v2786_v56 = vmul.f32 %v7368_v7, %v7368_v7  ;;  %v3104_v45 = vmul.f32 %v4293_v50, %v7354_v49  ;;  %vm3110_vm1 = vweird.f32 %v4293_v50 }
 0x436   :  { %v3008_v0 = vsub.f32 %v2944_v11, %v2976_v36  ;;  %v2660_v41 = vadd.f32 %v2659_v24, %v6163_v37  ;;  %v2787_v24 = vmul.f32 %v6190_v5, %v6190_v5  ;;  %vm3111_vm3 = vmor %vm3109_vm2, %vm3110_vm1 }
 0x437   :  { %v2435_v3 = vpop.f32.mrf.mxu2  ;;  %v2883_v17 = vsel %vm2590_vm0, %v2786_v56, 0.0  ;;  %v3105_v26 = vmul.f32 %v4293_v50, %v3104_v45 }
 0x438   :  { %v3040_v53 = vmax.f32 %v3008_v0, 0.0  ;;  %v2436_v61 = vadd.f32 %v2435_v3, %v2323_v57  ;;  %2661 = vadd.xlane.f32.xlu2 %v2660_v41  ;;  %v2884_v42 = vadd.f32 %v2883_v17, %v2785_v59 }
 0x439   :  { %v3106_v11 = vmul.f32 0.5, %v3105_v26  ;;  %v2602_v26 = vpop.xlane.xlu1 %2601 }
 0x43a   :  { %v3072_v62 = vadd.f32 1e-05, %v3040_v53  ;;  %v2548_v34 = vpop.f32.mrf.mxu3  ;;  %2885 = vadd.xlane.f32.xlu1 %v2884_v42  ;;  %v3423_v53 = vld [vmem:[%s8722_s2] sm:$0xff] }
 0x43b   :  { %v7384_v7 = vadd.f32 %v2548_v34, %v2436_v61  ;;  %v3107_v34 = vsub.f32 1.5, %v3106_v11 }
 0x43c   :  { %4294 = vrsqrt.f32 %v3072_v62  ;;  %vm3119_vm5 = vweird.f32 %v3072_v62 }
 0x43d   :  { %8846 = vst [vmem:[#allocation51_spill] sm:$0xff] %v7384_v7  ;;  %v2663_v36 = vsel %vm2590_vm0, %v7384_v7, 0.0  ;;  %v2788_v15 = vmul.f32 %v7384_v7, %v7384_v7  ;;  %v3108_v41 = vmul.f32 %v4293_v50, %v3107_v34 }
 0x43e   :  { %v2664_v21 = vadd.f32 %v2663_v36, %v6190_v5 }
 0x43f   :  { %v2887_v59 = vsel %vm2590_vm0, %v2788_v15, 0.0  ;;  %v3112_v17 = vsel %vm3111_vm3, %v4293_v50, %v3108_v41  ;;  %v3424_v50 = vld [vmem:[%s8722_s2 + $0x8] sm:$0xff]  ;;  %v2438_v41 = vpop.f32.mrf.mxu2 }
 0x440   :  { %2665 = vadd.xlane.f32.xlu0 %v2664_v21  ;;  %v2888_v56 = vadd.f32 %v2887_v59, %v2787_v24  ;;  %v3455_v61 = vmul.f32 %v3423_v53, %v3112_v17  ;;  %v7403_v24 = vmul.f32 0.0051020407, %v2602_v26 }
 0x441   :  { %v2826_v21 = vpop.xlane.xlu1 %2825 }
 0x442   :  { %v4295_v45 = vpop.eup %4294  ;;  %2889 = vadd.xlane.f32.xlu2 %v2888_v56  ;;  %v3487_v36 = vmul.f32 %v3455_v61, %v7339_v30  ;;  %v2945_v59 = vmul.f32 0.0051020407, %v2826_v21  ;;  %v2977_v30 = vmul.f32 %v7403_v24, %v7403_v24 }
 0x443   :  { %v3114_v0 = vmul.f32 %v4295_v45, %v3072_v62  ;;  %vm3120_vm4 = vweird.f32 %v4295_v45  ;;  %v2212_v62 = vpop.f32.mrf.mxu0 }
 0x444   :  { %vm3121_vm6 = vmor %vm3119_vm5, %vm3120_vm4  ;;  %v3009_v56 = vsub.f32 %v2945_v59, %v2977_v30 }
 0x445   :  { %v3115_v57 = vmul.f32 %v4295_v45, %v3114_v0  ;;  %v2325_v0 = vpop.f32.mrf.mxu1 }
 0x447   :  { %v3116_v3 = vmul.f32 0.5, %v3115_v57  ;;  %v2213_v57 = vadd.f32 %v2212_v62, %v6808_v47 }
 0x449   :  { %v3117_v42 = vsub.f32 1.5, %v3116_v3  ;;  %v2326_v17 = vadd.f32 %v2325_v0, %v2213_v57 }
 0x44b   :  { %v3118_v15 = vmul.f32 %v4295_v45, %v3117_v42  ;;  %v2215_v53 = vpop.f32.mrf.mxu0  ;;  %v2439_v42 = vadd.f32 %v2438_v41, %v2326_v17  ;;  %v2789_v17 = vmul.f32 %v6205_v23, %v6205_v23 }
 0x44c   :  { %v2216_v26 = vadd.f32 %v2215_v53, %v6822_v27 }
 0x44d   :  { %v3122_v49 = vsel %vm3121_vm6, %v4295_v45, %v3118_v15  ;;  %v3041_v45 = vmax.f32 %v3009_v56, 0.0 }
 0x44e   :  { %v3456_v11 = vmul.f32 %v3424_v50, %v3122_v49  ;;  %v2606_v50 = vpop.xlane.xlu1 %2605 }
 0x44f   :  { %v3073_v3 = vadd.f32 1e-05, %v3041_v45  ;;  %v7413_v30 = vmul.f32 0.0051020407, %v2606_v50 }
 0x450   :  { %v3488_v34 = vmul.f32 %v3456_v11, %v7365_v10  ;;  %v2441_v10 = vpop.f32.mrf.mxu2 }
 0x451   :  { %4296 = vrsqrt.f32 %v3073_v3  ;;  %v2978_v0 = vmul.f32 %v7413_v30, %v7413_v30  ;;  %vm3129_vm8 = vweird.f32 %v3073_v3 }
 0x453   :  { %3551 = vrot.lane.b32.xlu1 %v3487_v36, %s4620_s26  ;;  %v2328_v36 = vpop.f32.mrf.mxu1  ;;  %v2218_v57 = vpop.f32.mrf.mxu0 }
 0x454   :  { %3681 = vperm.xlu0 %4262, %v3455_v61   ;;  %v2551_v61 = vpop.f32.mrf.mxu3 }
 0x455   :  { %v7411_v15 = vadd.f32 %v2551_v61, %v2439_v42  ;;  %v2219_v42 = vadd.f32 %v2218_v57, %v6836_v6 }
 0x457   :  { %8847 = vst [vmem:[#allocation52_spill] sm:$0xff] %v7411_v15  ;;  %v4297_v49 = vpop.eup %4296  ;;  %v2790_v56 = vmul.f32 %v7411_v15, %v7411_v15  ;;  %v2667_v27 = vsel %vm2590_vm0, %v7411_v15, 0.0 }
 0x458   :  { %v3124_v59 = vmul.f32 %v4297_v49, %v3073_v3  ;;  %v2668_v61 = vadd.f32 %v2667_v27, %v6205_v23  ;;  %vm3130_vm7 = vweird.f32 %v4297_v49  ;;  %v2793_v3 = vmul.f32 %v6247_v33, %v6247_v33 }
 0x459   :  { %v2891_v41 = vsel %vm2590_vm0, %v2790_v56, 0.0  ;;  %vm3131_vm9 = vmor %vm3129_vm8, %vm3130_vm7 }
 0x45a   :  { %3686 = vperm.xlu2 %4263, %v3456_v11   ;;  %v2329_v11 = vadd.f32 %v2328_v36, %v2216_v26  ;;  %v3125_v45 = vmul.f32 %v4297_v49, %v3124_v59  ;;  %v2892_v26 = vadd.f32 %v2891_v41, %v2789_v17 }
 0x45c   :  { %v2442_v21 = vadd.f32 %v2441_v10, %v2329_v11  ;;  %v2554_v47 = vpop.f32.mrf.mxu3  ;;  %v3126_v10 = vmul.f32 0.5, %v3125_v45  ;;  %v2331_v11 = vpop.f32.mrf.mxu1 }
 0x45d   :  { %v2332_v59 = vadd.f32 %v2331_v11, %v2219_v42  ;;  %v3425_v42 = vld [vmem:[%s8722_s2 + $0x10] sm:$0xff] }
 0x45e   :  { %v7417_v62 = vadd.f32 %v2554_v47, %v2442_v21  ;;  %v2444_v21 = vpop.f32.mrf.mxu2  ;;  %v3127_v56 = vsub.f32 1.5, %v3126_v10 }
 0x45f   :  { %v2445_v27 = vadd.f32 %v2444_v21, %v2332_v59 }
 0x460   :  { %8848 = vst [vmem:[#allocation53_spill] sm:$0xff] %v7417_v62  ;;  %v2792_v36 = vmul.f32 %v7417_v62, %v7417_v62  ;;  %v3128_v17 = vmul.f32 %v4297_v49, %v3127_v56 }
 0x462   :  { %3553 = vrot.lane.b32.xlu2 %v3488_v34, %s4620_s26  ;;  %v2830_v34 = vpop.xlane.xlu2 %2829  ;;  %v2895_v47 = vsel %vm2590_vm0, %v2792_v36, 0.0 }
 0x463   :  { %v2946_v53 = vmul.f32 0.0051020407, %v2830_v34  ;;  %v2791_v34 = vmul.f32 %v6232_v40, %v6232_v40 }
 0x464   :  { %v2557_v6 = vpop.f32.mrf.mxu3 }
 0x465   :  { %v3010_v50 = vsub.f32 %v2946_v53, %v2978_v0  ;;  %v2896_v57 = vadd.f32 %v2895_v47, %v2791_v34  ;;  %v7433_v45 = vadd.f32 %v2557_v6, %v2445_v27  ;;  %v2671_v0 = vsel %vm2590_vm0, %v7417_v62, 0.0 }
 0x466   :  { %v2672_v53 = vadd.f32 %v2671_v0, %v6232_v40  ;;  %v8863_v40 = vld [vmem:[#allocation33_spill] sm:$0xff] }
 0x467   :  { %v3042_v25 = vmax.f32 %v3010_v50, 0.0  ;;  %8849 = vst [vmem:[#allocation54_spill] sm:$0xff] %v7433_v45 }
 0x469   :  { %v3074_v41 = vadd.f32 1e-05, %v3042_v25  ;;  %v2794_v25 = vmul.f32 %v7433_v45, %v7433_v45 }
 0x46b   :  { %4298 = vrsqrt.f32 %v3074_v41  ;;  %v2899_v36 = vsel %vm2590_vm0, %v2794_v25, 0.0  ;;  %vm3139_vm11 = vweird.f32 %v3074_v41  ;;  %v2221_v25 = vpop.f32.mrf.mxu0 }
 0x46c   :  { %v2900_v11 = vadd.f32 %v2899_v36, %v2793_v3  ;;  %v2834_v36 = vpop.xlane.xlu0 %2833 }
 0x471   :  { %v4299_v10 = vpop.eup %4298 }
 0x472   :  { %v3134_v21 = vmul.f32 %v4299_v10, %v3074_v41  ;;  %vm3140_vm10 = vweird.f32 %v4299_v10  ;;  %v2222_v41 = vadd.f32 %v2221_v25, %v6850_v16 }
 0x473   :  { %vm3141_vm12 = vmor %vm3139_vm11, %vm3140_vm10 }
 0x474   :  { %v3135_v59 = vmul.f32 %v4299_v10, %v3134_v21 }
 0x476   :  { %v3136_v47 = vmul.f32 0.5, %v3135_v59  ;;  %v2947_v59 = vmul.f32 0.0051020407, %v2834_v36  ;;  %v2795_v36 = vmul.f32 %v6274_v12, %v6274_v12 }
 0x478   :  { %v3137_v56 = vsub.f32 1.5, %v3136_v47 }
 0x47a   :  { %v3138_v27 = vmul.f32 %v4299_v10, %v3137_v56 }
 0x47d   :  { %2669 = vadd.xlane.f32.xlu1 %v2668_v61  ;;  %v3132_v61 = vsel %vm3131_vm9, %v4297_v49, %v3128_v17  ;;  %v2610_v49 = vpop.xlane.xlu2 %2609  ;;  %v3142_v17 = vsel %vm3141_vm12, %v4299_v10, %v3138_v27  ;;  %v2447_v10 = vpop.f32.mrf.mxu2 }
 0x47e   :  { %2893 = vadd.xlane.f32.xlu0 %v2892_v26  ;;  %v3457_v26 = vmul.f32 %v3425_v42, %v3132_v61 }
 0x480   :  { %v3489_v50 = vmul.f32 %v3457_v26, %v7403_v24  ;;  %v7453_v24 = vld [vmem:[%s8722_s2 + $0x18] sm:$0xff] }
 0x481   :  { %v3458_v61 = vmul.f32 %v7453_v24, %v3142_v17  ;;  %v2675_v17 = vsel %vm2590_vm0, %v7433_v45, 0.0 }
 0x483   :  { %v3490_v21 = vmul.f32 %v3458_v61, %v7413_v30 }
 0x485   :  { %2897 = vadd.xlane.f32.xlu1 %v2896_v57  ;;  %v2614_v34 = vpop.xlane.xlu2 %2613  ;;  %v2838_v57 = vpop.xlane.xlu1 %2837 }
 0x486   :  { %v7448_v6 = vmul.f32 0.0051020407, %v2614_v34 }
 0x488   :  { %v2980_v0 = vmul.f32 %v7448_v6, %v7448_v6 }
 0x48b   :  { %2673 = vadd.xlane.f32.xlu2 %v2672_v53  ;;  %v2948_v53 = vmul.f32 0.0051020407, %v2838_v57 }
 0x48d   :  { %v3012_v42 = vsub.f32 %v2948_v53, %v2980_v0  ;;  %v2676_v0 = vadd.f32 %v2675_v17, %v6247_v33 }
 0x48f   :  { %v3044_v3 = vmax.f32 %v3012_v42, 0.0 }
 0x491   :  { %v3076_v56 = vadd.f32 1e-05, %v3044_v3 }
 0x492   :  { %3555 = vrot.lane.b32.xlu0 %v3489_v50, %s4620_s26  ;;  %v2334_v50 = vpop.f32.mrf.mxu1 }
 0x493   :  { %2901 = vadd.xlane.f32.xlu2 %v2900_v11  ;;  %v2335_v47 = vadd.f32 %v2334_v50, %v2222_v41  ;;  %4300 = vrsqrt.f32 %v3076_v56  ;;  %v2224_v41 = vpop.f32.mrf.mxu0  ;;  %vm3159_vm14 = vweird.f32 %v3076_v56 }
 0x495   :  { %v2448_v27 = vadd.f32 %v2447_v10, %v2335_v47 }
 0x49e   :  { %3691 = vperm.xlu1 %4264, %v3457_v26   ;;  %v7458_v26 = vmul.f32 0.0051020407, %v2610_v49  ;;  %v2560_v49 = vpop.f32.mrf.mxu3 }
 0x49f   :  { %v7465_v16 = vadd.f32 %v2560_v49, %v2448_v27 }
 0x4a0   :  { %v2979_v11 = vmul.f32 %v7458_v26, %v7458_v26 }
 0x4a1   :  { %8850 = vst [vmem:[#allocation55_spill] sm:$0xff] %v7465_v16  ;;  %v2796_v30 = vmul.f32 %v7465_v16, %v7465_v16  ;;  %v2679_v10 = vsel %vm2590_vm0, %v7465_v16, 0.0 }
 0x4a2   :  { %v3011_v34 = vsub.f32 %v2947_v59, %v2979_v11  ;;  %v2618_v11 = vpop.xlane.xlu0 %2617  ;;  %v2680_v27 = vadd.f32 %v2679_v10, %v6274_v12 }
 0x4a3   :  { %v2903_v25 = vsel %vm2590_vm0, %v2796_v30, 0.0  ;;  %v7477_v47 = vmul.f32 0.0051020407, %v2618_v11 }
 0x4a4   :  { %v3043_v57 = vmax.f32 %v3011_v34, 0.0  ;;  %v2904_v3 = vadd.f32 %v2903_v25, %v2795_v36  ;;  %v2450_v34 = vpop.f32.mrf.mxu2  ;;  %v2227_v25 = vpop.f32.mrf.mxu0 }
 0x4a5   :  { %v2981_v30 = vmul.f32 %v7477_v47, %v7477_v47  ;;  %v2228_v11 = vadd.f32 %v2227_v25, %v6878_v18 }
 0x4a6   :  { %v3075_v53 = vadd.f32 1e-05, %v3043_v57  ;;  %v2842_v57 = vpop.xlane.xlu2 %2841  ;;  %v2563_v36 = vpop.f32.mrf.mxu3 }
 0x4a8   :  { %4302 = vrsqrt.f32 %v3075_v53  ;;  %vm3149_vm2 = vweird.f32 %v3075_v53 }
 0x4ab   :  { %3696 = vperm.xlu2 %4263, %v3458_v61   ;;  %v4301_v61 = vpop.eup %4300 }
 0x4ac   :  { %v3154_v42 = vmul.f32 %v4301_v61, %v3076_v56  ;;  %vm3160_vm13 = vweird.f32 %v4301_v61 }
 0x4ad   :  { %vm3161_vm15 = vmor %vm3159_vm14, %vm3160_vm13 }
 0x4ae   :  { %v3155_v50 = vmul.f32 %v4301_v61, %v3154_v42  ;;  %v4303_v59 = vpop.eup %4302  ;;  %v2949_v42 = vmul.f32 0.0051020407, %v2842_v57  ;;  %v3428_v57 = vld [vmem:[%s8722_s2 + $0x28] sm:$0xff] }
 0x4af   :  { %v3144_v17 = vmul.f32 %v4303_v59, %v3075_v53  ;;  %vm3150_vm1 = vweird.f32 %v4303_v59  ;;  %v2799_v53 = vmul.f32 %v6316_v51, %v6316_v51 }
 0x4b0   :  { %v3156_v49 = vmul.f32 0.5, %v3155_v50  ;;  %v3013_v23 = vsub.f32 %v2949_v42, %v2981_v30  ;;  %vm3151_vm3 = vmor %vm3149_vm2, %vm3150_vm1 }
 0x4b2   :  { %v3157_v16 = vsub.f32 1.5, %v3156_v49 }
 0x4b3   :  { %3557 = vrot.lane.b32.xlu2 %v3490_v21, %s4620_s26  ;;  %v2337_v21 = vpop.f32.mrf.mxu1 }
 0x4b4   :  { %v3158_v10 = vmul.f32 %v4301_v61, %v3157_v16 }
 0x4b6   :  { %v3162_v49 = vsel %vm3161_vm15, %v4301_v61, %v3158_v10  ;;  %v3427_v61 = vld [vmem:[%s8722_s2 + $0x20] sm:$0xff] }
 0x4b7   :  { %v3460_v30 = vmul.f32 %v3428_v57, %v3162_v49 }
 0x4bb   :  { %v2340_v62 = vpop.f32.mrf.mxu1 }
 0x4bc   :  { %2677 = vadd.xlane.f32.xlu0 %v2676_v0  ;;  %v2225_v0 = vadd.f32 %v2224_v41, %v6864_v32  ;;  %v2341_v32 = vadd.f32 %v2340_v62, %v2228_v11  ;;  %v3045_v41 = vmax.f32 %v3013_v23, 0.0 }
 0x4be   :  { %v2338_v15 = vadd.f32 %v2337_v21, %v2225_v0  ;;  %v2566_v0 = vpop.f32.mrf.mxu3  ;;  %v3077_v16 = vadd.f32 1e-05, %v3045_v41 }
 0x4c0   :  { %v2451_v50 = vadd.f32 %v2450_v34, %v2338_v15  ;;  %4304 = vrsqrt.f32 %v3077_v16  ;;  %v3492_v34 = vmul.f32 %v3460_v30, %v7448_v6  ;;  %vm3169_vm5 = vweird.f32 %v3077_v16 }
 0x4c4   :  { %2905 = vadd.xlane.f32.xlu0 %v2904_v3  ;;  %v3145_v3 = vmul.f32 %v4303_v59, %v3144_v17  ;;  %v7487_v17 = vadd.f32 %v2563_v36, %v2451_v50 }
 0x4c6   :  { %v3146_v12 = vmul.f32 0.5, %v3145_v3  ;;  %8851 = vst [vmem:[#allocation56_spill] sm:$0xff] %v7487_v17  ;;  %v2683_v15 = vsel %vm2590_vm0, %v7487_v17, 0.0  ;;  %v4305_v3 = vpop.eup %4304 }
 0x4c7   :  { %v2684_v23 = vadd.f32 %v2683_v15, %v6289_v1  ;;  %v3164_v10 = vmul.f32 %v4305_v3, %v3077_v16  ;;  %vm3170_vm4 = vweird.f32 %v4305_v3  ;;  %v2846_v16 = vpop.xlane.xlu0 %2845 }
 0x4c8   :  { %2681 = vadd.xlane.f32.xlu1 %v2680_v27  ;;  %v2453_v27 = vpop.f32.mrf.mxu2  ;;  %v3147_v18 = vsub.f32 1.5, %v3146_v12  ;;  %vm3171_vm6 = vmor %vm3169_vm5, %vm3170_vm4 }
 0x4c9   :  { %v2454_v21 = vadd.f32 %v2453_v27, %v2341_v32  ;;  %v2622_v27 = vpop.xlane.xlu1 %2621  ;;  %v2626_v32 = vpop.xlane.xlu2 %2625 }
 0x4ca   :  { %v3148_v62 = vmul.f32 %v4303_v59, %v3147_v18  ;;  %v7506_v57 = vmul.f32 0.0051020407, %v2626_v32 }
 0x4cb   :  { %v7489_v42 = vadd.f32 %v2566_v0, %v2454_v21 }
 0x4cc   :  { %v3152_v12 = vsel %vm3151_vm3, %v4303_v59, %v3148_v62  ;;  %v3165_v59 = vmul.f32 %v4305_v3, %v3164_v10  ;;  %v2983_v18 = vmul.f32 %v7506_v57, %v7506_v57  ;;  %v2230_v62 = vpop.f32.mrf.mxu0  ;;  %v2950_v10 = vmul.f32 0.0051020407, %v2846_v16 }
 0x4cd   :  { %8852 = vst [vmem:[#allocation57_spill] sm:$0xff] %v7489_v42  ;;  %v2800_v56 = vmul.f32 %v7489_v42, %v7489_v42  ;;  %v3459_v25 = vmul.f32 %v3427_v61, %v3152_v12  ;;  %v2343_v61 = vpop.f32.mrf.mxu1 }
 0x4ce   :  { %v3166_v6 = vmul.f32 0.5, %v3165_v59  ;;  %v2569_v59 = vpop.f32.mrf.mxu3 }
 0x4cf   :  { %v2911_v36 = vsel %vm2590_vm0, %v2800_v56, 0.0  ;;  %v3491_v50 = vmul.f32 %v3459_v25, %v7458_v26  ;;  %v7513_v26 = vld [vmem:[%s8722_s2 + $0x30] sm:$0xff]  ;;  %v2231_v56 = vadd.f32 %v2230_v62, %v6892_v48  ;;  %v2630_v16 = vpop.xlane.xlu0 %2629 }
 0x4d0   :  { %v2912_v11 = vadd.f32 %v2911_v36, %v2799_v53  ;;  %v3167_v41 = vsub.f32 1.5, %v3166_v6 }
 0x4d1   :  { %v2850_v49 = vpop.xlane.xlu1 %2849  ;;  %v2344_v36 = vadd.f32 %v2343_v61, %v2231_v56 }
 0x4d2   :  { %v3168_v21 = vmul.f32 %v4305_v3, %v3167_v41  ;;  %v2951_v0 = vmul.f32 0.0051020407, %v2850_v49 }
 0x4d4   :  { %v3015_v15 = vsub.f32 %v2951_v0, %v2983_v18  ;;  %v2233_v61 = vpop.f32.mrf.mxu0 }
 0x4d6   :  { %v3047_v12 = vmax.f32 %v3015_v15, 0.0  ;;  %v2801_v15 = vmul.f32 %v6331_v8, %v6331_v8 }
 0x4d8   :  { %3706 = vperm.xlu0 %4262, %v3460_v30   ;;  %v3172_v30 = vsel %vm3171_vm6, %v4305_v3, %v3168_v21  ;;  %v3079_v3 = vadd.f32 1e-05, %v3047_v12 }
 0x4da   :  { %4306 = vrsqrt.f32 %v3079_v3  ;;  %vm3189_vm8 = vweird.f32 %v3079_v3 }
 0x4dc   :  { %2685 = vadd.xlane.f32.xlu2 %v2684_v23  ;;  %v3461_v23 = vmul.f32 %v7513_v26, %v3172_v30 }
 0x4e0   :  { %3561 = vrot.lane.b32.xlu0 %v3492_v34, %s4620_s26  ;;  %v7517_v34 = vmul.f32 0.0051020407, %v2622_v27  ;;  %v2687_v27 = vsel %vm2590_vm0, %v7489_v42, 0.0  ;;  %v4307_v49 = vpop.eup %4306 }
 0x4e1   :  { %3701 = vperm.xlu1 %4264, %v3459_v25   ;;  %v2456_v25 = vpop.f32.mrf.mxu2  ;;  %v2688_v32 = vadd.f32 %v2687_v27, %v6316_v51  ;;  %v3184_v18 = vmul.f32 %v4307_v49, %v3079_v3  ;;  %v2854_v27 = vpop.xlane.xlu2 %2853  ;;  %vm3190_vm7 = vweird.f32 %v4307_v49 }
 0x4e2   :  { %v2457_v53 = vadd.f32 %v2456_v25, %v2344_v36  ;;  %vm3191_vm9 = vmor %vm3189_vm8, %vm3190_vm7 }
 0x4e3   :  { %v3185_v12 = vmul.f32 %v4307_v49, %v3184_v18 }
 0x4e4   :  { %2913 = vadd.xlane.f32.xlu2 %v2912_v11  ;;  %v2982_v11 = vmul.f32 %v7517_v34, %v7517_v34  ;;  %v7523_v48 = vadd.f32 %v2569_v59, %v2457_v53  ;;  %v2346_v53 = vpop.f32.mrf.mxu1 }
 0x4e5   :  { %v3186_v36 = vmul.f32 0.5, %v3185_v12  ;;  %v8855_v12 = vld [vmem:[#allocation31_spill] sm:$0xff] }
 0x4e6   :  { %8853 = vst [vmem:[#allocation58_spill] sm:$0xff] %v7523_v48  ;;  %v3014_v6 = vsub.f32 %v2950_v10, %v2982_v11  ;;  %v2802_v41 = vmul.f32 %v7523_v48, %v7523_v48  ;;  %v2691_v11 = vsel %vm2590_vm0, %v7523_v48, 0.0  ;;  %v7540_v10 = vmul.f32 0.0051020407, %v2630_v16 }
 0x4e8   :  { %v3046_v21 = vmax.f32 %v3014_v6, 0.0  ;;  %v2915_v0 = vsel %vm2590_vm0, %v2802_v41, 0.0  ;;  %v3187_v6 = vsub.f32 1.5, %v3186_v36  ;;  %v8854_v41 = vld [vmem:[#allocation30_spill] sm:$0xff]  ;;  %v2984_v18 = vmul.f32 %v7540_v10, %v7540_v10 }
 0x4e9   :  { %3559 = vrot.lane.b32.xlu1 %v3491_v50, %s4620_s26  ;;  %v3493_v50 = vmul.f32 %v3461_v23, %v7477_v47  ;;  %v2798_v47 = vmul.f32 %v7487_v17, %v7487_v17  ;;  %v2916_v56 = vadd.f32 %v2915_v0, %v2801_v15  ;;  %v2459_v59 = vpop.f32.mrf.mxu2  ;;  %v2952_v0 = vmul.f32 0.0051020407, %v2854_v27  ;;  %v2236_v15 = vpop.f32.mrf.mxu0  ;;  %v3431_v27 = vld [vmem:[%s8722_s2 + $0x40] sm:$0xff] }
 0x4ea   :  { %v3078_v30 = vadd.f32 1e-05, %v3046_v21  ;;  %v2234_v21 = vadd.f32 %v2233_v61, %v8854_v41 }
 0x4eb   :  { %v2907_v62 = vsel %vm2590_vm0, %v2798_v47, 0.0  ;;  %v3016_v36 = vsub.f32 %v2952_v0, %v2984_v18 }
 0x4ec   :  { %4308 = vrsqrt.f32 %v3078_v30  ;;  %v2349_v48 = vpop.f32.mrf.mxu1  ;;  %vm3179_vm11 = vweird.f32 %v3078_v30 }
 0x4f1   :  { %v2462_v61 = vpop.f32.mrf.mxu2 }
 0x4fc   :  { %3711 = vperm.xlu2 %4263, %v3461_v23   ;;  %v2797_v23 = vmul.f32 %v6289_v1, %v6289_v1 }
 0x4fe   :  { %v2908_v25 = vadd.f32 %v2907_v62, %v2797_v23  ;;  %v2572_v62 = vpop.f32.mrf.mxu3  ;;  %v3188_v23 = vmul.f32 %v4307_v49, %v3187_v6 }
 0x500   :  { %v3192_v41 = vsel %vm3191_vm9, %v4307_v49, %v3188_v23 }
 0x504   :  { %3563 = vrot.lane.b32.xlu2 %v3493_v50, %s4620_s26  ;;  %v4309_v50 = vpop.eup %4308 }
 0x505   :  { %v3174_v47 = vmul.f32 %v4309_v50, %v3078_v30  ;;  %vm3180_vm10 = vweird.f32 %v4309_v50  ;;  %v2634_v30 = vpop.xlane.xlu1 %2633 }
 0x506   :  { %vm3181_vm12 = vmor %vm3179_vm11, %vm3180_vm10 }
 0x507   :  { %v3175_v16 = vmul.f32 %v4309_v50, %v3174_v47 }
 0x509   :  { %v3176_v17 = vmul.f32 0.5, %v3175_v16 }
 0x50a   :  { %2689 = vadd.xlane.f32.xlu0 %v2688_v32  ;;  %v2692_v32 = vadd.f32 %v2691_v11, %v6331_v8 }
 0x50b   :  { %v3177_v3 = vsub.f32 1.5, %v3176_v17 }
 0x50d   :  { %v3178_v23 = vmul.f32 %v4309_v50, %v3177_v3 }
 0x50f   :  { %v3182_v17 = vsel %vm3181_vm12, %v4309_v50, %v3178_v23  ;;  %v2638_v50 = vpop.xlane.xlu2 %2637 }
 0x512   :  { %2917 = vadd.xlane.f32.xlu0 %v2916_v56  ;;  %v2347_v56 = vadd.f32 %v2346_v53, %v2234_v21  ;;  %v3463_v21 = vmul.f32 %v3431_v27, %v3192_v41 }
 0x513   :  { %2909 = vadd.xlane.f32.xlu1 %v2908_v25  ;;  %v2237_v25 = vadd.f32 %v2236_v15, %v8855_v12  ;;  %v2575_v15 = vpop.f32.mrf.mxu3 }
 0x514   :  { %v2460_v11 = vadd.f32 %v2459_v59, %v2347_v56  ;;  %v8858_v59 = vld [vmem:[#allocation24_spill] sm:$0xff] }
 0x515   :  { %v2350_v8 = vadd.f32 %v2349_v48, %v2237_v25  ;;  %v3495_v48 = vmul.f32 %v3463_v21, %v7506_v57  ;;  %v8859_v25 = vld [vmem:[#allocation25_spill] sm:$0xff] }
 0x516   :  { %v7550_v6 = vadd.f32 %v2572_v62, %v2460_v11  ;;  %v3430_v62 = vld [vmem:[%s8722_s2 + $0x38] sm:$0xff]  ;;  %v2805_v16 = vmul.f32 %v8859_v25, %v8859_v25 }
 0x517   :  { %v2463_v53 = vadd.f32 %v2462_v61, %v2350_v8  ;;  %v3462_v57 = vmul.f32 %v3430_v62, %v3182_v17  ;;  %v8860_v17 = vld [vmem:[#allocation32_spill] sm:$0xff] }
 0x518   :  { %8856 = vst [vmem:[#allocation30_spill] sm:$0xff] %v7550_v6  ;;  %v2695_v49 = vsel %vm2590_vm0, %v7550_v6, 0.0 }
 0x519   :  { %v7552_v18 = vadd.f32 %v2575_v15, %v2463_v53  ;;  %v2696_v0 = vadd.f32 %v2695_v49, %v8858_v59  ;;  %v3494_v41 = vmul.f32 %v3462_v57, %v7517_v34  ;;  %v2862_v53 = vpop.xlane.xlu1 %2861  ;;  %v7573_v49 = vpop.xlane.xlu2 %2865 }
 0x51a   :  { %v2954_v3 = vmul.f32 0.0051020407, %v2862_v53 }
 0x51b   :  { %2693 = vadd.xlane.f32.xlu1 %v2692_v32  ;;  %v3048_v32 = vmax.f32 %v3016_v36, 0.0  ;;  %8857 = vst [vmem:[#allocation31_spill] sm:$0xff] %v7552_v18  ;;  %v2806_v8 = vmul.f32 %v7552_v18, %v7552_v18 }
 0x51d   :  { %v3080_v47 = vadd.f32 1e-05, %v3048_v32  ;;  %v2923_v56 = vsel %vm2590_vm0, %v2806_v8, 0.0  ;;  %v7569_v32 = vmul.f32 0.0051020407, %v2638_v50  ;;  %v7578_v8 = vld [vmem:[%s8722_s2 + $0x48] sm:$0xff]  ;;  %v2578_v50 = vpop.f32.mrf.mxu3 }
 0x51e   :  { %v2924_v36 = vadd.f32 %v2923_v56, %v2805_v16  ;;  %v2352_v16 = vpop.f32.mrf.mxu1 }
 0x51f   :  { %4310 = vrsqrt.f32 %v3080_v47  ;;  %v2986_v15 = vmul.f32 %v7569_v32, %v7569_v32  ;;  %vm3199_vm14 = vweird.f32 %v3080_v47 }
 0x521   :  { %v3018_v23 = vsub.f32 %v2954_v3, %v2986_v15  ;;  %v2699_v3 = vsel %vm2590_vm0, %v7552_v18, 0.0  ;;  %v7637_v42 = vpop.xlane.xlu1 %2645 }
 0x523   :  { %v3050_v56 = vmax.f32 %v3018_v23, 0.0 }
 0x525   :  { %v4311_v12 = vpop.eup %4310 }
 0x526   :  { %3721 = vperm.xlu0 %4262, %v3463_v21   ;;  %v3194_v11 = vmul.f32 %v4311_v12, %v3080_v47  ;;  %vm3200_vm13 = vweird.f32 %v4311_v12  ;;  %v3082_v47 = vadd.f32 1e-05, %v3050_v56 }
 0x527   :  { %vm3201_vm15 = vmor %vm3199_vm14, %vm3200_vm13 }
 0x528   :  { %v3195_v61 = vmul.f32 %v4311_v12, %v3194_v11  ;;  %v2465_v11 = vpop.f32.mrf.mxu2  ;;  %4312 = vrsqrt.f32 %v3082_v47  ;;  %vm3219_vm2 = vweird.f32 %v3082_v47 }
 0x529   :  { %v2874_v33 = vpop.xlane.xlu1 %2873 }
 0x52a   :  { %v3196_v27 = vmul.f32 0.5, %v3195_v61 }
 0x52c   :  { %v3197_v21 = vsub.f32 1.5, %v3196_v27  ;;  %v2858_v27 = vpop.xlane.xlu0 %2857 }
 0x52d   :  { %2697 = vadd.xlane.f32.xlu2 %v2696_v0  ;;  %v2953_v23 = vmul.f32 0.0051020407, %v2858_v27 }
 0x52e   :  { %3567 = vrot.lane.b32.xlu0 %v3495_v48, %s4620_s26  ;;  %v3198_v0 = vmul.f32 %v4311_v12, %v3197_v21  ;;  %v2239_v48 = vpop.f32.mrf.mxu0 }
 0x52f   :  { %v2240_v62 = vadd.f32 %v2239_v48, %v8860_v17 }
 0x530   :  { %v3202_v34 = vsel %vm3201_vm15, %v4311_v12, %v3198_v0  ;;  %v7584_v12 = vmul.f32 0.0051020407, %v2634_v30  ;;  %v2700_v30 = vadd.f32 %v2699_v3, %v8859_v25 }
 0x531   :  { %v2353_v61 = vadd.f32 %v2352_v16, %v2240_v62 }
 0x532   :  { %v2985_v0 = vmul.f32 %v7584_v12, %v7584_v12 }
 0x534   :  { %3716 = vperm.xlu1 %4264, %v3462_v57   ;;  %v7581_v57 = vpop.xlane.xlu2 %2649  ;;  %v3017_v17 = vsub.f32 %v2953_v23, %v2985_v0  ;;  %v2642_v62 = vpop.xlane.xlu0 %2641 }
 0x535   :  { %2925 = vadd.xlane.f32.xlu2 %v2924_v36  ;;  %v3464_v36 = vmul.f32 %v7578_v8, %v3202_v34  ;;  %v4313_v34 = vpop.eup %4312 }
 0x536   :  { %v3214_v56 = vmul.f32 %v4313_v34, %v3082_v47  ;;  %v2242_v23 = vpop.f32.mrf.mxu0  ;;  %vm3220_vm1 = vweird.f32 %v4313_v34 }
 0x537   :  { %v3496_v15 = vmul.f32 %v3464_v36, %v7540_v10  ;;  %vm3221_vm3 = vmor %vm3219_vm2, %vm3220_vm1 }
 0x538   :  { %v3215_v27 = vmul.f32 %v4313_v34, %v3214_v56 }
 0x53c   :  { %3565 = vrot.lane.b32.xlu1 %v3494_v41, %s4620_s26  ;;  %v2466_v41 = vadd.f32 %v2465_v11, %v2353_v61  ;;  %v7588_v21 = vpop.xlane.xlu2 %2877  ;;  %v3049_v61 = vmax.f32 %v3017_v17, 0.0  ;;  %v7608_v3 = vpop.xlane.xlu0 %2869 }
 0x53e   :  { %v7586_v53 = vadd.f32 %v2578_v50, %v2466_v41  ;;  %v2804_v41 = vmul.f32 %v7550_v6, %v7550_v6  ;;  %v2355_v6 = vpop.f32.mrf.mxu1 }
 0x540   :  { %8861 = vst [vmem:[#allocation32_spill] sm:$0xff] %v7586_v53  ;;  %v2808_v48 = vmul.f32 %v7586_v53, %v7586_v53  ;;  %v2919_v0 = vsel %vm2590_vm0, %v2804_v41, 0.0  ;;  %v2703_v41 = vsel %vm2590_vm0, %v7586_v53, 0.0 }
 0x542   :  { %v2927_v16 = vsel %vm2590_vm0, %v2808_v48, 0.0  ;;  %v3216_v48 = vmul.f32 0.5, %v3215_v27 }
 0x544   :  { %v7599_v10 = vpop.xlane.xlu2 %2661  ;;  %v3217_v56 = vsub.f32 1.5, %v3216_v48  ;;  %v2581_v48 = vpop.f32.mrf.mxu3 }
 0x546   :  { %v3218_v27 = vmul.f32 %v4313_v34, %v3217_v56  ;;  %v2358_v47 = vpop.f32.mrf.mxu1 }
 0x548   :  { %v3222_v25 = vsel %vm3221_vm3, %v4313_v34, %v3218_v27 }
 0x54c   :  { %v7613_v1 = vpop.xlane.xlu2 %2889  ;;  %v2584_v45 = vpop.f32.mrf.mxu3 }
 0x54d   :  { %3726 = vperm.xlu2 %4263, %v3464_v36   ;;  %v8862_v36 = vld [vmem:[#allocation26_spill] sm:$0xff] }
 0x54e   :  { %v2807_v11 = vmul.f32 %v8862_v36, %v8862_v36 }
 0x550   :  { %v2928_v50 = vadd.f32 %v2927_v16, %v2807_v11  ;;  %v7616_v16 = vmul.f32 0.0051020407, %v2642_v62  ;;  %v2468_v11 = vpop.f32.mrf.mxu2  ;;  %v2704_v62 = vadd.f32 %v2703_v41, %v8862_v36 }
 0x554   :  { %v7627_v18 = vpop.permute.xlu2 %3686  ;;  %v2587_v39 = vpop.f32.mrf.mxu3 }
 0x555   :  { %3569 = vrot.lane.b32.xlu2 %v3496_v15, %s4620_s26  ;;  %v7606_v15 = vadd.f32 1e-05, %v3049_v61  ;;  %v2654_v61 = vpop.xlane.xlu0 %2653 }
 0x557   :  { %4314 = vrsqrt.f32 %v7606_v15  ;;  %vm3209_vm5 = vweird.f32 %v7606_v15 }
 0x558   :  { %2701 = vadd.xlane.f32.xlu0 %v2700_v30  ;;  %v2803_v30 = vmul.f32 %v8858_v59, %v8858_v59  ;;  %v2243_v59 = vadd.f32 %v2242_v23, %v8863_v40  ;;  %v8864_v23 = vld [vmem:[#allocation34_spill] sm:$0xff] }
 0x55a   :  { %v2920_v17 = vadd.f32 %v2919_v0, %v2803_v30  ;;  %v2987_v0 = vmul.f32 %v7616_v16, %v7616_v16  ;;  %v2955_v30 = vmul.f32 0.0051020407, %v7573_v49  ;;  %v2356_v40 = vadd.f32 %v2355_v6, %v2243_v59  ;;  %v7635_v49 = vld [vmem:[%s8722_s2 + $0x58] sm:$0xff] }
 0x55b   :  { %v3466_v6 = vmul.f32 %v7635_v49, %v3222_v25 }
 0x55c   :  { %v3019_v37 = vsub.f32 %v2955_v30, %v2987_v0  ;;  %v2469_v41 = vadd.f32 %v2468_v11, %v2356_v40  ;;  %v7645_v0 = vpop.permute.xlu2 %3553  ;;  %v7647_v11 = vmul.f32 0.0051020407, %v2654_v61 }
 0x55d   :  { %v7639_v36 = vpop.xlane.xlu0 %2881 }
 0x55e   :  { %v7643_v34 = vadd.f32 %v2581_v48, %v2469_v41  ;;  %v2958_v48 = vmul.f32 0.0051020407, %v7588_v21 }
 0x560   :  { %2929 = vadd.xlane.f32.xlu0 %v2928_v50  ;;  %v7620_v50 = vpop.eup %4314  ;;  %8865 = vst [vmem:[#allocation33_spill] sm:$0xff] %v7643_v34  ;;  %v2707_v25 = vsel %vm2590_vm0, %v7643_v34, 0.0  ;;  %v2810_v44 = vmul.f32 %v7643_v34, %v7643_v34 }
 0x561   :  { %v3204_v53 = vmul.f32 %v7620_v50, %v7606_v15  ;;  %vm3210_vm4 = vweird.f32 %v7620_v50 }
 0x562   :  { %vm3211_vm6 = vmor %vm3209_vm5, %vm3210_vm4 }
 0x563   :  { %v3205_v51 = vmul.f32 %v7620_v50, %v3204_v53 }
 0x565   :  { %v2666_v53 = vpop.xlane.xlu0 %2665 }
 0x566   :  { %2921 = vadd.xlane.f32.xlu1 %v2920_v17  ;;  %v2245_v17 = vpop.f32.mrf.mxu0  ;;  %v7708_v58 = vmul.f32 0.0051020407, %v2666_v53 }
 0x567   :  { %v2246_v56 = vadd.f32 %v2245_v17, %v8864_v23  ;;  %v3051_v17 = vmax.f32 %v3019_v37, 0.0  ;;  %v3206_v23 = vmul.f32 0.5, %v3205_v51  ;;  %v3498_v37 = vmul.f32 %v3466_v6, %v7569_v32 }
 0x568   :  { %v2990_v51 = vmul.f32 %v7647_v11, %v7647_v11  ;;  %v2993_v53 = vmul.f32 %v7708_v58, %v7708_v58 }
 0x569   :  { %v2359_v59 = vadd.f32 %v2358_v47, %v2246_v56  ;;  %v3083_v30 = vadd.f32 1e-05, %v3051_v17  ;;  %v3207_v56 = vsub.f32 1.5, %v3206_v23  ;;  %v8867_v47 = vld [vmem:[#allocation27_spill] sm:$0xff] }
 0x56a   :  { %v2708_v61 = vadd.f32 %v2707_v25, %v8867_v47  ;;  %v3022_v32 = vsub.f32 %v2958_v48, %v2990_v51 }
 0x56b   :  { %4316 = vrsqrt.f32 %v3083_v30  ;;  %v3208_v41 = vmul.f32 %v7620_v50, %v3207_v56  ;;  %v7677_v56 = vld [vmem:[%s8722_s2 + $0x50] sm:$0xff]  ;;  %vm3229_vm8 = vweird.f32 %v3083_v30 }
 0x56c   :  { %v3054_v15 = vmax.f32 %v3022_v32, 0.0 }
 0x56d   :  { %v7668_v21 = vpop.permute.xlu0 %3681  ;;  %v3212_v25 = vsel %vm3211_vm6, %v7620_v50, %v3208_v41  ;;  %v7689_v41 = vmul.f32 0.0051020407, %v7581_v57 }
 0x56e   :  { %2705 = vadd.xlane.f32.xlu1 %v2704_v62  ;;  %v2471_v62 = vpop.f32.mrf.mxu2  ;;  %v3465_v48 = vmul.f32 %v7677_v56, %v3212_v25  ;;  %v2957_v25 = vmul.f32 0.0051020407, %v2874_v33  ;;  %v2248_v31 = vpop.f32.mrf.mxu0 }
 0x56f   :  { %v2472_v27 = vadd.f32 %v2471_v62, %v2359_v59  ;;  %v7663_v62 = vpop.xlane.xlu2 %2673 }
 0x571   :  { %v7649_v40 = vadd.f32 %v2584_v45, %v2472_v27  ;;  %v4317_v17 = vpop.eup %4316  ;;  %v8868_v27 = vld [vmem:[#allocation28_spill] sm:$0xff] }
 0x572   :  { %v2811_v23 = vmul.f32 %v8868_v27, %v8868_v27  ;;  %v3224_v51 = vmul.f32 %v4317_v17, %v3083_v30  ;;  %vm3230_vm7 = vweird.f32 %v4317_v17 }
 0x573   :  { %8866 = vst [vmem:[#allocation34_spill] sm:$0xff] %v7649_v40  ;;  %v2812_v45 = vmul.f32 %v7649_v40, %v7649_v40  ;;  %vm3231_vm9 = vmor %vm3229_vm8, %vm3230_vm7 }
 0x574   :  { %3736 = vperm.xlu0 %4262, %v3466_v6   ;;  %v7666_v6 = vpop.xlane.xlu1 %2657  ;;  %v3225_v7 = vmul.f32 %v4317_v17, %v3224_v51 }
 0x575   :  { %v2935_v59 = vsel %vm2590_vm0, %v2812_v45, 0.0  ;;  %v7684_v5 = vpop.xlane.xlu0 %2893 }
 0x576   :  { %v3226_v32 = vmul.f32 0.5, %v3225_v7  ;;  %v2474_v46 = vpop.f32.mrf.mxu2 }
 0x577   :  { %v7686_v50 = vpop.xlane.xlu2 %2901 }
 0x57c   :  { %3573 = vrot.lane.b32.xlu0 %v3498_v37, %s4620_s26  ;;  %v2936_v37 = vadd.f32 %v2935_v59, %v2811_v23  ;;  %v7682_v45 = vpop.xlane.xlu1 %2885  ;;  %v3497_v59 = vmul.f32 %v3465_v48, %v7584_v12  ;;  %v2989_v23 = vmul.f32 %v7689_v41, %v7689_v41 }
 0x57d   :  { %v7698_v51 = vpop.permute.xlu0 %3555 }
 0x57e   :  { %2709 = vadd.xlane.f32.xlu2 %v2708_v61  ;;  %v7680_v61 = vadd.f32 1e-05, %v3054_v15  ;;  %v3227_v15 = vsub.f32 1.5, %v3226_v32  ;;  %v3021_v57 = vsub.f32 %v2957_v25, %v2989_v23  ;;  %v2361_v32 = vpop.f32.mrf.mxu1 }
 0x57f   :  { %v7702_v43 = vpop.permute.xlu2 %3696 }
 0x580   :  { %4318 = vrsqrt.f32 %v7680_v61  ;;  %v3228_v12 = vmul.f32 %v4317_v17, %v3227_v15  ;;  %v7715_v15 = vld [vmem:[%s8722_s2 + $0x60] sm:$0xff]  ;;  %vm3259_vm11 = vweird.f32 %v7680_v61 }
 0x582   :  { %v3232_v29 = vsel %vm3231_vm9, %v4317_v17, %v3228_v12 }
 0x585   :  { %v2678_v25 = vpop.xlane.xlu0 %2677 }
 0x586   :  { %2937 = vadd.xlane.f32.xlu2 %v2936_v37  ;;  %v7696_v37 = vpop.permute.xlu1 %3551  ;;  %v7700_v63 = vpop.eup %4318 }
 0x587   :  { %3731 = vperm.xlu1 %4264, %v3465_v48   ;;  %v3254_v7 = vmul.f32 %v7700_v63, %v7680_v61  ;;  %v8869_v48 = vld [vmem:[#allocation35_spill] sm:$0xff]  ;;  %v7723_v13 = vpop.permute.xlu2 %3557  ;;  %vm3260_vm10 = vweird.f32 %v7700_v63 }
 0x588   :  { %v2249_v33 = vadd.f32 %v2248_v31, %v8869_v48  ;;  %vm3261_vm12 = vmor %vm3259_vm11, %vm3260_vm10 }
 0x589   :  { %v3255_v38 = vmul.f32 %v7700_v63, %v3254_v7  ;;  %v2961_v7 = vmul.f32 0.0051020407, %v7613_v1 }
 0x58a   :  { %v2362_v28 = vadd.f32 %v2361_v32, %v2249_v33 }
 0x58b   :  { %v3256_v48 = vmul.f32 0.5, %v3255_v38  ;;  %v3025_v33 = vsub.f32 %v2961_v7, %v2993_v53 }
 0x58c   :  { %v2475_v30 = vadd.f32 %v2474_v46, %v2362_v28  ;;  %v2711_v28 = vsel %vm2590_vm0, %v7649_v40, 0.0 }
 0x58d   :  { %v3257_v12 = vsub.f32 1.5, %v3256_v48  ;;  %v7732_v38 = vpop.xlane.xlu0 %2905  ;;  %v2712_v1 = vadd.f32 %v2711_v28, %v8868_v27  ;;  %v3057_v48 = vmax.f32 %v3025_v33, 0.0  ;;  %v2960_v33 = vmul.f32 0.0051020407, %v7682_v45 }
 0x58e   :  { %v7710_v23 = vpop.xlane.xlu1 %2669  ;;  %v7726_v17 = vadd.f32 %v2587_v39, %v2475_v30  ;;  %v7744_v30 = vmul.f32 0.0051020407, %v7599_v10 }
 0x58f   :  { %3571 = vrot.lane.b32.xlu1 %v3497_v59, %s4620_s26  ;;  %v3053_v59 = vmax.f32 %v3021_v57, 0.0  ;;  %v3467_v57 = vmul.f32 %v7715_v15, %v3232_v29  ;;  %v7735_v29 = vmul.f32 0.0051020407, %v7637_v42  ;;  %v7746_v53 = vpop.xlane.xlu2 %2685  ;;  %v3258_v7 = vmul.f32 %v7700_v63, %v3257_v12 }
 0x590   :  { %8870 = vst [vmem:[#allocation35_spill] sm:$0xff] %v7726_v17  ;;  %v2814_v39 = vmul.f32 %v7726_v17, %v7726_v17  ;;  %v2992_v12 = vmul.f32 %v7744_v30, %v7744_v30  ;;  %v7761_v28 = vadd.f32 1e-05, %v3057_v48 }
 0x591   :  { %v7717_v31 = vadd.f32 1e-05, %v3053_v59  ;;  %v3499_v59 = vmul.f32 %v3467_v57, %v7616_v16  ;;  %v2988_v42 = vmul.f32 %v7735_v29, %v7735_v29  ;;  %v2956_v16 = vmul.f32 0.0051020407, %v7608_v3  ;;  %v8871_v3 = vld [vmem:[#allocation29_spill] sm:$0xff] }
 0x592   :  { %v3262_v61 = vsel %vm3261_vm12, %v7700_v63, %v3258_v7  ;;  %v3024_v2 = vsub.f32 %v2960_v33, %v2992_v12  ;;  %vm3289_vm2 = vweird.f32 %v7761_v28 }
 0x593   :  { %4320 = vrsqrt.f32 %v7717_v31  ;;  %v3020_v27 = vsub.f32 %v2956_v16, %v2988_v42  ;;  %v7787_v16 = vmul.f32 0.0051020407, %v7666_v6  ;;  %vm3249_vm14 = vweird.f32 %v7717_v31 }
 0x594   :  { %4322 = vrsqrt.f32 %v7761_v28  ;;  %v3056_v19 = vmax.f32 %v3024_v2, 0.0  ;;  %v2809_v2 = vmul.f32 %v8867_v47, %v8867_v47 }
 0x595   :  { %v3052_v7 = vmax.f32 %v3020_v27, 0.0  ;;  %v2931_v27 = vsel %vm2590_vm0, %v2810_v44, 0.0  ;;  %v2959_v44 = vmul.f32 0.0051020407, %v7639_v36 }
 0x596   :  { %v7730_v46 = vpop.xlane.xlu1 %2897 }
 0x597   :  { %v7778_v63 = vpop.xlane.xlu2 %2913 }
 0x599   :  { %v7741_v32 = vpop.eup %4320 }
 0x59a   :  { %v3244_v10 = vmul.f32 %v7741_v32, %v7717_v31  ;;  %v7784_v42 = vpop.eup %4322  ;;  %vm3250_vm13 = vweird.f32 %v7741_v32  ;;  %v7834_v31 = vld [vmem:[%s8722_s2 + $0x70] sm:$0xff] }
 0x59b   :  { %v3284_v6 = vmul.f32 %v7784_v42, %v7761_v28  ;;  %vm3251_vm15 = vmor %vm3249_vm14, %vm3250_vm13  ;;  %8875 = vst [vmem:[#allocation62_spill] sm:$0xff] %v7834_v31  ;;  %vm3290_vm1 = vweird.f32 %v7784_v42  ;;  %v8876_v28 = vmov 1  }
 0x59c   :  { %v3245_v48 = vmul.f32 %v7741_v32, %v3244_v10  ;;  %vm3291_vm3 = vmor %vm3289_vm2, %vm3290_vm1 }
 0x59e   :  { %3741 = vperm.xlu2 %4263, %v3467_v57   ;;  %v2939_v57 = vsel %vm2590_vm0, %v2814_v39, 0.0  ;;  %v7771_v40 = vpop.permute.xlu1 %3691  ;;  %v7773_v39 = vpop.permute.xlu0 %3706 }
 0x59f   :  { %8872 = vst [vmem:[#allocation59_spill] sm:$0xff] %v7771_v40  ;;  %v3246_v40 = vmul.f32 0.5, %v3245_v48 }
 0x5a0   :  { %8873 = vst [vmem:[#allocation60_spill] sm:$0xff] %v7773_v39  ;;  %v7782_v39 = vmul.f32 0.0051020407, %v2678_v25 }
 0x5a1   :  { %v3247_v33 = vsub.f32 1.5, %v3246_v40  ;;  %v2964_v40 = vmul.f32 0.0051020407, %v7686_v50  ;;  %v4612_v50 = vld [vmem:[%s8722_s2 + $0x8] sm:$0xff] }
 0x5a2   :  { %v2996_v25 = vmul.f32 %v7782_v39, %v7782_v39 }
 0x5a3   :  { %v3248_v48 = vmul.f32 %v7741_v32, %v3247_v33  ;;  %v7828_v33 = vmul.f32 0.0051020407, %v7663_v62 }
 0x5a4   :  { %v3028_v36 = vsub.f32 %v2964_v40, %v2996_v25 }
 0x5a5   :  { %v3252_v25 = vsel %vm3251_vm15, %v7741_v32, %v3248_v48  ;;  %v2995_v48 = vmul.f32 %v7828_v33, %v7828_v33 }
 0x5a6   :  { %2713 = vadd.xlane.f32.xlu0 %v2712_v1  ;;  %3575 = vrot.lane.b32.xlu2 %v3499_v59, %s4620_s26  ;;  %v7767_v1 = vld [vmem:[%s8722_s2 + $0x78] sm:$0xff]  ;;  %v2813_v59 = vmul.f32 %v8871_v3, %v8871_v3  ;;  %v7789_v10 = vpop.xlane.xlu1 %2681  ;;  %v3060_v40 = vmax.f32 %v3028_v36, 0.0  ;;  %v3469_v62 = vmul.f32 %v7834_v31, %v3252_v25  ;;  %v3650_v25 = vsub.f32 %v7453_v24, %v7723_v13 }
 0x5a7   :  { %v3470_v20 = vmul.f32 %v7767_v1, %v3262_v61  ;;  %v7795_v61 = vadd.f32 1e-05, %v3056_v19  ;;  %v2932_v19 = vadd.f32 %v2931_v27, %v2809_v2  ;;  %v3648_v2 = vsub.f32 %v4612_v50, %v7645_v0 }
 0x5a8   :  { %v2940_v45 = vadd.f32 %v2939_v57, %v2813_v59  ;;  %v7791_v57 = vadd.f32 1e-05, %v3052_v7  ;;  %v7797_v59 = vpop.permute.xlu0 %3561  ;;  %v3285_v7 = vmul.f32 %v7784_v42, %v3284_v6  ;;  %v7848_v36 = vadd.f32 1e-05, %v3060_v40 }
 0x5a9   :  { %v3502_v12 = vmul.f32 %v3470_v20, %v7647_v11  ;;  %v8785_v11 = vmov 1   ;;  %v3501_v13 = vmul.f32 %v3469_v62, %v7689_v41  ;;  %vm3279_vm7 = vweird.f32 %v7795_v61 }
 0x5aa   :  { %4324 = vrsqrt.f32 %v7791_v57  ;;  %vm3239_vm6 = vweird.f32 %v7791_v57  ;;  %vm3319_vm12 = vweird.f32 %v7848_v36 }
 0x5ab   :  { %4326 = vrsqrt.f32 %v7795_v61 }
 0x5ac   :  { %4328 = vrsqrt.f32 %v7848_v36 }
 0x5ae   :  { %3756 = vperm.xlu2 %4263, %v3470_v20   ;;  %2941 = vadd.xlane.f32.xlu0 %v2940_v45  ;;  %v2991_v20 = vmul.f32 %v7787_v16, %v7787_v16  ;;  %v7813_v45 = vpop.permute.xlu2 %3711  ;;  %v7819_v27 = vpop.permute.xlu1 %3701 }
 0x5af   :  { %8874 = vst [vmem:[#allocation61_spill] sm:$0xff] %v7819_v27 }
 0x5b0   :  { %v2690_v6 = vpop.xlane.xlu0 %2689 }
 0x5b6   :  { %3581 = vrot.lane.b32.xlu2 %v3502_v12, %s4620_s26  ;;  %v3023_v12 = vsub.f32 %v2959_v44, %v2991_v20  ;;  %v7836_v20 = vpop.eup %4324  ;;  %v3286_v44 = vmul.f32 0.5, %v3285_v7 }
 0x5b7   :  { %4266 = vset.pattern.permute.xlu2 %v8785_v11  ;;  %v7838_v0 = vpop.eup %4326  ;;  %v3234_v32 = vmul.f32 %v7836_v20, %v7791_v57  ;;  %vm3240_vm4 = vweird.f32 %v7836_v20  ;;  %v7921_v57 = vld [vmem:[%s8722_s2 + $0x68] sm:$0xff] }
 0x5b8   :  { %v3055_v50 = vmax.f32 %v3023_v12, 0.0  ;;  %v3287_v7 = vsub.f32 1.5, %v3286_v44  ;;  %v2963_v12 = vmul.f32 0.0051020407, %v7730_v46  ;;  %v7865_v46 = vpop.xlane.xlu0 %2917  ;;  %v7881_v41 = vpop.eup %4328  ;;  %vm3280_vm5 = vweird.f32 %v7838_v0  ;;  %vm3241_vm8 = vmor %vm3239_vm6, %vm3240_vm4 }
 0x5b9   :  { %2933 = vadd.xlane.f32.xlu1 %v2932_v19  ;;  %v2715_v19 = vsel %vm2590_vm0, %v7726_v17, 0.0  ;;  %v3274_v17 = vmul.f32 %v7838_v0, %v7795_v61  ;;  %vm3281_vm9 = vmor %vm3279_vm7, %vm3280_vm5  ;;  %v7927_v61 = vld [vmem:[%s8722_s2 + $0x88] sm:$0xff]  ;;  %vm3320_vm10 = vweird.f32 %v7881_v41 }
 0x5ba   :  { %v2716_v11 = vadd.f32 %v2715_v19, %v8871_v3  ;;  %v7853_v19 = vpop.permute.xlu2 %3563  ;;  %v3235_v3 = vmul.f32 %v7836_v20, %v3234_v32  ;;  %v3027_v34 = vsub.f32 %v2963_v12, %v2995_v48  ;;  %v3288_v44 = vmul.f32 %v7784_v42, %v3287_v7  ;;  %v7874_v32 = vld [vmem:[%s8722_s2 + $0x90] sm:$0xff]  ;;  %8879 = vst [vmem:[#allocation64_spill] sm:$0xff] %v7927_v61  ;;  %vm3321_vm13 = vmor %vm3319_vm12, %vm3320_vm10 }
 0x5bb   :  { %v3275_v47 = vmul.f32 %v7838_v0, %v3274_v17  ;;  %v7876_v48 = vmul.f32 0.0051020407, %v2690_v6  ;;  %v3314_v6 = vmul.f32 %v7881_v41, %v7848_v36  ;;  %v3653_v54 = vsub.f32 %v7513_v26, %v7853_v19 }
 0x5bc   :  { %v3236_v24 = vmul.f32 0.5, %v3235_v3  ;;  %v3059_v40 = vmax.f32 %v3027_v34, 0.0  ;;  %v3292_v17 = vsel %vm3291_vm3, %v7784_v42, %v3288_v44 }
 0x5bd   :  { %v3473_v42 = vmul.f32 %v7874_v32, %v3292_v17  ;;  %v2999_v44 = vmul.f32 %v7876_v48, %v7876_v48  ;;  %v2967_v17 = vmul.f32 0.0051020407, %v7778_v63  ;;  %v3315_v60 = vmul.f32 %v7881_v41, %v3314_v6 }
 0x5be   :  { %3910 = vperm.xlu2 %4266, %v3648_v2   ;;  %v7850_v2 = vadd.f32 1e-05, %v3055_v50  ;;  %v3276_v50 = vmul.f32 0.5, %v3275_v47  ;;  %v3237_v47 = vsub.f32 1.5, %v3236_v24  ;;  %v7885_v3 = vadd.f32 1e-05, %v3059_v40 }
 0x5bf   :  { %v4613_v40 = vld [vmem:[%s8722_s2] sm:$0xff]  ;;  %v3031_v31 = vsub.f32 %v2967_v17, %v2999_v44  ;;  %v7912_v63 = vmul.f32 0.0051020407, %v7710_v23  ;;  %v3316_v44 = vmul.f32 0.5, %v3315_v60 }
 0x5c0   :  { %4330 = vrsqrt.f32 %v7850_v2  ;;  %v3277_v12 = vsub.f32 1.5, %v3276_v50  ;;  %v3647_v50 = vsub.f32 %v4613_v40, %v7696_v37  ;;  %v3238_v27 = vmul.f32 %v7836_v20, %v3237_v47 }
 0x5c1   :  { %2717 = vadd.xlane.f32.xlu1 %v2716_v11  ;;  %v7858_v11 = vpop.permute.xlu1 %3559  ;;  %4332 = vrsqrt.f32 %v7885_v3  ;;  %v3505_v40 = vmul.f32 %v3473_v42, %v7708_v58  ;;  %v3317_v17 = vsub.f32 1.5, %v3316_v44  ;;  %vm3269_vm14 = vweird.f32 %v7850_v2 }
 0x5c2   :  { %3751 = vperm.xlu0 %4262, %v3469_v62   ;;  %v7878_v7 = vpop.xlane.xlu2 %2697  ;;  %vm3309_vm2 = vweird.f32 %v7885_v3 }
 0x5c6   :  { %3920 = vperm.xlu2 %4266, %v3650_v25   ;;  %v7883_v34 = vpop.eup %4330  ;;  %v8877_v25 = vmov 0  }
 0x5c7   :  { %v3264_v24 = vmul.f32 %v7883_v34, %v7850_v2  ;;  %v7929_v23 = vpop.eup %4332  ;;  %vm3270_vm11 = vweird.f32 %v7883_v34 }
 0x5c8   :  { %vm3271_vm15 = vmor %vm3269_vm14, %vm3270_vm11  ;;  %vm3310_vm1 = vweird.f32 %v7929_v23 }
 0x5c9   :  { %v2910_v62 = vpop.xlane.xlu1 %2909  ;;  %v3265_v37 = vmul.f32 %v7883_v34, %v3264_v24  ;;  %v3063_v24 = vmax.f32 %v3031_v31, 0.0  ;;  %v3304_v31 = vmul.f32 %v7929_v23, %v7885_v3  ;;  %vm3311_vm3 = vmor %vm3309_vm2, %vm3310_vm1 }
 0x5ca   :  { %3579 = vrot.lane.b32.xlu0 %v3501_v13, %s4620_s26  ;;  %v7893_v13 = vpop.permute.xlu0 %3721  ;;  %v7914_v47 = vpop.xlane.xlu2 %2925 }
 0x5cb   :  { %4265 = vset.pattern.permute.xlu0 %v8876_v28  ;;  %8878 = vst [vmem:[#allocation63_spill] sm:$0xff] %v7893_v13  ;;  %v3278_v13 = vmul.f32 %v7838_v0, %v3277_v12  ;;  %v3242_v12 = vsel %vm3241_vm8, %v7836_v20, %v3238_v27  ;;  %v3266_v27 = vmul.f32 0.5, %v3265_v37  ;;  %v7948_v37 = vadd.f32 1e-05, %v3063_v24 }
 0x5cc   :  { %v3468_v20 = vmul.f32 %v7921_v57, %v3242_v12 }
 0x5cd   :  { %v3282_v6 = vsel %vm3281_vm9, %v7838_v0, %v3278_v13  ;;  %v2994_v0 = vmul.f32 %v7912_v63, %v7912_v63  ;;  %v7940_v13 = vmul.f32 0.0051020407, %v7746_v53  ;;  %v3267_v12 = vsub.f32 1.5, %v3266_v27 }
 0x5ce   :  { %4269 = vset.pattern.permute.xlu2 %v8877_v25  ;;  %v3472_v60 = vmul.f32 %v7927_v61, %v3282_v6  ;;  %v3305_v6 = vmul.f32 %v7929_v23, %v3304_v31  ;;  %v3318_v61 = vmul.f32 %v7881_v41, %v3317_v17  ;;  %4334 = vrsqrt.f32 %v7948_v37 }
 0x5cf   :  { %3771 = vperm.xlu2 %4269, %v3473_v42   ;;  %v2962_v42 = vmul.f32 0.0051020407, %v7684_v5  ;;  %v2998_v53 = vmul.f32 %v7940_v13, %v7940_v13  ;;  %v3500_v27 = vmul.f32 %v3468_v20, %v7735_v29  ;;  %vm3349_vm5 = vweird.f32 %v7948_v37 }
 0x5d0   :  { %v3504_v19 = vmul.f32 %v3472_v60, %v7744_v30  ;;  %v3306_v31 = vmul.f32 0.5, %v3305_v6  ;;  %v3322_v29 = vsel %vm3321_vm13, %v7881_v41, %v3318_v61  ;;  %v7989_v41 = vld [vmem:[%s8722_s2 + $0x80] sm:$0xff] }
 0x5d1   :  { %v7931_v58 = vpop.xlane.xlu1 %2693  ;;  %v3026_v5 = vsub.f32 %v2962_v42, %v2994_v0  ;;  %v3268_v42 = vmul.f32 %v7883_v34, %v3267_v12 }
 0x5d2   :  { %3905 = vperm.xlu0 %4265, %v3647_v50   ;;  %v7942_v50 = vpop.permute.xlu0 %3567  ;;  %v3307_v17 = vsub.f32 1.5, %v3306_v31  ;;  %v8015_v31 = vmul.f32 0.0051020407, %v7789_v10 }
 0x5d3   :  { %v3058_v0 = vmax.f32 %v3026_v5, 0.0 }
 0x5d4   :  { %v7981_v30 = vpop.eup %4334 }
 0x5d5   :  { %v7983_v2 = vadd.f32 1e-05, %v3058_v0  ;;  %v3344_v12 = vmul.f32 %v7981_v30, %v7948_v37  ;;  %v2970_v0 = vmul.f32 0.0051020407, %v7914_v47  ;;  %vm3350_vm4 = vweird.f32 %v7981_v30 }
 0x5d6   :  { %vm3351_vm6 = vmor %vm3349_vm5, %vm3350_vm4 }
 0x5d7   :  { %3587 = vrot.lane.b32.xlu2 %v3505_v40, %s4620_s26  ;;  %v2966_v40 = vmul.f32 0.0051020407, %v2910_v62  ;;  %v7960_v62 = vpop.permute.xlu2 %3726  ;;  %4336 = vrsqrt.f32 %v7983_v2  ;;  %vm3299_vm8 = vweird.f32 %v7983_v2 }
 0x5d8   :  { %4273 = vset.pattern.permute.xlu2 %v8876_v28 }
 0x5d9   :  { %v3030_v44 = vsub.f32 %v2966_v40, %v2998_v53  ;;  %v7958_v24 = vpop.permute.xlu1 %3716  ;;  %v4614_v53 = vld [vmem:[%s8722_s2 + $0x28] sm:$0xff] }
 0x5da   :  { %4268 = vset.pattern.permute.xlu0 %v8877_v25  ;;  %3746 = vperm.xlu1 %4264, %v3468_v20   ;;  %v2702_v26 = vpop.xlane.xlu0 %2701  ;;  %v3652_v6 = vsub.f32 %v4614_v53, %v7797_v59  ;;  %v8038_v53 = vmul.f32 0.0051020407, %v7878_v7 }
 0x5db   :  { %3766 = vperm.xlu0 %4268, %v3472_v60   ;;  %v3062_v20 = vmax.f32 %v3030_v44, 0.0  ;;  %v7976_v36 = vmul.f32 0.0051020407, %v2702_v26  ;;  %v3272_v60 = vsel %vm3271_vm15, %v7883_v34, %v3268_v42  ;;  %v3308_v26 = vmul.f32 %v7929_v23, %v3307_v17 }
 0x5dc   :  { %v3471_v34 = vmul.f32 %v7989_v41, %v3272_v60 }
 0x5dd   :  { %v7992_v40 = vadd.f32 1e-05, %v3062_v20  ;;  %v3002_v5 = vmul.f32 %v7976_v36, %v7976_v36  ;;  %v8017_v47 = vpop.eup %4336  ;;  %v3312_v20 = vsel %vm3311_vm3, %v7929_v23, %v3308_v26  ;;  %v2997_v23 = vmul.f32 %v8015_v31, %v8015_v31 }
 0x5de   :  { %v3503_v3 = vmul.f32 %v3471_v34, %v7787_v16  ;;  %v2965_v16 = vmul.f32 0.0051020407, %v7732_v38  ;;  %vm3300_vm7 = vweird.f32 %v8017_v47 }
 0x5df   :  { %3935 = vperm.xlu2 %4273, %v3653_v54   ;;  %v7972_v54 = vld [vmem:[%s8722_s2 + $0xa8] sm:$0xff]  ;;  %4338 = vrsqrt.f32 %v7992_v40  ;;  %v3034_v42 = vsub.f32 %v2970_v0, %v3002_v5  ;;  %vm3301_vm10 = vmor %vm3299_vm8, %vm3300_vm7  ;;  %vm3339_vm11 = vweird.f32 %v7992_v40 }
 0x5e0   :  { %v3476_v61 = vmul.f32 %v7972_v54, %v3322_v29  ;;  %v8022_v29 = vld [vmem:[%s8722_s2 + $0xa0] sm:$0xff]  ;;  %v3029_v7 = vsub.f32 %v2965_v16, %v2997_v23 }
 0x5e1   :  { %v8005_v44 = vpop.permute.xlu1 %3565  ;;  %v3066_v17 = vmax.f32 %v3034_v42, 0.0  ;;  %v3475_v5 = vmul.f32 %v8022_v29, %v3312_v20  ;;  %v3001_v42 = vmul.f32 %v8038_v53, %v8038_v53 }
 0x5e2   :  { %3577 = vrot.lane.b32.xlu1 %v3500_v27, %s4620_s26  ;;  %v3570_v27 = vpop.permute.xlu2 %3569  ;;  %v3508_v59 = vmul.f32 %v3476_v61, %v7782_v39 }
 0x5e3   :  { %3585 = vrot.lane.b32.xlu0 %v3504_v19, %s4620_s26  ;;  %v3345_v19 = vmul.f32 %v7981_v30, %v3344_v12  ;;  %v8046_v0 = vadd.f32 1e-05, %v3066_v17  ;;  %v3656_v38 = vsub.f32 %v7578_v8, %v3570_v27  ;;  %v3507_v8 = vmul.f32 %v3475_v5, %v7828_v33 }
 0x5e4   :  { %4271 = vset.pattern.permute.xlu0 %v8876_v28  ;;  %v3061_v27 = vmax.f32 %v3029_v7, 0.0 }
 0x5e5   :  { %v3346_v60 = vmul.f32 0.5, %v3345_v19  ;;  %v8027_v12 = vpop.eup %4338  ;;  %4340 = vrsqrt.f32 %v8046_v0  ;;  %vm3379_vm14 = vweird.f32 %v8046_v0 }
 0x5e6   :  { %vm3340_vm9 = vweird.f32 %v8027_v12 }
 0x5e7   :  { %4274 = vset.pattern.permute.xlu2 %v8877_v25  ;;  %vm3341_vm12 = vmor %vm3339_vm11, %vm3340_vm9 }
 0x5e8   :  { %3786 = vperm.xlu2 %4274, %v3476_v61   ;;  %v3294_v61 = vmul.f32 %v8017_v47, %v7983_v2  ;;  %v8110_v2 = vld [vmem:[%s8722_s2 + $0x98] sm:$0xff] }
 0x5e9   :  { %v2922_v39 = vpop.xlane.xlu1 %2921 }
 0x5ea   :  { %3761 = vperm.xlu1 %4264, %v3471_v34   ;;  %v3347_v34 = vsub.f32 1.5, %v3346_v60  ;;  %v2969_v26 = vmul.f32 0.0051020407, %v2922_v39  ;;  %v3295_v19 = vmul.f32 %v8017_v47, %v3294_v61 }
 0x5eb   :  { %3930 = vperm.xlu0 %4271, %v3652_v6   ;;  %v3334_v6 = vmul.f32 %v8027_v12, %v7992_v40 }
 0x5ec   :  { %v3348_v60 = vmul.f32 %v7981_v30, %v3347_v34  ;;  %v3296_v61 = vmul.f32 0.5, %v3295_v19  ;;  %v4616_v19 = vld [vmem:[%s8722_s2 + $0x20] sm:$0xff] }
 0x5ed   :  { %v3335_v17 = vmul.f32 %v8027_v12, %v3334_v6  ;;  %v8072_v6 = vpop.eup %4340 }
 0x5ee   :  { %v3352_v23 = vsel %vm3351_vm6, %v7981_v30, %v3348_v60  ;;  %v3297_v33 = vsub.f32 1.5, %v3296_v61  ;;  %v3651_v30 = vsub.f32 %v4616_v19, %v7858_v11  ;;  %v2968_v19 = vmul.f32 0.0051020407, %v7865_v46 }
 0x5ef   :  { %v3336_v16 = vmul.f32 0.5, %v3335_v17  ;;  %vm3380_vm13 = vweird.f32 %v8072_v6 }
 0x5f0   :  { %3593 = vrot.lane.b32.xlu2 %v3508_v59, %s4620_s26  ;;  %v4615_v59 = vld [vmem:[%s8722_s2 + $0x10] sm:$0xff]  ;;  %v3298_v11 = vmul.f32 %v8017_v47, %v3297_v33  ;;  %vm3381_vm15 = vmor %vm3379_vm14, %vm3380_vm13 }
 0x5f1   :  { %v8029_v10 = vpop.xlane.xlu2 %2709  ;;  %4279 = vset.pattern.permute.xlu2 %v8876_v28  ;;  %v3649_v20 = vsub.f32 %v4615_v59, %v7698_v51  ;;  %v8067_v51 = vld [vmem:[%s8722_s2 + $0xc0] sm:$0xff]  ;;  %v3337_v7 = vsub.f32 1.5, %v3336_v16 }
 0x5f2   :  { %3583 = vrot.lane.b32.xlu1 %v3503_v3, %s4620_s26  ;;  %v3033_v3 = vsub.f32 %v2969_v26, %v3001_v42  ;;  %v3479_v37 = vmul.f32 %v8067_v51, %v3352_v23  ;;  %v8077_v26 = vpop.xlane.xlu0 %2929  ;;  %v3302_v61 = vsel %vm3301_vm10, %v8017_v47, %v3298_v11 }
 0x5f3   :  { %4272 = vset.pattern.permute.xlu0 %v8877_v25  ;;  %4267 = vset.pattern.permute.xlu1 %v8876_v28  ;;  %v3338_v17 = vmul.f32 %v8027_v12, %v3337_v7 }
 0x5f4   :  { %3781 = vperm.xlu0 %4272, %v3475_v5   ;;  %v3065_v34 = vmax.f32 %v3033_v3, 0.0  ;;  %v8074_v5 = vadd.f32 1e-05, %v3061_v27 }
 0x5f5   :  { %v3342_v16 = vsel %vm3341_vm12, %v8027_v12, %v3338_v17 }
 0x5f6   :  { %v8083_v42 = vadd.f32 1e-05, %v3065_v34  ;;  %4342 = vrsqrt.f32 %v8074_v5  ;;  %v3474_v34 = vmul.f32 %v8110_v2, %v3302_v61  ;;  %vm3329_vm2 = vweird.f32 %v8074_v5 }
 0x5f8   :  { %3950 = vperm.xlu2 %4279, %v3656_v38   ;;  %v3374_v38 = vmul.f32 %v8072_v6, %v8046_v0  ;;  %4344 = vrsqrt.f32 %v8083_v42  ;;  %v3506_v61 = vmul.f32 %v3474_v34, %v7912_v63  ;;  %vm3369_vm5 = vweird.f32 %v8083_v42 }
 0x5f9   :  { %v8060_v39 = vpop.xlane.xlu2 %2937 }
 0x5fa   :  { %3915 = vperm.xlu1 %4267, %v3649_v20   ;;  %v4617_v20 = vld [vmem:[%s8722_s2 + $0x40] sm:$0xff]  ;;  %v3375_v3 = vmul.f32 %v8072_v6, %v3374_v38  ;;  %v8113_v27 = vpop.permute.xlu0 %3736 }
 0x5fb   :  { %v3655_v60 = vsub.f32 %v4617_v20, %v7942_v50  ;;  %v8104_v50 = vmul.f32 0.0051020407, %v7931_v58  ;;  %v8121_v58 = vld [vmem:[%s8722_s2 + $0xb8] sm:$0xff] }
 0x5fc   :  { %3591 = vrot.lane.b32.xlu0 %v3507_v8, %s4620_s26  ;;  %v3511_v8 = vmul.f32 %v3479_v37, %v7876_v48  ;;  %v8115_v23 = vpop.eup %4342  ;;  %v3376_v40 = vmul.f32 0.5, %v3375_v3 }
 0x5fd   :  { %4277 = vset.pattern.permute.xlu0 %v8876_v28  ;;  %v3000_v48 = vmul.f32 %v8104_v50, %v8104_v50  ;;  %v3324_v12 = vmul.f32 %v8115_v23, %v8074_v5  ;;  %vm3330_vm1 = vweird.f32 %v8115_v23  ;;  %v3841_v5 = vmul.f32 %v7627_v18, %v5833_v9 }
 0x5fe   :  { %v8125_v33 = vpop.eup %4344  ;;  %vm3331_vm4 = vmor %vm3329_vm2, %vm3330_vm1 }
 0x5ff   :  { %v3364_v7 = vmul.f32 %v8125_v33, %v8083_v42  ;;  %v3032_v38 = vsub.f32 %v2968_v19, %v3000_v48  ;;  %v3325_v20 = vmul.f32 %v8115_v23, %v3324_v12  ;;  %v4618_v12 = vld [vmem:[%s8722_s2 + $0x38] sm:$0xff]  ;;  %vm3370_vm3 = vweird.f32 %v8125_v33 }
 0x600   :  { %4280 = vset.pattern.permute.xlu2 %v8877_v25  ;;  %vm8198_vm6 = vmor %vm3369_vm5, %vm3370_vm3 }
 0x601   :  { %v8088_v59 = vpop.permute.xlu2 %3741  ;;  %3801 = vperm.xlu2 %4280, %v3479_v37   ;;  %v3478_v37 = vmul.f32 %v8121_v58, %v3342_v16  ;;  %v3365_v17 = vmul.f32 %v8125_v33, %v3364_v7  ;;  %v8146_v16 = vpop.xlane.xlu1 %2705 }
 0x602   :  { %3925 = vperm.xlu1 %4267, %v3651_v30   ;;  %v3377_v30 = vsub.f32 1.5, %v3376_v40  ;;  %v3574_v3 = vpop.permute.xlu0 %3573  ;;  %v3326_v40 = vmul.f32 0.5, %v3325_v20 }
 0x604   :  { %3945 = vperm.xlu0 %4277, %v3655_v60   ;;  %v3378_v11 = vmul.f32 %v8072_v6, %v3377_v30  ;;  %v3327_v0 = vsub.f32 1.5, %v3326_v40 }
 0x606   :  { %v3382_v63 = vsel %vm3381_vm15, %v8072_v6, %v3378_v11  ;;  %v3328_v20 = vmul.f32 %v8115_v23, %v3327_v0 }
 0x609   :  { %v3576_v47 = vpop.permute.xlu2 %3575  ;;  %3599 = vrot.lane.b32.xlu2 %v3511_v8, %s4620_s26  ;;  %v3064_v8 = vmax.f32 %v3032_v38, 0.0  ;;  %v8171_v7 = vpop.permute.xlu1 %3731 }
 0x60a   :  { %4270 = vset.pattern.permute.xlu1 %v8877_v25  ;;  %4285 = vset.pattern.permute.xlu2 %v8876_v28  ;;  %v3659_v60 = vsub.f32 %v7715_v15, %v3576_v47  ;;  %v3510_v15 = vmul.f32 %v3478_v37, %v7940_v13  ;;  %v8155_v47 = vld [vmem:[%s8722_s2 + $0xd8] sm:$0xff] }
 0x60b   :  { %3776 = vperm.xlu1 %4270, %v3474_v34   ;;  %v3366_v34 = vmul.f32 0.5, %v3365_v17  ;;  %v8159_v48 = vadd.f32 1e-05, %v3064_v8  ;;  %v3482_v13 = vmul.f32 %v8155_v47, %v3382_v63  ;;  %v8187_v8 = vld [vmem:[%s8722_s2 + $0xb0] sm:$0xff] }
 0x60c   :  { %4278 = vset.pattern.permute.xlu0 %v8877_v25 }
 0x60d   :  { %3796 = vperm.xlu0 %4278, %v3478_v37   ;;  %v3654_v37 = vsub.f32 %v4618_v12, %v8005_v44  ;;  %v3367_v19 = vsub.f32 1.5, %v3366_v34  ;;  %4346 = vrsqrt.f32 %v8159_v48  ;;  %v2973_v44 = vmul.f32 0.0051020407, %v8060_v39 }
 0x60e   :  { %v3514_v40 = vmul.f32 %v3482_v13, %v7976_v36  ;;  %vm3359_vm11 = vweird.f32 %v8159_v48 }
 0x60f   :  { %v3368_v17 = vmul.f32 %v8125_v33, %v3367_v19  ;;  %v3845_v19 = vmul.f32 %v7702_v43, %v5875_v4 }
 0x611   :  { %v8143_v46 = vpop.permute.xlu2 %3756  ;;  %3965 = vperm.xlu2 %4285, %v3659_v60   ;;  %v3658_v60 = vsub.f32 %v7635_v49, %v3574_v3  ;;  %v3332_v49 = vsel %vm3331_vm4, %v8115_v23, %v3328_v20  ;;  %v3842_v3 = vmul.f32 %v7627_v18, %v7015_v14  ;;  %v3372_v42 = vsel %vm8198_vm6, %v8125_v33, %v3368_v17  ;;  %v8208_v23 = vld [vmem:[%s8722_s2 + $0xd0] sm:$0xff] }
 0x612   :  { %v3477_v9 = vmul.f32 %v8187_v8, %v3332_v49 }
 0x613   :  { %3589 = vrot.lane.b32.xlu1 %v3506_v61, %s4620_s26  ;;  %v8191_v39 = vpop.eup %4346 }
 0x614   :  { %4275 = vset.pattern.permute.xlu1 %v8876_v28  ;;  %v3354_v0 = vmul.f32 %v8191_v39, %v8159_v48  ;;  %v3509_v17 = vmul.f32 %v3477_v9, %v8015_v31  ;;  %vm3360_vm9 = vweird.f32 %v8191_v39 }
 0x615   :  { %3597 = vrot.lane.b32.xlu0 %v3510_v15, %s4620_s26  ;;  %vm3361_vm12 = vmor %vm3359_vm11, %vm3360_vm9 }
 0x616   :  { %4283 = vset.pattern.permute.xlu0 %v8876_v28  ;;  %v3355_v20 = vmul.f32 %v8191_v39, %v3354_v0 }
 0x619   :  { %v8167_v30 = vpop.permute.xlu2 %3581  ;;  %4286 = vset.pattern.permute.xlu2 %v8877_v25  ;;  %v2714_v6 = vpop.xlane.xlu0 %2713 }
 0x61a   :  { %v8173_v38 = vmul.f32 0.0051020407, %v2714_v6  ;;  %3816 = vperm.xlu2 %4286, %v3482_v13   ;;  %v3572_v13 = vpop.permute.xlu1 %3571  ;;  %v3846_v6 = vmul.f32 %v7702_v43, %v7058_v52 }
 0x61b   :  { %3940 = vperm.xlu1 %4275, %v3654_v37   ;;  %v3481_v37 = vmul.f32 %v8208_v23, %v3372_v42 }
 0x61c   :  { %v3005_v11 = vmul.f32 %v8173_v38, %v8173_v38 }
 0x61d   :  { %3960 = vperm.xlu0 %4283, %v3658_v60   ;;  %v8230_v60 = vmul.f32 0.0051020407, %v8029_v10  ;;  %v3513_v43 = vmul.f32 %v3481_v37, %v8038_v53 }
 0x61e   :  { %v3037_v61 = vsub.f32 %v2973_v44, %v3005_v11 }
 0x61f   :  { %v3004_v10 = vmul.f32 %v8230_v60, %v8230_v60 }
 0x620   :  { %v3069_v15 = vmax.f32 %v3037_v61, 0.0  ;;  %v8234_v61 = vmul.f32 0.0051020407, %v8146_v16 }
 0x621   :  { %v3911_v34 = vpop.permute.xlu2 %3910  ;;  %v2942_v4 = vpop.xlane.xlu0 %2941 }
 0x622   :  { %v3101_v14 = vadd.f32 1e-05, %v3069_v15  ;;  %v4065_v18 = vadd.f32 %v3911_v34, %v3841_v5  ;;  %v4066_v36 = vadd.f32 %v3911_v34, %v3842_v3  ;;  %3605 = vrot.lane.b32.xlu2 %v3514_v40, %s4620_s26  ;;  %v3356_v40 = vmul.f32 0.5, %v3355_v20 }
 0x623   :  { %4276 = vset.pattern.permute.xlu1 %v8877_v25  ;;  %v3003_v16 = vmul.f32 %v8234_v61, %v8234_v61 }
 0x624   :  { %4348 = vrsqrt.f32 %v3101_v14  ;;  %v4129_v33 = vmax.f32 %v4065_v18, 0.0  ;;  %v4130_v12 = vmax.f32 %v4066_v36, 0.0  ;;  %3791 = vperm.xlu1 %4276, %v3477_v9   ;;  %v3357_v9 = vsub.f32 1.5, %v3356_v40 }
 0x625   :  { %4284 = vset.pattern.permute.xlu0 %v8877_v25  ;;  %v2971_v18 = vmul.f32 0.0051020407, %v8077_v26  ;;  %vm3409_vm8 = vweird.f32 %v3101_v14 }
 0x626   :  { %4193 = vst [vmem:[%s8723_s3 + $0x10] sm:$0xff] %v4129_v33  ;;  %3811 = vperm.xlu0 %4284, %v3481_v37   ;;  %v3657_v37 = vsub.f32 %v7677_v56, %v3572_v13 }
 0x627   :  { %4194 = vst.msk [vmem:[%s8723_s3 + $0x18] sm:$0xff] %vm2590_vm0, %v4130_v12  ;;  %v3035_v12 = vsub.f32 %v2971_v18, %v3003_v16  ;;  %v3852_v16 = vmul.f32 %v7813_v45, %v7130_v22 }
 0x629   :  { %v3921_v44 = vpop.permute.xlu2 %3920  ;;  %v3067_v56 = vmax.f32 %v3035_v12, 0.0  ;;  %v8883_v12 = vld [vmem:[#allocation36_spill] sm:$0xff] }
 0x62a   :  { %v4349_v11 = vpop.eup %4348  ;;  %v4069_v49 = vadd.f32 %v3921_v44, %v3845_v19  ;;  %v4070_v5 = vadd.f32 %v3921_v44, %v3846_v6  ;;  %v8258_v19 = vld [vmem:[%s8722_s2 + $0xf0] sm:$0xff]  ;;  %v3358_v44 = vmul.f32 %v8191_v39, %v3357_v9 }
 0x62b   :  { %v3404_v3 = vmul.f32 %v4349_v11, %v3101_v14  ;;  %vm3410_vm7 = vweird.f32 %v4349_v11  ;;  %v8269_v14 = vld [vmem:[%s8722_s2 + $0xc8] sm:$0xff] }
 0x62c   :  { %v4133_v15 = vmax.f32 %v4069_v49, 0.0  ;;  %v4134_v63 = vmax.f32 %v4070_v5, 0.0  ;;  %v2934_v52 = vpop.xlane.xlu1 %2933  ;;  %3595 = vrot.lane.b32.xlu1 %v3509_v17, %s4620_s26  ;;  %vm3411_vm10 = vmor %vm3409_vm8, %vm3410_vm7  ;;  %v3362_v5 = vsel %vm3361_vm12, %v8191_v39, %v3358_v44 }
 0x62d   :  { %v3405_v34 = vmul.f32 %v4349_v11, %v3404_v3  ;;  %v2972_v31 = vmul.f32 0.0051020407, %v2934_v52  ;;  %4281 = vset.pattern.permute.xlu1 %v8876_v28  ;;  %v3480_v48 = vmul.f32 %v8269_v14, %v3362_v5 }
 0x62e   :  { %4197 = vst [vmem:[%s8723_s3 + $0x30] sm:$0xff] %v4133_v15  ;;  %3603 = vrot.lane.b32.xlu0 %v3513_v43, %s4620_s26 }
 0x62f   :  { %v3406_v42 = vmul.f32 0.5, %v3405_v34  ;;  %4198 = vst.msk [vmem:[%s8723_s3 + $0x38] sm:$0xff] %vm2590_vm0, %v4134_v63  ;;  %v3036_v53 = vsub.f32 %v2972_v31, %v3004_v10  ;;  %v2974_v34 = vmul.f32 0.0051020407, %v2942_v4  ;;  %v3851_v31 = vmul.f32 %v7813_v45, %v5944_v35 }
 0x630   :  { %v3840_v35 = vmul.f32 %v7668_v21, %v8883_v12 }
 0x631   :  { %v3407_v36 = vsub.f32 1.5, %v3406_v42  ;;  %v3068_v0 = vmax.f32 %v3036_v53, 0.0  ;;  %v8252_v33 = vpop.permute.xlu2 %3771 }
 0x633   :  { %v3408_v6 = vmul.f32 %v4349_v11, %v3407_v36  ;;  %v3100_v20 = vadd.f32 1e-05, %v3068_v0 }
 0x634   :  { %v8262_v26 = vpop.permute.xlu0 %3751  ;;  %3955 = vperm.xlu1 %4281, %v3657_v37   ;;  %v2718_v49 = vpop.xlane.xlu1 %2717  ;;  %v3512_v37 = vmul.f32 %v3480_v48, %v8104_v50 }
 0x635   :  { %v3412_v17 = vsel %vm3411_vm10, %v4349_v11, %v3408_v6  ;;  %4350 = vrsqrt.f32 %v3100_v20  ;;  %v8272_v3 = vmul.f32 0.0051020407, %v2718_v49  ;;  %v8274_v11 = vadd.f32 1e-05, %v3067_v56  ;;  %v8301_v49 = vld [vmem:[%s8722_s2 + $0xe8] sm:$0xff] }
 0x636   :  { %v3485_v13 = vmul.f32 %v8258_v19, %v3412_v17  ;;  %vm3399_vm14 = vweird.f32 %v3100_v20 }
 0x637   :  { %v3006_v43 = vmul.f32 %v8272_v3, %v8272_v3  ;;  %4352 = vrsqrt.f32 %v8274_v11  ;;  %vm3389_vm2 = vweird.f32 %v8274_v11 }
 0x638   :  { %3831 = vperm.xlu2 %4286, %v3485_v13   ;;  %v3517_v39 = vmul.f32 %v3485_v13, %v8173_v38  ;;  %v8882_v38 = vld [vmem:[#allocation2_spill] sm:$0xff] }
 0x639   :  { %v3588_v40 = vpop.permute.xlu2 %3587  ;;  %v3038_v53 = vsub.f32 %v2974_v34, %v3006_v43  ;;  %v3839_v4 = vmul.f32 %v7668_v21, %v8882_v38  ;;  %v3662_v21 = vsub.f32 %v7767_v1, %v8167_v30 }
 0x63a   :  { %v3665_v34 = vsub.f32 %v7874_v32, %v3588_v40  ;;  %v3857_v40 = vmul.f32 %v7960_v62, %v6001_v55 }
 0x63b   :  { %v4351_v15 = vpop.eup %4350  ;;  %v3070_v50 = vmax.f32 %v3038_v53, 0.0 }
 0x63c   :  { %v3394_v63 = vmul.f32 %v4351_v15, %v3100_v20  ;;  %v8277_v52 = vpop.permute.xlu0 %3579  ;;  %4282 = vset.pattern.permute.xlu1 %v8877_v25  ;;  %vm3400_vm13 = vweird.f32 %v4351_v15 }
 0x63d   :  { %3806 = vperm.xlu1 %4282, %v3480_v48   ;;  %v8295_v22 = vpop.eup %4352  ;;  %vm3401_vm15 = vmor %vm3399_vm14, %vm3400_vm13 }
 0x63e   :  { %v3395_v10 = vmul.f32 %v4351_v15, %v3394_v63  ;;  %v3384_v5 = vmul.f32 %v8295_v22, %v8274_v11  ;;  %vm3390_vm1 = vweird.f32 %v8295_v22 }
 0x63f   :  { %vm3391_vm3 = vmor %vm3389_vm2, %vm3390_vm1 }
 0x640   :  { %v3396_v42 = vmul.f32 0.5, %v3395_v10  ;;  %3611 = vrot.lane.b32.xlu2 %v3517_v39, %s4620_s26  ;;  %v3385_v43 = vmul.f32 %v8295_v22, %v3384_v5 }
 0x641   :  { %v3936_v9 = vpop.permute.xlu2 %3935  ;;  %4290 = vset.pattern.permute.xlu2 %v8876_v28 }
 0x642   :  { %v3397_v18 = vsub.f32 1.5, %v3396_v42  ;;  %v4075_v36 = vadd.f32 %v3936_v9, %v3851_v31  ;;  %v4076_v0 = vadd.f32 %v3936_v9, %v3852_v16  ;;  %v3386_v31 = vmul.f32 0.5, %v3385_v43 }
 0x644   :  { %v4139_v45 = vmax.f32 %v4075_v36, 0.0  ;;  %v4140_v6 = vmax.f32 %v4076_v0, 0.0  ;;  %v3906_v44 = vpop.permute.xlu0 %3905  ;;  %v3398_v17 = vmul.f32 %v4351_v15, %v3397_v18  ;;  %v3387_v53 = vsub.f32 1.5, %v3386_v31 }
 0x645   :  { %v4063_v56 = vadd.f32 %v3906_v44, %v3839_v4  ;;  %v4064_v13 = vadd.f32 %v3906_v44, %v3840_v35  ;;  %3601 = vrot.lane.b32.xlu1 %v3512_v37, %s4620_s26  ;;  %v8884_v4 = vld [vmem:[#allocation42_spill] sm:$0xff]  ;;  %v8886_v44 = vld [vmem:[#allocation5_spill] sm:$0xff] }
 0x646   :  { %4203 = vst [vmem:[%s8723_s3 + $0x60] sm:$0xff] %v4139_v45  ;;  %v3402_v20 = vsel %vm3401_vm15, %v4351_v15, %v3398_v17  ;;  %4287 = vset.pattern.permute.xlu1 %v8876_v28  ;;  %v8321_v15 = vadd.f32 1e-05, %v3070_v50  ;;  %v3388_v32 = vmul.f32 %v8295_v22, %v3387_v53  ;;  %v3858_v12 = vmul.f32 %v7960_v62, %v8884_v4  ;;  %v8885_v35 = vld [vmem:[#allocation62_spill] sm:$0xff]  ;;  %v8887_v17 = vld [vmem:[#allocation60_spill] sm:$0xff]  ;;  %v8892_v4 = vld [vmem:[#allocation37_spill] sm:$0xff] }
 0x647   :  { %4204 = vst.msk [vmem:[%s8723_s3 + $0x68] sm:$0xff] %vm2590_vm0, %v4140_v6  ;;  %v4127_v48 = vmax.f32 %v4063_v56, 0.0  ;;  %v4128_v63 = vmax.f32 %v4064_v13, 0.0  ;;  %v3484_v1 = vmul.f32 %v8301_v49, %v3402_v20  ;;  %v8355_v6 = vld [vmem:[%s8722_s2 + $0xe0] sm:$0xff]  ;;  %v8888_v56 = vld [vmem:[#allocation39_spill] sm:$0xff] }
 0x648   :  { %3980 = vperm.xlu2 %4290, %v3662_v21   ;;  %4354 = vrsqrt.f32 %v8321_v15  ;;  %v3392_v55 = vsel %vm3391_vm3, %v8295_v22, %v3388_v32  ;;  %v3850_v11 = vmul.f32 %v8887_v17, %v8888_v56  ;;  %vm3419_vm5 = vweird.f32 %v8321_v15  ;;  %v8890_v32 = vld [vmem:[#allocation3_spill] sm:$0xff] }
 0x649   :  { %4191 = vst [vmem:[%s8723_s3] sm:$0xff] %v4127_v48  ;;  %v8319_v30 = vpop.permute.xlu2 %3786  ;;  %3826 = vperm.xlu0 %4284, %v3484_v1   ;;  %v3516_v16 = vmul.f32 %v3484_v1, %v8230_v60  ;;  %v3483_v5 = vmul.f32 %v8355_v6, %v3392_v55  ;;  %v8889_v1 = vld [vmem:[#allocation64_spill] sm:$0xff] }
 0x64a   :  { %4192 = vst.msk [vmem:[%s8723_s3 + $0x8] sm:$0xff] %vm2590_vm0, %v4128_v63 }
 0x64c   :  { %v8328_v39 = vpop.permute.xlu1 %3746 }
 0x64d   :  { %v8330_v10 = vpop.permute.xlu0 %3766 }
 0x64e   :  { %v8337_v9 = vpop.eup %4354 }
 0x64f   :  { %v3414_v60 = vmul.f32 %v8337_v9, %v8321_v15  ;;  %vm3420_vm4 = vweird.f32 %v8337_v9 }
 0x650   :  { %3995 = vperm.xlu2 %4290, %v3665_v34   ;;  %vm3421_vm6 = vmor %vm3419_vm5, %vm3420_vm4 }
 0x651   :  { %v3594_v42 = vpop.permute.xlu2 %3593  ;;  %3609 = vrot.lane.b32.xlu0 %v3516_v16, %s4620_s26  ;;  %v3415_v62 = vmul.f32 %v8337_v9, %v3414_v60  ;;  %v8891_v60 = vld [vmem:[#allocation59_spill] sm:$0xff] }
 0x652   :  { %4289 = vset.pattern.permute.xlu0 %v8876_v28  ;;  %v3668_v38 = vsub.f32 %v7972_v54, %v3594_v42 }
 0x653   :  { %v3416_v63 = vmul.f32 0.5, %v3415_v62 }
 0x654   :  { %v3578_v18 = vpop.permute.xlu1 %3577 }
 0x655   :  { %v3660_v36 = vsub.f32 %v7921_v57, %v3578_v18  ;;  %v3586_v0 = vpop.permute.xlu0 %3585  ;;  %v3661_v57 = vsub.f32 %v8885_v35, %v8277_v52  ;;  %v3849_v52 = vmul.f32 %v8887_v17, %v8886_v44  ;;  %v3417_v42 = vsub.f32 1.5, %v3416_v63  ;;  %v8893_v44 = vld [vmem:[#allocation10_spill] sm:$0xff] }
 0x656   :  { %v3664_v43 = vsub.f32 %v8889_v1, %v3586_v0  ;;  %v3863_v17 = vmul.f32 %v8088_v59, %v8893_v44  ;;  %v8898_v1 = vld [vmem:[#allocation7_spill] sm:$0xff]  ;;  %v8901_v44 = vld [vmem:[#allocation6_spill] sm:$0xff] }
 0x657   :  { %3970 = vperm.xlu1 %4287, %v3660_v36   ;;  %v3418_v36 = vmul.f32 %v8337_v9, %v3417_v42 }
 0x658   :  { %4010 = vperm.xlu2 %4290, %v3668_v38  }
 0x659   :  { %v3951_v54 = vpop.permute.xlu2 %3950  ;;  %3975 = vperm.xlu0 %4289, %v3661_v57   ;;  %v3422_v35 = vsel %vm3421_vm6, %v8337_v9, %v3418_v36 }
 0x65a   :  { %v4081_v37 = vadd.f32 %v3951_v54, %v3857_v40  ;;  %v4082_v45 = vadd.f32 %v3951_v54, %v3858_v12  ;;  %v3843_v40 = vmul.f32 %v8891_v60, %v8890_v32  ;;  %v8399_v12 = vld [vmem:[%s8722_s2 + $0xf8] sm:$0xff] }
 0x65c   :  { %v4145_v13 = vmax.f32 %v4081_v37, 0.0  ;;  %v4146_v21 = vmax.f32 %v4082_v45, 0.0  ;;  %v8363_v50 = vpop.permute.xlu1 %3761  ;;  %v3486_v37 = vmul.f32 %v8399_v12, %v3422_v35 }
 0x65d   :  { %v3931_v20 = vpop.permute.xlu0 %3930 }
 0x65e   :  { %4209 = vst [vmem:[%s8723_s3 + $0x90] sm:$0xff] %v4145_v13  ;;  %v4073_v22 = vadd.f32 %v3931_v20, %v3849_v52  ;;  %v4074_v48 = vadd.f32 %v3931_v20, %v3850_v11  ;;  %v8894_v52 = vld [vmem:[#allocation45_spill] sm:$0xff]  ;;  %v8895_v13 = vld [vmem:[#allocation4_spill] sm:$0xff] }
 0x65f   :  { %4210 = vst.msk [vmem:[%s8723_s3 + $0x98] sm:$0xff] %vm2590_vm0, %v4146_v21  ;;  %4288 = vset.pattern.permute.xlu1 %v8877_v25  ;;  %v3515_v25 = vmul.f32 %v3483_v5, %v8234_v61  ;;  %v3844_v61 = vmul.f32 %v8891_v60, %v8892_v4  ;;  %v3864_v56 = vmul.f32 %v8088_v59, %v8894_v52  ;;  %v8896_v21 = vld [vmem:[#allocation61_spill] sm:$0xff]  ;;  %v8902_v52 = vld [vmem:[#allocation40_spill] sm:$0xff] }
 0x660   :  { %v4137_v34 = vmax.f32 %v4073_v22, 0.0  ;;  %v4138_v31 = vmax.f32 %v4074_v48, 0.0  ;;  %3821 = vperm.xlu1 %4288, %v3483_v5   ;;  %v3847_v20 = vmul.f32 %v8896_v21, %v8895_v13  ;;  %v8897_v5 = vld [vmem:[#allocation38_spill] sm:$0xff] }
 0x661   :  { %v8375_v16 = vpop.permute.xlu2 %3801  ;;  %3990 = vperm.xlu0 %4289, %v3664_v43   ;;  %v3848_v59 = vmul.f32 %v8896_v21, %v8897_v5  ;;  %v8899_v43 = vld [vmem:[#allocation63_spill] sm:$0xff] }
 0x662   :  { %4201 = vst [vmem:[%s8723_s3 + $0x50] sm:$0xff] %v4137_v34  ;;  %v3855_v34 = vmul.f32 %v8899_v43, %v8898_v1 }
 0x663   :  { %4202 = vst.msk [vmem:[%s8723_s3 + $0x58] sm:$0xff] %vm2590_vm0, %v4138_v31  ;;  %v8900_v31 = vld [vmem:[#allocation41_spill] sm:$0xff] }
 0x664   :  { %v3584_v53 = vpop.permute.xlu1 %3583  ;;  %v3856_v42 = vmul.f32 %v8899_v43, %v8900_v31 }
 0x666   :  { %v8385_v18 = vpop.permute.xlu0 %3781 }
 0x668   :  { %3607 = vrot.lane.b32.xlu1 %v3515_v25, %s4620_s26 }
 0x669   :  { %v3600_v0 = vpop.permute.xlu2 %3599 }
 0x66a   :  { %v3671_v38 = vsub.f32 %v8067_v51, %v3600_v0  ;;  %v3518_v0 = vmul.f32 %v3486_v37, %v8272_v3 }
 0x66c   :  { %4025 = vperm.xlu2 %4290, %v3671_v38   ;;  %v3916_v57 = vpop.permute.xlu1 %3915 }
 0x66d   :  { %v4067_v15 = vadd.f32 %v3916_v57, %v3843_v40  ;;  %v4068_v54 = vadd.f32 %v3916_v57, %v3844_v61 }
 0x66e   :  { %v3592_v51 = vpop.permute.xlu0 %3591 }
 0x66f   :  { %v4131_v45 = vmax.f32 %v4067_v15, 0.0  ;;  %v4132_v55 = vmax.f32 %v4068_v54, 0.0  ;;  %v3667_v62 = vsub.f32 %v8022_v29, %v3592_v51  ;;  %v3663_v15 = vsub.f32 %v7989_v41, %v3584_v53 }
 0x670   :  { %3836 = vperm.xlu1 %4288, %v3486_v37   ;;  %v3854_v41 = vmul.f32 %v7958_v24, %v8902_v52 }
 0x671   :  { %4195 = vst [vmem:[%s8723_s3 + $0x20] sm:$0xff] %v4131_v45  ;;  %v3966_v9 = vpop.permute.xlu2 %3965  ;;  %4005 = vperm.xlu0 %4289, %v3667_v62  }
 0x672   :  { %4196 = vst.msk [vmem:[%s8723_s3 + $0x28] sm:$0xff] %vm2590_vm0, %v4132_v55  ;;  %v4087_v11 = vadd.f32 %v3966_v9, %v3863_v17  ;;  %v4088_v29 = vadd.f32 %v3966_v9, %v3864_v56  ;;  %v3853_v17 = vmul.f32 %v7958_v24, %v8901_v44  ;;  %v8903_v56 = vld [vmem:[#allocation9_spill] sm:$0xff] }
 0x673   :  { %v3861_v9 = vmul.f32 %v8113_v27, %v8903_v56  ;;  %v8911_v56 = vld [vmem:[#allocation19_spill] sm:$0xff] }
 0x674   :  { %v4151_v22 = vmax.f32 %v4087_v11, 0.0  ;;  %v4152_v48 = vmax.f32 %v4088_v29, 0.0  ;;  %v3926_v63 = vpop.permute.xlu1 %3925 }
 0x675   :  { %v4071_v25 = vadd.f32 %v3926_v63, %v3847_v20  ;;  %v4072_v36 = vadd.f32 %v3926_v63, %v3848_v59 }
 0x676   :  { %4215 = vst [vmem:[%s8723_s3 + $0xc0] sm:$0xff] %v4151_v22  ;;  %v3946_v38 = vpop.permute.xlu0 %3945 }
 0x677   :  { %4216 = vst.msk [vmem:[%s8723_s3 + $0xc8] sm:$0xff] %vm2590_vm0, %v4152_v48  ;;  %v4135_v32 = vmax.f32 %v4071_v25, 0.0  ;;  %v4136_v60 = vmax.f32 %v4072_v36, 0.0  ;;  %v4079_v40 = vadd.f32 %v3946_v38, %v3855_v34  ;;  %v4080_v4 = vadd.f32 %v3946_v38, %v3856_v42  ;;  %v8905_v42 = vld [vmem:[#allocation13_spill] sm:$0xff]  ;;  %v8906_v36 = vld [vmem:[#allocation48_spill] sm:$0xff] }
 0x678   :  { %3613 = vrot.lane.b32.xlu1 %v3518_v0, %s4620_s26  ;;  %v3869_v25 = vmul.f32 %v8143_v46, %v8905_v42  ;;  %v3870_v0 = vmul.f32 %v8143_v46, %v8906_v36  ;;  %v8915_v36 = vld [vmem:[#allocation11_spill] sm:$0xff] }
 0x679   :  { %4199 = vst [vmem:[%s8723_s3 + $0x40] sm:$0xff] %v4135_v32  ;;  %v4143_v3 = vmax.f32 %v4079_v40, 0.0  ;;  %v4144_v61 = vmax.f32 %v4080_v4, 0.0  ;;  %v8435_v35 = vpop.permute.xlu2 %3816  ;;  %4291 = vset.pattern.permute.xlu1 %v8876_v28  ;;  %v8907_v4 = vld [vmem:[#allocation8_spill] sm:$0xff] }
 0x67a   :  { %4200 = vst.msk [vmem:[%s8723_s3 + $0x48] sm:$0xff] %vm2590_vm0, %v4136_v60 }
 0x67b   :  { %4207 = vst [vmem:[%s8723_s3 + $0x80] sm:$0xff] %v4143_v3  ;;  %v8908_v3 = vld [vmem:[#allocation43_spill] sm:$0xff] }
 0x67c   :  { %4208 = vst.msk [vmem:[%s8723_s3 + $0x88] sm:$0xff] %vm2590_vm0, %v4144_v61 }
 0x67d   :  { %v8449_v57 = vpop.permute.xlu1 %3776 }
 0x67f   :  { %v8452_v54 = vpop.permute.xlu0 %3796 }
 0x680   :  { %3985 = vperm.xlu1 %4291, %v3663_v15  }
 0x681   :  { %v3606_v28 = vpop.permute.xlu2 %3605 }
 0x682   :  { %v3674_v37 = vsub.f32 %v8155_v47, %v3606_v28  ;;  %v8904_v47 = vld [vmem:[#allocation44_spill] sm:$0xff] }
 0x683   :  { %v3862_v11 = vmul.f32 %v8113_v27, %v8904_v47  ;;  %v8912_v47 = vld [vmem:[#allocation54_spill] sm:$0xff] }
 0x684   :  { %4040 = vperm.xlu2 %4290, %v3674_v37   ;;  %v8909_v37 = vld [vmem:[#allocation16_spill] sm:$0xff] }
 0x685   :  { %v3590_v51 = vpop.permute.xlu1 %3589 }
 0x686   :  { %v3666_v45 = vsub.f32 %v8110_v2, %v3590_v51  ;;  %v3875_v51 = vmul.f32 %v8252_v33, %v8909_v37 }
 0x687   :  { %v3598_v55 = vpop.permute.xlu0 %3597 }
 0x688   :  { %v3670_v62 = vsub.f32 %v8121_v58, %v3598_v55  ;;  %4000 = vperm.xlu1 %4291, %v3666_v45   ;;  %v8910_v45 = vld [vmem:[#allocation51_spill] sm:$0xff] }
 0x68a   :  { %4020 = vperm.xlu0 %4289, %v3670_v62  }
 0x68d   :  { %v3941_v53 = vpop.permute.xlu1 %3940 }
 0x68e   :  { %v4077_v29 = vadd.f32 %v3941_v53, %v3853_v17  ;;  %v4078_v2 = vadd.f32 %v3941_v53, %v3854_v41 }
 0x68f   :  { %v3961_v13 = vpop.permute.xlu0 %3960 }
 0x690   :  { %v4141_v21 = vmax.f32 %v4077_v29, 0.0  ;;  %v4142_v58 = vmax.f32 %v4078_v2, 0.0  ;;  %v4085_v20 = vadd.f32 %v3961_v13, %v3861_v9  ;;  %v4086_v5 = vadd.f32 %v3961_v13, %v3862_v11 }
 0x691   :  { %v3881_v9 = vmul.f32 %v8319_v30, %v8911_v56  ;;  %v3882_v11 = vmul.f32 %v8319_v30, %v8912_v47  ;;  %v8922_v47 = vld [vmem:[#allocation31_spill] sm:$0xff] }
 0x692   :  { %4205 = vst [vmem:[%s8723_s3 + $0x70] sm:$0xff] %v4141_v21  ;;  %v4149_v59 = vmax.f32 %v4085_v20, 0.0  ;;  %v4150_v24 = vmax.f32 %v4086_v5, 0.0  ;;  %v8468_v22 = vpop.permute.xlu2 %3831 }
 0x693   :  { %4206 = vst.msk [vmem:[%s8723_s3 + $0x78] sm:$0xff] %vm2590_vm0, %v4142_v58 }
 0x694   :  { %4213 = vst [vmem:[%s8723_s3 + $0xb0] sm:$0xff] %v4149_v59 }
 0x695   :  { %4214 = vst.msk [vmem:[%s8723_s3 + $0xb8] sm:$0xff] %vm2590_vm0, %v4150_v24  ;;  %v8913_v24 = vld [vmem:[#allocation22_spill] sm:$0xff] }
 0x696   :  { %v8481_v27 = vpop.permute.xlu1 %3791 }
 0x698   :  { %v8483_v48 = vpop.permute.xlu0 %3811 }
 0x69a   :  { %v3612_v63 = vpop.permute.xlu2 %3611 }
 0x69b   :  { %v3677_v1 = vsub.f32 %v8258_v19, %v3612_v63  ;;  %v3859_v19 = vmul.f32 %v8171_v7, %v8907_v4  ;;  %v3887_v63 = vmul.f32 %v8375_v16, %v8913_v24 }
 0x69d   :  { %4055 = vperm.xlu2 %4290, %v3677_v1   ;;  %v8914_v1 = vld [vmem:[#allocation57_spill] sm:$0xff] }
 0x69e   :  { %v3596_v43 = vpop.permute.xlu1 %3595 }
 0x69f   :  { %v3669_v34 = vsub.f32 %v8187_v8, %v3596_v43  ;;  %v3860_v8 = vmul.f32 %v8171_v7, %v8908_v3  ;;  %v3876_v7 = vmul.f32 %v8252_v33, %v8910_v45  ;;  %v3888_v43 = vmul.f32 %v8375_v16, %v8914_v1  ;;  %v8917_v3 = vld [vmem:[#allocation12_spill] sm:$0xff] }
 0x6a0   :  { %v3604_v31 = vpop.permute.xlu0 %3603  ;;  %v3867_v16 = vmul.f32 %v8262_v26, %v8917_v3  ;;  %v8928_v3 = vld [vmem:[#allocation34_spill] sm:$0xff] }
 0x6a1   :  { %v3673_v38 = vsub.f32 %v8208_v23, %v3604_v31  ;;  %4015 = vperm.xlu1 %4291, %v3669_v34  }
 0x6a2   :  { %v3981_v32 = vpop.permute.xlu2 %3980 }
 0x6a3   :  { %v4093_v60 = vadd.f32 %v3981_v32, %v3869_v25  ;;  %v4094_v40 = vadd.f32 %v3981_v32, %v3870_v0  ;;  %4035 = vperm.xlu0 %4289, %v3673_v38   ;;  %v3865_v0 = vmul.f32 %v8328_v39, %v8915_v36  ;;  %v8926_v36 = vld [vmem:[#allocation49_spill] sm:$0xff] }
 0x6a5   :  { %v4157_v61 = vmax.f32 %v4093_v60, 0.0  ;;  %v4158_v15 = vmax.f32 %v4094_v40, 0.0 }
 0x6a6   :  { %v3956_v28 = vpop.permute.xlu1 %3955 }
 0x6a7   :  { %4221 = vst [vmem:[%s8723_s3 + $0xf0] sm:$0xff] %v4157_v61  ;;  %v4083_v46 = vadd.f32 %v3956_v28, %v3859_v19  ;;  %v4084_v23 = vadd.f32 %v3956_v28, %v3860_v8  ;;  %v8918_v8 = vld [vmem:[#allocation47_spill] sm:$0xff] }
 0x6a8   :  { %4222 = vst.msk [vmem:[%s8723_s3 + $0xf8] sm:$0xff] %vm2590_vm0, %v4158_v15 }
 0x6a9   :  { %v4147_v55 = vmax.f32 %v4083_v46, 0.0  ;;  %v4148_v62 = vmax.f32 %v4084_v23, 0.0 }
 0x6aa   :  { %v3996_v44 = vpop.permute.xlu2 %3995 }
 0x6ab   :  { %4211 = vst [vmem:[%s8723_s3 + $0xa0] sm:$0xff] %v4147_v55  ;;  %v4099_v17 = vadd.f32 %v3996_v44, %v3875_v51  ;;  %v4100_v52 = vadd.f32 %v3996_v44, %v3876_v7  ;;  %v8919_v51 = vld [vmem:[#allocation15_spill] sm:$0xff]  ;;  %v8920_v7 = vld [vmem:[#allocation50_spill] sm:$0xff] }
 0x6ac   :  { %4212 = vst.msk [vmem:[%s8723_s3 + $0xa8] sm:$0xff] %vm2590_vm0, %v4148_v62  ;;  %v3873_v45 = vmul.f32 %v8330_v10, %v8919_v51  ;;  %v3874_v55 = vmul.f32 %v8330_v10, %v8920_v7  ;;  %v8932_v51 = vld [vmem:[#allocation56_spill] sm:$0xff] }
 0x6ad   :  { %v4163_v41 = vmax.f32 %v4099_v17, 0.0  ;;  %v4164_v53 = vmax.f32 %v4100_v52, 0.0 }
 0x6af   :  { %4227 = vst [vmem:[%s8723_s3 + $0x120] sm:$0xff] %v4163_v41  ;;  %v8517_v33 = vpop.permute.xlu1 %3806 }
 0x6b0   :  { %4228 = vst.msk [vmem:[%s8723_s3 + $0x128] sm:$0xff] %vm2590_vm0, %v4164_v53 }
 0x6b2   :  { %v4011_v29 = vpop.permute.xlu2 %4010 }
 0x6b3   :  { %v4105_v2 = vadd.f32 %v4011_v29, %v3881_v9  ;;  %v4106_v13 = vadd.f32 %v4011_v29, %v3882_v11  ;;  %v8921_v9 = vld [vmem:[#allocation25_spill] sm:$0xff]  ;;  %v3894_v11 = vmul.f32 %v8435_v35, %v8922_v47 }
 0x6b4   :  { %v3893_v10 = vmul.f32 %v8435_v35, %v8921_v9  ;;  %v8934_v9 = vld [vmem:[#allocation55_spill] sm:$0xff] }
 0x6b5   :  { %v4169_v21 = vmax.f32 %v4105_v2, 0.0  ;;  %v4170_v58 = vmax.f32 %v4106_v13, 0.0 }
 0x6b7   :  { %4233 = vst [vmem:[%s8723_s3 + $0x150] sm:$0xff] %v4169_v21  ;;  %v3602_v20 = vpop.permute.xlu1 %3601 }
 0x6b8   :  { %4234 = vst.msk [vmem:[%s8723_s3 + $0x158] sm:$0xff] %vm2590_vm0, %v4170_v58  ;;  %v3672_v5 = vsub.f32 %v8269_v14, %v3602_v20  ;;  %v8916_v14 = vld [vmem:[#allocation46_spill] sm:$0xff] }
 0x6b9   :  { %v3866_v38 = vmul.f32 %v8328_v39, %v8916_v14  ;;  %v8923_v20 = vld [vmem:[#allocation18_spill] sm:$0xff] }
 0x6ba   :  { %4030 = vperm.xlu1 %4291, %v3672_v5   ;;  %v3879_v5 = vmul.f32 %v8385_v18, %v8923_v20 }
 0x6bb   :  { %v8535_v59 = vpop.permute.xlu0 %3826 }
 0x6c3   :  { %v3610_v30 = vpop.permute.xlu0 %3609 }
 0x6c4   :  { %v3676_v34 = vsub.f32 %v8301_v49, %v3610_v30  ;;  %v3868_v49 = vmul.f32 %v8262_v26, %v8918_v8  ;;  %v8924_v30 = vld [vmem:[#allocation53_spill] sm:$0xff] }
 0x6c5   :  { %v3880_v24 = vmul.f32 %v8385_v18, %v8924_v30 }
 0x6c6   :  { %v4026_v31 = vpop.permute.xlu2 %4025  ;;  %4050 = vperm.xlu0 %4289, %v3676_v34  }
 0x6c7   :  { %v4111_v42 = vadd.f32 %v4026_v31, %v3887_v63  ;;  %v4112_v25 = vadd.f32 %v4026_v31, %v3888_v43 }
 0x6c9   :  { %v4175_v32 = vmax.f32 %v4111_v42, 0.0  ;;  %v4176_v60 = vmax.f32 %v4112_v25, 0.0  ;;  %v3971_v40 = vpop.permute.xlu1 %3970  ;;  %v8925_v42 = vld [vmem:[#allocation14_spill] sm:$0xff] }
 0x6ca   :  { %v4089_v4 = vadd.f32 %v3971_v40, %v3865_v0  ;;  %v4090_v19 = vadd.f32 %v3971_v40, %v3866_v38  ;;  %v3871_v25 = vmul.f32 %v8363_v50, %v8925_v42  ;;  %v3872_v0 = vmul.f32 %v8363_v50, %v8926_v36 }
 0x6cb   :  { %4239 = vst [vmem:[%s8723_s3 + $0x180] sm:$0xff] %v4175_v32  ;;  %v3976_v15 = vpop.permute.xlu0 %3975 }
 0x6cc   :  { %4240 = vst.msk [vmem:[%s8723_s3 + $0x188] sm:$0xff] %vm2590_vm0, %v4176_v60  ;;  %v4153_v39 = vmax.f32 %v4089_v4, 0.0  ;;  %v4154_v61 = vmax.f32 %v4090_v19, 0.0  ;;  %v4091_v28 = vadd.f32 %v3976_v15, %v3867_v16  ;;  %v4092_v46 = vadd.f32 %v3976_v15, %v3868_v49  ;;  %v8927_v4 = vld [vmem:[#allocation28_spill] sm:$0xff]  ;;  %v8929_v49 = vld [vmem:[#allocation17_spill] sm:$0xff] }
 0x6cd   :  { %v3899_v19 = vmul.f32 %v8468_v22, %v8927_v4  ;;  %v3900_v16 = vmul.f32 %v8468_v22, %v8928_v3  ;;  %v8941_v3 = vld [vmem:[#allocation26_spill] sm:$0xff] }
 0x6ce   :  { %4217 = vst [vmem:[%s8723_s3 + $0xd0] sm:$0xff] %v4153_v39  ;;  %v4155_v26 = vmax.f32 %v4091_v28, 0.0  ;;  %v4156_v23 = vmax.f32 %v4092_v46, 0.0  ;;  %v3877_v39 = vmul.f32 %v8449_v57, %v8929_v49 }
 0x6cf   :  { %4218 = vst.msk [vmem:[%s8723_s3 + $0xd8] sm:$0xff] %vm2590_vm0, %v4154_v61  ;;  %v8930_v61 = vld [vmem:[#allocation52_spill] sm:$0xff] }
 0x6d0   :  { %4219 = vst [vmem:[%s8723_s3 + $0xe0] sm:$0xff] %v4155_v26  ;;  %v3878_v15 = vmul.f32 %v8449_v57, %v8930_v61  ;;  %v8931_v26 = vld [vmem:[#allocation21_spill] sm:$0xff] }
 0x6d1   :  { %4220 = vst.msk [vmem:[%s8723_s3 + $0xe8] sm:$0xff] %vm2590_vm0, %v4156_v23  ;;  %v3885_v23 = vmul.f32 %v8452_v54, %v8931_v26 }
 0x6d2   :  { %v8571_v37 = vpop.permute.xlu1 %3821 }
 0x6d3   :  { %v3991_v62 = vpop.permute.xlu0 %3990 }
 0x6d4   :  { %v4097_v44 = vadd.f32 %v3991_v62, %v3873_v45  ;;  %v4098_v17 = vadd.f32 %v3991_v62, %v3874_v55  ;;  %v3886_v45 = vmul.f32 %v8452_v54, %v8932_v51 }
 0x6d6   :  { %v4161_v52 = vmax.f32 %v4097_v44, 0.0  ;;  %v4162_v41 = vmax.f32 %v4098_v17, 0.0 }
 0x6d8   :  { %4225 = vst [vmem:[%s8723_s3 + $0x110] sm:$0xff] %v4161_v52 }
 0x6d9   :  { %4226 = vst.msk [vmem:[%s8723_s3 + $0x118] sm:$0xff] %vm2590_vm0, %v4162_v41 }
 0x6da   :  { %v3608_v53 = vpop.permute.xlu1 %3607 }
 0x6db   :  { %v3675_v56 = vsub.f32 %v8355_v6, %v3608_v53  ;;  %v8933_v53 = vld [vmem:[#allocation20_spill] sm:$0xff] }
 0x6dd   :  { %4045 = vperm.xlu1 %4291, %v3675_v56   ;;  %v3883_v56 = vmul.f32 %v8481_v27, %v8933_v53 }
 0x6de   :  { %v4041_v29 = vpop.permute.xlu2 %4040 }
 0x6df   :  { %v4117_v2 = vadd.f32 %v4041_v29, %v3893_v10  ;;  %v4118_v13 = vadd.f32 %v4041_v29, %v3894_v11  ;;  %v3884_v10 = vmul.f32 %v8481_v27, %v8934_v9  ;;  %v8935_v11 = vld [vmem:[#allocation24_spill] sm:$0xff] }
 0x6e0   :  { %v3891_v29 = vmul.f32 %v8483_v48, %v8935_v11 }
 0x6e1   :  { %v4181_v21 = vmax.f32 %v4117_v2, 0.0  ;;  %v4182_v58 = vmax.f32 %v4118_v13, 0.0  ;;  %v8936_v2 = vld [vmem:[#allocation30_spill] sm:$0xff] }
 0x6e2   :  { %v8593_v63 = vpop.permute.xlu1 %3836  ;;  %v3892_v13 = vmul.f32 %v8483_v48, %v8936_v2  ;;  %v8937_v48 = vld [vmem:[#allocation23_spill] sm:$0xff] }
 0x6e3   :  { %4245 = vst [vmem:[%s8723_s3 + $0x1b0] sm:$0xff] %v4181_v21  ;;  %v4006_v6 = vpop.permute.xlu0 %4005 }
 0x6e4   :  { %4246 = vst.msk [vmem:[%s8723_s3 + $0x1b8] sm:$0xff] %vm2590_vm0, %v4182_v58  ;;  %v4103_v35 = vadd.f32 %v4006_v6, %v3879_v5  ;;  %v4104_v1 = vadd.f32 %v4006_v6, %v3880_v24 }
 0x6e6   :  { %v4167_v43 = vmax.f32 %v4103_v35, 0.0  ;;  %v4168_v34 = vmax.f32 %v4104_v1, 0.0  ;;  %v3889_v1 = vmul.f32 %v8517_v33, %v8937_v48 }
 0x6e8   :  { %4231 = vst [vmem:[%s8723_s3 + $0x140] sm:$0xff] %v4167_v43  ;;  %v8938_v43 = vld [vmem:[#allocation58_spill] sm:$0xff] }
 0x6e9   :  { %4232 = vst.msk [vmem:[%s8723_s3 + $0x148] sm:$0xff] %vm2590_vm0, %v4168_v34  ;;  %v3890_v34 = vmul.f32 %v8517_v33, %v8938_v43 }
 0x6ea   :  { %v3614_v18 = vpop.permute.xlu1 %3613 }
 0x6eb   :  { %v3678_v31 = vsub.f32 %v8399_v12, %v3614_v18 }
 0x6ed   :  { %4060 = vperm.xlu1 %4291, %v3678_v31  }
 0x6f2   :  { %v3986_v14 = vpop.permute.xlu1 %3985 }
 0x6f3   :  { %v4095_v38 = vadd.f32 %v3986_v14, %v3871_v25  ;;  %v4096_v32 = vadd.f32 %v3986_v14, %v3872_v0  ;;  %v8939_v0 = vld [vmem:[#allocation27_spill] sm:$0xff] }
 0x6f4   :  { %v3897_v14 = vmul.f32 %v8535_v59, %v8939_v0 }
 0x6f5   :  { %v4159_v60 = vmax.f32 %v4095_v38, 0.0  ;;  %v4160_v40 = vmax.f32 %v4096_v32, 0.0  ;;  %v8940_v38 = vld [vmem:[#allocation33_spill] sm:$0xff] }
 0x6f6   :  { %v3898_v33 = vmul.f32 %v8535_v59, %v8940_v38 }
 0x6f7   :  { %4223 = vst [vmem:[%s8723_s3 + $0x100] sm:$0xff] %v4159_v60  ;;  %v4056_v12 = vpop.permute.xlu2 %4055 }
 0x6f8   :  { %4224 = vst.msk [vmem:[%s8723_s3 + $0x108] sm:$0xff] %vm2590_vm0, %v4160_v40  ;;  %v4123_v50 = vadd.f32 %v4056_v12, %v3899_v19  ;;  %v4124_v8 = vadd.f32 %v4056_v12, %v3900_v16  ;;  %v3895_v16 = vmul.f32 %v8571_v37, %v8941_v3  ;;  %v8942_v12 = vld [vmem:[#allocation32_spill] sm:$0xff] }
 0x6f9   :  { %v3896_v59 = vmul.f32 %v8571_v37, %v8942_v12 }
 0x6fa   :  { %v4187_v28 = vmax.f32 %v4123_v50, 0.0  ;;  %v4188_v22 = vmax.f32 %v4124_v8, 0.0  ;;  %v4001_v46 = vpop.permute.xlu1 %4000 }
 0x6fb   :  { %v4101_v7 = vadd.f32 %v4001_v46, %v3877_v39  ;;  %v4102_v55 = vadd.f32 %v4001_v46, %v3878_v15  ;;  %v8943_v15 = vld [vmem:[#allocation29_spill] sm:$0xff] }
 0x6fc   :  { %4251 = vst [vmem:[%s8723_s3 + $0x1e0] sm:$0xff] %v4187_v28  ;;  %v4021_v62 = vpop.permute.xlu0 %4020  ;;  %v3901_v28 = vmul.f32 %v8593_v63, %v8943_v15 }
 0x6fd   :  { %4252 = vst.msk [vmem:[%s8723_s3 + $0x1e8] sm:$0xff] %vm2590_vm0, %v4188_v22  ;;  %v4165_v57 = vmax.f32 %v4101_v7, 0.0  ;;  %v4166_v44 = vmax.f32 %v4102_v55, 0.0  ;;  %v4109_v17 = vadd.f32 %v4021_v62, %v3885_v23  ;;  %v4110_v52 = vadd.f32 %v4021_v62, %v3886_v45  ;;  %v8944_v22 = vld [vmem:[#allocation35_spill] sm:$0xff] }
 0x6fe   :  { %v3902_v37 = vmul.f32 %v8593_v63, %v8944_v22 }
 0x6ff   :  { %4229 = vst [vmem:[%s8723_s3 + $0x130] sm:$0xff] %v4165_v57  ;;  %v4173_v54 = vmax.f32 %v4109_v17, 0.0  ;;  %v4174_v41 = vmax.f32 %v4110_v52, 0.0 }
 0x700   :  { %4230 = vst.msk [vmem:[%s8723_s3 + $0x138] sm:$0xff] %vm2590_vm0, %v4166_v44 }
 0x701   :  { %4237 = vst [vmem:[%s8723_s3 + $0x170] sm:$0xff] %v4173_v54 }
 0x702   :  { %4238 = vst.msk [vmem:[%s8723_s3 + $0x178] sm:$0xff] %vm2590_vm0, %v4174_v41 }
 0x713   :  { %v4016_v47 = vpop.permute.xlu1 %4015 }
 0x714   :  { %v4107_v21 = vadd.f32 %v4016_v47, %v3883_v56  ;;  %v4108_v58 = vadd.f32 %v4016_v47, %v3884_v10 }
 0x715   :  { %v4036_v20 = vpop.permute.xlu0 %4035 }
 0x716   :  { %v4171_v5 = vmax.f32 %v4107_v21, 0.0  ;;  %v4172_v30 = vmax.f32 %v4108_v58, 0.0  ;;  %v4115_v24 = vadd.f32 %v4036_v20, %v3891_v29  ;;  %v4116_v6 = vadd.f32 %v4036_v20, %v3892_v13 }
 0x718   :  { %4235 = vst [vmem:[%s8723_s3 + $0x160] sm:$0xff] %v4171_v5  ;;  %v4179_v35 = vmax.f32 %v4115_v24, 0.0  ;;  %v4180_v27 = vmax.f32 %v4116_v6, 0.0 }
 0x719   :  { %4236 = vst.msk [vmem:[%s8723_s3 + $0x168] sm:$0xff] %vm2590_vm0, %v4172_v30 }
 0x71a   :  { %4243 = vst [vmem:[%s8723_s3 + $0x1a0] sm:$0xff] %v4179_v35 }
 0x71b   :  { %4244 = vst.msk [vmem:[%s8723_s3 + $0x1a8] sm:$0xff] %vm2590_vm0, %v4180_v27 }
 0x72c   :  { %v4031_v18 = vpop.permute.xlu1 %4030 }
 0x72d   :  { %v4113_v31 = vadd.f32 %v4031_v18, %v3889_v1  ;;  %v4114_v42 = vadd.f32 %v4031_v18, %v3890_v34 }
 0x72f   :  { %v4177_v25 = vmax.f32 %v4113_v31, 0.0  ;;  %v4178_v36 = vmax.f32 %v4114_v42, 0.0 }
 0x731   :  { %4241 = vst [vmem:[%s8723_s3 + $0x190] sm:$0xff] %v4177_v25 }
 0x732   :  { %4242 = vst.msk [vmem:[%s8723_s3 + $0x198] sm:$0xff] %vm2590_vm0, %v4178_v36 }
 0x738   :  { %v4051_v32 = vpop.permute.xlu0 %4050 }
 0x739   :  { %v4121_v60 = vadd.f32 %v4051_v32, %v3897_v14  ;;  %v4122_v40 = vadd.f32 %v4051_v32, %v3898_v33 }
 0x73b   :  { %v4185_v4 = vmax.f32 %v4121_v60, 0.0  ;;  %v4186_v19 = vmax.f32 %v4122_v40, 0.0 }
 0x73d   :  { %4249 = vst [vmem:[%s8723_s3 + $0x1d0] sm:$0xff] %v4185_v4 }
 0x73e   :  { %4250 = vst.msk [vmem:[%s8723_s3 + $0x1d8] sm:$0xff] %vm2590_vm0, %v4186_v19 }
 0x74f   :  { %v4046_v50 = vpop.permute.xlu1 %4045 }
 0x750   :  { %v4119_v8 = vadd.f32 %v4046_v50, %v3895_v16  ;;  %v4120_v49 = vadd.f32 %v4046_v50, %v3896_v59 }
 0x752   :  { %v4183_v39 = vmax.f32 %v4119_v8, 0.0  ;;  %v4184_v61 = vmax.f32 %v4120_v49, 0.0 }
 0x754   :  { %4247 = vst [vmem:[%s8723_s3 + $0x1c0] sm:$0xff] %v4183_v39 }
 0x755   :  { %4248 = vst.msk [vmem:[%s8723_s3 + $0x1c8] sm:$0xff] %vm2590_vm0, %v4184_v61 }
 0x75f   :  { %v4061_v46 = vpop.permute.xlu1 %4060 }
 0x760   :  { %v4125_v26 = vadd.f32 %v4061_v46, %v3901_v28  ;;  %v4126_v23 = vadd.f32 %v4061_v46, %v3902_v37 }
 0x762   :  { %v4189_v51 = vmax.f32 %v4125_v26, 0.0  ;;  %v4190_v45 = vmax.f32 %v4126_v23, 0.0 }
 0x764   :  { %4253 = vst [vmem:[%s8723_s3 + $0x1f0] sm:$0xff] %v4189_v51 }
 0x765   :  { %4254 = vst.msk [vmem:[%s8723_s3 + $0x1f8] sm:$0xff] %vm2590_vm0, %v4190_v45 }

</bundles_post_ra>
